<compile_context>
chip_gen: v6e
topology: v6e:2x2x1
jax: 0.10.0
libtpu: 0.0.40
codegen_flags: <defaults>
</compile_context>

<pallas_src>
import functools
import numpy as np
import jax
import jax.numpy as jnp
from jax import lax
from jax.experimental import pallas as pl
from jax.experimental.pallas import tpu as pltpu

F32 = jnp.float32
LN_EPS = 1e-5        # PyG-style graph LayerNorm / nn.LayerNorm eps
IN_EPS = 1e-5        # nn.InstanceNorm2d eps
LEAKY = 0.01         # F.leaky_relu default negative slope
GIN_EPS = 1.0        # GINConv(nn, eps=True) -> float(True)=1.0 -> (1+1)*x_i

# Trivial affine params (PyG LayerNorm weight=1/bias=0, InstanceNorm2d
# weight=1/bias=0, reg nn.LayerNorm gamma=1/beta=0) are folded away.

_TAPS = [(dy, dx) for dy in (-1, 0, 1) for dx in (-1, 0, 1)]   # ky*3+kx order


# ----------------------------------------------------------------------------
# Fused Pallas kernel: one graph pair per grid step.
# ----------------------------------------------------------------------------
def n2gim_kernel(xb_ref, adjb_ref,
                 wemb_ref, bemb_ref, wgin_ref, bgin_ref, wffn_ref, bffn_ref,
                 attw_ref, attb3_ref, trep_ref, srow_ref,
                 c1w_ref, c1b_ref, c2w_ref, c2b_ref, c3w_ref, c3b_ref,
                 c4w_ref, c4b_ref, mask9_ref,
                 r1w_ref, r1b_ref, r2w_ref, r2b_ref,
                 out_ref, *, num_gnn, n_nodes):
    H = attw_ref.shape[0]            # hidden size == image height/width (32)
    W = H
    L = num_gnn + 1                  # nb channels (3)
    n = n_nodes                      # nodes per graph (8)
    HW = trep_ref.shape[1]           # H*W (1024), planar lane dimension
    C1 = c2w_ref.shape[1]            # CNN hidden channels (12)

    # ---- stacked twin backbone (both graphs of the pair at once) --------
    def ln_half(a):
        # PyG LayerNorm(batch): mean/var over ALL nodes & channels of a graph.
        m = jnp.mean(a)
        ac = a - m
        v = jnp.mean(ac * ac)
        return ac * lax.rsqrt(v + LN_EPS)

    def graph_ln(z):                 # per-graph LN on the stacked [2n, H]
        return jnp.concatenate([ln_half(z[0:n]), ln_half(z[n:2 * n])], axis=0)

    def pool(hh):                    # second-order pooling per graph: h^T h
        a = lax.dot_general(hh[0:n], hh[0:n], (((0,), (0,)), ((), ())),
                            preferred_element_type=F32)
        b = lax.dot_general(hh[n:2 * n], hh[n:2 * n], (((0,), (0,)), ((), ())),
                            preferred_element_type=F32)
        return a, b

    x = xb_ref[0]                    # [2n, Cin]  (graph t rows 0..n-1, s rows n..)
    adj = adjb_ref[0]                # [2n, 2n]   block-diagonal adjacency

    h = jnp.dot(x, wemb_ref[...], preferred_element_type=F32) + bemb_ref[...]
    si, sj = [], []
    a0, b0 = pool(h)
    si.append(a0); sj.append(b0)
    for k in range(num_gnn):
        # GINConv(nn, eps=True): nn((1 + eps) * x_i + sum_{j in N(i)} x_j)
        agg = jnp.dot(adj, h, preferred_element_type=F32)
        z = (1.0 + GIN_EPS) * h + agg
        z = jnp.dot(z, wgin_ref[k], preferred_element_type=F32) + bgin_ref[k]
        h = h + jnp.maximum(graph_ln(z), 0.0)          # residual around gnn
        z = jnp.dot(h, wffn_ref[k], preferred_element_type=F32) + bffn_ref[k]
        h = jnp.maximum(graph_ln(z), 0.0)              # ffn output
        ak, bk = pool(h)
        si.append(ak); sj.append(bk)

    # ---- nb_ops: relu(Softmax2d(|si-sj| @ W^T + b) * (si @ sj^T)) -------
    # all L attention projections fused into one stacked [3H, H] matmul.
    dstack = jnp.concatenate([jnp.abs(si[l] - sj[l]) for l in range(L)], axis=0)
    astack = lax.dot_general(dstack, attw_ref[...], (((1,), (1,)), ((), ())),
                             preferred_element_type=F32) + attb3_ref[...]
    atts = [astack[l * H:(l + 1) * H] for l in range(L)]
    xs = [lax.dot_general(si[l], sj[l], (((1,), (1,)), ((), ())),
                          preferred_element_type=F32) for l in range(L)]
    m = atts[0]
    for l in range(1, L):
        m = jnp.maximum(m, atts[l])
    es = [jnp.exp(a - m) for a in atts]
    den = es[0]
    for l in range(1, L):
        den = den + es[l]
    inv = pl.reciprocal(den, approx=True)              # EUP, not VALU
    nbs = [jnp.maximum(es[l] * inv * xs[l], 0.0) for l in range(L)]

    # ---- conv1 (1x1, L->C1) fused with the matrix -> planar-row flatten --
    # flat(nb_l)[0, h*W+w] = nb_l[h, w] = sum_a Srow[a, p] * (nb_l @ Trep)[a, p]
    nbstack = jnp.concatenate(nbs, axis=0)             # [L*H, W]
    repall = jnp.dot(nbstack, trep_ref[...],
                     preferred_element_type=F32)       # [L*H, HW]
    srow = srow_ref[...]                               # [H, HW]
    y = None
    for l in range(L):
        flat = jnp.sum(repall[l * H:(l + 1) * H] * srow,
                       axis=0, keepdims=True)          # [1, HW]
        term = c1w_ref[l] * flat                       # [C1,1]*[1,HW] -> [C1,HW]
        y = term if y is None else y + term
    y = y + c1b_ref[...]
    y = jnp.where(y > 0, y, LEAKY * y)

    def inorm(a):
        # InstanceNorm2d (affine folded): per-channel (= per-row) over lanes.
        mu = jnp.mean(a, axis=1, keepdims=True)
        ac = a - mu
        va = jnp.mean(ac * ac, axis=1, keepdims=True)
        return ac * lax.rsqrt(va + IN_EPS)

    y = inorm(y)

    # ---- 3x3 convs on the planar [C, HW] slab via lane rolls + masks -----
    def conv3x3(yin, w9_ref):
        # zero-padded 3x3 conv; input [Cin, HW], weights [9, Cout, Cin].
        acc = None
        for t, (dy, dx) in enumerate(_TAPS):
            s = dy * W + dx
            if s == 0:
                patch = yin
            else:
                patch = pltpu.roll(yin, shift=(-s) % HW, axis=1)
                patch = patch * mask9_ref[t:t + 1, :]  # zero out-of-image taps
            term = jnp.dot(w9_ref[t], patch, preferred_element_type=F32)
            acc = term if acc is None else acc + term
        return acc

    # conv2 / conv3 residual blocks: InstanceNorm(leaky_relu(x + conv(x)))
    y = y + conv3x3(y, c2w_ref) + c2b_ref[...]
    y = jnp.where(y > 0, y, LEAKY * y)
    y = inorm(y)
    y = y + conv3x3(y, c3w_ref) + c3b_ref[...]
    y = jnp.where(y > 0, y, LEAKY * y)
    y = inorm(y)

    # conv4 (C1 -> 1) + relu + InstanceNorm2d(1); output is already flat.
    y4 = jnp.maximum(conv3x3(y, c4w_ref) + c4b_ref[...], 0.0)   # [1, HW]
    y4 = inorm(y4)

    # ---- reg head: Linear -> LayerNorm -> ReLU -> Linear -----------------
    h1 = jnp.dot(y4, r1w_ref[...], preferred_element_type=F32) + r1b_ref[...]
    mu = jnp.mean(h1, axis=-1, keepdims=True)
    hc = h1 - mu
    va = jnp.mean(hc * hc, axis=-1, keepdims=True)
    h1 = jnp.maximum(hc * lax.rsqrt(va + LN_EPS), 0.0)
    out = jnp.dot(h1, r2w_ref[...], preferred_element_type=F32) + r2b_ref[...]
    out_ref[0] = out                                    # [1, 1]


# ----------------------------------------------------------------------------
# Wrapper: one pallas_call for the whole forward.
# ----------------------------------------------------------------------------
def _conv_w_to_9(w):
    # [Cout, Cin, 3, 3] -> [9, Cout, Cin], indexed by t = ky*3 + kx.
    cout, cin = w.shape[0], w.shape[1]
    return jnp.transpose(w, (2, 3, 0, 1)).reshape(9, cout, cin)


@jax.jit
def n2gim_forward(x_t, adj_t, x_s, adj_s, p):
    B, n, Cin = x_t.shape
    H = p['wemb'].shape[1]
    K = p['wgin'].shape[0]
    L = K + 1
    W = H
    HW = H * W
    C1 = p['conv1_w'].shape[0]

    # stack the two graphs of each pair -> shared backbone matmuls.
    xb = jnp.concatenate([x_t, x_s], axis=1)                       # [B, 2n, Cin]
    zer = jnp.zeros_like(adj_t)
    adjb = jnp.concatenate(
        [jnp.concatenate([adj_t, zer], axis=2),
         jnp.concatenate([zer, adj_s], axis=2)], axis=1)           # [B, 2n, 2n]

    # constant helpers (host numpy, folded at trace time):
    #   Trep[b, p] = (p %  W == b)   Srow[a, p] = (p // W == a)
    #   mask9[t, p] = 1 iff the 3x3 tap t of pixel p reads inside the image.
    pidx = np.arange(HW)
    hrow = pidx // W
    wcol = pidx % W
    trep = jnp.asarray((wcol[None, :] == np.arange(W)[:, None]).astype(np.float32))
    srow = jnp.asarray((hrow[None, :] == np.arange(H)[:, None]).astype(np.float32))
    masks = []
    for dy, dx in _TAPS:
        ok = ((hrow + dy >= 0) & (hrow + dy < H) &
              (wcol + dx >= 0) & (wcol + dx < W))
        masks.append(ok.astype(np.float32))
    mask9 = jnp.asarray(np.stack(masks))                           # [9, HW]

    attb3 = jnp.tile(p['att_b'], (L, 1))                           # [L*H, H]
    c1w = jnp.transpose(p['conv1_w'])[:, :, None]                  # [L, C1, 1]

    def full(shape):
        return pl.BlockSpec(shape, lambda b: (0,) * len(shape))

    kern = functools.partial(n2gim_kernel, num_gnn=K, n_nodes=n)
    out = pl.pallas_call(
        kern,
        out_shape=jax.ShapeDtypeStruct((B, 1, 1), F32),
        grid=(B,),
        in_specs=[
            pl.BlockSpec((1, 2 * n, Cin), lambda b: (b, 0, 0)),
            pl.BlockSpec((1, 2 * n, 2 * n), lambda b: (b, 0, 0)),
            full((Cin, H)), full((1, H)),
            full((K, H, H)), full((K, 1, H)),
            full((K, H, H)), full((K, 1, H)),
            full((H, H)), full((L * H, H)),
            full((W, HW)), full((H, HW)),
            full((L, C1, 1)), full((C1, 1)),
            full((9, C1, C1)), full((C1, 1)),
            full((9, C1, C1)), full((C1, 1)),
            full((9, 1, C1)), full((1, 1)),
            full((9, HW)),
            full((HW, H // 2)), full((1, H // 2)),
            full((H // 2, 1)), full((1, 1)),
        ],
        out_specs=pl.BlockSpec((1, 1, 1), lambda b: (b, 0, 0)),
        compiler_params=pltpu.CompilerParams(
            dimension_semantics=("parallel",)),
    )(xb, adjb,
      p['wemb'], p['bemb'], p['wgin'], p['bgin'], p['wffn'], p['bffn'],
      p['att_w'], attb3, trep, srow,
      c1w, p['conv1_b'].T,
      _conv_w_to_9(p['conv2_w']), p['conv2_b'].T,
      _conv_w_to_9(p['conv3_w']), p['conv3_b'].T,
      _conv_w_to_9(p['conv4_w']), p['conv4_b'].T,
      mask9,
      p['reg_w1'], p['reg_b1'], p['reg_w2'], p['reg_b2'])
    return out[:, 0, 0]


# ----------------------------------------------------------------------------
# Pure-JAX reference (numerical sanity check)
# ----------------------------------------------------------------------------
def _ref_graph_ln(z):
    m = jnp.mean(z, axis=(1, 2), keepdims=True)
    zc = z - m
    v = jnp.mean(zc * zc, axis=(1, 2), keepdims=True)
    return zc / jnp.sqrt(v + LN_EPS)


def _ref_backbone(x, adj, p):
    h = x @ p['wemb'] + p['bemb'][0]
    nbs = [jnp.einsum('bnh,bnk->bhk', h, h)]
    for k in range(p['wgin'].shape[0]):
        z = (1.0 + GIN_EPS) * h + adj @ h
        z = z @ p['wgin'][k] + p['bgin'][k][0]
        z = jnp.maximum(_ref_graph_ln(z), 0.0)
        h = h + z
        z = h @ p['wffn'][k] + p['bffn'][k][0]
        h = jnp.maximum(_ref_graph_ln(z), 0.0)
        nbs.append(jnp.einsum('bnh,bnk->bhk', h, h))
    return jnp.stack(nbs, axis=1)


def _ref_inorm(y):
    m = jnp.mean(y, axis=(2, 3), keepdims=True)
    yc = y - m
    v = jnp.mean(yc * yc, axis=(2, 3), keepdims=True)
    return yc / jnp.sqrt(v + IN_EPS)


def n2gim_reference(x_t, adj_t, x_s, adj_s, p):
    si = _ref_backbone(x_t, adj_t, p)
    sj = _ref_backbone(x_s, adj_s, p)
    x = jnp.einsum('blij,blkj->blik', si, sj)
    att = jnp.einsum('blij,kj->blik', jnp.abs(si - sj), p['att_w']) + p['att_b']
    att = jax.nn.softmax(att, axis=1)
    nb = jnp.maximum(att * x, 0.0)
    lrelu = lambda y: jnp.where(y > 0, y, LEAKY * y)
    conv = lambda y, w, pad: lax.conv_general_dilated(y, w, (1, 1), pad)
    y = conv(nb, p['conv1_w'][:, :, None, None], 'VALID') + p['conv1_b'][0][None, :, None, None]
    y = _ref_inorm(lrelu(y))
    y = _ref_inorm(lrelu(y + conv(y, p['conv2_w'], 'SAME') + p['conv2_b'][0][None, :, None, None]))
    y = _ref_inorm(lrelu(y + conv(y, p['conv3_w'], 'SAME') + p['conv3_b'][0][None, :, None, None]))
    y = _ref_inorm(jnp.maximum(conv(y, p['conv4_w'], 'SAME') + p['conv4_b'][0][None, :, None, None], 0.0))
    flat = y.reshape(y.shape[0], -1)
    h = flat @ p['reg_w1'] + p['reg_b1'][0]
    m = jnp.mean(h, axis=-1, keepdims=True)
    hc = h - m
    v = jnp.mean(hc * hc, axis=-1, keepdims=True)
    h = jnp.maximum(hc / jnp.sqrt(v + LN_EPS), 0.0)
    return (h @ p['reg_w2'] + p['reg_b2'][0])[:, 0]


# ----------------------------------------------------------------------------
# Deterministic parameter init & example inputs
# ----------------------------------------------------------------------------
def init_params(key, Cin, H, num_gnn):
    ks = jax.random.split(key, 12)
    s = 0.1
    L = num_gnn + 1
    return {
        'wemb': s * jax.random.normal(ks[0], (Cin, H), F32),
        'bemb': jnp.zeros((1, H), F32),
        'wgin': s * jax.random.normal(ks[1], (num_gnn, H, H), F32),
        'bgin': jnp.zeros((num_gnn, 1, H), F32),
        'wffn': s * jax.random.normal(ks[2], (num_gnn, H, H), F32),
        'bffn': jnp.zeros((num_gnn, 1, H), F32),
        'att_w': s * jax.random.normal(ks[3], (H, H), F32),   # N2Gim.weight
        'att_b': s * jax.random.normal(ks[4], (H, H), F32),   # N2Gim.bias
        'conv1_w': s * jax.random.normal(ks[5], (12, L), F32),
        'conv1_b': jnp.zeros((1, 12), F32),
        'conv2_w': s * jax.random.normal(ks[6], (12, 12, 3, 3), F32),
        'conv2_b': jnp.zeros((1, 12), F32),
        'conv3_w': s * jax.random.normal(ks[7], (12, 12, 3, 3), F32),
        'conv3_b': jnp.zeros((1, 12), F32),
        'conv4_w': s * jax.random.normal(ks[8], (1, 12, 3, 3), F32),
        'conv4_b': jnp.zeros((1, 1), F32),
        'reg_w1': s * jax.random.normal(ks[9], (H * H, H // 2), F32),
        'reg_b1': jnp.zeros((1, H // 2), F32),
        'reg_w2': s * jax.random.normal(ks[10], (H // 2, 1), F32),
        'reg_b2': jnp.zeros((1, 1), F32),
    }


def make_adj(key, B, n):
    a = (jax.random.uniform(key, (B, n, n)) > 0.5).astype(F32)
    a = jnp.maximum(a, jnp.transpose(a, (0, 2, 1)))      # symmetric
    a = a * (1.0 - jnp.eye(n, dtype=F32)[None])           # no self loops
    return a


if __name__ == "__main__":
    B, n, Cin, H, num_gnn = 2, 8, 4, 32, 2
    key = jax.random.PRNGKey(0)
    k_xt, k_xs, k_at, k_as, k_p = jax.random.split(key, 5)

    x_t = jax.random.normal(k_xt, (B, n, Cin), F32)    # data1.x (dense-batched)
    x_s = jax.random.normal(k_xs, (B, n, Cin), F32)    # data2.x
    adj_t = make_adj(k_at, B, n)                       # data1.edge_index (dense)
    adj_s = make_adj(k_as, B, n)                       # data2.edge_index (dense)
    params = init_params(k_p, Cin, H, num_gnn)

    out = n2gim_forward(x_t, adj_t, x_s, adj_s, params)
    out = jax.block_until_ready(out)

    ref = n2gim_reference(x_t, adj_t, x_s, adj_s, params)
    ref = jax.block_until_ready(ref)
    np.testing.assert_allclose(np.asarray(out), np.asarray(ref),
                               rtol=1e-2, atol=1e-2)
    print("KERNEL_OK")
</pallas_src>

<mosaic_0001>
module attributes {stable_mosaic.version = 11 : i64} {
  func.func @n2gim_kernel(%arg0: i32, %arg1: memref<1x16x4xf32, #tpu.memory_space<vmem>>, %arg2: memref<1x16x16xf32, #tpu.memory_space<vmem>>, %arg3: memref<4x32xf32, #tpu.memory_space<vmem>>, %arg4: memref<1x32xf32, #tpu.memory_space<vmem>>, %arg5: memref<2x32x32xf32, #tpu.memory_space<vmem>>, %arg6: memref<2x1x32xf32, #tpu.memory_space<vmem>>, %arg7: memref<2x32x32xf32, #tpu.memory_space<vmem>>, %arg8: memref<2x1x32xf32, #tpu.memory_space<vmem>>, %arg9: memref<32x32xf32, #tpu.memory_space<vmem>>, %arg10: memref<96x32xf32, #tpu.memory_space<vmem>>, %arg11: memref<32x1024xf32, #tpu.memory_space<vmem>>, %arg12: memref<32x1024xf32, #tpu.memory_space<vmem>>, %arg13: memref<3x12x1xf32, #tpu.memory_space<vmem>>, %arg14: memref<12x1xf32, #tpu.memory_space<vmem>>, %arg15: memref<9x12x12xf32, #tpu.memory_space<vmem>>, %arg16: memref<12x1xf32, #tpu.memory_space<vmem>>, %arg17: memref<9x12x12xf32, #tpu.memory_space<vmem>>, %arg18: memref<12x1xf32, #tpu.memory_space<vmem>>, %arg19: memref<9x1x12xf32, #tpu.memory_space<vmem>>, %arg20: memref<1x1xf32, #tpu.memory_space<vmem>>, %arg21: memref<9x1024xf32, #tpu.memory_space<vmem>>, %arg22: memref<1024x16xf32, #tpu.memory_space<vmem>>, %arg23: memref<1x16xf32, #tpu.memory_space<vmem>>, %arg24: memref<16x1xf32, #tpu.memory_space<vmem>>, %arg25: memref<1x1xf32, #tpu.memory_space<vmem>>, %arg26: memref<1x1x1xf32, #tpu.memory_space<vmem>>) attributes {dimension_semantics = [#tpu.dimension_semantics<parallel>], iteration_bounds = array<i64: 2>, scalar_prefetch = 0 : i64, scratch_operands = 0 : i64, tpu.core_type = #tpu.core_type<tc>, window_params = [{transform_indices = @transform_0, window_bounds = array<i64: 1, 16, 4>}, {transform_indices = @transform_1, window_bounds = array<i64: 1, 16, 16>}, {pipeline_mode = #tpu.pipeline_mode<synchronous>, transform_indices = @transform_2, window_bounds = array<i64: 4, 32>}, {pipeline_mode = #tpu.pipeline_mode<synchronous>, transform_indices = @transform_3, window_bounds = array<i64: 1, 32>}, {pipeline_mode = #tpu.pipeline_mode<synchronous>, transform_indices = @transform_4, window_bounds = array<i64: 2, 32, 32>}, {pipeline_mode = #tpu.pipeline_mode<synchronous>, transform_indices = @transform_5, window_bounds = array<i64: 2, 1, 32>}, {pipeline_mode = #tpu.pipeline_mode<synchronous>, transform_indices = @transform_6, window_bounds = array<i64: 2, 32, 32>}, {pipeline_mode = #tpu.pipeline_mode<synchronous>, transform_indices = @transform_7, window_bounds = array<i64: 2, 1, 32>}, {pipeline_mode = #tpu.pipeline_mode<synchronous>, transform_indices = @transform_8, window_bounds = array<i64: 32, 32>}, {pipeline_mode = #tpu.pipeline_mode<synchronous>, transform_indices = @transform_9, window_bounds = array<i64: 96, 32>}, {pipeline_mode = #tpu.pipeline_mode<synchronous>, transform_indices = @transform_10, window_bounds = array<i64: 32, 1024>}, {pipeline_mode = #tpu.pipeline_mode<synchronous>, transform_indices = @transform_11, window_bounds = array<i64: 32, 1024>}, {pipeline_mode = #tpu.pipeline_mode<synchronous>, transform_indices = @transform_12, window_bounds = array<i64: 3, 12, 1>}, {pipeline_mode = #tpu.pipeline_mode<synchronous>, transform_indices = @transform_13, window_bounds = array<i64: 12, 1>}, {pipeline_mode = #tpu.pipeline_mode<synchronous>, transform_indices = @transform_14, window_bounds = array<i64: 9, 12, 12>}, {pipeline_mode = #tpu.pipeline_mode<synchronous>, transform_indices = @transform_15, window_bounds = array<i64: 12, 1>}, {pipeline_mode = #tpu.pipeline_mode<synchronous>, transform_indices = @transform_16, window_bounds = array<i64: 9, 12, 12>}, {pipeline_mode = #tpu.pipeline_mode<synchronous>, transform_indices = @transform_17, window_bounds = array<i64: 12, 1>}, {pipeline_mode = #tpu.pipeline_mode<synchronous>, transform_indices = @transform_18, window_bounds = array<i64: 9, 1, 12>}, {pipeline_mode = #tpu.pipeline_mode<synchronous>, transform_indices = @transform_19, window_bounds = array<i64: 1, 1>}, {pipeline_mode = #tpu.pipeline_mode<synchronous>, transform_indices = @transform_20, window_bounds = array<i64: 9, 1024>}, {pipeline_mode = #tpu.pipeline_mode<synchronous>, transform_indices = @transform_21, window_bounds = array<i64: 1024, 16>}, {pipeline_mode = #tpu.pipeline_mode<synchronous>, transform_indices = @transform_22, window_bounds = array<i64: 1, 16>}, {pipeline_mode = #tpu.pipeline_mode<synchronous>, transform_indices = @transform_23, window_bounds = array<i64: 16, 1>}, {pipeline_mode = #tpu.pipeline_mode<synchronous>, transform_indices = @transform_24, window_bounds = array<i64: 1, 1>}, {transform_indices = @transform_25, window_bounds = array<i64: 1, 1, 1>}]} {
    %c0 = arith.constant 0 : index
    %c0_0 = arith.constant 0 : index
    %c0_1 = arith.constant 0 : index
    %0 = vector.load %arg1[%c0, %c0_0, %c0_1] : memref<1x16x4xf32, #tpu.memory_space<vmem>>, vector<1x16x4xf32>
    %1 = vector.shape_cast %0 : vector<1x16x4xf32> to vector<16x4xf32>
    %c0_2 = arith.constant 0 : index
    %c0_3 = arith.constant 0 : index
    %c0_4 = arith.constant 0 : index
    %2 = vector.load %arg2[%c0_2, %c0_3, %c0_4] : memref<1x16x16xf32, #tpu.memory_space<vmem>>, vector<1x16x16xf32>
    %3 = vector.shape_cast %2 : vector<1x16x16xf32> to vector<16x16xf32>
    %c0_5 = arith.constant 0 : index
    %c0_6 = arith.constant 0 : index
    %4 = vector.load %arg3[%c0_5, %c0_6] : memref<4x32xf32, #tpu.memory_space<vmem>>, vector<4x32xf32>
    %cst = arith.constant dense<0.000000e+00> : vector<16x32xf32>
    %5 = tpu.matmul %1, %4, %cst {dimension_numbers = #tpu.dot_dimension_numbers<[1], [0], [0], [1], [0, 0, 1, 1], [], []>} : vector<16x4xf32>, vector<4x32xf32>, vector<16x32xf32> -> vector<16x32xf32>
    %c0_7 = arith.constant 0 : index
    %c0_8 = arith.constant 0 : index
    %6 = vector.load %arg4[%c0_7, %c0_8] : memref<1x32xf32, #tpu.memory_space<vmem>>, vector<1x32xf32>
    %7 = vector.broadcast %6 : vector<1x32xf32> to vector<16x32xf32>
    %8 = arith.addf %5, %7 : vector<16x32xf32>
    %9 = vector.extract_strided_slice %8 {offsets = [0, 0], sizes = [8, 32], strides = [1, 1]} : vector<16x32xf32> to vector<8x32xf32>
    %10 = vector.extract_strided_slice %8 {offsets = [0, 0], sizes = [8, 32], strides = [1, 1]} : vector<16x32xf32> to vector<8x32xf32>
    %cst_9 = arith.constant dense<0.000000e+00> : vector<32x32xf32>
    %11 = tpu.matmul %9, %10, %cst_9 {dimension_numbers = #tpu.dot_dimension_numbers<[0], [0], [1], [1], [0, 1, 1, 1], [], []>} : vector<8x32xf32>, vector<8x32xf32>, vector<32x32xf32> -> vector<32x32xf32>
    %12 = vector.extract_strided_slice %8 {offsets = [8, 0], sizes = [8, 32], strides = [1, 1]} : vector<16x32xf32> to vector<8x32xf32>
    %13 = vector.extract_strided_slice %8 {offsets = [8, 0], sizes = [8, 32], strides = [1, 1]} : vector<16x32xf32> to vector<8x32xf32>
    %cst_10 = arith.constant dense<0.000000e+00> : vector<32x32xf32>
    %14 = tpu.matmul %12, %13, %cst_10 {dimension_numbers = #tpu.dot_dimension_numbers<[0], [0], [1], [1], [0, 1, 1, 1], [], []>} : vector<8x32xf32>, vector<8x32xf32>, vector<32x32xf32> -> vector<32x32xf32>
    %cst_11 = arith.constant dense<0.000000e+00> : vector<16x32xf32>
    %15 = tpu.matmul %3, %8, %cst_11 {dimension_numbers = #tpu.dot_dimension_numbers<[1], [0], [0], [1], [0, 0, 1, 1], [], []>} : vector<16x16xf32>, vector<16x32xf32>, vector<16x32xf32> -> vector<16x32xf32>
    %cst_12 = arith.constant 2.000000e+00 : f32
    %16 = vector.broadcast %cst_12 : f32 to vector<16x32xf32>
    %17 = arith.mulf %16, %8 : vector<16x32xf32>
    %18 = arith.addf %17, %15 : vector<16x32xf32>
    %c0_13 = arith.constant 0 : index
    %c0_14 = arith.constant 0 : index
    %c0_15 = arith.constant 0 : index
    %19 = vector.load %arg5[%c0_13, %c0_14, %c0_15] : memref<2x32x32xf32, #tpu.memory_space<vmem>>, vector<1x32x32xf32>
    %20 = vector.shape_cast %19 : vector<1x32x32xf32> to vector<32x32xf32>
    %cst_16 = arith.constant dense<0.000000e+00> : vector<16x32xf32>
    %21 = tpu.matmul %18, %20, %cst_16 {dimension_numbers = #tpu.dot_dimension_numbers<[1], [0], [0], [1], [0, 0, 1, 1], [], []>} : vector<16x32xf32>, vector<32x32xf32>, vector<16x32xf32> -> vector<16x32xf32>
    %c0_17 = arith.constant 0 : index
    %c0_18 = arith.constant 0 : index
    %c0_19 = arith.constant 0 : index
    %22 = vector.load %arg6[%c0_17, %c0_18, %c0_19] : memref<2x1x32xf32, #tpu.memory_space<vmem>>, vector<1x1x32xf32>
    %23 = vector.shape_cast %22 : vector<1x1x32xf32> to vector<1x32xf32>
    %24 = vector.broadcast %23 : vector<1x32xf32> to vector<16x32xf32>
    %25 = arith.addf %21, %24 : vector<16x32xf32>
    %26 = vector.extract_strided_slice %25 {offsets = [0, 0], sizes = [8, 32], strides = [1, 1]} : vector<16x32xf32> to vector<8x32xf32>
    %27 = vector.shape_cast %26 : vector<8x32xf32> to vector<1x8x32xf32>
    %cst_20 = arith.constant dense<0.000000e+00> : vector<1xf32>
    %28 = vector.multi_reduction <add>, %27, %cst_20 [1, 2] : vector<1x8x32xf32> to vector<1xf32>
    %29 = vector.shape_cast %28 : vector<1xf32> to vector<1x1x1xf32>
    %30 = vector.extract %29[0, 0, 0] : f32 from vector<1x1x1xf32>
    %cst_21 = arith.constant 2.560000e+02 : f32
    %31 = arith.divf %30, %cst_21 : f32
    %32 = vector.broadcast %31 : f32 to vector<8x32xf32>
    %33 = arith.subf %26, %32 : vector<8x32xf32>
    %34 = arith.mulf %33, %33 : vector<8x32xf32>
    %35 = vector.shape_cast %34 : vector<8x32xf32> to vector<1x8x32xf32>
    %cst_22 = arith.constant dense<0.000000e+00> : vector<1xf32>
    %36 = vector.multi_reduction <add>, %35, %cst_22 [1, 2] : vector<1x8x32xf32> to vector<1xf32>
    %37 = vector.shape_cast %36 : vector<1xf32> to vector<1x1x1xf32>
    %38 = vector.extract %37[0, 0, 0] : f32 from vector<1x1x1xf32>
    %cst_23 = arith.constant 2.560000e+02 : f32
    %39 = arith.divf %38, %cst_23 : f32
    %cst_24 = arith.constant 9.99999974E-6 : f32
    %40 = arith.addf %39, %cst_24 : f32
    %41 = math.rsqrt %40 : f32
    %42 = vector.broadcast %41 : f32 to vector<8x32xf32>
    %43 = arith.mulf %33, %42 : vector<8x32xf32>
    %44 = vector.extract_strided_slice %25 {offsets = [8, 0], sizes = [8, 32], strides = [1, 1]} : vector<16x32xf32> to vector<8x32xf32>
    %45 = vector.shape_cast %44 : vector<8x32xf32> to vector<1x8x32xf32>
    %cst_25 = arith.constant dense<0.000000e+00> : vector<1xf32>
    %46 = vector.multi_reduction <add>, %45, %cst_25 [1, 2] : vector<1x8x32xf32> to vector<1xf32>
    %47 = vector.shape_cast %46 : vector<1xf32> to vector<1x1x1xf32>
    %48 = vector.extract %47[0, 0, 0] : f32 from vector<1x1x1xf32>
    %cst_26 = arith.constant 2.560000e+02 : f32
    %49 = arith.divf %48, %cst_26 : f32
    %50 = vector.broadcast %49 : f32 to vector<8x32xf32>
    %51 = arith.subf %44, %50 : vector<8x32xf32>
    %52 = arith.mulf %51, %51 : vector<8x32xf32>
    %53 = vector.shape_cast %52 : vector<8x32xf32> to vector<1x8x32xf32>
    %cst_27 = arith.constant dense<0.000000e+00> : vector<1xf32>
    %54 = vector.multi_reduction <add>, %53, %cst_27 [1, 2] : vector<1x8x32xf32> to vector<1xf32>
    %55 = vector.shape_cast %54 : vector<1xf32> to vector<1x1x1xf32>
    %56 = vector.extract %55[0, 0, 0] : f32 from vector<1x1x1xf32>
    %cst_28 = arith.constant 2.560000e+02 : f32
    %57 = arith.divf %56, %cst_28 : f32
    %cst_29 = arith.constant 9.99999974E-6 : f32
    %58 = arith.addf %57, %cst_29 : f32
    %59 = math.rsqrt %58 : f32
    %60 = vector.broadcast %59 : f32 to vector<8x32xf32>
    %61 = arith.mulf %51, %60 : vector<8x32xf32>
    %62 = tpu.concatenate %43, %61 in 0 : vector<8x32xf32>, vector<8x32xf32> -> vector<16x32xf32>
    %cst_30 = arith.constant 0.000000e+00 : f32
    %63 = vector.broadcast %cst_30 : f32 to vector<16x32xf32>
    %64 = arith.maximumf %62, %63 : vector<16x32xf32>
    %65 = arith.addf %8, %64 : vector<16x32xf32>
    %c0_31 = arith.constant 0 : index
    %c0_32 = arith.constant 0 : index
    %c0_33 = arith.constant 0 : index
    %66 = vector.load %arg7[%c0_31, %c0_32, %c0_33] : memref<2x32x32xf32, #tpu.memory_space<vmem>>, vector<1x32x32xf32>
    %67 = vector.shape_cast %66 : vector<1x32x32xf32> to vector<32x32xf32>
    %cst_34 = arith.constant dense<0.000000e+00> : vector<16x32xf32>
    %68 = tpu.matmul %65, %67, %cst_34 {dimension_numbers = #tpu.dot_dimension_numbers<[1], [0], [0], [1], [0, 0, 1, 1], [], []>} : vector<16x32xf32>, vector<32x32xf32>, vector<16x32xf32> -> vector<16x32xf32>
    %c0_35 = arith.constant 0 : index
    %c0_36 = arith.constant 0 : index
    %c0_37 = arith.constant 0 : index
    %69 = vector.load %arg8[%c0_35, %c0_36, %c0_37] : memref<2x1x32xf32, #tpu.memory_space<vmem>>, vector<1x1x32xf32>
    %70 = vector.shape_cast %69 : vector<1x1x32xf32> to vector<1x32xf32>
    %71 = vector.broadcast %70 : vector<1x32xf32> to vector<16x32xf32>
    %72 = arith.addf %68, %71 : vector<16x32xf32>
    %73 = vector.extract_strided_slice %72 {offsets = [0, 0], sizes = [8, 32], strides = [1, 1]} : vector<16x32xf32> to vector<8x32xf32>
    %74 = vector.shape_cast %73 : vector<8x32xf32> to vector<1x8x32xf32>
    %cst_38 = arith.constant dense<0.000000e+00> : vector<1xf32>
    %75 = vector.multi_reduction <add>, %74, %cst_38 [1, 2] : vector<1x8x32xf32> to vector<1xf32>
    %76 = vector.shape_cast %75 : vector<1xf32> to vector<1x1x1xf32>
    %77 = vector.extract %76[0, 0, 0] : f32 from vector<1x1x1xf32>
    %cst_39 = arith.constant 2.560000e+02 : f32
    %78 = arith.divf %77, %cst_39 : f32
    %79 = vector.broadcast %78 : f32 to vector<8x32xf32>
    %80 = arith.subf %73, %79 : vector<8x32xf32>
    %81 = arith.mulf %80, %80 : vector<8x32xf32>
    %82 = vector.shape_cast %81 : vector<8x32xf32> to vector<1x8x32xf32>
    %cst_40 = arith.constant dense<0.000000e+00> : vector<1xf32>
    %83 = vector.multi_reduction <add>, %82, %cst_40 [1, 2] : vector<1x8x32xf32> to vector<1xf32>
    %84 = vector.shape_cast %83 : vector<1xf32> to vector<1x1x1xf32>
    %85 = vector.extract %84[0, 0, 0] : f32 from vector<1x1x1xf32>
    %cst_41 = arith.constant 2.560000e+02 : f32
    %86 = arith.divf %85, %cst_41 : f32
    %cst_42 = arith.constant 9.99999974E-6 : f32
    %87 = arith.addf %86, %cst_42 : f32
    %88 = math.rsqrt %87 : f32
    %89 = vector.broadcast %88 : f32 to vector<8x32xf32>
    %90 = arith.mulf %80, %89 : vector<8x32xf32>
    %91 = vector.extract_strided_slice %72 {offsets = [8, 0], sizes = [8, 32], strides = [1, 1]} : vector<16x32xf32> to vector<8x32xf32>
    %92 = vector.shape_cast %91 : vector<8x32xf32> to vector<1x8x32xf32>
    %cst_43 = arith.constant dense<0.000000e+00> : vector<1xf32>
    %93 = vector.multi_reduction <add>, %92, %cst_43 [1, 2] : vector<1x8x32xf32> to vector<1xf32>
    %94 = vector.shape_cast %93 : vector<1xf32> to vector<1x1x1xf32>
    %95 = vector.extract %94[0, 0, 0] : f32 from vector<1x1x1xf32>
    %cst_44 = arith.constant 2.560000e+02 : f32
    %96 = arith.divf %95, %cst_44 : f32
    %97 = vector.broadcast %96 : f32 to vector<8x32xf32>
    %98 = arith.subf %91, %97 : vector<8x32xf32>
    %99 = arith.mulf %98, %98 : vector<8x32xf32>
    %100 = vector.shape_cast %99 : vector<8x32xf32> to vector<1x8x32xf32>
    %cst_45 = arith.constant dense<0.000000e+00> : vector<1xf32>
    %101 = vector.multi_reduction <add>, %100, %cst_45 [1, 2] : vector<1x8x32xf32> to vector<1xf32>
    %102 = vector.shape_cast %101 : vector<1xf32> to vector<1x1x1xf32>
    %103 = vector.extract %102[0, 0, 0] : f32 from vector<1x1x1xf32>
    %cst_46 = arith.constant 2.560000e+02 : f32
    %104 = arith.divf %103, %cst_46 : f32
    %cst_47 = arith.constant 9.99999974E-6 : f32
    %105 = arith.addf %104, %cst_47 : f32
    %106 = math.rsqrt %105 : f32
    %107 = vector.broadcast %106 : f32 to vector<8x32xf32>
    %108 = arith.mulf %98, %107 : vector<8x32xf32>
    %109 = tpu.concatenate %90, %108 in 0 : vector<8x32xf32>, vector<8x32xf32> -> vector<16x32xf32>
    %cst_48 = arith.constant 0.000000e+00 : f32
    %110 = vector.broadcast %cst_48 : f32 to vector<16x32xf32>
    %111 = arith.maximumf %109, %110 : vector<16x32xf32>
    %112 = vector.extract_strided_slice %111 {offsets = [0, 0], sizes = [8, 32], strides = [1, 1]} : vector<16x32xf32> to vector<8x32xf32>
    %113 = vector.extract_strided_slice %111 {offsets = [0, 0], sizes = [8, 32], strides = [1, 1]} : vector<16x32xf32> to vector<8x32xf32>
    %cst_49 = arith.constant dense<0.000000e+00> : vector<32x32xf32>
    %114 = tpu.matmul %112, %113, %cst_49 {dimension_numbers = #tpu.dot_dimension_numbers<[0], [0], [1], [1], [0, 1, 1, 1], [], []>} : vector<8x32xf32>, vector<8x32xf32>, vector<32x32xf32> -> vector<32x32xf32>
    %115 = vector.extract_strided_slice %111 {offsets = [8, 0], sizes = [8, 32], strides = [1, 1]} : vector<16x32xf32> to vector<8x32xf32>
    %116 = vector.extract_strided_slice %111 {offsets = [8, 0], sizes = [8, 32], strides = [1, 1]} : vector<16x32xf32> to vector<8x32xf32>
    %cst_50 = arith.constant dense<0.000000e+00> : vector<32x32xf32>
    %117 = tpu.matmul %115, %116, %cst_50 {dimension_numbers = #tpu.dot_dimension_numbers<[0], [0], [1], [1], [0, 1, 1, 1], [], []>} : vector<8x32xf32>, vector<8x32xf32>, vector<32x32xf32> -> vector<32x32xf32>
    %cst_51 = arith.constant dense<0.000000e+00> : vector<16x32xf32>
    %118 = tpu.matmul %3, %111, %cst_51 {dimension_numbers = #tpu.dot_dimension_numbers<[1], [0], [0], [1], [0, 0, 1, 1], [], []>} : vector<16x16xf32>, vector<16x32xf32>, vector<16x32xf32> -> vector<16x32xf32>
    %cst_52 = arith.constant 2.000000e+00 : f32
    %119 = vector.broadcast %cst_52 : f32 to vector<16x32xf32>
    %120 = arith.mulf %119, %111 : vector<16x32xf32>
    %121 = arith.addf %120, %118 : vector<16x32xf32>
    %c1 = arith.constant 1 : index
    %c0_53 = arith.constant 0 : index
    %c0_54 = arith.constant 0 : index
    %122 = vector.load %arg5[%c1, %c0_53, %c0_54] : memref<2x32x32xf32, #tpu.memory_space<vmem>>, vector<1x32x32xf32>
    %123 = vector.shape_cast %122 : vector<1x32x32xf32> to vector<32x32xf32>
    %cst_55 = arith.constant dense<0.000000e+00> : vector<16x32xf32>
    %124 = tpu.matmul %121, %123, %cst_55 {dimension_numbers = #tpu.dot_dimension_numbers<[1], [0], [0], [1], [0, 0, 1, 1], [], []>} : vector<16x32xf32>, vector<32x32xf32>, vector<16x32xf32> -> vector<16x32xf32>
    %c1_56 = arith.constant 1 : index
    %c0_57 = arith.constant 0 : index
    %c0_58 = arith.constant 0 : index
    %125 = vector.load %arg6[%c1_56, %c0_57, %c0_58] : memref<2x1x32xf32, #tpu.memory_space<vmem>>, vector<1x1x32xf32>
    %126 = vector.shape_cast %125 : vector<1x1x32xf32> to vector<1x32xf32>
    %127 = vector.broadcast %126 : vector<1x32xf32> to vector<16x32xf32>
    %128 = arith.addf %124, %127 : vector<16x32xf32>
    %129 = vector.extract_strided_slice %128 {offsets = [0, 0], sizes = [8, 32], strides = [1, 1]} : vector<16x32xf32> to vector<8x32xf32>
    %130 = vector.shape_cast %129 : vector<8x32xf32> to vector<1x8x32xf32>
    %cst_59 = arith.constant dense<0.000000e+00> : vector<1xf32>
    %131 = vector.multi_reduction <add>, %130, %cst_59 [1, 2] : vector<1x8x32xf32> to vector<1xf32>
    %132 = vector.shape_cast %131 : vector<1xf32> to vector<1x1x1xf32>
    %133 = vector.extract %132[0, 0, 0] : f32 from vector<1x1x1xf32>
    %cst_60 = arith.constant 2.560000e+02 : f32
    %134 = arith.divf %133, %cst_60 : f32
    %135 = vector.broadcast %134 : f32 to vector<8x32xf32>
    %136 = arith.subf %129, %135 : vector<8x32xf32>
    %137 = arith.mulf %136, %136 : vector<8x32xf32>
    %138 = vector.shape_cast %137 : vector<8x32xf32> to vector<1x8x32xf32>
    %cst_61 = arith.constant dense<0.000000e+00> : vector<1xf32>
    %139 = vector.multi_reduction <add>, %138, %cst_61 [1, 2] : vector<1x8x32xf32> to vector<1xf32>
    %140 = vector.shape_cast %139 : vector<1xf32> to vector<1x1x1xf32>
    %141 = vector.extract %140[0, 0, 0] : f32 from vector<1x1x1xf32>
    %cst_62 = arith.constant 2.560000e+02 : f32
    %142 = arith.divf %141, %cst_62 : f32
    %cst_63 = arith.constant 9.99999974E-6 : f32
    %143 = arith.addf %142, %cst_63 : f32
    %144 = math.rsqrt %143 : f32
    %145 = vector.broadcast %144 : f32 to vector<8x32xf32>
    %146 = arith.mulf %136, %145 : vector<8x32xf32>
    %147 = vector.extract_strided_slice %128 {offsets = [8, 0], sizes = [8, 32], strides = [1, 1]} : vector<16x32xf32> to vector<8x32xf32>
    %148 = vector.shape_cast %147 : vector<8x32xf32> to vector<1x8x32xf32>
    %cst_64 = arith.constant dense<0.000000e+00> : vector<1xf32>
    %149 = vector.multi_reduction <add>, %148, %cst_64 [1, 2] : vector<1x8x32xf32> to vector<1xf32>
    %150 = vector.shape_cast %149 : vector<1xf32> to vector<1x1x1xf32>
    %151 = vector.extract %150[0, 0, 0] : f32 from vector<1x1x1xf32>
    %cst_65 = arith.constant 2.560000e+02 : f32
    %152 = arith.divf %151, %cst_65 : f32
    %153 = vector.broadcast %152 : f32 to vector<8x32xf32>
    %154 = arith.subf %147, %153 : vector<8x32xf32>
    %155 = arith.mulf %154, %154 : vector<8x32xf32>
    %156 = vector.shape_cast %155 : vector<8x32xf32> to vector<1x8x32xf32>
    %cst_66 = arith.constant dense<0.000000e+00> : vector<1xf32>
    %157 = vector.multi_reduction <add>, %156, %cst_66 [1, 2] : vector<1x8x32xf32> to vector<1xf32>
    %158 = vector.shape_cast %157 : vector<1xf32> to vector<1x1x1xf32>
    %159 = vector.extract %158[0, 0, 0] : f32 from vector<1x1x1xf32>
    %cst_67 = arith.constant 2.560000e+02 : f32
    %160 = arith.divf %159, %cst_67 : f32
    %cst_68 = arith.constant 9.99999974E-6 : f32
    %161 = arith.addf %160, %cst_68 : f32
    %162 = math.rsqrt %161 : f32
    %163 = vector.broadcast %162 : f32 to vector<8x32xf32>
    %164 = arith.mulf %154, %163 : vector<8x32xf32>
    %165 = tpu.concatenate %146, %164 in 0 : vector<8x32xf32>, vector<8x32xf32> -> vector<16x32xf32>
    %cst_69 = arith.constant 0.000000e+00 : f32
    %166 = vector.broadcast %cst_69 : f32 to vector<16x32xf32>
    %167 = arith.maximumf %165, %166 : vector<16x32xf32>
    %168 = arith.addf %111, %167 : vector<16x32xf32>
    %c1_70 = arith.constant 1 : index
    %c0_71 = arith.constant 0 : index
    %c0_72 = arith.constant 0 : index
    %169 = vector.load %arg7[%c1_70, %c0_71, %c0_72] : memref<2x32x32xf32, #tpu.memory_space<vmem>>, vector<1x32x32xf32>
    %170 = vector.shape_cast %169 : vector<1x32x32xf32> to vector<32x32xf32>
    %cst_73 = arith.constant dense<0.000000e+00> : vector<16x32xf32>
    %171 = tpu.matmul %168, %170, %cst_73 {dimension_numbers = #tpu.dot_dimension_numbers<[1], [0], [0], [1], [0, 0, 1, 1], [], []>} : vector<16x32xf32>, vector<32x32xf32>, vector<16x32xf32> -> vector<16x32xf32>
    %c1_74 = arith.constant 1 : index
    %c0_75 = arith.constant 0 : index
    %c0_76 = arith.constant 0 : index
    %172 = vector.load %arg8[%c1_74, %c0_75, %c0_76] : memref<2x1x32xf32, #tpu.memory_space<vmem>>, vector<1x1x32xf32>
    %173 = vector.shape_cast %172 : vector<1x1x32xf32> to vector<1x32xf32>
    %174 = vector.broadcast %173 : vector<1x32xf32> to vector<16x32xf32>
    %175 = arith.addf %171, %174 : vector<16x32xf32>
    %176 = vector.extract_strided_slice %175 {offsets = [0, 0], sizes = [8, 32], strides = [1, 1]} : vector<16x32xf32> to vector<8x32xf32>
    %177 = vector.shape_cast %176 : vector<8x32xf32> to vector<1x8x32xf32>
    %cst_77 = arith.constant dense<0.000000e+00> : vector<1xf32>
    %178 = vector.multi_reduction <add>, %177, %cst_77 [1, 2] : vector<1x8x32xf32> to vector<1xf32>
    %179 = vector.shape_cast %178 : vector<1xf32> to vector<1x1x1xf32>
    %180 = vector.extract %179[0, 0, 0] : f32 from vector<1x1x1xf32>
    %cst_78 = arith.constant 2.560000e+02 : f32
    %181 = arith.divf %180, %cst_78 : f32
    %182 = vector.broadcast %181 : f32 to vector<8x32xf32>
    %183 = arith.subf %176, %182 : vector<8x32xf32>
    %184 = arith.mulf %183, %183 : vector<8x32xf32>
    %185 = vector.shape_cast %184 : vector<8x32xf32> to vector<1x8x32xf32>
    %cst_79 = arith.constant dense<0.000000e+00> : vector<1xf32>
    %186 = vector.multi_reduction <add>, %185, %cst_79 [1, 2] : vector<1x8x32xf32> to vector<1xf32>
    %187 = vector.shape_cast %186 : vector<1xf32> to vector<1x1x1xf32>
    %188 = vector.extract %187[0, 0, 0] : f32 from vector<1x1x1xf32>
    %cst_80 = arith.constant 2.560000e+02 : f32
    %189 = arith.divf %188, %cst_80 : f32
    %cst_81 = arith.constant 9.99999974E-6 : f32
    %190 = arith.addf %189, %cst_81 : f32
    %191 = math.rsqrt %190 : f32
    %192 = vector.broadcast %191 : f32 to vector<8x32xf32>
    %193 = arith.mulf %183, %192 : vector<8x32xf32>
    %194 = vector.extract_strided_slice %175 {offsets = [8, 0], sizes = [8, 32], strides = [1, 1]} : vector<16x32xf32> to vector<8x32xf32>
    %195 = vector.shape_cast %194 : vector<8x32xf32> to vector<1x8x32xf32>
    %cst_82 = arith.constant dense<0.000000e+00> : vector<1xf32>
    %196 = vector.multi_reduction <add>, %195, %cst_82 [1, 2] : vector<1x8x32xf32> to vector<1xf32>
    %197 = vector.shape_cast %196 : vector<1xf32> to vector<1x1x1xf32>
    %198 = vector.extract %197[0, 0, 0] : f32 from vector<1x1x1xf32>
    %cst_83 = arith.constant 2.560000e+02 : f32
    %199 = arith.divf %198, %cst_83 : f32
    %200 = vector.broadcast %199 : f32 to vector<8x32xf32>
    %201 = arith.subf %194, %200 : vector<8x32xf32>
    %202 = arith.mulf %201, %201 : vector<8x32xf32>
    %203 = vector.shape_cast %202 : vector<8x32xf32> to vector<1x8x32xf32>
    %cst_84 = arith.constant dense<0.000000e+00> : vector<1xf32>
    %204 = vector.multi_reduction <add>, %203, %cst_84 [1, 2] : vector<1x8x32xf32> to vector<1xf32>
    %205 = vector.shape_cast %204 : vector<1xf32> to vector<1x1x1xf32>
    %206 = vector.extract %205[0, 0, 0] : f32 from vector<1x1x1xf32>
    %cst_85 = arith.constant 2.560000e+02 : f32
    %207 = arith.divf %206, %cst_85 : f32
    %cst_86 = arith.constant 9.99999974E-6 : f32
    %208 = arith.addf %207, %cst_86 : f32
    %209 = math.rsqrt %208 : f32
    %210 = vector.broadcast %209 : f32 to vector<8x32xf32>
    %211 = arith.mulf %201, %210 : vector<8x32xf32>
    %212 = tpu.concatenate %193, %211 in 0 : vector<8x32xf32>, vector<8x32xf32> -> vector<16x32xf32>
    %cst_87 = arith.constant 0.000000e+00 : f32
    %213 = vector.broadcast %cst_87 : f32 to vector<16x32xf32>
    %214 = arith.maximumf %212, %213 : vector<16x32xf32>
    %215 = vector.extract_strided_slice %214 {offsets = [0, 0], sizes = [8, 32], strides = [1, 1]} : vector<16x32xf32> to vector<8x32xf32>
    %216 = vector.extract_strided_slice %214 {offsets = [0, 0], sizes = [8, 32], strides = [1, 1]} : vector<16x32xf32> to vector<8x32xf32>
    %cst_88 = arith.constant dense<0.000000e+00> : vector<32x32xf32>
    %217 = tpu.matmul %215, %216, %cst_88 {dimension_numbers = #tpu.dot_dimension_numbers<[0], [0], [1], [1], [0, 1, 1, 1], [], []>} : vector<8x32xf32>, vector<8x32xf32>, vector<32x32xf32> -> vector<32x32xf32>
    %218 = vector.extract_strided_slice %214 {offsets = [8, 0], sizes = [8, 32], strides = [1, 1]} : vector<16x32xf32> to vector<8x32xf32>
    %219 = vector.extract_strided_slice %214 {offsets = [8, 0], sizes = [8, 32], strides = [1, 1]} : vector<16x32xf32> to vector<8x32xf32>
    %cst_89 = arith.constant dense<0.000000e+00> : vector<32x32xf32>
    %220 = tpu.matmul %218, %219, %cst_89 {dimension_numbers = #tpu.dot_dimension_numbers<[0], [0], [1], [1], [0, 1, 1, 1], [], []>} : vector<8x32xf32>, vector<8x32xf32>, vector<32x32xf32> -> vector<32x32xf32>
    %221 = arith.subf %11, %14 : vector<32x32xf32>
    %222 = math.absf %221 : vector<32x32xf32>
    %223 = arith.subf %114, %117 : vector<32x32xf32>
    %224 = math.absf %223 : vector<32x32xf32>
    %225 = arith.subf %217, %220 : vector<32x32xf32>
    %226 = math.absf %225 : vector<32x32xf32>
    %227 = tpu.concatenate %222, %224, %226 in 0 : vector<32x32xf32>, vector<32x32xf32>, vector<32x32xf32> -> vector<96x32xf32>
    %c0_90 = arith.constant 0 : index
    %c0_91 = arith.constant 0 : index
    %228 = vector.load %arg9[%c0_90, %c0_91] : memref<32x32xf32, #tpu.memory_space<vmem>>, vector<32x32xf32>
    %cst_92 = arith.constant dense<0.000000e+00> : vector<96x32xf32>
    %229 = tpu.matmul %227, %228, %cst_92 {dimension_numbers = #tpu.dot_dimension_numbers<[1], [1], [0], [0], [0, 0, 1, 0], [], []>} : vector<96x32xf32>, vector<32x32xf32>, vector<96x32xf32> -> vector<96x32xf32>
    %c0_93 = arith.constant 0 : index
    %c0_94 = arith.constant 0 : index
    %230 = vector.load %arg10[%c0_93, %c0_94] : memref<96x32xf32, #tpu.memory_space<vmem>>, vector<96x32xf32>
    %231 = arith.addf %229, %230 : vector<96x32xf32>
    %232 = vector.extract_strided_slice %231 {offsets = [0, 0], sizes = [32, 32], strides = [1, 1]} : vector<96x32xf32> to vector<32x32xf32>
    %233 = vector.extract_strided_slice %231 {offsets = [32, 0], sizes = [32, 32], strides = [1, 1]} : vector<96x32xf32> to vector<32x32xf32>
    %234 = vector.extract_strided_slice %231 {offsets = [64, 0], sizes = [32, 32], strides = [1, 1]} : vector<96x32xf32> to vector<32x32xf32>
    %cst_95 = arith.constant dense<0.000000e+00> : vector<32x32xf32>
    %235 = tpu.matmul %11, %14, %cst_95 {dimension_numbers = #tpu.dot_dimension_numbers<[1], [1], [0], [0], [0, 0, 1, 0], [], []>} : vector<32x32xf32>, vector<32x32xf32>, vector<32x32xf32> -> vector<32x32xf32>
    %cst_96 = arith.constant dense<0.000000e+00> : vector<32x32xf32>
    %236 = tpu.matmul %114, %117, %cst_96 {dimension_numbers = #tpu.dot_dimension_numbers<[1], [1], [0], [0], [0, 0, 1, 0], [], []>} : vector<32x32xf32>, vector<32x32xf32>, vector<32x32xf32> -> vector<32x32xf32>
    %cst_97 = arith.constant dense<0.000000e+00> : vector<32x32xf32>
    %237 = tpu.matmul %217, %220, %cst_97 {dimension_numbers = #tpu.dot_dimension_numbers<[1], [1], [0], [0], [0, 0, 1, 0], [], []>} : vector<32x32xf32>, vector<32x32xf32>, vector<32x32xf32> -> vector<32x32xf32>
    %238 = arith.maximumf %232, %233 : vector<32x32xf32>
    %239 = arith.maximumf %238, %234 : vector<32x32xf32>
    %240 = arith.subf %232, %239 : vector<32x32xf32>
    %241 = math.exp %240 : vector<32x32xf32>
    %242 = arith.subf %233, %239 : vector<32x32xf32>
    %243 = math.exp %242 : vector<32x32xf32>
    %244 = arith.subf %234, %239 : vector<32x32xf32>
    %245 = math.exp %244 : vector<32x32xf32>
    %246 = arith.addf %241, %243 : vector<32x32xf32>
    %247 = arith.addf %246, %245 : vector<32x32xf32>
    %248 = tpu.reciprocal %247 {approx = true} : vector<32x32xf32> -> vector<32x32xf32>
    %249 = arith.mulf %241, %248 : vector<32x32xf32>
    %250 = arith.mulf %249, %235 : vector<32x32xf32>
    %cst_98 = arith.constant 0.000000e+00 : f32
    %251 = vector.broadcast %cst_98 : f32 to vector<32x32xf32>
    %252 = arith.maximumf %250, %251 : vector<32x32xf32>
    %253 = arith.mulf %243, %248 : vector<32x32xf32>
    %254 = arith.mulf %253, %236 : vector<32x32xf32>
    %cst_99 = arith.constant 0.000000e+00 : f32
    %255 = vector.broadcast %cst_99 : f32 to vector<32x32xf32>
    %256 = arith.maximumf %254, %255 : vector<32x32xf32>
    %257 = arith.mulf %245, %248 : vector<32x32xf32>
    %258 = arith.mulf %257, %237 : vector<32x32xf32>
    %cst_100 = arith.constant 0.000000e+00 : f32
    %259 = vector.broadcast %cst_100 : f32 to vector<32x32xf32>
    %260 = arith.maximumf %258, %259 : vector<32x32xf32>
    %261 = tpu.concatenate %252, %256, %260 in 0 : vector<32x32xf32>, vector<32x32xf32>, vector<32x32xf32> -> vector<96x32xf32>
    %c0_101 = arith.constant 0 : index
    %c0_102 = arith.constant 0 : index
    %262 = vector.load %arg11[%c0_101, %c0_102] : memref<32x1024xf32, #tpu.memory_space<vmem>>, vector<32x1024xf32>
    %cst_103 = arith.constant dense<0.000000e+00> : vector<96x1024xf32>
    %263 = tpu.matmul %261, %262, %cst_103 {dimension_numbers = #tpu.dot_dimension_numbers<[1], [0], [0], [1], [0, 0, 1, 1], [], []>} : vector<96x32xf32>, vector<32x1024xf32>, vector<96x1024xf32> -> vector<96x1024xf32>
    %c0_104 = arith.constant 0 : index
    %c0_105 = arith.constant 0 : index
    %264 = vector.load %arg12[%c0_104, %c0_105] : memref<32x1024xf32, #tpu.memory_space<vmem>>, vector<32x1024xf32>
    %265 = vector.extract_strided_slice %263 {offsets = [0, 0], sizes = [32, 1024], strides = [1, 1]} : vector<96x1024xf32> to vector<32x1024xf32>
    %266 = arith.mulf %265, %264 : vector<32x1024xf32>
    %cst_106 = arith.constant dense<0.000000e+00> : vector<1024xf32>
    %267 = vector.multi_reduction <add>, %266, %cst_106 [0] : vector<32x1024xf32> to vector<1024xf32>
    %268 = vector.shape_cast %267 : vector<1024xf32> to vector<1x1024xf32>
    %c0_107 = arith.constant 0 : index
    %c0_108 = arith.constant 0 : index
    %c0_109 = arith.constant 0 : index
    %269 = vector.load %arg13[%c0_107, %c0_108, %c0_109] : memref<3x12x1xf32, #tpu.memory_space<vmem>>, vector<1x12x1xf32>
    %270 = vector.shape_cast %269 : vector<1x12x1xf32> to vector<12x1xf32>
    %271 = vector.broadcast %270 : vector<12x1xf32> to vector<12x1024xf32>
    %272 = vector.broadcast %268 : vector<1x1024xf32> to vector<12x1024xf32>
    %273 = arith.mulf %271, %272 : vector<12x1024xf32>
    %274 = vector.extract_strided_slice %263 {offsets = [32, 0], sizes = [32, 1024], strides = [1, 1]} : vector<96x1024xf32> to vector<32x1024xf32>
    %275 = arith.mulf %274, %264 : vector<32x1024xf32>
    %cst_110 = arith.constant dense<0.000000e+00> : vector<1024xf32>
    %276 = vector.multi_reduction <add>, %275, %cst_110 [0] : vector<32x1024xf32> to vector<1024xf32>
    %277 = vector.shape_cast %276 : vector<1024xf32> to vector<1x1024xf32>
    %c1_111 = arith.constant 1 : index
    %c0_112 = arith.constant 0 : index
    %c0_113 = arith.constant 0 : index
    %278 = vector.load %arg13[%c1_111, %c0_112, %c0_113] : memref<3x12x1xf32, #tpu.memory_space<vmem>>, vector<1x12x1xf32>
    %279 = vector.shape_cast %278 : vector<1x12x1xf32> to vector<12x1xf32>
    %280 = vector.broadcast %279 : vector<12x1xf32> to vector<12x1024xf32>
    %281 = vector.broadcast %277 : vector<1x1024xf32> to vector<12x1024xf32>
    %282 = arith.mulf %280, %281 : vector<12x1024xf32>
    %283 = arith.addf %273, %282 : vector<12x1024xf32>
    %284 = vector.extract_strided_slice %263 {offsets = [64, 0], sizes = [32, 1024], strides = [1, 1]} : vector<96x1024xf32> to vector<32x1024xf32>
    %285 = arith.mulf %284, %264 : vector<32x1024xf32>
    %cst_114 = arith.constant dense<0.000000e+00> : vector<1024xf32>
    %286 = vector.multi_reduction <add>, %285, %cst_114 [0] : vector<32x1024xf32> to vector<1024xf32>
    %287 = vector.shape_cast %286 : vector<1024xf32> to vector<1x1024xf32>
    %c2 = arith.constant 2 : index
    %c0_115 = arith.constant 0 : index
    %c0_116 = arith.constant 0 : index
    %288 = vector.load %arg13[%c2, %c0_115, %c0_116] : memref<3x12x1xf32, #tpu.memory_space<vmem>>, vector<1x12x1xf32>
    %289 = vector.shape_cast %288 : vector<1x12x1xf32> to vector<12x1xf32>
    %290 = vector.broadcast %289 : vector<12x1xf32> to vector<12x1024xf32>
    %291 = vector.broadcast %287 : vector<1x1024xf32> to vector<12x1024xf32>
    %292 = arith.mulf %290, %291 : vector<12x1024xf32>
    %293 = arith.addf %283, %292 : vector<12x1024xf32>
    %c0_117 = arith.constant 0 : index
    %c0_118 = arith.constant 0 : index
    %294 = vector.load %arg14[%c0_117, %c0_118] : memref<12x1xf32, #tpu.memory_space<vmem>>, vector<12x1xf32>
    %295 = vector.broadcast %294 : vector<12x1xf32> to vector<12x1024xf32>
    %296 = arith.addf %293, %295 : vector<12x1024xf32>
    %cst_119 = arith.constant 0.000000e+00 : f32
    %297 = vector.broadcast %cst_119 : f32 to vector<12x1024xf32>
    %298 = arith.cmpf ogt, %296, %297 : vector<12x1024xf32>
    %cst_120 = arith.constant 0.00999999977 : f32
    %299 = vector.broadcast %cst_120 : f32 to vector<12x1024xf32>
    %300 = arith.mulf %299, %296 : vector<12x1024xf32>
    %301 = arith.select %298, %296, %300 : vector<12x1024xi1>, vector<12x1024xf32>
    %cst_121 = arith.constant dense<0.000000e+00> : vector<12xf32>
    %302 = vector.multi_reduction <add>, %301, %cst_121 [1] : vector<12x1024xf32> to vector<12xf32>
    %303 = vector.shape_cast %302 : vector<12xf32> to vector<12x1xf32>
    %cst_122 = arith.constant 1.024000e+03 : f32
    %304 = vector.broadcast %cst_122 : f32 to vector<12x1xf32>
    %305 = arith.divf %303, %304 : vector<12x1xf32>
    %306 = vector.broadcast %305 : vector<12x1xf32> to vector<12x1024xf32>
    %307 = arith.subf %301, %306 : vector<12x1024xf32>
    %308 = arith.mulf %307, %307 : vector<12x1024xf32>
    %cst_123 = arith.constant dense<0.000000e+00> : vector<12xf32>
    %309 = vector.multi_reduction <add>, %308, %cst_123 [1] : vector<12x1024xf32> to vector<12xf32>
    %310 = vector.shape_cast %309 : vector<12xf32> to vector<12x1xf32>
    %cst_124 = arith.constant 1.024000e+03 : f32
    %311 = vector.broadcast %cst_124 : f32 to vector<12x1xf32>
    %312 = arith.divf %310, %311 : vector<12x1xf32>
    %cst_125 = arith.constant 9.99999974E-6 : f32
    %313 = vector.broadcast %cst_125 : f32 to vector<12x1xf32>
    %314 = arith.addf %312, %313 : vector<12x1xf32>
    %315 = math.rsqrt %314 : vector<12x1xf32>
    %316 = vector.broadcast %315 : vector<12x1xf32> to vector<12x1024xf32>
    %317 = arith.mulf %307, %316 : vector<12x1024xf32>
    %c33_i32 = arith.constant 33 : i32
    %318 = tpu.dynamic_rotate %317 by %c33_i32 dim 1 : vector<12x1024xf32>, i32 -> vector<12x1024xf32>
    %c0_126 = arith.constant 0 : index
    %c0_127 = arith.constant 0 : index
    %319 = vector.load %arg21[%c0_126, %c0_127] : memref<9x1024xf32, #tpu.memory_space<vmem>>, vector<1x1024xf32>
    %320 = vector.broadcast %319 : vector<1x1024xf32> to vector<12x1024xf32>
    %321 = arith.mulf %318, %320 : vector<12x1024xf32>
    %c0_128 = arith.constant 0 : index
    %c0_129 = arith.constant 0 : index
    %c0_130 = arith.constant 0 : index
    %322 = vector.load %arg15[%c0_128, %c0_129, %c0_130] : memref<9x12x12xf32, #tpu.memory_space<vmem>>, vector<1x12x12xf32>
    %323 = vector.shape_cast %322 : vector<1x12x12xf32> to vector<12x12xf32>
    %cst_131 = arith.constant dense<0.000000e+00> : vector<12x1024xf32>
    %324 = tpu.matmul %323, %321, %cst_131 {dimension_numbers = #tpu.dot_dimension_numbers<[1], [0], [0], [1], [0, 0, 1, 1], [], []>} : vector<12x12xf32>, vector<12x1024xf32>, vector<12x1024xf32> -> vector<12x1024xf32>
    %c32_i32 = arith.constant 32 : i32
    %325 = tpu.dynamic_rotate %317 by %c32_i32 dim 1 : vector<12x1024xf32>, i32 -> vector<12x1024xf32>
    %c1_132 = arith.constant 1 : index
    %c0_133 = arith.constant 0 : index
    %326 = vector.load %arg21[%c1_132, %c0_133] : memref<9x1024xf32, #tpu.memory_space<vmem>>, vector<1x1024xf32>
    %327 = vector.broadcast %326 : vector<1x1024xf32> to vector<12x1024xf32>
    %328 = arith.mulf %325, %327 : vector<12x1024xf32>
    %c1_134 = arith.constant 1 : index
    %c0_135 = arith.constant 0 : index
    %c0_136 = arith.constant 0 : index
    %329 = vector.load %arg15[%c1_134, %c0_135, %c0_136] : memref<9x12x12xf32, #tpu.memory_space<vmem>>, vector<1x12x12xf32>
    %330 = vector.shape_cast %329 : vector<1x12x12xf32> to vector<12x12xf32>
    %cst_137 = arith.constant dense<0.000000e+00> : vector<12x1024xf32>
    %331 = tpu.matmul %330, %328, %cst_137 {dimension_numbers = #tpu.dot_dimension_numbers<[1], [0], [0], [1], [0, 0, 1, 1], [], []>} : vector<12x12xf32>, vector<12x1024xf32>, vector<12x1024xf32> -> vector<12x1024xf32>
    %332 = arith.addf %324, %331 : vector<12x1024xf32>
    %c31_i32 = arith.constant 31 : i32
    %333 = tpu.dynamic_rotate %317 by %c31_i32 dim 1 : vector<12x1024xf32>, i32 -> vector<12x1024xf32>
    %c2_138 = arith.constant 2 : index
    %c0_139 = arith.constant 0 : index
    %334 = vector.load %arg21[%c2_138, %c0_139] : memref<9x1024xf32, #tpu.memory_space<vmem>>, vector<1x1024xf32>
    %335 = vector.broadcast %334 : vector<1x1024xf32> to vector<12x1024xf32>
    %336 = arith.mulf %333, %335 : vector<12x1024xf32>
    %c2_140 = arith.constant 2 : index
    %c0_141 = arith.constant 0 : index
    %c0_142 = arith.constant 0 : index
    %337 = vector.load %arg15[%c2_140, %c0_141, %c0_142] : memref<9x12x12xf32, #tpu.memory_space<vmem>>, vector<1x12x12xf32>
    %338 = vector.shape_cast %337 : vector<1x12x12xf32> to vector<12x12xf32>
    %cst_143 = arith.constant dense<0.000000e+00> : vector<12x1024xf32>
    %339 = tpu.matmul %338, %336, %cst_143 {dimension_numbers = #tpu.dot_dimension_numbers<[1], [0], [0], [1], [0, 0, 1, 1], [], []>} : vector<12x12xf32>, vector<12x1024xf32>, vector<12x1024xf32> -> vector<12x1024xf32>
    %340 = arith.addf %332, %339 : vector<12x1024xf32>
    %c1_i32 = arith.constant 1 : i32
    %341 = tpu.dynamic_rotate %317 by %c1_i32 dim 1 : vector<12x1024xf32>, i32 -> vector<12x1024xf32>
    %c3 = arith.constant 3 : index
    %c0_144 = arith.constant 0 : index
    %342 = vector.load %arg21[%c3, %c0_144] : memref<9x1024xf32, #tpu.memory_space<vmem>>, vector<1x1024xf32>
    %343 = vector.broadcast %342 : vector<1x1024xf32> to vector<12x1024xf32>
    %344 = arith.mulf %341, %343 : vector<12x1024xf32>
    %c3_145 = arith.constant 3 : index
    %c0_146 = arith.constant 0 : index
    %c0_147 = arith.constant 0 : index
    %345 = vector.load %arg15[%c3_145, %c0_146, %c0_147] : memref<9x12x12xf32, #tpu.memory_space<vmem>>, vector<1x12x12xf32>
    %346 = vector.shape_cast %345 : vector<1x12x12xf32> to vector<12x12xf32>
    %cst_148 = arith.constant dense<0.000000e+00> : vector<12x1024xf32>
    %347 = tpu.matmul %346, %344, %cst_148 {dimension_numbers = #tpu.dot_dimension_numbers<[1], [0], [0], [1], [0, 0, 1, 1], [], []>} : vector<12x12xf32>, vector<12x1024xf32>, vector<12x1024xf32> -> vector<12x1024xf32>
    %348 = arith.addf %340, %347 : vector<12x1024xf32>
    %c4 = arith.constant 4 : index
    %c0_149 = arith.constant 0 : index
    %c0_150 = arith.constant 0 : index
    %349 = vector.load %arg15[%c4, %c0_149, %c0_150] : memref<9x12x12xf32, #tpu.memory_space<vmem>>, vector<1x12x12xf32>
    %350 = vector.shape_cast %349 : vector<1x12x12xf32> to vector<12x12xf32>
    %cst_151 = arith.constant dense<0.000000e+00> : vector<12x1024xf32>
    %351 = tpu.matmul %350, %317, %cst_151 {dimension_numbers = #tpu.dot_dimension_numbers<[1], [0], [0], [1], [0, 0, 1, 1], [], []>} : vector<12x12xf32>, vector<12x1024xf32>, vector<12x1024xf32> -> vector<12x1024xf32>
    %352 = arith.addf %348, %351 : vector<12x1024xf32>
    %c1023_i32 = arith.constant 1023 : i32
    %353 = tpu.dynamic_rotate %317 by %c1023_i32 dim 1 : vector<12x1024xf32>, i32 -> vector<12x1024xf32>
    %c5 = arith.constant 5 : index
    %c0_152 = arith.constant 0 : index
    %354 = vector.load %arg21[%c5, %c0_152] : memref<9x1024xf32, #tpu.memory_space<vmem>>, vector<1x1024xf32>
    %355 = vector.broadcast %354 : vector<1x1024xf32> to vector<12x1024xf32>
    %356 = arith.mulf %353, %355 : vector<12x1024xf32>
    %c5_153 = arith.constant 5 : index
    %c0_154 = arith.constant 0 : index
    %c0_155 = arith.constant 0 : index
    %357 = vector.load %arg15[%c5_153, %c0_154, %c0_155] : memref<9x12x12xf32, #tpu.memory_space<vmem>>, vector<1x12x12xf32>
    %358 = vector.shape_cast %357 : vector<1x12x12xf32> to vector<12x12xf32>
    %cst_156 = arith.constant dense<0.000000e+00> : vector<12x1024xf32>
    %359 = tpu.matmul %358, %356, %cst_156 {dimension_numbers = #tpu.dot_dimension_numbers<[1], [0], [0], [1], [0, 0, 1, 1], [], []>} : vector<12x12xf32>, vector<12x1024xf32>, vector<12x1024xf32> -> vector<12x1024xf32>
    %360 = arith.addf %352, %359 : vector<12x1024xf32>
    %c993_i32 = arith.constant 993 : i32
    %361 = tpu.dynamic_rotate %317 by %c993_i32 dim 1 : vector<12x1024xf32>, i32 -> vector<12x1024xf32>
    %c6 = arith.constant 6 : index
    %c0_157 = arith.constant 0 : index
    %362 = vector.load %arg21[%c6, %c0_157] : memref<9x1024xf32, #tpu.memory_space<vmem>>, vector<1x1024xf32>
    %363 = vector.broadcast %362 : vector<1x1024xf32> to vector<12x1024xf32>
    %364 = arith.mulf %361, %363 : vector<12x1024xf32>
    %c6_158 = arith.constant 6 : index
    %c0_159 = arith.constant 0 : index
    %c0_160 = arith.constant 0 : index
    %365 = vector.load %arg15[%c6_158, %c0_159, %c0_160] : memref<9x12x12xf32, #tpu.memory_space<vmem>>, vector<1x12x12xf32>
    %366 = vector.shape_cast %365 : vector<1x12x12xf32> to vector<12x12xf32>
    %cst_161 = arith.constant dense<0.000000e+00> : vector<12x1024xf32>
    %367 = tpu.matmul %366, %364, %cst_161 {dimension_numbers = #tpu.dot_dimension_numbers<[1], [0], [0], [1], [0, 0, 1, 1], [], []>} : vector<12x12xf32>, vector<12x1024xf32>, vector<12x1024xf32> -> vector<12x1024xf32>
    %368 = arith.addf %360, %367 : vector<12x1024xf32>
    %c992_i32 = arith.constant 992 : i32
    %369 = tpu.dynamic_rotate %317 by %c992_i32 dim 1 : vector<12x1024xf32>, i32 -> vector<12x1024xf32>
    %c7 = arith.constant 7 : index
    %c0_162 = arith.constant 0 : index
    %370 = vector.load %arg21[%c7, %c0_162] : memref<9x1024xf32, #tpu.memory_space<vmem>>, vector<1x1024xf32>
    %371 = vector.broadcast %370 : vector<1x1024xf32> to vector<12x1024xf32>
    %372 = arith.mulf %369, %371 : vector<12x1024xf32>
    %c7_163 = arith.constant 7 : index
    %c0_164 = arith.constant 0 : index
    %c0_165 = arith.constant 0 : index
    %373 = vector.load %arg15[%c7_163, %c0_164, %c0_165] : memref<9x12x12xf32, #tpu.memory_space<vmem>>, vector<1x12x12xf32>
    %374 = vector.shape_cast %373 : vector<1x12x12xf32> to vector<12x12xf32>
    %cst_166 = arith.constant dense<0.000000e+00> : vector<12x1024xf32>
    %375 = tpu.matmul %374, %372, %cst_166 {dimension_numbers = #tpu.dot_dimension_numbers<[1], [0], [0], [1], [0, 0, 1, 1], [], []>} : vector<12x12xf32>, vector<12x1024xf32>, vector<12x1024xf32> -> vector<12x1024xf32>
    %376 = arith.addf %368, %375 : vector<12x1024xf32>
    %c991_i32 = arith.constant 991 : i32
    %377 = tpu.dynamic_rotate %317 by %c991_i32 dim 1 : vector<12x1024xf32>, i32 -> vector<12x1024xf32>
    %c8 = arith.constant 8 : index
    %c0_167 = arith.constant 0 : index
    %378 = vector.load %arg21[%c8, %c0_167] : memref<9x1024xf32, #tpu.memory_space<vmem>>, vector<1x1024xf32>
    %379 = vector.broadcast %378 : vector<1x1024xf32> to vector<12x1024xf32>
    %380 = arith.mulf %377, %379 : vector<12x1024xf32>
    %c8_168 = arith.constant 8 : index
    %c0_169 = arith.constant 0 : index
    %c0_170 = arith.constant 0 : index
    %381 = vector.load %arg15[%c8_168, %c0_169, %c0_170] : memref<9x12x12xf32, #tpu.memory_space<vmem>>, vector<1x12x12xf32>
    %382 = vector.shape_cast %381 : vector<1x12x12xf32> to vector<12x12xf32>
    %cst_171 = arith.constant dense<0.000000e+00> : vector<12x1024xf32>
    %383 = tpu.matmul %382, %380, %cst_171 {dimension_numbers = #tpu.dot_dimension_numbers<[1], [0], [0], [1], [0, 0, 1, 1], [], []>} : vector<12x12xf32>, vector<12x1024xf32>, vector<12x1024xf32> -> vector<12x1024xf32>
    %384 = arith.addf %376, %383 : vector<12x1024xf32>
    %385 = arith.addf %317, %384 : vector<12x1024xf32>
    %c0_172 = arith.constant 0 : index
    %c0_173 = arith.constant 0 : index
    %386 = vector.load %arg16[%c0_172, %c0_173] : memref<12x1xf32, #tpu.memory_space<vmem>>, vector<12x1xf32>
    %387 = vector.broadcast %386 : vector<12x1xf32> to vector<12x1024xf32>
    %388 = arith.addf %385, %387 : vector<12x1024xf32>
    %cst_174 = arith.constant 0.000000e+00 : f32
    %389 = vector.broadcast %cst_174 : f32 to vector<12x1024xf32>
    %390 = arith.cmpf ogt, %388, %389 : vector<12x1024xf32>
    %cst_175 = arith.constant 0.00999999977 : f32
    %391 = vector.broadcast %cst_175 : f32 to vector<12x1024xf32>
    %392 = arith.mulf %391, %388 : vector<12x1024xf32>
    %393 = arith.select %390, %388, %392 : vector<12x1024xi1>, vector<12x1024xf32>
    %cst_176 = arith.constant dense<0.000000e+00> : vector<12xf32>
    %394 = vector.multi_reduction <add>, %393, %cst_176 [1] : vector<12x1024xf32> to vector<12xf32>
    %395 = vector.shape_cast %394 : vector<12xf32> to vector<12x1xf32>
    %cst_177 = arith.constant 1.024000e+03 : f32
    %396 = vector.broadcast %cst_177 : f32 to vector<12x1xf32>
    %397 = arith.divf %395, %396 : vector<12x1xf32>
    %398 = vector.broadcast %397 : vector<12x1xf32> to vector<12x1024xf32>
    %399 = arith.subf %393, %398 : vector<12x1024xf32>
    %400 = arith.mulf %399, %399 : vector<12x1024xf32>
    %cst_178 = arith.constant dense<0.000000e+00> : vector<12xf32>
    %401 = vector.multi_reduction <add>, %400, %cst_178 [1] : vector<12x1024xf32> to vector<12xf32>
    %402 = vector.shape_cast %401 : vector<12xf32> to vector<12x1xf32>
    %cst_179 = arith.constant 1.024000e+03 : f32
    %403 = vector.broadcast %cst_179 : f32 to vector<12x1xf32>
    %404 = arith.divf %402, %403 : vector<12x1xf32>
    %cst_180 = arith.constant 9.99999974E-6 : f32
    %405 = vector.broadcast %cst_180 : f32 to vector<12x1xf32>
    %406 = arith.addf %404, %405 : vector<12x1xf32>
    %407 = math.rsqrt %406 : vector<12x1xf32>
    %408 = vector.broadcast %407 : vector<12x1xf32> to vector<12x1024xf32>
    %409 = arith.mulf %399, %408 : vector<12x1024xf32>
    %c33_i32_181 = arith.constant 33 : i32
    %410 = tpu.dynamic_rotate %409 by %c33_i32_181 dim 1 : vector<12x1024xf32>, i32 -> vector<12x1024xf32>
    %c0_182 = arith.constant 0 : index
    %c0_183 = arith.constant 0 : index
    %411 = vector.load %arg21[%c0_182, %c0_183] : memref<9x1024xf32, #tpu.memory_space<vmem>>, vector<1x1024xf32>
    %412 = vector.broadcast %411 : vector<1x1024xf32> to vector<12x1024xf32>
    %413 = arith.mulf %410, %412 : vector<12x1024xf32>
    %c0_184 = arith.constant 0 : index
    %c0_185 = arith.constant 0 : index
    %c0_186 = arith.constant 0 : index
    %414 = vector.load %arg17[%c0_184, %c0_185, %c0_186] : memref<9x12x12xf32, #tpu.memory_space<vmem>>, vector<1x12x12xf32>
    %415 = vector.shape_cast %414 : vector<1x12x12xf32> to vector<12x12xf32>
    %cst_187 = arith.constant dense<0.000000e+00> : vector<12x1024xf32>
    %416 = tpu.matmul %415, %413, %cst_187 {dimension_numbers = #tpu.dot_dimension_numbers<[1], [0], [0], [1], [0, 0, 1, 1], [], []>} : vector<12x12xf32>, vector<12x1024xf32>, vector<12x1024xf32> -> vector<12x1024xf32>
    %c32_i32_188 = arith.constant 32 : i32
    %417 = tpu.dynamic_rotate %409 by %c32_i32_188 dim 1 : vector<12x1024xf32>, i32 -> vector<12x1024xf32>
    %c1_189 = arith.constant 1 : index
    %c0_190 = arith.constant 0 : index
    %418 = vector.load %arg21[%c1_189, %c0_190] : memref<9x1024xf32, #tpu.memory_space<vmem>>, vector<1x1024xf32>
    %419 = vector.broadcast %418 : vector<1x1024xf32> to vector<12x1024xf32>
    %420 = arith.mulf %417, %419 : vector<12x1024xf32>
    %c1_191 = arith.constant 1 : index
    %c0_192 = arith.constant 0 : index
    %c0_193 = arith.constant 0 : index
    %421 = vector.load %arg17[%c1_191, %c0_192, %c0_193] : memref<9x12x12xf32, #tpu.memory_space<vmem>>, vector<1x12x12xf32>
    %422 = vector.shape_cast %421 : vector<1x12x12xf32> to vector<12x12xf32>
    %cst_194 = arith.constant dense<0.000000e+00> : vector<12x1024xf32>
    %423 = tpu.matmul %422, %420, %cst_194 {dimension_numbers = #tpu.dot_dimension_numbers<[1], [0], [0], [1], [0, 0, 1, 1], [], []>} : vector<12x12xf32>, vector<12x1024xf32>, vector<12x1024xf32> -> vector<12x1024xf32>
    %424 = arith.addf %416, %423 : vector<12x1024xf32>
    %c31_i32_195 = arith.constant 31 : i32
    %425 = tpu.dynamic_rotate %409 by %c31_i32_195 dim 1 : vector<12x1024xf32>, i32 -> vector<12x1024xf32>
    %c2_196 = arith.constant 2 : index
    %c0_197 = arith.constant 0 : index
    %426 = vector.load %arg21[%c2_196, %c0_197] : memref<9x1024xf32, #tpu.memory_space<vmem>>, vector<1x1024xf32>
    %427 = vector.broadcast %426 : vector<1x1024xf32> to vector<12x1024xf32>
    %428 = arith.mulf %425, %427 : vector<12x1024xf32>
    %c2_198 = arith.constant 2 : index
    %c0_199 = arith.constant 0 : index
    %c0_200 = arith.constant 0 : index
    %429 = vector.load %arg17[%c2_198, %c0_199, %c0_200] : memref<9x12x12xf32, #tpu.memory_space<vmem>>, vector<1x12x12xf32>
    %430 = vector.shape_cast %429 : vector<1x12x12xf32> to vector<12x12xf32>
    %cst_201 = arith.constant dense<0.000000e+00> : vector<12x1024xf32>
    %431 = tpu.matmul %430, %428, %cst_201 {dimension_numbers = #tpu.dot_dimension_numbers<[1], [0], [0], [1], [0, 0, 1, 1], [], []>} : vector<12x12xf32>, vector<12x1024xf32>, vector<12x1024xf32> -> vector<12x1024xf32>
    %432 = arith.addf %424, %431 : vector<12x1024xf32>
    %c1_i32_202 = arith.constant 1 : i32
    %433 = tpu.dynamic_rotate %409 by %c1_i32_202 dim 1 : vector<12x1024xf32>, i32 -> vector<12x1024xf32>
    %c3_203 = arith.constant 3 : index
    %c0_204 = arith.constant 0 : index
    %434 = vector.load %arg21[%c3_203, %c0_204] : memref<9x1024xf32, #tpu.memory_space<vmem>>, vector<1x1024xf32>
    %435 = vector.broadcast %434 : vector<1x1024xf32> to vector<12x1024xf32>
    %436 = arith.mulf %433, %435 : vector<12x1024xf32>
    %c3_205 = arith.constant 3 : index
    %c0_206 = arith.constant 0 : index
    %c0_207 = arith.constant 0 : index
    %437 = vector.load %arg17[%c3_205, %c0_206, %c0_207] : memref<9x12x12xf32, #tpu.memory_space<vmem>>, vector<1x12x12xf32>
    %438 = vector.shape_cast %437 : vector<1x12x12xf32> to vector<12x12xf32>
    %cst_208 = arith.constant dense<0.000000e+00> : vector<12x1024xf32>
    %439 = tpu.matmul %438, %436, %cst_208 {dimension_numbers = #tpu.dot_dimension_numbers<[1], [0], [0], [1], [0, 0, 1, 1], [], []>} : vector<12x12xf32>, vector<12x1024xf32>, vector<12x1024xf32> -> vector<12x1024xf32>
    %440 = arith.addf %432, %439 : vector<12x1024xf32>
    %c4_209 = arith.constant 4 : index
    %c0_210 = arith.constant 0 : index
    %c0_211 = arith.constant 0 : index
    %441 = vector.load %arg17[%c4_209, %c0_210, %c0_211] : memref<9x12x12xf32, #tpu.memory_space<vmem>>, vector<1x12x12xf32>
    %442 = vector.shape_cast %441 : vector<1x12x12xf32> to vector<12x12xf32>
    %cst_212 = arith.constant dense<0.000000e+00> : vector<12x1024xf32>
    %443 = tpu.matmul %442, %409, %cst_212 {dimension_numbers = #tpu.dot_dimension_numbers<[1], [0], [0], [1], [0, 0, 1, 1], [], []>} : vector<12x12xf32>, vector<12x1024xf32>, vector<12x1024xf32> -> vector<12x1024xf32>
    %444 = arith.addf %440, %443 : vector<12x1024xf32>
    %c1023_i32_213 = arith.constant 1023 : i32
    %445 = tpu.dynamic_rotate %409 by %c1023_i32_213 dim 1 : vector<12x1024xf32>, i32 -> vector<12x1024xf32>
    %c5_214 = arith.constant 5 : index
    %c0_215 = arith.constant 0 : index
    %446 = vector.load %arg21[%c5_214, %c0_215] : memref<9x1024xf32, #tpu.memory_space<vmem>>, vector<1x1024xf32>
    %447 = vector.broadcast %446 : vector<1x1024xf32> to vector<12x1024xf32>
    %448 = arith.mulf %445, %447 : vector<12x1024xf32>
    %c5_216 = arith.constant 5 : index
    %c0_217 = arith.constant 0 : index
    %c0_218 = arith.constant 0 : index
    %449 = vector.load %arg17[%c5_216, %c0_217, %c0_218] : memref<9x12x12xf32, #tpu.memory_space<vmem>>, vector<1x12x12xf32>
    %450 = vector.shape_cast %449 : vector<1x12x12xf32> to vector<12x12xf32>
    %cst_219 = arith.constant dense<0.000000e+00> : vector<12x1024xf32>
    %451 = tpu.matmul %450, %448, %cst_219 {dimension_numbers = #tpu.dot_dimension_numbers<[1], [0], [0], [1], [0, 0, 1, 1], [], []>} : vector<12x12xf32>, vector<12x1024xf32>, vector<12x1024xf32> -> vector<12x1024xf32>
    %452 = arith.addf %444, %451 : vector<12x1024xf32>
    %c993_i32_220 = arith.constant 993 : i32
    %453 = tpu.dynamic_rotate %409 by %c993_i32_220 dim 1 : vector<12x1024xf32>, i32 -> vector<12x1024xf32>
    %c6_221 = arith.constant 6 : index
    %c0_222 = arith.constant 0 : index
    %454 = vector.load %arg21[%c6_221, %c0_222] : memref<9x1024xf32, #tpu.memory_space<vmem>>, vector<1x1024xf32>
    %455 = vector.broadcast %454 : vector<1x1024xf32> to vector<12x1024xf32>
    %456 = arith.mulf %453, %455 : vector<12x1024xf32>
    %c6_223 = arith.constant 6 : index
    %c0_224 = arith.constant 0 : index
    %c0_225 = arith.constant 0 : index
    %457 = vector.load %arg17[%c6_223, %c0_224, %c0_225] : memref<9x12x12xf32, #tpu.memory_space<vmem>>, vector<1x12x12xf32>
    %458 = vector.shape_cast %457 : vector<1x12x12xf32> to vector<12x12xf32>
    %cst_226 = arith.constant dense<0.000000e+00> : vector<12x1024xf32>
    %459 = tpu.matmul %458, %456, %cst_226 {dimension_numbers = #tpu.dot_dimension_numbers<[1], [0], [0], [1], [0, 0, 1, 1], [], []>} : vector<12x12xf32>, vector<12x1024xf32>, vector<12x1024xf32> -> vector<12x1024xf32>
    %460 = arith.addf %452, %459 : vector<12x1024xf32>
    %c992_i32_227 = arith.constant 992 : i32
    %461 = tpu.dynamic_rotate %409 by %c992_i32_227 dim 1 : vector<12x1024xf32>, i32 -> vector<12x1024xf32>
    %c7_228 = arith.constant 7 : index
    %c0_229 = arith.constant 0 : index
    %462 = vector.load %arg21[%c7_228, %c0_229] : memref<9x1024xf32, #tpu.memory_space<vmem>>, vector<1x1024xf32>
    %463 = vector.broadcast %462 : vector<1x1024xf32> to vector<12x1024xf32>
    %464 = arith.mulf %461, %463 : vector<12x1024xf32>
    %c7_230 = arith.constant 7 : index
    %c0_231 = arith.constant 0 : index
    %c0_232 = arith.constant 0 : index
    %465 = vector.load %arg17[%c7_230, %c0_231, %c0_232] : memref<9x12x12xf32, #tpu.memory_space<vmem>>, vector<1x12x12xf32>
    %466 = vector.shape_cast %465 : vector<1x12x12xf32> to vector<12x12xf32>
    %cst_233 = arith.constant dense<0.000000e+00> : vector<12x1024xf32>
    %467 = tpu.matmul %466, %464, %cst_233 {dimension_numbers = #tpu.dot_dimension_numbers<[1], [0], [0], [1], [0, 0, 1, 1], [], []>} : vector<12x12xf32>, vector<12x1024xf32>, vector<12x1024xf32> -> vector<12x1024xf32>
    %468 = arith.addf %460, %467 : vector<12x1024xf32>
    %c991_i32_234 = arith.constant 991 : i32
    %469 = tpu.dynamic_rotate %409 by %c991_i32_234 dim 1 : vector<12x1024xf32>, i32 -> vector<12x1024xf32>
    %c8_235 = arith.constant 8 : index
    %c0_236 = arith.constant 0 : index
    %470 = vector.load %arg21[%c8_235, %c0_236] : memref<9x1024xf32, #tpu.memory_space<vmem>>, vector<1x1024xf32>
    %471 = vector.broadcast %470 : vector<1x1024xf32> to vector<12x1024xf32>
    %472 = arith.mulf %469, %471 : vector<12x1024xf32>
    %c8_237 = arith.constant 8 : index
    %c0_238 = arith.constant 0 : index
    %c0_239 = arith.constant 0 : index
    %473 = vector.load %arg17[%c8_237, %c0_238, %c0_239] : memref<9x12x12xf32, #tpu.memory_space<vmem>>, vector<1x12x12xf32>
    %474 = vector.shape_cast %473 : vector<1x12x12xf32> to vector<12x12xf32>
    %cst_240 = arith.constant dense<0.000000e+00> : vector<12x1024xf32>
    %475 = tpu.matmul %474, %472, %cst_240 {dimension_numbers = #tpu.dot_dimension_numbers<[1], [0], [0], [1], [0, 0, 1, 1], [], []>} : vector<12x12xf32>, vector<12x1024xf32>, vector<12x1024xf32> -> vector<12x1024xf32>
    %476 = arith.addf %468, %475 : vector<12x1024xf32>
    %477 = arith.addf %409, %476 : vector<12x1024xf32>
    %c0_241 = arith.constant 0 : index
    %c0_242 = arith.constant 0 : index
    %478 = vector.load %arg18[%c0_241, %c0_242] : memref<12x1xf32, #tpu.memory_space<vmem>>, vector<12x1xf32>
    %479 = vector.broadcast %478 : vector<12x1xf32> to vector<12x1024xf32>
    %480 = arith.addf %477, %479 : vector<12x1024xf32>
    %cst_243 = arith.constant 0.000000e+00 : f32
    %481 = vector.broadcast %cst_243 : f32 to vector<12x1024xf32>
    %482 = arith.cmpf ogt, %480, %481 : vector<12x1024xf32>
    %cst_244 = arith.constant 0.00999999977 : f32
    %483 = vector.broadcast %cst_244 : f32 to vector<12x1024xf32>
    %484 = arith.mulf %483, %480 : vector<12x1024xf32>
    %485 = arith.select %482, %480, %484 : vector<12x1024xi1>, vector<12x1024xf32>
    %cst_245 = arith.constant dense<0.000000e+00> : vector<12xf32>
    %486 = vector.multi_reduction <add>, %485, %cst_245 [1] : vector<12x1024xf32> to vector<12xf32>
    %487 = vector.shape_cast %486 : vector<12xf32> to vector<12x1xf32>
    %cst_246 = arith.constant 1.024000e+03 : f32
    %488 = vector.broadcast %cst_246 : f32 to vector<12x1xf32>
    %489 = arith.divf %487, %488 : vector<12x1xf32>
    %490 = vector.broadcast %489 : vector<12x1xf32> to vector<12x1024xf32>
    %491 = arith.subf %485, %490 : vector<12x1024xf32>
    %492 = arith.mulf %491, %491 : vector<12x1024xf32>
    %cst_247 = arith.constant dense<0.000000e+00> : vector<12xf32>
    %493 = vector.multi_reduction <add>, %492, %cst_247 [1] : vector<12x1024xf32> to vector<12xf32>
    %494 = vector.shape_cast %493 : vector<12xf32> to vector<12x1xf32>
    %cst_248 = arith.constant 1.024000e+03 : f32
    %495 = vector.broadcast %cst_248 : f32 to vector<12x1xf32>
    %496 = arith.divf %494, %495 : vector<12x1xf32>
    %cst_249 = arith.constant 9.99999974E-6 : f32
    %497 = vector.broadcast %cst_249 : f32 to vector<12x1xf32>
    %498 = arith.addf %496, %497 : vector<12x1xf32>
    %499 = math.rsqrt %498 : vector<12x1xf32>
    %500 = vector.broadcast %499 : vector<12x1xf32> to vector<12x1024xf32>
    %501 = arith.mulf %491, %500 : vector<12x1024xf32>
    %c33_i32_250 = arith.constant 33 : i32
    %502 = tpu.dynamic_rotate %501 by %c33_i32_250 dim 1 : vector<12x1024xf32>, i32 -> vector<12x1024xf32>
    %c0_251 = arith.constant 0 : index
    %c0_252 = arith.constant 0 : index
    %503 = vector.load %arg21[%c0_251, %c0_252] : memref<9x1024xf32, #tpu.memory_space<vmem>>, vector<1x1024xf32>
    %504 = vector.broadcast %503 : vector<1x1024xf32> to vector<12x1024xf32>
    %505 = arith.mulf %502, %504 : vector<12x1024xf32>
    %c0_253 = arith.constant 0 : index
    %c0_254 = arith.constant 0 : index
    %c0_255 = arith.constant 0 : index
    %506 = vector.load %arg19[%c0_253, %c0_254, %c0_255] : memref<9x1x12xf32, #tpu.memory_space<vmem>>, vector<1x1x12xf32>
    %507 = vector.shape_cast %506 : vector<1x1x12xf32> to vector<1x12xf32>
    %cst_256 = arith.constant dense<0.000000e+00> : vector<1x1024xf32>
    %508 = tpu.matmul %507, %505, %cst_256 {dimension_numbers = #tpu.dot_dimension_numbers<[1], [0], [0], [1], [0, 0, 1, 1], [], []>} : vector<1x12xf32>, vector<12x1024xf32>, vector<1x1024xf32> -> vector<1x1024xf32>
    %c32_i32_257 = arith.constant 32 : i32
    %509 = tpu.dynamic_rotate %501 by %c32_i32_257 dim 1 : vector<12x1024xf32>, i32 -> vector<12x1024xf32>
    %c1_258 = arith.constant 1 : index
    %c0_259 = arith.constant 0 : index
    %510 = vector.load %arg21[%c1_258, %c0_259] : memref<9x1024xf32, #tpu.memory_space<vmem>>, vector<1x1024xf32>
    %511 = vector.broadcast %510 : vector<1x1024xf32> to vector<12x1024xf32>
    %512 = arith.mulf %509, %511 : vector<12x1024xf32>
    %c1_260 = arith.constant 1 : index
    %c0_261 = arith.constant 0 : index
    %c0_262 = arith.constant 0 : index
    %513 = vector.load %arg19[%c1_260, %c0_261, %c0_262] : memref<9x1x12xf32, #tpu.memory_space<vmem>>, vector<1x1x12xf32>
    %514 = vector.shape_cast %513 : vector<1x1x12xf32> to vector<1x12xf32>
    %cst_263 = arith.constant dense<0.000000e+00> : vector<1x1024xf32>
    %515 = tpu.matmul %514, %512, %cst_263 {dimension_numbers = #tpu.dot_dimension_numbers<[1], [0], [0], [1], [0, 0, 1, 1], [], []>} : vector<1x12xf32>, vector<12x1024xf32>, vector<1x1024xf32> -> vector<1x1024xf32>
    %516 = arith.addf %508, %515 : vector<1x1024xf32>
    %c31_i32_264 = arith.constant 31 : i32
    %517 = tpu.dynamic_rotate %501 by %c31_i32_264 dim 1 : vector<12x1024xf32>, i32 -> vector<12x1024xf32>
    %c2_265 = arith.constant 2 : index
    %c0_266 = arith.constant 0 : index
    %518 = vector.load %arg21[%c2_265, %c0_266] : memref<9x1024xf32, #tpu.memory_space<vmem>>, vector<1x1024xf32>
    %519 = vector.broadcast %518 : vector<1x1024xf32> to vector<12x1024xf32>
    %520 = arith.mulf %517, %519 : vector<12x1024xf32>
    %c2_267 = arith.constant 2 : index
    %c0_268 = arith.constant 0 : index
    %c0_269 = arith.constant 0 : index
    %521 = vector.load %arg19[%c2_267, %c0_268, %c0_269] : memref<9x1x12xf32, #tpu.memory_space<vmem>>, vector<1x1x12xf32>
    %522 = vector.shape_cast %521 : vector<1x1x12xf32> to vector<1x12xf32>
    %cst_270 = arith.constant dense<0.000000e+00> : vector<1x1024xf32>
    %523 = tpu.matmul %522, %520, %cst_270 {dimension_numbers = #tpu.dot_dimension_numbers<[1], [0], [0], [1], [0, 0, 1, 1], [], []>} : vector<1x12xf32>, vector<12x1024xf32>, vector<1x1024xf32> -> vector<1x1024xf32>
    %524 = arith.addf %516, %523 : vector<1x1024xf32>
    %c1_i32_271 = arith.constant 1 : i32
    %525 = tpu.dynamic_rotate %501 by %c1_i32_271 dim 1 : vector<12x1024xf32>, i32 -> vector<12x1024xf32>
    %c3_272 = arith.constant 3 : index
    %c0_273 = arith.constant 0 : index
    %526 = vector.load %arg21[%c3_272, %c0_273] : memref<9x1024xf32, #tpu.memory_space<vmem>>, vector<1x1024xf32>
    %527 = vector.broadcast %526 : vector<1x1024xf32> to vector<12x1024xf32>
    %528 = arith.mulf %525, %527 : vector<12x1024xf32>
    %c3_274 = arith.constant 3 : index
    %c0_275 = arith.constant 0 : index
    %c0_276 = arith.constant 0 : index
    %529 = vector.load %arg19[%c3_274, %c0_275, %c0_276] : memref<9x1x12xf32, #tpu.memory_space<vmem>>, vector<1x1x12xf32>
    %530 = vector.shape_cast %529 : vector<1x1x12xf32> to vector<1x12xf32>
    %cst_277 = arith.constant dense<0.000000e+00> : vector<1x1024xf32>
    %531 = tpu.matmul %530, %528, %cst_277 {dimension_numbers = #tpu.dot_dimension_numbers<[1], [0], [0], [1], [0, 0, 1, 1], [], []>} : vector<1x12xf32>, vector<12x1024xf32>, vector<1x1024xf32> -> vector<1x1024xf32>
    %532 = arith.addf %524, %531 : vector<1x1024xf32>
    %c4_278 = arith.constant 4 : index
    %c0_279 = arith.constant 0 : index
    %c0_280 = arith.constant 0 : index
    %533 = vector.load %arg19[%c4_278, %c0_279, %c0_280] : memref<9x1x12xf32, #tpu.memory_space<vmem>>, vector<1x1x12xf32>
    %534 = vector.shape_cast %533 : vector<1x1x12xf32> to vector<1x12xf32>
    %cst_281 = arith.constant dense<0.000000e+00> : vector<1x1024xf32>
    %535 = tpu.matmul %534, %501, %cst_281 {dimension_numbers = #tpu.dot_dimension_numbers<[1], [0], [0], [1], [0, 0, 1, 1], [], []>} : vector<1x12xf32>, vector<12x1024xf32>, vector<1x1024xf32> -> vector<1x1024xf32>
    %536 = arith.addf %532, %535 : vector<1x1024xf32>
    %c1023_i32_282 = arith.constant 1023 : i32
    %537 = tpu.dynamic_rotate %501 by %c1023_i32_282 dim 1 : vector<12x1024xf32>, i32 -> vector<12x1024xf32>
    %c5_283 = arith.constant 5 : index
    %c0_284 = arith.constant 0 : index
    %538 = vector.load %arg21[%c5_283, %c0_284] : memref<9x1024xf32, #tpu.memory_space<vmem>>, vector<1x1024xf32>
    %539 = vector.broadcast %538 : vector<1x1024xf32> to vector<12x1024xf32>
    %540 = arith.mulf %537, %539 : vector<12x1024xf32>
    %c5_285 = arith.constant 5 : index
    %c0_286 = arith.constant 0 : index
    %c0_287 = arith.constant 0 : index
    %541 = vector.load %arg19[%c5_285, %c0_286, %c0_287] : memref<9x1x12xf32, #tpu.memory_space<vmem>>, vector<1x1x12xf32>
    %542 = vector.shape_cast %541 : vector<1x1x12xf32> to vector<1x12xf32>
    %cst_288 = arith.constant dense<0.000000e+00> : vector<1x1024xf32>
    %543 = tpu.matmul %542, %540, %cst_288 {dimension_numbers = #tpu.dot_dimension_numbers<[1], [0], [0], [1], [0, 0, 1, 1], [], []>} : vector<1x12xf32>, vector<12x1024xf32>, vector<1x1024xf32> -> vector<1x1024xf32>
    %544 = arith.addf %536, %543 : vector<1x1024xf32>
    %c993_i32_289 = arith.constant 993 : i32
    %545 = tpu.dynamic_rotate %501 by %c993_i32_289 dim 1 : vector<12x1024xf32>, i32 -> vector<12x1024xf32>
    %c6_290 = arith.constant 6 : index
    %c0_291 = arith.constant 0 : index
    %546 = vector.load %arg21[%c6_290, %c0_291] : memref<9x1024xf32, #tpu.memory_space<vmem>>, vector<1x1024xf32>
    %547 = vector.broadcast %546 : vector<1x1024xf32> to vector<12x1024xf32>
    %548 = arith.mulf %545, %547 : vector<12x1024xf32>
    %c6_292 = arith.constant 6 : index
    %c0_293 = arith.constant 0 : index
    %c0_294 = arith.constant 0 : index
    %549 = vector.load %arg19[%c6_292, %c0_293, %c0_294] : memref<9x1x12xf32, #tpu.memory_space<vmem>>, vector<1x1x12xf32>
    %550 = vector.shape_cast %549 : vector<1x1x12xf32> to vector<1x12xf32>
    %cst_295 = arith.constant dense<0.000000e+00> : vector<1x1024xf32>
    %551 = tpu.matmul %550, %548, %cst_295 {dimension_numbers = #tpu.dot_dimension_numbers<[1], [0], [0], [1], [0, 0, 1, 1], [], []>} : vector<1x12xf32>, vector<12x1024xf32>, vector<1x1024xf32> -> vector<1x1024xf32>
    %552 = arith.addf %544, %551 : vector<1x1024xf32>
    %c992_i32_296 = arith.constant 992 : i32
    %553 = tpu.dynamic_rotate %501 by %c992_i32_296 dim 1 : vector<12x1024xf32>, i32 -> vector<12x1024xf32>
    %c7_297 = arith.constant 7 : index
    %c0_298 = arith.constant 0 : index
    %554 = vector.load %arg21[%c7_297, %c0_298] : memref<9x1024xf32, #tpu.memory_space<vmem>>, vector<1x1024xf32>
    %555 = vector.broadcast %554 : vector<1x1024xf32> to vector<12x1024xf32>
    %556 = arith.mulf %553, %555 : vector<12x1024xf32>
    %c7_299 = arith.constant 7 : index
    %c0_300 = arith.constant 0 : index
    %c0_301 = arith.constant 0 : index
    %557 = vector.load %arg19[%c7_299, %c0_300, %c0_301] : memref<9x1x12xf32, #tpu.memory_space<vmem>>, vector<1x1x12xf32>
    %558 = vector.shape_cast %557 : vector<1x1x12xf32> to vector<1x12xf32>
    %cst_302 = arith.constant dense<0.000000e+00> : vector<1x1024xf32>
    %559 = tpu.matmul %558, %556, %cst_302 {dimension_numbers = #tpu.dot_dimension_numbers<[1], [0], [0], [1], [0, 0, 1, 1], [], []>} : vector<1x12xf32>, vector<12x1024xf32>, vector<1x1024xf32> -> vector<1x1024xf32>
    %560 = arith.addf %552, %559 : vector<1x1024xf32>
    %c991_i32_303 = arith.constant 991 : i32
    %561 = tpu.dynamic_rotate %501 by %c991_i32_303 dim 1 : vector<12x1024xf32>, i32 -> vector<12x1024xf32>
    %c8_304 = arith.constant 8 : index
    %c0_305 = arith.constant 0 : index
    %562 = vector.load %arg21[%c8_304, %c0_305] : memref<9x1024xf32, #tpu.memory_space<vmem>>, vector<1x1024xf32>
    %563 = vector.broadcast %562 : vector<1x1024xf32> to vector<12x1024xf32>
    %564 = arith.mulf %561, %563 : vector<12x1024xf32>
    %c8_306 = arith.constant 8 : index
    %c0_307 = arith.constant 0 : index
    %c0_308 = arith.constant 0 : index
    %565 = vector.load %arg19[%c8_306, %c0_307, %c0_308] : memref<9x1x12xf32, #tpu.memory_space<vmem>>, vector<1x1x12xf32>
    %566 = vector.shape_cast %565 : vector<1x1x12xf32> to vector<1x12xf32>
    %cst_309 = arith.constant dense<0.000000e+00> : vector<1x1024xf32>
    %567 = tpu.matmul %566, %564, %cst_309 {dimension_numbers = #tpu.dot_dimension_numbers<[1], [0], [0], [1], [0, 0, 1, 1], [], []>} : vector<1x12xf32>, vector<12x1024xf32>, vector<1x1024xf32> -> vector<1x1024xf32>
    %568 = arith.addf %560, %567 : vector<1x1024xf32>
    %c0_310 = arith.constant 0 : index
    %c0_311 = arith.constant 0 : index
    %569 = vector.load %arg20[%c0_310, %c0_311] : memref<1x1xf32, #tpu.memory_space<vmem>>, vector<1x1xf32>
    %570 = vector.broadcast %569 : vector<1x1xf32> to vector<1x1024xf32>
    %571 = arith.addf %568, %570 : vector<1x1024xf32>
    %cst_312 = arith.constant 0.000000e+00 : f32
    %572 = vector.broadcast %cst_312 : f32 to vector<1x1024xf32>
    %573 = arith.maximumf %571, %572 : vector<1x1024xf32>
    %cst_313 = arith.constant dense<0.000000e+00> : vector<1xf32>
    %574 = vector.multi_reduction <add>, %573, %cst_313 [1] : vector<1x1024xf32> to vector<1xf32>
    %575 = vector.shape_cast %574 : vector<1xf32> to vector<1x1xf32>
    %cst_314 = arith.constant 1.024000e+03 : f32
    %576 = vector.broadcast %cst_314 : f32 to vector<1x1xf32>
    %577 = arith.divf %575, %576 : vector<1x1xf32>
    %578 = vector.broadcast %577 : vector<1x1xf32> to vector<1x1024xf32>
    %579 = arith.subf %573, %578 : vector<1x1024xf32>
    %580 = arith.mulf %579, %579 : vector<1x1024xf32>
    %cst_315 = arith.constant dense<0.000000e+00> : vector<1xf32>
    %581 = vector.multi_reduction <add>, %580, %cst_315 [1] : vector<1x1024xf32> to vector<1xf32>
    %582 = vector.shape_cast %581 : vector<1xf32> to vector<1x1xf32>
    %cst_316 = arith.constant 1.024000e+03 : f32
    %583 = vector.broadcast %cst_316 : f32 to vector<1x1xf32>
    %584 = arith.divf %582, %583 : vector<1x1xf32>
    %cst_317 = arith.constant 9.99999974E-6 : f32
    %585 = vector.broadcast %cst_317 : f32 to vector<1x1xf32>
    %586 = arith.addf %584, %585 : vector<1x1xf32>
    %587 = math.rsqrt %586 : vector<1x1xf32>
    %588 = vector.broadcast %587 : vector<1x1xf32> to vector<1x1024xf32>
    %589 = arith.mulf %579, %588 : vector<1x1024xf32>
    %c0_318 = arith.constant 0 : index
    %c0_319 = arith.constant 0 : index
    %590 = vector.load %arg22[%c0_318, %c0_319] : memref<1024x16xf32, #tpu.memory_space<vmem>>, vector<1024x16xf32>
    %cst_320 = arith.constant dense<0.000000e+00> : vector<1x16xf32>
    %591 = tpu.matmul %589, %590, %cst_320 {dimension_numbers = #tpu.dot_dimension_numbers<[1], [0], [0], [1], [0, 0, 1, 1], [], []>} : vector<1x1024xf32>, vector<1024x16xf32>, vector<1x16xf32> -> vector<1x16xf32>
    %c0_321 = arith.constant 0 : index
    %c0_322 = arith.constant 0 : index
    %592 = vector.load %arg23[%c0_321, %c0_322] : memref<1x16xf32, #tpu.memory_space<vmem>>, vector<1x16xf32>
    %593 = arith.addf %591, %592 : vector<1x16xf32>
    %cst_323 = arith.constant dense<0.000000e+00> : vector<1xf32>
    %594 = vector.multi_reduction <add>, %593, %cst_323 [1] : vector<1x16xf32> to vector<1xf32>
    %595 = vector.shape_cast %594 : vector<1xf32> to vector<1x1xf32>
    %cst_324 = arith.constant 1.600000e+01 : f32
    %596 = vector.broadcast %cst_324 : f32 to vector<1x1xf32>
    %597 = arith.divf %595, %596 : vector<1x1xf32>
    %598 = vector.broadcast %597 : vector<1x1xf32> to vector<1x16xf32>
    %599 = arith.subf %593, %598 : vector<1x16xf32>
    %600 = arith.mulf %599, %599 : vector<1x16xf32>
    %cst_325 = arith.constant dense<0.000000e+00> : vector<1xf32>
    %601 = vector.multi_reduction <add>, %600, %cst_325 [1] : vector<1x16xf32> to vector<1xf32>
    %602 = vector.shape_cast %601 : vector<1xf32> to vector<1x1xf32>
    %cst_326 = arith.constant 1.600000e+01 : f32
    %603 = vector.broadcast %cst_326 : f32 to vector<1x1xf32>
    %604 = arith.divf %602, %603 : vector<1x1xf32>
    %cst_327 = arith.constant 9.99999974E-6 : f32
    %605 = vector.broadcast %cst_327 : f32 to vector<1x1xf32>
    %606 = arith.addf %604, %605 : vector<1x1xf32>
    %607 = math.rsqrt %606 : vector<1x1xf32>
    %608 = vector.broadcast %607 : vector<1x1xf32> to vector<1x16xf32>
    %609 = arith.mulf %599, %608 : vector<1x16xf32>
    %cst_328 = arith.constant 0.000000e+00 : f32
    %610 = vector.broadcast %cst_328 : f32 to vector<1x16xf32>
    %611 = arith.maximumf %609, %610 : vector<1x16xf32>
    %c0_329 = arith.constant 0 : index
    %c0_330 = arith.constant 0 : index
    %612 = vector.load %arg24[%c0_329, %c0_330] : memref<16x1xf32, #tpu.memory_space<vmem>>, vector<16x1xf32>
    %cst_331 = arith.constant dense<0.000000e+00> : vector<1x1xf32>
    %613 = tpu.matmul %611, %612, %cst_331 {dimension_numbers = #tpu.dot_dimension_numbers<[1], [0], [0], [1], [0, 0, 1, 1], [], []>} : vector<1x16xf32>, vector<16x1xf32>, vector<1x1xf32> -> vector<1x1xf32>
    %c0_332 = arith.constant 0 : index
    %c0_333 = arith.constant 0 : index
    %614 = vector.load %arg25[%c0_332, %c0_333] : memref<1x1xf32, #tpu.memory_space<vmem>>, vector<1x1xf32>
    %615 = arith.addf %613, %614 : vector<1x1xf32>
    %c0_334 = arith.constant 0 : index
    %c0_335 = arith.constant 0 : index
    %c0_336 = arith.constant 0 : index
    %616 = vector.load %arg26[%c0_334, %c0_335, %c0_336] : memref<1x1x1xf32, #tpu.memory_space<vmem>>, vector<1x1x1xf32>
    %617 = vector.shape_cast %616 : vector<1x1x1xf32> to vector<1x1xf32>
    %618 = vector.shape_cast %615 : vector<1x1xf32> to vector<1x1x1xf32>
    tpu.vector_store %arg26[%c0_334, %c0_335, %c0_336], %618 {strides = array<i32>} : memref<1x1x1xf32, #tpu.memory_space<vmem>>, vector<1x1x1xf32>,
    return
  }
  func.func @transform_0(%arg0: i32) -> (i32, i32, i32) {
    %c0_i32 = arith.constant 0 : i32
    %c0_i32_0 = arith.constant 0 : i32
    %c0_i32_1 = arith.constant 0 : i32
    return %arg0, %c0_i32, %c0_i32_0 : i32, i32, i32
  }
  func.func @transform_1(%arg0: i32) -> (i32, i32, i32) {
    %c0_i32 = arith.constant 0 : i32
    %c0_i32_0 = arith.constant 0 : i32
    %c0_i32_1 = arith.constant 0 : i32
    return %arg0, %c0_i32, %c0_i32_0 : i32, i32, i32
  }
  func.func @transform_2(%arg0: i32) -> (i32, i32) {
    %c0_i32 = arith.constant 0 : i32
    %c0_i32_0 = arith.constant 0 : i32
    %c0_i32_1 = arith.constant 0 : i32
    return %c0_i32, %c0_i32_0 : i32, i32
  }
  func.func @transform_3(%arg0: i32) -> (i32, i32) {
    %c0_i32 = arith.constant 0 : i32
    %c0_i32_0 = arith.constant 0 : i32
    %c0_i32_1 = arith.constant 0 : i32
    return %c0_i32, %c0_i32_0 : i32, i32
  }
  func.func @transform_4(%arg0: i32) -> (i32, i32, i32) {
    %c0_i32 = arith.constant 0 : i32
    %c0_i32_0 = arith.constant 0 : i32
    %c0_i32_1 = arith.constant 0 : i32
    %c0_i32_2 = arith.constant 0 : i32
    return %c0_i32, %c0_i32_0, %c0_i32_1 : i32, i32, i32
  }
  func.func @transform_5(%arg0: i32) -> (i32, i32, i32) {
    %c0_i32 = arith.constant 0 : i32
    %c0_i32_0 = arith.constant 0 : i32
    %c0_i32_1 = arith.constant 0 : i32
    %c0_i32_2 = arith.constant 0 : i32
    return %c0_i32, %c0_i32_0, %c0_i32_1 : i32, i32, i32
  }
  func.func @transform_6(%arg0: i32) -> (i32, i32, i32) {
    %c0_i32 = arith.constant 0 : i32
    %c0_i32_0 = arith.constant 0 : i32
    %c0_i32_1 = arith.constant 0 : i32
    %c0_i32_2 = arith.constant 0 : i32
    return %c0_i32, %c0_i32_0, %c0_i32_1 : i32, i32, i32
  }
  func.func @transform_7(%arg0: i32) -> (i32, i32, i32) {
    %c0_i32 = arith.constant 0 : i32
    %c0_i32_0 = arith.constant 0 : i32
    %c0_i32_1 = arith.constant 0 : i32
    %c0_i32_2 = arith.constant 0 : i32
    return %c0_i32, %c0_i32_0, %c0_i32_1 : i32, i32, i32
  }
  func.func @transform_8(%arg0: i32) -> (i32, i32) {
    %c0_i32 = arith.constant 0 : i32
    %c0_i32_0 = arith.constant 0 : i32
    %c0_i32_1 = arith.constant 0 : i32
    return %c0_i32, %c0_i32_0 : i32, i32
  }
  func.func @transform_9(%arg0: i32) -> (i32, i32) {
    %c0_i32 = arith.constant 0 : i32
    %c0_i32_0 = arith.constant 0 : i32
    %c0_i32_1 = arith.constant 0 : i32
    return %c0_i32, %c0_i32_0 : i32, i32
  }
  func.func @transform_10(%arg0: i32) -> (i32, i32) {
    %c0_i32 = arith.constant 0 : i32
    %c0_i32_0 = arith.constant 0 : i32
    %c0_i32_1 = arith.constant 0 : i32
    return %c0_i32, %c0_i32_0 : i32, i32
  }
  func.func @transform_11(%arg0: i32) -> (i32, i32) {
    %c0_i32 = arith.constant 0 : i32
    %c0_i32_0 = arith.constant 0 : i32
    %c0_i32_1 = arith.constant 0 : i32
    return %c0_i32, %c0_i32_0 : i32, i32
  }
  func.func @transform_12(%arg0: i32) -> (i32, i32, i32) {
    %c0_i32 = arith.constant 0 : i32
    %c0_i32_0 = arith.constant 0 : i32
    %c0_i32_1 = arith.constant 0 : i32
    %c0_i32_2 = arith.constant 0 : i32
    return %c0_i32, %c0_i32_0, %c0_i32_1 : i32, i32, i32
  }
  func.func @transform_13(%arg0: i32) -> (i32, i32) {
    %c0_i32 = arith.constant 0 : i32
    %c0_i32_0 = arith.constant 0 : i32
    %c0_i32_1 = arith.constant 0 : i32
    return %c0_i32, %c0_i32_0 : i32, i32
  }
  func.func @transform_14(%arg0: i32) -> (i32, i32, i32) {
    %c0_i32 = arith.constant 0 : i32
    %c0_i32_0 = arith.constant 0 : i32
    %c0_i32_1 = arith.constant 0 : i32
    %c0_i32_2 = arith.constant 0 : i32
    return %c0_i32, %c0_i32_0, %c0_i32_1 : i32, i32, i32
  }
  func.func @transform_15(%arg0: i32) -> (i32, i32) {
    %c0_i32 = arith.constant 0 : i32
    %c0_i32_0 = arith.constant 0 : i32
    %c0_i32_1 = arith.constant 0 : i32
    return %c0_i32, %c0_i32_0 : i32, i32
  }
  func.func @transform_16(%arg0: i32) -> (i32, i32, i32) {
    %c0_i32 = arith.constant 0 : i32
    %c0_i32_0 = arith.constant 0 : i32
    %c0_i32_1 = arith.constant 0 : i32
    %c0_i32_2 = arith.constant 0 : i32
    return %c0_i32, %c0_i32_0, %c0_i32_1 : i32, i32, i32
  }
  func.func @transform_17(%arg0: i32) -> (i32, i32) {
    %c0_i32 = arith.constant 0 : i32
    %c0_i32_0 = arith.constant 0 : i32
    %c0_i32_1 = arith.constant 0 : i32
    return %c0_i32, %c0_i32_0 : i32, i32
  }
  func.func @transform_18(%arg0: i32) -> (i32, i32, i32) {
    %c0_i32 = arith.constant 0 : i32
    %c0_i32_0 = arith.constant 0 : i32
    %c0_i32_1 = arith.constant 0 : i32
    %c0_i32_2 = arith.constant 0 : i32
    return %c0_i32, %c0_i32_0, %c0_i32_1 : i32, i32, i32
  }
  func.func @transform_19(%arg0: i32) -> (i32, i32) {
    %c0_i32 = arith.constant 0 : i32
    %c0_i32_0 = arith.constant 0 : i32
    %c0_i32_1 = arith.constant 0 : i32
    return %c0_i32, %c0_i32_0 : i32, i32
  }
  func.func @transform_20(%arg0: i32) -> (i32, i32) {
    %c0_i32 = arith.constant 0 : i32
    %c0_i32_0 = arith.constant 0 : i32
    %c0_i32_1 = arith.constant 0 : i32
    return %c0_i32, %c0_i32_0 : i32, i32
  }
  func.func @transform_21(%arg0: i32) -> (i32, i32) {
    %c0_i32 = arith.constant 0 : i32
    %c0_i32_0 = arith.constant 0 : i32
    %c0_i32_1 = arith.constant 0 : i32
    return %c0_i32, %c0_i32_0 : i32, i32
  }
  func.func @transform_22(%arg0: i32) -> (i32, i32) {
    %c0_i32 = arith.constant 0 : i32
    %c0_i32_0 = arith.constant 0 : i32
    %c0_i32_1 = arith.constant 0 : i32
    return %c0_i32, %c0_i32_0 : i32, i32
  }
  func.func @transform_23(%arg0: i32) -> (i32, i32) {
    %c0_i32 = arith.constant 0 : i32
    %c0_i32_0 = arith.constant 0 : i32
    %c0_i32_1 = arith.constant 0 : i32
    return %c0_i32, %c0_i32_0 : i32, i32
  }
  func.func @transform_24(%arg0: i32) -> (i32, i32) {
    %c0_i32 = arith.constant 0 : i32
    %c0_i32_0 = arith.constant 0 : i32
    %c0_i32_1 = arith.constant 0 : i32
    return %c0_i32, %c0_i32_0 : i32, i32
  }
  func.func @transform_25(%arg0: i32) -> (i32, i32, i32) {
    %c0_i32 = arith.constant 0 : i32
    %c0_i32_0 = arith.constant 0 : i32
    %c0_i32_1 = arith.constant 0 : i32
    return %arg0, %c0_i32, %c0_i32_0 : i32, i32, i32
  }
}

</mosaic_0001>

<bundles_post_ra>
// kernel: n2gim_forward.1
= control target key start
LH: loop header
LB: loop body
LE: loop exit
PB: predicated region body
PF: predicated region fallthrough
CT: control target
= control target key end

     0   :  { %s24684_s0 = inlined_call_operand.vmem [shape: f32[2,16,4], index: 0, kind: input, shape index: {}]   ;;  %s24685_s1 = inlined_call_operand.vmem [shape: f32[2,16,16], index: 1, kind: input, shape index: {}]   ;;  %s24686_s2 = inlined_call_operand.vmem [shape: f32[4,32], index: 2, kind: input, shape index: {}]   ;;  %s24687_s3 = inlined_call_operand.vmem [shape: f32[1,32], index: 3, kind: input, shape index: {}]   ;;  %s24688_s4 = inlined_call_operand.vmem [shape: f32[2,32,32], index: 4, kind: input, shape index: {}]   ;;  %s24689_s5 = inlined_call_operand.vmem [shape: f32[2,1,32], index: 5, kind: input, shape index: {}]   ;;  %s24690_s6 = inlined_call_operand.vmem [shape: f32[2,32,32], index: 6, kind: input, shape index: {}]   ;;  %s24691_s7 = inlined_call_operand.vmem [shape: f32[2,1,32], index: 7, kind: input, shape index: {}]   ;;  %s24692_s8 = inlined_call_operand.vmem [shape: f32[32,32], index: 8, kind: input, shape index: {}]   ;;  %s24693_s9 = inlined_call_operand.vmem [shape: f32[96,32], index: 9, kind: input, shape index: {}]   ;;  %s24694_s10 = inlined_call_operand.vmem [shape: f32[32,1024], index: 10, kind: input, shape index: {}]   ;;  %s24695_s11 = inlined_call_operand.vmem [shape: f32[32,1024], index: 11, kind: input, shape index: {}]   ;;  %s24696_s12 = inlined_call_operand.vmem [shape: f32[3,12,1], index: 12, kind: input, shape index: {}]   ;;  %s24697_s13 = inlined_call_operand.vmem [shape: f32[12,1], index: 13, kind: input, shape index: {}]   ;;  %s24698_s14 = inlined_call_operand.vmem [shape: f32[9,12,12], index: 14, kind: input, shape index: {}]   ;;  %s24699_s15 = inlined_call_operand.vmem [shape: f32[12,1], index: 15, kind: input, shape index: {}]   ;;  %s24700_s16 = inlined_call_operand.vmem [shape: f32[9,12,12], index: 16, kind: input, shape index: {}]   ;;  %s24701_s17 = inlined_call_operand.vmem [shape: f32[12,1], index: 17, kind: input, shape index: {}]   ;;  %s24702_s18 = inlined_call_operand.vmem [shape: f32[9,1,12], index: 18, kind: input, shape index: {}]   ;;  %s24703_s19 = inlined_call_operand.<no memory space> [shape: f32[1,1], index: 19, kind: input, shape index: {}]   ;;  %s24704_s20 = inlined_call_operand.vmem [shape: f32[9,1024], index: 20, kind: input, shape index: {}]   ;;  %s24705_s21 = inlined_call_operand.vmem [shape: f32[1024,16], index: 21, kind: input, shape index: {}]   ;;  %s24706_s22 = inlined_call_operand.vmem [shape: f32[1,16], index: 22, kind: input, shape index: {}]   ;;  %s24707_s23 = inlined_call_operand.vmem [shape: f32[16,1], index: 23, kind: input, shape index: {}]   ;;  %s24708_s25 = inlined_call_operand.vmem [shape: f32[2,1,1], index: 25, kind: output, shape index: {}]   ;;  %s24709_s24 = inlined_call_operand.<no memory space> [shape: f32[1,1], index: 24, kind: input, shape index: {}]  }
   0x1   :  { %25040 = sst [smem:[#allocation115_spill]] %s24684_s0  ;;  %v30_v0 = vstv %s24703_s19  ;;  %v32_v1 = vstv %s24709_s24 }
   0x2   :  { %25041 = sst [smem:[#allocation116_spill]] %s24685_s1  ;;  %31 = vst [vmem:[#allocation2] sm:$0x1] %v30_v0  ;;  %33 = vst [vmem:[#allocation3] sm:$0x1] %v32_v1 }
   0x3   :  { %25042 = sst [smem:[#allocation117_spill]] %s24686_s2 }
   0x4   :  { %25043 = sst [smem:[#allocation118_spill]] %s24687_s3 }
   0x5   :  { %25044 = sst [smem:[#allocation119_spill]] %s24688_s4 }
   0x6   :  { %25045 = sst [smem:[#allocation120_spill]] %s24689_s5 }
   0x7   :  { %25046 = sst [smem:[#allocation121_spill]] %s24690_s6 }
   0x8   :  { %25047 = sst [smem:[#allocation122_spill]] %s24691_s7  ;;  %s17904_s7 = smov 0  }
   0x9   :  { %25048 = sst [smem:[#allocation123_spill]] %s24692_s8 }
   0xa   :  { %25049 = sst [smem:[#allocation124_spill]] %s24693_s9 }
   0xb LB: > { %s16572_s3 = sadd.s32 4294967295, %s17755_s7   ;;  %p16576_p0 = scmp.ge.s32.totalorder %s17755_s7, 1  ;;  %s17755_s7 = sphi %s17904_s7, %s39_s7  }
   0xc   : > { %p701_p1 = scmp.lt.s32.totalorder %s17755_s7, 3 }
   0xe   : > { %p702_p2 = pnand %p16576_p0, %p701_p1 }
  0x10   : > { %705 = sbr.rel (%p702_p2) target bundleno = 9274 (0x243a), region = 120 }
  0x15   : > { %s25050_s24 = sld [smem:[#allocation117_spill]]  ;;  %vm804_vm0 = vcmask 1043456   ;;  %p772_p3 = scmp.lt.s32.totalorder %s16572_s3, 1  ;;  %vm797_vm1 = vcmask 31744   ;;  %vm915_vm2 = vcmask 64512   ;;  %vm1142_vm3 = vcmask 130048  }
  0x16   : > { %s25051_s4 = sld [smem:[#allocation115_spill]]  ;;  %vm1239_vm4 = vcmask 261120  }
  0x17   : > { %s25616_s3 = smov (!%p772_p3, %s16572_s3), 1  ;;  %s25052_s0 = sld [smem:[#allocation118_spill]] }
  0x18   : > { %s17180_s1 = sshll.u32 %s25616_s3, 4  ;;  %s25053_s6 = sld [smem:[#allocation116_spill]] }
  0x19   : > { %s25055_s29 = sld [smem:[#allocation120_spill]] }
  0x1a   : > { %s25056_s9 = sld [smem:[#allocation121_spill]] }
  0x1b   : > { %v789_v2 = vld [vmem:[%s25050_s24] sm:$0xf]  ;;  %s25054_s24 = sld [smem:[#allocation119_spill]] }
  0x1c   : > { %17430 = vmatprep.subr.msk.mxu0 %vm804_vm0, %v789_v2  ;;  %s776_s28 = scalar_lea.vmem %s25051_s4, %s17180_s1  ;;  %s25057_s5 = sld [smem:[#allocation122_spill]] }
  0x1d   : > { %17431 = vmatpush3.msk.msra.mxu0 %vm804_vm0, %v789_v2  ;;  %v785_v3 = vld [vmem:[%s776_s28] sm:$0xff]  ;;  %v786_v4 = vld [vmem:[%s776_s28 + $0x8] sm:$0xff] }
  0x1e   : > { %17432 = vmatprep.mubr.msk.f32.mxu0 %vm797_vm1, %v785_v3  ;;  %v16581_v5 = vld [vmem:[%s25052_s0] ss:$0 sm:$0xff]  ;;  %s781_s30 = scalar_lea.vmem %s25053_s6, %s17180_s1 }
  0x1f   : > { %17433 = vmatmul.mubr.msk.f32.vlgmr.msra.gmra.mxu0 %vm797_vm1, %v786_v4  ;;  %v17946_v13 = vld [vmem:[%s781_s30] sm:$0xff]  ;;  %v17949_v15 = vld [vmem:[%s781_s30 + $0x8] sm:$0xff] }
  0x20   : > { %v16595_v38 = vld [vmem:[%s25055_s29] ss:$0 sm:$0xff] }
  0x21   : > { %v1231_v20 = vld [vmem:[%s25054_s24 + $0x18] sm:$0xff]  ;;  %v1230_v21 = vld [vmem:[%s25054_s24 + $0x10] sm:$0xff]  ;;  %v1229_v22 = vld [vmem:[%s25054_s24 + $0x8] sm:$0xff] }
  0x22   : > { %v1228_v23 = vld [vmem:[%s25054_s24] sm:$0xff] }
  0xdf   : > { %v17434_v6 = vpop.f32.mrf.mxu0 }
  0xe0   : > { %v17926_v7 = vadd.f32 %v17434_v6, %v16581_v5 }
  0xe1   : > { %v874_v8 = vpop.f32.mrf.mxu0 }
  0xe2   : > { %v17928_v9 = vadd.f32 %v16581_v5, %v874_v8  ;;  %17443 = vmatprep.subr.mxu0 %v17926_v7  ;;  %v1225_v30 = vmul.f32 2.0, %v17926_v7 }
  0xe3   : > { %17444 = vmatpush3.msra.mxu0 %v17926_v7 }
  0xe4   : > { %883 = vxpose.xlu0.b32.start.end [1/1] (short) (narrow) %v17928_v9, 32  ;;  %17435 = vmatprep.subr.mxu1 %v17928_v9  ;;  %v1224_v29 = vmul.f32 2.0, %v17928_v9 }
  0xe5   : > { %17436 = vmatpush3.msra.mxu1 %v17928_v9  ;;  %17458 = vmatprep.subr.mxu0 %v1231_v20 }
  0xe6   : > { %17451 = vmatprep.subr.mxu1 %v17926_v7 }
  0xf1   : > { %1013 = vxpose.xlu0.b32.start.end [1/1] (short) (narrow) %v17926_v7, 32 }
 0x160   : > { %v899_v10 = vpop.trf.xlu0 }
 0x161   : > { %17437 = vmatprep.mubr.msk.f32.mxu1 %vm915_vm2, %v899_v10 }
 0x164   : > { %v900_v11 = vpop.trf.xlu0 }
 0x165   : > { %17438 = vmatmul.mubr.msk.f32.vlgmr.msra.gmra.mxu1 %vm915_vm2, %v900_v11 }
 0x166   : > { %17452 = vmatpush3.msra.mxu1 %v17926_v7 }
 0x167   : > { %17453 = vmatprep.subr.mxu1 %v17928_v9 }
 0x168   : > { %17454 = vmatpush3.msra.mxu1 %v17928_v9  ;;  %v901_v12 = vpop.trf.xlu0 }
 0x169   : > { %17440 = vmatprep.mubr.msk.f32.mxu1 %vm915_vm2, %v901_v12 }
 0x16c   : > { %v902_v14 = vpop.trf.xlu0 }
 0x16d   : > { %17441 = vmatmul.mubr.msk.f32.gmra.mxu1 %vm915_vm2, %v902_v14 }
 0x16e   : > { %17455 = vmatprep.mubr.msk.f32.mxu1 %vm1142_vm3, %v17946_v13 }
 0x170   : > { %v1029_v16 = vpop.trf.xlu0 }
 0x171   : > { %17456 = vmatmul.mubr.msk.f32.vlgmr.msra.gmra.mxu1 %vm1142_vm3, %v17949_v15  ;;  %17445 = vmatprep.mubr.msk.f32.mxu0 %vm915_vm2, %v1029_v16 }
 0x174   : > { %v1030_v17 = vpop.trf.xlu0 }
 0x175   : > { %17446 = vmatmul.mubr.msk.f32.vlgmr.msra.gmra.mxu0 %vm915_vm2, %v1030_v17 }
 0x176   : > { %17459 = vmatpush3.msra.mxu0 %v1231_v20 }
 0x177   : > { %17460 = vmatprep.subr.mxu0 %v1230_v21 }
 0x178   : > { %v1031_v18 = vpop.trf.xlu0  ;;  %17461 = vmatpush3.msra.mxu0 %v1230_v21 }
 0x179   : > { %17448 = vmatprep.mubr.msk.f32.mxu0 %vm915_vm2, %v1031_v18  ;;  %17462 = vmatprep.subr.mxu0 %v1229_v22 }
 0x17a   : > { %17463 = vmatpush3.msra.mxu0 %v1229_v22  ;;  %v1398_v22 = vld [vmem:[%s25056_s9 + $0x18] sm:$0xff] }
 0x17b   : > { %17464 = vmatprep.subr.mxu0 %v1228_v23  ;;  %17469 = vmatprep.subr.mxu1 %v1398_v22 }
 0x17c   : > { %v1032_v19 = vpop.trf.xlu0  ;;  %17465 = vmatpush3.msra.mxu0 %v1228_v23  ;;  %17470 = vmatpush3.msra.mxu1 %v1398_v22 }
 0x17d   : > { %17449 = vmatmul.mubr.msk.f32.gmra.mxu0 %vm915_vm2, %v1032_v19 }
 0x225   : > { %v17971_v24 = vpop.f32.mrf.mxu1 }
 0x227   : > { %v17973_v25 = vpop.f32.mrf.mxu1 }
 0x22d   : > { %v17975_v26 = vpop.f32.mrf.mxu1 }
 0x22f   : > { %v17977_v27 = vpop.f32.mrf.mxu1 }
 0x231   : > { %v17457_v28 = vpop.f32.mrf.mxu1 }
 0x232   : > { %v1227_v33 = vadd.f32 %v17457_v28, %v1225_v30  ;;  %v1397_v28 = vld [vmem:[%s25056_s9 + $0x10] sm:$0xff] }
 0x233   : > { %v1215_v31 = vpop.f32.mrf.mxu1  ;;  %17471 = vmatprep.subr.mxu1 %v1397_v28 }
 0x234   : > { %v1226_v32 = vadd.f32 %v1224_v29, %v1215_v31  ;;  %17472 = vmatpush3.msra.mxu1 %v1397_v28  ;;  %v1396_v29 = vld [vmem:[%s25056_s9 + $0x8] sm:$0xff]  ;;  %v1395_v31 = vld [vmem:[%s25056_s9] sm:$0xff] }
 0x235   : > { %v17983_v34 = vpop.f32.mrf.mxu0  ;;  %17473 = vmatprep.subr.mxu1 %v1396_v29 }
 0x236   : > { %17466 = vmatprep.mubr.msk.f32.mxu0 %vm1239_vm4, %v1226_v32  ;;  %17474 = vmatpush3.msra.mxu1 %v1396_v29 }
 0x237   : > { %17467 = vmatmul.mubr.msk.f32.vlgmr.msra.gmra.mxu0 %vm1239_vm4, %v1227_v33  ;;  %v17985_v35 = vpop.f32.mrf.mxu0  ;;  %17475 = vmatprep.subr.mxu1 %v1395_v31 }
 0x238   : > { %17476 = vmatpush3.msra.mxu1 %v1395_v31 }
 0x23d   : > { %v17987_v36 = vpop.f32.mrf.mxu0 }
 0x23f   : > { %v17989_v37 = vpop.f32.mrf.mxu0 }
 0x2f7   : > { %v17468_v39 = vpop.f32.mrf.mxu0 }
 0x2f8   : > { %v1318_v40 = vadd.f32 %v17468_v39, %v16595_v38 }
 0x2f9   : > { %v1312_v41 = vpop.f32.mrf.mxu0 }
 0x2fa   : > { %v1313_v42 = vadd.f32 %v16595_v38, %v1312_v41  ;;  %v1356_v55 = vsel %vm1239_vm4, %v1318_v40, 0.0 }
 0x2fc   : > { %v1321_v43 = vsel %vm1239_vm4, %v1313_v42, 0.0 }
 0x2fd   : > { %1322 = vadd.xlane.f32.xlu1 %v1321_v43 }
 0x386   : > { %v1323_v44 = vpop.xlane.xlu1 %1322 }
 0x387   : > { %v1324_v45 = vrot.slane %v1323_v44, 4 }
 0x389   : > { %v1325_v46 = vadd.f32 %v1324_v45, %v1323_v44  ;;  %v16598_v45 = vld [vmem:[%s25057_s5] ss:$0 sm:$0xff] }
 0x38b   : > { %v1326_v47 = vrot.slane %v1325_v46, 2 }
 0x38d   : > { %v1327_v48 = vadd.f32 %v1326_v47, %v1325_v46 }
 0x38f   : > { %v1328_v49 = vrot.slane %v1327_v48, 1 }
 0x391   : > { %v1329_v50 = vadd.f32 %v1328_v49, %v1327_v48 }
 0x393   : > { %17616 = vpush %v1329_v50 }
 0x3c4   : > { %s17617_s2 = spop %17616 }
 0x3c5   : > { %s1333_s6 = smul.f32 0.00390625, %s17617_s2 }
 0x3c7   : > { %v1334_v51 = vstv %s1333_s6 }
 0x3c8   : > { %v1335_v52 = vsub.f32 %v1313_v42, %v1334_v51 }
 0x3ca   : > { %v1336_v53 = vmul.f32 %v1335_v52, %v1335_v52 }
 0x3cc   : > { %v1337_v54 = vsel %vm1239_vm4, %v1336_v53, 0.0 }
 0x3cd   : > { %1338 = vadd.xlane.f32.xlu1 %v1337_v54 }
 0x3d1   : > { %1357 = vadd.xlane.f32.xlu1 %v1356_v55 }
 0x456   : > { %v1339_v56 = vpop.xlane.xlu1 %1338 }
 0x457   : > { %v1340_v57 = vrot.slane %v1339_v56, 4 }
 0x459   : > { %v1341_v58 = vadd.f32 %v1340_v57, %v1339_v56 }
 0x45a   : > { %v1358_v63 = vpop.xlane.xlu1 %1357 }
 0x45b   : > { %v1342_v59 = vrot.slane %v1341_v58, 2  ;;  %v1359_v0 = vrot.slane %v1358_v63, 4 }
 0x45d   : > { %v1343_v60 = vadd.f32 %v1342_v59, %v1341_v58  ;;  %v1360_v1 = vadd.f32 %v1359_v0, %v1358_v63 }
 0x45f   : > { %v1344_v61 = vrot.slane %v1343_v60, 1  ;;  %v1361_v3 = vrot.slane %v1360_v1, 2 }
 0x461   : > { %v1345_v62 = vadd.f32 %v1344_v61, %v1343_v60  ;;  %v1362_v4 = vadd.f32 %v1361_v3, %v1360_v1 }
 0x463   : > { %17618 = vpush %v1345_v62  ;;  %v1363_v5 = vrot.slane %v1362_v4, 1 }
 0x465   : > { %v1364_v8 = vadd.f32 %v1363_v5, %v1362_v4 }
 0x494   : > { %s17619_s30 = spop %17618 }
 0x495   : > { %s1349_s19 = smul.f32 0.00390625, %s17619_s30 }
 0x497   : > { %s1350_s26 = sadd.f32 1e-05, %s1349_s19 }
 0x499   : > { %v1351_v2 = vstv %s1350_s26 }
 0x49a   : > { %17685 = vrsqrt.f32 %v1351_v2 }
 0x4a7   : > { %v17686_v6 = vpop.eup %17685 }
 0x4a8   : > { %17620 = vpush %v17686_v6 }
 0x4a9   : > { %17622 = vpush %v1364_v8 }
 0x4d9   : > { %s17621_s1 = spop %17620 }
 0x4da   : > { %v1354_v10 = vstv %s17621_s1  ;;  %s17623_s8 = spop %17622 }
 0x4db   : > { %v1355_v11 = vmul.f32 %v1354_v10, %v1335_v52  ;;  %s1368_s27 = smul.f32 0.00390625, %s17623_s8 }
 0x4dd   : > { %v1391_v12 = vmax.f32 %v1355_v11, 0.0  ;;  %v1369_v14 = vstv %s1368_s27 }
 0x4de   : > { %v1370_v16 = vsub.f32 %v1318_v40, %v1369_v14 }
 0x4df   : > { %v1393_v17 = vadd.f32 %v1391_v12, %v17928_v9 }
 0x4e0   : > { %v1371_v18 = vmul.f32 %v1370_v16, %v1370_v16 }
 0x4e1   : > { %17477 = vmatprep.mubr.msk.f32.mxu1 %vm1239_vm4, %v1393_v17 }
 0x4e2   : > { %v1372_v19 = vsel %vm1239_vm4, %v1371_v18, 0.0 }
 0x4e3   : > { %1373 = vadd.xlane.f32.xlu1 %v1372_v19 }
 0x56c   : > { %v1374_v20 = vpop.xlane.xlu1 %1373 }
 0x56d   : > { %v1375_v21 = vrot.slane %v1374_v20, 4 }
 0x56f   : > { %v1376_v23 = vadd.f32 %v1375_v21, %v1374_v20 }
 0x571   : > { %v1377_v9 = vrot.slane %v1376_v23, 2 }
 0x573   : > { %v1378_v30 = vadd.f32 %v1377_v9, %v1376_v23 }
 0x575   : > { %v1379_v32 = vrot.slane %v1378_v30, 1 }
 0x577   : > { %v1380_v33 = vadd.f32 %v1379_v32, %v1378_v30 }
 0x579   : > { %17624 = vpush %v1380_v33 }
 0x5aa   : > { %s17625_s26 = spop %17624 }
 0x5ab   : > { %s1384_s1 = smul.f32 0.00390625, %s17625_s26 }
 0x5ad   : > { %s1385_s8 = sadd.f32 1e-05, %s1384_s1 }
 0x5af   : > { %v1386_v38 = vstv %s1385_s8 }
 0x5b0   : > { %17687 = vrsqrt.f32 %v1386_v38 }
 0x5bd   : > { %v17688_v39 = vpop.eup %17687 }
 0x5be   : > { %17626 = vpush %v17688_v39 }
 0x5ef   : > { %s17627_s27 = spop %17626 }
 0x5f0   : > { %v1389_v40 = vstv %s17627_s27 }
 0x5f1   : > { %v1390_v41 = vmul.f32 %v1389_v40, %v1370_v16 }
 0x5f3   : > { %v1392_v42 = vmax.f32 %v1390_v41, 0.0 }
 0x5f5   : > { %v1394_v43 = vadd.f32 %v1392_v42, %v17926_v7 }
 0x5f7   : > { %17478 = vmatmul.mubr.msk.f32.vlgmr.msra.gmra.mxu1 %vm1239_vm4, %v1394_v43 }
 0x6b7   : > { %v17479_v44 = vpop.f32.mrf.mxu1 }
 0x6b8   : > { %v1484_v48 = vadd.f32 %v17479_v44, %v16598_v45 }
 0x6b9   : > { %v1478_v46 = vpop.f32.mrf.mxu1 }
 0x6ba   : > { %v1479_v47 = vadd.f32 %v16598_v45, %v1478_v46  ;;  %v1522_v50 = vsel %vm1239_vm4, %v1484_v48, 0.0 }
 0x6bc   : > { %v1487_v49 = vsel %vm1239_vm4, %v1479_v47, 0.0 }
 0x6bd   : > { %1488 = vadd.xlane.f32.xlu1 %v1487_v49  ;;  %v16613_v49 = vld [vmem:[%s25054_s24 + $0x30] sm:$0xff] }
 0x6c1   : > { %1523 = vadd.xlane.f32.xlu1 %v1522_v50 }
 0x746   : > { %v1489_v51 = vpop.xlane.xlu1 %1488 }
 0x747   : > { %v1490_v52 = vrot.slane %v1489_v51, 4 }
 0x749   : > { %v1491_v53 = vadd.f32 %v1490_v52, %v1489_v51  ;;  %v16611_v51 = vld [vmem:[%s25054_s24 + $0x20] sm:$0xff] }
 0x74a   : > { %v1524_v4 = vpop.xlane.xlu1 %1523 }
 0x74b   : > { %v1492_v7 = vrot.slane %v1491_v53, 2  ;;  %v1525_v5 = vrot.slane %v1524_v4, 4 }
 0x74d   : > { %v1493_v54 = vadd.f32 %v1492_v7, %v1491_v53  ;;  %v1526_v6 = vadd.f32 %v1525_v5, %v1524_v4 }
 0x74f   : > { %v1494_v55 = vrot.slane %v1493_v54, 1  ;;  %v1527_v10 = vrot.slane %v1526_v6, 2 }
 0x751   : > { %v1495_v56 = vadd.f32 %v1494_v55, %v1493_v54  ;;  %v1528_v11 = vadd.f32 %v1527_v10, %v1526_v6 }
 0x753   : > { %17628 = vpush %v1495_v56  ;;  %v1529_v12 = vrot.slane %v1528_v11, 1 }
 0x755   : > { %v1530_v16 = vadd.f32 %v1529_v12, %v1528_v11 }
 0x784   : > { %s17629_s0 = spop %17628 }
 0x785   : > { %s1499_s2 = smul.f32 0.00390625, %s17629_s0 }
 0x787   : > { %v1500_v57 = vstv %s1499_s2 }
 0x788   : > { %v1501_v58 = vsub.f32 %v1479_v47, %v1500_v57 }
 0x78a   : > { %v1502_v59 = vmul.f32 %v1501_v58, %v1501_v58 }
 0x78c   : > { %v1503_v60 = vsel %vm1239_vm4, %v1502_v59, 0.0 }
 0x78d   : > { %1504 = vadd.xlane.f32.xlu0 %v1503_v60 }
 0x816   : > { %v1505_v61 = vpop.xlane.xlu0 %1504 }
 0x817   : > { %v1506_v62 = vrot.slane %v1505_v61, 4 }
 0x819   : > { %v1507_v63 = vadd.f32 %v1506_v62, %v1505_v61 }
 0x81b   : > { %v1508_v0 = vrot.slane %v1507_v63, 2 }
 0x81d   : > { %v1509_v1 = vadd.f32 %v1508_v0, %v1507_v63 }
 0x81f   : > { %v1510_v2 = vrot.slane %v1509_v1, 1 }
 0x821   : > { %v1511_v3 = vadd.f32 %v1510_v2, %v1509_v1 }
 0x823   : > { %17630 = vpush %v1511_v3  ;;  %v16616_v3 = vld [vmem:[%s25055_s29 + $0x1] ss:$0 sm:$0xff] }
 0x854   : > { %s17631_s6 = spop %17630 }
 0x855   : > { %s1515_s30 = smul.f32 0.00390625, %s17631_s6 }
 0x857   : > { %s1516_s19 = sadd.f32 1e-05, %s1515_s30 }
 0x859   : > { %v1517_v8 = vstv %s1516_s19 }
 0x85a   : > { %17689 = vrsqrt.f32 %v1517_v8 }
 0x867   : > { %v17690_v14 = vpop.eup %17689 }
 0x868   : > { %17632 = vpush %v17690_v14 }
 0x869   : > { %17634 = vpush %v1530_v16 }
 0x899   : > { %s17633_s26 = spop %17632 }
 0x89a   : > { %v1520_v17 = vstv %s17633_s26  ;;  %s17635_s1 = spop %17634 }
 0x89b   : > { %v1521_v18 = vmul.f32 %v1520_v17, %v1501_v58  ;;  %s1534_s8 = smul.f32 0.00390625, %s17635_s1 }
 0x89d   : > { %v18020_v19 = vmax.f32 %v1521_v18, 0.0  ;;  %v1535_v20 = vstv %s1534_s8 }
 0x89e   : > { %v1536_v21 = vsub.f32 %v1484_v48, %v1535_v20 }
 0x89f   : > { %17480 = vmatprep.subr.mxu0 %v18020_v19  ;;  %v1892_v57 = vmul.f32 2.0, %v18020_v19 }
 0x8a0   : > { %17481 = vmatpush3.msra.mxu0 %v18020_v19  ;;  %v1537_v22 = vmul.f32 %v1536_v21, %v1536_v21 }
 0x8a2   : > { %v1538_v23 = vsel %vm1239_vm4, %v1537_v22, 0.0 }
 0x8a3   : > { %1539 = vadd.xlane.f32.xlu1 %v1538_v23 }
 0x8d6   : > { %1559 = vxpose.xlu1.b32.start.end [1/1] (short) (narrow) %v18020_v19, 32 }
 0x92c   : > { %v1540_v28 = vpop.xlane.xlu1 %1539 }
 0x92d   : > { %v1541_v9 = vrot.slane %v1540_v28, 4 }
 0x92f   : > { %v1542_v29 = vadd.f32 %v1541_v9, %v1540_v28 }
 0x931   : > { %v1543_v30 = vrot.slane %v1542_v29, 2 }
 0x933   : > { %v1544_v31 = vadd.f32 %v1543_v30, %v1542_v29 }
 0x935   : > { %v1545_v32 = vrot.slane %v1544_v31, 1 }
 0x937   : > { %v1546_v33 = vadd.f32 %v1545_v32, %v1544_v31 }
 0x939   : > { %17636 = vpush %v1546_v33 }
 0x952   : > { %v1575_v38 = vpop.trf.xlu1 }
 0x953   : > { %17482 = vmatprep.mubr.msk.f32.mxu0 %vm915_vm2, %v1575_v38 }
 0x956   : > { %v1576_v39 = vpop.trf.xlu1 }
 0x957   : > { %17483 = vmatmul.mubr.msk.f32.vlgmr.msra.gmra.mxu0 %vm915_vm2, %v1576_v39 }
 0x95a   : > { %v1577_v40 = vpop.trf.xlu1 }
 0x95b   : > { %17485 = vmatprep.mubr.msk.f32.mxu0 %vm915_vm2, %v1577_v40 }
 0x95e   : > { %v1578_v41 = vpop.trf.xlu1 }
 0x95f   : > { %17486 = vmatmul.mubr.msk.f32.gmra.mxu0 %vm915_vm2, %v1578_v41 }
 0x960   : > { %17500 = vmatprep.mubr.msk.f32.mxu0 %vm1142_vm3, %v17946_v13  ;;  %v16614_v13 = vld [vmem:[%s25054_s24 + $0x38] sm:$0xff] }
 0x96a   : > { %s17637_s27 = spop %17636 }
 0x96b   : > { %s1550_s4 = smul.f32 0.00390625, %s17637_s27 }
 0x96d   : > { %s1551_s28 = sadd.f32 1e-05, %s1550_s4 }
 0x96f   : > { %v1552_v42 = vstv %s1551_s28  ;;  %s25058_s28 = sld [smem:[#allocation123_spill]] }
 0x970   : > { %17691 = vrsqrt.f32 %v1552_v42 }
 0x97d   : > { %v17692_v43 = vpop.eup %17691 }
 0x97e   : > { %17638 = vpush %v17692_v43 }
 0x9af   : > { %s17639_s0 = spop %17638 }
 0x9b0   : > { %v1555_v44 = vstv %s17639_s0 }
 0x9b1   : > { %v1556_v45 = vmul.f32 %v1555_v44, %v1536_v21 }
 0x9b3   : > { %v18032_v46 = vmax.f32 %v1556_v45, 0.0 }
 0x9b5   : > { %1688 = vxpose.xlu0.b32.start.end [1/1] (short) (narrow) %v18032_v46, 32  ;;  %17488 = vmatprep.subr.mxu1 %v18032_v46  ;;  %v1893_v58 = vmul.f32 2.0, %v18032_v46 }
 0x9b6   : > { %17496 = vmatprep.subr.mxu0 %v18032_v46  ;;  %17489 = vmatpush3.msra.mxu1 %v18032_v46 }
 0x9b7   : > { %17497 = vmatpush3.msra.mxu0 %v18032_v46  ;;  %17503 = vmatprep.subr.mxu1 %v16614_v13 }
 0x9b8   : > { %17498 = vmatprep.subr.mxu0 %v18020_v19 }
 0x9b9   : > { %17499 = vmatpush3.msra.mxu0 %v18020_v19 }
 0x9ba   : > { %17501 = vmatmul.mubr.msk.f32.vlgmr.msra.gmra.mxu0 %vm1142_vm3, %v17949_v15  ;;  %v16612_v15 = vld [vmem:[%s25054_s24 + $0x28] sm:$0xff] }
 0xa17   : > { %v18059_v53 = vpop.f32.mrf.mxu0 }
 0xa19   : > { %v18061_v7 = vpop.f32.mrf.mxu0 }
 0xa1f   : > { %v18063_v54 = vpop.f32.mrf.mxu0 }
 0xa21   : > { %v18065_v55 = vpop.f32.mrf.mxu0 }
 0xa31   : > { %v1704_v47 = vpop.trf.xlu0 }
 0xa32   : > { %17490 = vmatprep.mubr.msk.f32.mxu1 %vm915_vm2, %v1704_v47 }
 0xa35   : > { %v1705_v48 = vpop.trf.xlu0 }
 0xa36   : > { %17491 = vmatmul.mubr.msk.f32.vlgmr.msra.gmra.mxu1 %vm915_vm2, %v1705_v48 }
 0xa37   : > { %17504 = vmatpush3.msra.mxu1 %v16614_v13 }
 0xa38   : > { %17505 = vmatprep.subr.mxu1 %v16613_v49 }
 0xa39   : > { %v1706_v50 = vpop.trf.xlu0  ;;  %17506 = vmatpush3.msra.mxu1 %v16613_v49 }
 0xa3a   : > { %17493 = vmatprep.mubr.msk.f32.mxu1 %vm915_vm2, %v1706_v50  ;;  %17507 = vmatprep.subr.mxu1 %v16612_v15 }
 0xa3b   : > { %17508 = vmatpush3.msra.mxu1 %v16612_v15 }
 0xa3c   : > { %17509 = vmatprep.subr.mxu1 %v16611_v51 }
 0xa3d   : > { %v1707_v52 = vpop.trf.xlu0  ;;  %17510 = vmatpush3.msra.mxu1 %v16611_v51 }
 0xa3e   : > { %17494 = vmatmul.mubr.msk.f32.gmra.mxu1 %vm915_vm2, %v1707_v52 }
 0xa7a   : > { %v17502_v56 = vpop.f32.mrf.mxu0 }
 0xa7b   : > { %v1895_v61 = vadd.f32 %v17502_v56, %v1893_v58 }
 0xa7c   : > { %v1883_v59 = vpop.f32.mrf.mxu0 }
 0xa7d   : > { %v1894_v60 = vadd.f32 %v1892_v57, %v1883_v59 }
 0xa7f   : > { %17511 = vmatprep.mubr.msk.f32.mxu1 %vm1239_vm4, %v1894_v60  ;;  %v16622_v60 = vld [vmem:[%s25056_s9 + $0x38] sm:$0xff] }
 0xa80   : > { %17512 = vmatmul.mubr.msk.f32.vlgmr.msra.gmra.mxu1 %vm1239_vm4, %v1895_v61  ;;  %17514 = vmatprep.subr.mxu0 %v16622_v60 }
 0xa81   : > { %17515 = vmatpush3.msra.mxu0 %v16622_v60 }
 0xaf6   : > { %v18071_v62 = vpop.f32.mrf.mxu1 }
 0xaf8   : > { %v18073_v63 = vpop.f32.mrf.mxu1 }
 0xafe   : > { %v18075_v0 = vpop.f32.mrf.mxu1 }
 0xb00   : > { %v18077_v1 = vpop.f32.mrf.mxu1 }
 0xb40   : > { %v17513_v2 = vpop.f32.mrf.mxu1 }
 0xb41   : > { %v1987_v6 = vadd.f32 %v17513_v2, %v16616_v3  ;;  %v16621_v2 = vld [vmem:[%s25056_s9 + $0x30] sm:$0xff] }
 0xb42   : > { %v1981_v4 = vpop.f32.mrf.mxu1  ;;  %17516 = vmatprep.subr.mxu0 %v16621_v2 }
 0xb43   : > { %v1982_v5 = vadd.f32 %v16616_v3, %v1981_v4  ;;  %v2025_v10 = vsel %vm1239_vm4, %v1987_v6, 0.0  ;;  %17517 = vmatpush3.msra.mxu0 %v16621_v2  ;;  %v16620_v3 = vld [vmem:[%s25056_s9 + $0x28] sm:$0xff] }
 0xb44   : > { %17518 = vmatprep.subr.mxu0 %v16620_v3 }
 0xb45   : > { %v1990_v8 = vsel %vm1239_vm4, %v1982_v5, 0.0  ;;  %17519 = vmatpush3.msra.mxu0 %v16620_v3 }
 0xb46   : > { %1991 = vadd.xlane.f32.xlu1 %v1990_v8 }
 0xb4a   : > { %2026 = vadd.xlane.f32.xlu1 %v2025_v10 }
 0xbcf   : > { %v1992_v11 = vpop.xlane.xlu1 %1991 }
 0xbd0   : > { %v1993_v12 = vrot.slane %v1992_v11, 4 }
 0xbd2   : > { %v1994_v14 = vadd.f32 %v1993_v12, %v1992_v11 }
 0xbd3   : > { %v2027_v39 = vpop.xlane.xlu1 %2026 }
 0xbd4   : > { %v1995_v16 = vrot.slane %v1994_v14, 2  ;;  %v2028_v40 = vrot.slane %v2027_v39, 4 }
 0xbd6   : > { %v1996_v17 = vadd.f32 %v1995_v16, %v1994_v14  ;;  %v2029_v41 = vadd.f32 %v2028_v40, %v2027_v39 }
 0xbd8   : > { %v1997_v18 = vrot.slane %v1996_v17, 1  ;;  %v2030_v43 = vrot.slane %v2029_v41, 2 }
 0xbda   : > { %v1998_v20 = vadd.f32 %v1997_v18, %v1996_v17  ;;  %v2031_v44 = vadd.f32 %v2030_v43, %v2029_v41  ;;  %v16624_v18 = vld [vmem:[%s25057_s5 + $0x1] ss:$0 sm:$0xff]  ;;  %s24735_s5 = smov 127  }
 0xbdc   : > { %17640 = vpush %v1998_v20  ;;  %v2032_v45 = vrot.slane %v2031_v44, 1 }
 0xbde   : > { %v2033_v47 = vadd.f32 %v2032_v45, %v2031_v44 }
 0xc0d   : > { %s17641_s0 = spop %17640 }
 0xc0e   : > { %s2002_s2 = smul.f32 0.00390625, %s17641_s0 }
 0xc10   : > { %v2003_v21 = vstv %s2002_s2 }
 0xc11   : > { %v2004_v22 = vsub.f32 %v1982_v5, %v2003_v21  ;;  %v16619_v5 = vld [vmem:[%s25056_s9 + $0x20] sm:$0xff] }
 0xc12   : > { %17520 = vmatprep.subr.mxu0 %v16619_v5 }
 0xc13   : > { %v2005_v23 = vmul.f32 %v2004_v22, %v2004_v22  ;;  %17521 = vmatpush3.msra.mxu0 %v16619_v5 }
 0xc15   : > { %v2006_v28 = vsel %vm1239_vm4, %v2005_v23, 0.0 }
 0xc16   : > { %2007 = vadd.xlane.f32.xlu0 %v2006_v28 }
 0xc9f   : > { %v2008_v9 = vpop.xlane.xlu0 %2007 }
 0xca0   : > { %v2009_v29 = vrot.slane %v2008_v9, 4 }
 0xca2   : > { %v2010_v30 = vadd.f32 %v2009_v29, %v2008_v9 }
 0xca4   : > { %v2011_v31 = vrot.slane %v2010_v30, 2 }
 0xca6   : > { %v2012_v32 = vadd.f32 %v2011_v31, %v2010_v30 }
 0xca8   : > { %v2013_v33 = vrot.slane %v2012_v32, 1 }
 0xcaa   : > { %v2014_v38 = vadd.f32 %v2013_v33, %v2012_v32 }
 0xcac   : > { %17642 = vpush %v2014_v38 }
 0xcdd   : > { %s17643_s6 = spop %17642 }
 0xcde   : > { %s2018_s30 = smul.f32 0.00390625, %s17643_s6 }
 0xce0   : > { %s2019_s19 = sadd.f32 1e-05, %s2018_s30 }
 0xce2   : > { %v2020_v42 = vstv %s2019_s19 }
 0xce3   : > { %17693 = vrsqrt.f32 %v2020_v42 }
 0xcf0   : > { %v17694_v13 = vpop.eup %17693 }
 0xcf1   : > { %17644 = vpush %v17694_v13 }
 0xcf2   : > { %17646 = vpush %v2033_v47 }
 0xd22   : > { %s17645_s26 = spop %17644 }
 0xd23   : > { %v2023_v48 = vstv %s17645_s26  ;;  %s17647_s1 = spop %17646 }
 0xd24   : > { %v2024_v49 = vmul.f32 %v2023_v48, %v2004_v22  ;;  %s2037_s8 = smul.f32 0.00390625, %s17647_s1 }
 0xd26   : > { %v2060_v15 = vmax.f32 %v2024_v49, 0.0  ;;  %v2038_v50 = vstv %s2037_s8 }
 0xd27   : > { %v2039_v51 = vsub.f32 %v1987_v6, %v2038_v50 }
 0xd28   : > { %v2062_v52 = vadd.f32 %v2060_v15, %v18020_v19 }
 0xd29   : > { %v2040_v56 = vmul.f32 %v2039_v51, %v2039_v51 }
 0xd2a   : > { %17522 = vmatprep.mubr.msk.f32.mxu0 %vm1239_vm4, %v2062_v52 }
 0xd2b   : > { %v2041_v57 = vsel %vm1239_vm4, %v2040_v56, 0.0 }
 0xd2c   : > { %2042 = vadd.xlane.f32.xlu1 %v2041_v57 }
 0xdb5   : > { %v2043_v58 = vpop.xlane.xlu1 %2042 }
 0xdb6   : > { %v2044_v59 = vrot.slane %v2043_v58, 4 }
 0xdb8   : > { %v2045_v61 = vadd.f32 %v2044_v59, %v2043_v58 }
 0xdba   : > { %v2046_v19 = vrot.slane %v2045_v61, 2 }
 0xdbc   : > { %v2047_v4 = vadd.f32 %v2046_v19, %v2045_v61 }
 0xdbe   : > { %v2048_v6 = vrot.slane %v2047_v4, 1 }
 0xdc0   : > { %v2049_v8 = vadd.f32 %v2048_v6, %v2047_v4 }
 0xdc2   : > { %17648 = vpush %v2049_v8  ;;  %v2515_v8 = vld [vmem:[%s25058_s28 + $0x18] sm:$0xff] }
 0xdf3   : > { %s17649_s26 = spop %17648 }
 0xdf4   : > { %s2053_s1 = smul.f32 0.00390625, %s17649_s26 }
 0xdf6   : > { %s2054_s8 = sadd.f32 1e-05, %s2053_s1 }
 0xdf8   : > { %v2055_v10 = vstv %s2054_s8 }
 0xdf9   : > { %17695 = vrsqrt.f32 %v2055_v10 }
 0xe06   : > { %v17696_v11 = vpop.eup %17695 }
 0xe07   : > { %17650 = vpush %v17696_v11 }
 0xe38   : > { %s17651_s27 = spop %17650 }
 0xe39   : > { %v2058_v12 = vstv %s17651_s27 }
 0xe3a   : > { %v2059_v14 = vmul.f32 %v2058_v12, %v2039_v51 }
 0xe3c   : > { %v2061_v16 = vmax.f32 %v2059_v14, 0.0 }
 0xe3e   : > { %v2063_v17 = vadd.f32 %v2061_v16, %v18032_v46 }
 0xe40   : > { %17523 = vmatmul.mubr.msk.f32.vlgmr.msra.gmra.mxu0 %vm1239_vm4, %v2063_v17 }
 0xf00   : > { %v17524_v20 = vpop.f32.mrf.mxu0 }
 0xf01   : > { %v2155_v21 = vadd.f32 %v17524_v20, %v16624_v18 }
 0xf02   : > { %v2149_v22 = vpop.f32.mrf.mxu0 }
 0xf03   : > { %v2150_v23 = vadd.f32 %v16624_v18, %v2149_v22  ;;  %v2193_v42 = vsel %vm1239_vm4, %v2155_v21, 0.0  ;;  %v2514_v22 = vld [vmem:[%s25058_s28 + $0x10] sm:$0xff] }
 0xf05   : > { %v2158_v28 = vsel %vm1239_vm4, %v2150_v23, 0.0 }
 0xf06   : > { %2159 = vadd.xlane.f32.xlu1 %v2158_v28 }
 0xf8f   : > { %v2160_v9 = vpop.xlane.xlu1 %2159 }
 0xf90   : > { %v2161_v29 = vrot.slane %v2160_v9, 4 }
 0xf92   : > { %v2162_v30 = vadd.f32 %v2161_v29, %v2160_v9  ;;  %v2513_v9 = vld [vmem:[%s25058_s28 + $0x8] sm:$0xff] }
 0xf94   : > { %v2163_v31 = vrot.slane %v2162_v30, 2 }
 0xf96   : > { %v2164_v32 = vadd.f32 %v2163_v31, %v2162_v30  ;;  %v2512_v31 = vld [vmem:[%s25058_s28] sm:$0xff] }
 0xf98   : > { %v2165_v33 = vrot.slane %v2164_v32, 1 }
 0xf9a   : > { %v2166_v46 = vadd.f32 %v2165_v33, %v2164_v32  ;;  %v2489_v32 = vsub.f32 %v17971_v24, %v17983_v34  ;;  %v2490_v33 = vsub.f32 %v17977_v27, %v17989_v37 }
 0xf9c   : > { %17652 = vpush %v2166_v46  ;;  %v2493_v46 = vand.u32 2147483647, %v2489_v32 }
 0xfcd   : > { %s17653_s0 = spop %17652 }
 0xfce   : > { %s2170_s2 = smul.f32 0.00390625, %s17653_s0  ;;  %s24952_s0 = smov 33  }
 0xfd0   : > { %v2171_v38 = vstv %s2170_s2  ;;  %s24773_s2 = smov 31  }
 0xfd1   : > { %v2172_v39 = vsub.f32 %v2150_v23, %v2171_v38  ;;  %v2488_v23 = vsub.f32 %v17973_v25, %v17985_v35  ;;  %v2491_v38 = vsub.f32 %v17975_v26, %v17987_v36 }
 0xfd3   : > { %v2173_v40 = vmul.f32 %v2172_v39, %v2172_v39  ;;  %v2492_v29 = vand.u32 2147483647, %v2488_v23 }
 0xfd5   : > { %v2174_v41 = vsel %vm1239_vm4, %v2173_v40, 0.0  ;;  %v2496_v40 = vsub.f32 %v18061_v7, %v18073_v63 }
 0xfd6   : > { %2175 = vadd.xlane.f32.xlu1 %v2174_v41  ;;  %v2495_v41 = vand.u32 2147483647, %v2491_v38 }
 0xfda   : > { %2194 = vadd.xlane.f32.xlu1 %v2193_v42  ;;  %v2497_v42 = vsub.f32 %v18059_v53, %v18071_v62 }
0x105f   : > { %v2176_v43 = vpop.xlane.xlu1 %2175 }
0x1060   : > { %v2177_v44 = vrot.slane %v2176_v43, 4 }
0x1062   : > { %v2178_v45 = vadd.f32 %v2177_v44, %v2176_v43  ;;  %v2500_v43 = vand.u32 2147483647, %v2496_v40  ;;  %v2498_v44 = vsub.f32 %v18065_v55, %v18077_v1 }
0x1063   : > { %v2195_v15 = vpop.xlane.xlu1 %2194 }
0x1064   : > { %v2179_v13 = vrot.slane %v2178_v45, 2  ;;  %v2196_v50 = vrot.slane %v2195_v15, 4 }
0x1066   : > { %v2180_v47 = vadd.f32 %v2179_v13, %v2178_v45  ;;  %v2197_v51 = vadd.f32 %v2196_v50, %v2195_v15  ;;  %v2501_v45 = vand.u32 2147483647, %v2497_v42  ;;  %v2499_v13 = vsub.f32 %v18063_v54, %v18075_v0 }
0x1068   : > { %v2181_v48 = vrot.slane %v2180_v47, 1  ;;  %v2198_v56 = vrot.slane %v2197_v51, 2 }
0x106a   : > { %v2182_v49 = vadd.f32 %v2181_v48, %v2180_v47  ;;  %v2199_v57 = vadd.f32 %v2198_v56, %v2197_v51  ;;  %v2502_v47 = vand.u32 2147483647, %v2498_v44 }
0x106c   : > { %17654 = vpush %v2182_v49  ;;  %v2200_v58 = vrot.slane %v2199_v57, 1  ;;  %v2503_v49 = vand.u32 2147483647, %v2499_v13 }
0x106e   : > { %v2201_v60 = vadd.f32 %v2200_v58, %v2199_v57 }
0x109d   : > { %s17655_s6 = spop %17654 }
0x109e   : > { %s2186_s30 = smul.f32 0.00390625, %s17655_s6  ;;  %s24737_s6 = smov 1  }
0x10a0   : > { %s2187_s19 = sadd.f32 1e-05, %s2186_s30  ;;  %s24771_s30 = smov 97  }
0x10a2   : > { %v2188_v52 = vstv %s2187_s19  ;;  %s24785_s19 = smov 96  }
0x10a3   : > { %17697 = vrsqrt.f32 %v2188_v52 }
0x10b0   : > { %v17698_v59 = vpop.eup %17697 }
0x10b1   : > { %17656 = vpush %v17698_v59 }
0x10b2   : > { %17658 = vpush %v2201_v60  ;;  %v3145_v60 = vld [vmem:[%s24694_s10 + $0xc8] sm:$0xff] }
0x10e2   : > { %s17657_s26 = spop %17656 }
0x10e3   : > { %v2191_v61 = vstv %s17657_s26  ;;  %s17659_s1 = spop %17658  ;;  %s24783_s26 = smov 95  }
0x10e4   : > { %v2192_v2 = vmul.f32 %v2191_v61, %v2172_v39  ;;  %s2205_s8 = smul.f32 0.00390625, %s17659_s1  ;;  %v2494_v39 = vand.u32 2147483647, %v2490_v33  ;;  %v3147_v61 = vld [vmem:[%s24694_s10 + $0xd8] sm:$0xff] }
0x10e6   : > { %v2228_v19 = vmax.f32 %v2192_v2, 0.0  ;;  %v2206_v3 = vstv %s2205_s8  ;;  %v3144_v2 = vld [vmem:[%s24694_s10 + $0xc0] sm:$0xff] }
0x10e7   : > { %v18108_v4 = vsub.f32 %v2155_v21, %v2206_v3  ;;  %v3137_v3 = vld [vmem:[%s24694_s10 + $0x88] sm:$0xff] }
0x10e8   : > { %17525 = vmatprep.subr.mxu1 %v2228_v19 }
0x10e9   : > { %17526 = vmatpush3.msra.mxu1 %v2228_v19  ;;  %v2208_v5 = vmul.f32 %v18108_v4, %v18108_v4 }
0x10ea   : > { %17541 = vmatprep.subr.msk.mxu1 %vm1239_vm4, %v2515_v8 }
0x10eb   : > { %v2209_v6 = vsel %vm1239_vm4, %v2208_v5, 0.0  ;;  %v3136_v5 = vld [vmem:[%s24694_s10 + $0x80] sm:$0xff] }
0x10ec   : > { %2210 = vadd.xlane.f32.xlu1 %v2209_v6  ;;  %v3138_v6 = vld [vmem:[%s24694_s10 + $0x90] sm:$0xff] }
0x111f   : > { %2230 = vxpose.xlu1.b32.start.end [1/1] (short) (narrow) %v2228_v19, 32  ;;  %v3146_v19 = vld [vmem:[%s24694_s10 + $0xd0] sm:$0xff] }
0x1175   : > { %v2211_v10 = vpop.xlane.xlu1 %2210 }
0x1176   : > { %v2212_v11 = vrot.slane %v2211_v10, 4 }
0x1178   : > { %v2213_v12 = vadd.f32 %v2212_v11, %v2211_v10  ;;  %v3131_v10 = vld [vmem:[%s24694_s10 + $0x58] sm:$0xff]  ;;  %v3128_v11 = vld [vmem:[%s24694_s10 + $0x40] sm:$0xff] }
0x117a   : > { %v2214_v14 = vrot.slane %v2213_v12, 2 }
0x117c   : > { %v2215_v16 = vadd.f32 %v2214_v14, %v2213_v12  ;;  %v3130_v12 = vld [vmem:[%s24694_s10 + $0x50] sm:$0xff]  ;;  %v3121_v14 = vld [vmem:[%s24694_s10 + $0x8] sm:$0xff] }
0x117e   : > { %v2216_v17 = vrot.slane %v2215_v16, 1 }
0x1180   : > { %v2217_v18 = vadd.f32 %v2216_v17, %v2215_v16  ;;  %v3123_v16 = vld [vmem:[%s24694_s10 + $0x18] sm:$0xff]  ;;  %v3120_v17 = vld [vmem:[%s24694_s10] sm:$0xff] }
0x1182   : > { %17660 = vpush %v2217_v18  ;;  %v3122_v18 = vld [vmem:[%s24694_s10 + $0x10] sm:$0xff] }
0x119b   : > { %v2246_v20 = vpop.trf.xlu1 }
0x119c   : > { %17527 = vmatprep.mubr.msk.f32.mxu1 %vm915_vm2, %v2246_v20  ;;  %v24717_v20 = vmov 0.0  }
0x119f   : > { %v2247_v21 = vpop.trf.xlu1 }
0x11a0   : > { %17528 = vmatmul.mubr.msk.f32.vlgmr.msra.gmra.mxu1 %vm915_vm2, %v2247_v21  ;;  %v3149_v21 = vld [vmem:[%s24694_s10 + $0xe8] sm:$0xff] }
0x11a1   : > { %17542 = vmatpush3.xpose.msk.msra.mxu1 %vm1239_vm4, %v2515_v8  ;;  %v3129_v8 = vld [vmem:[%s24694_s10 + $0x48] sm:$0xff] }
0x11a2   : > { %17543 = vmatprep.subr.msk.mxu1 %vm1239_vm4, %v2514_v22 }
0x11a3   : > { %v2248_v28 = vpop.trf.xlu1 }
0x11a4   : > { %17530 = vmatprep.mubr.msk.f32.mxu1 %vm915_vm2, %v2248_v28 }
0x11a5   : > { %17544 = vmatpush3.xpose.msk.msra.mxu1 %vm1239_vm4, %v2514_v22  ;;  %v3151_v22 = vld [vmem:[%s24694_s10 + $0xf8] sm:$0xff] }
0x11a6   : > { %17545 = vmatprep.subr.msk.mxu1 %vm1239_vm4, %v2513_v9 }
0x11a7   : > { %v2249_v30 = vpop.trf.xlu1 }
0x11a8   : > { %17531 = vmatmul.mubr.msk.f32.gmra.mxu1 %vm915_vm2, %v2249_v30 }
0x11a9   : > { %17546 = vmatpush3.xpose.msk.msra.mxu1 %vm1239_vm4, %v2513_v9  ;;  %17549 = vmatprep.mubr.msk.f32.mxu1 %vm1239_vm4, %v2492_v29 }
0x11aa   : > { %17547 = vmatprep.subr.msk.mxu1 %vm1239_vm4, %v2512_v31 }
0x11ad   : > { %17548 = vmatpush3.xpose.msk.msra.mxu1 %vm1239_vm4, %v2512_v31 }
0x11b0   : > { %17550 = vmatmul.mubr.msk.f32.vlgmr.msra.gmra.mxu1 %vm1239_vm4, %v2493_v46 }
0x11b1   : > { %17552 = vmatprep.mubr.msk.f32.mxu1 %vm1239_vm4, %v2494_v39 }
0x11b3   : > { %s17661_s1 = spop %17660 }
0x11b4   : > { %s2221_s8 = smul.f32 0.00390625, %s17661_s1  ;;  %17553 = vmatmul.mubr.msk.f32.gmra.mxu1 %vm1239_vm4, %v2495_v41 }
0x11b5   : > { %17555 = vmatprep.mubr.msk.f32.mxu1 %vm1239_vm4, %v2500_v43 }
0x11b6   : > { %s2222_s27 = sadd.f32 1e-05, %s2221_s8 }
0x11b8   : > { %v2223_v48 = vstv %s2222_s27  ;;  %17556 = vmatmul.mubr.msk.f32.gmra.mxu1 %vm1239_vm4, %v2501_v45  ;;  %s25059_s27 = sld [smem:[#allocation124_spill]] }
0x11b9   : > { %17699 = vrsqrt.f32 %v2223_v48  ;;  %17558 = vmatprep.mubr.msk.f32.mxu1 %vm1239_vm4, %v2502_v47 }
0x11bc   : > { %17559 = vmatmul.mubr.msk.f32.gmra.mxu1 %vm1239_vm4, %v2503_v49 }
0x11be   : > { %v2521_v32 = vld [vmem:[%s25059_s27 + $0x28] sm:$0xff]  ;;  %v2520_v38 = vld [vmem:[%s25059_s27 + $0x20] sm:$0xff]  ;;  %v2523_v49 = vld [vmem:[%s25059_s27 + $0x38] sm:$0xff] }
0x11bf   : > { %v2517_v46 = vld [vmem:[%s25059_s27 + $0x8] sm:$0xff]  ;;  %v2516_v40 = vld [vmem:[%s25059_s27] sm:$0xff] }
0x11c0   : > { %v2525_v42 = vld [vmem:[%s25059_s27 + $0x48] sm:$0xff]  ;;  %v2524_v13 = vld [vmem:[%s25059_s27 + $0x40] sm:$0xff] }
0x11c6   : > { %v17700_v15 = vpop.eup %17699 }
0x11c7   : > { %17662 = vpush %v17700_v15 }
0x11f8   : > { %s17663_s4 = spop %17662 }
0x11f9   : > { %v2226_v50 = vstv %s17663_s4  ;;  %s24954_s4 = smov 32  }
0x11fa   : > { %v2227_v51 = vmul.f32 %v2226_v50, %v18108_v4  ;;  %v3139_v4 = vld [vmem:[%s24694_s10 + $0x98] sm:$0xff] }
0x11fc   : > { %v2229_v52 = vmax.f32 %v2227_v51, 0.0  ;;  %v2519_v51 = vld [vmem:[%s25059_s27 + $0x18] sm:$0xff] }
0x11fe   : > { %2359 = vxpose.xlu0.b32.start.end [1/1] (short) (narrow) %v2229_v52, 32  ;;  %17533 = vmatprep.subr.mxu0 %v2229_v52 }
0x11ff   : > { %17534 = vmatpush3.msra.mxu0 %v2229_v52 }
0x1200   : > { %17567 = vmatprep.subr.msk.mxu0 %vm1239_vm4, %v17987_v36 }
0x127a   : > { %v2375_v56 = vpop.trf.xlu0 }
0x127b   : > { %17535 = vmatprep.mubr.msk.f32.mxu0 %vm915_vm2, %v2375_v56 }
0x127e   : > { %v2376_v57 = vpop.trf.xlu0 }
0x127f   : > { %17536 = vmatmul.mubr.msk.f32.vlgmr.msra.gmra.mxu0 %vm915_vm2, %v2376_v57 }
0x1280   : > { %17568 = vmatpush3.xpose.msk.msra.mxu0 %vm1239_vm4, %v17987_v36 }
0x1281   : > { %17569 = vmatprep.subr.msk.mxu0 %vm1239_vm4, %v17989_v37 }
0x1282   : > { %v2377_v58 = vpop.trf.xlu0 }
0x1283   : > { %17538 = vmatprep.mubr.msk.f32.mxu0 %vm915_vm2, %v2377_v58 }
0x1284   : > { %17570 = vmatpush3.xpose.msk.msra.mxu0 %vm1239_vm4, %v17989_v37 }
0x1285   : > { %17571 = vmatprep.subr.msk.mxu0 %vm1239_vm4, %v17983_v34 }
0x1286   : > { %v2378_v59 = vpop.trf.xlu0 }
0x1287   : > { %17539 = vmatmul.mubr.msk.f32.gmra.mxu0 %vm915_vm2, %v2378_v59  ;;  %v2522_v59 = vld [vmem:[%s25059_s27 + $0x30] sm:$0xff] }
0x1288   : > { %17572 = vmatpush3.xpose.msk.msra.mxu0 %vm1239_vm4, %v17983_v34  ;;  %17575 = vmatprep.mubr.msk.f32.mxu0 %vm1239_vm4, %v17973_v25 }
0x1289   : > { %17573 = vmatprep.subr.msk.mxu0 %vm1239_vm4, %v17985_v35 }
0x128c   : > { %17574 = vmatpush3.xpose.msk.msra.mxu0 %vm1239_vm4, %v17985_v35 }
0x128d   : > { %17581 = vmatprep.subr.msk.mxu0 %vm1239_vm4, %v18075_v0 }
0x128f   : > { %17576 = vmatmul.mubr.msk.f32.vlgmr.msra.gmra.mxu0 %vm1239_vm4, %v17971_v24  ;;  %v17529_v24 = vpop.f32.mrf.mxu1 }
0x1290   : > { %17578 = vmatprep.mubr.msk.f32.mxu0 %vm1239_vm4, %v17977_v27  ;;  %17582 = vmatpush3.xpose.msk.msra.mxu0 %vm1239_vm4, %v18075_v0 }
0x1291   : > { %17583 = vmatprep.subr.msk.mxu0 %vm1239_vm4, %v18077_v1 }
0x1293   : > { %17579 = vmatmul.mubr.msk.f32.gmra.mxu0 %vm1239_vm4, %v17975_v26  ;;  %v2340_v26 = vpop.f32.mrf.mxu1 }
0x1294   : > { %17584 = vmatpush3.xpose.msk.msra.mxu0 %vm1239_vm4, %v18077_v1  ;;  %17589 = vmatprep.mubr.msk.f32.mxu0 %vm1239_vm4, %v18061_v7 }
0x1295   : > { %17585 = vmatprep.subr.msk.mxu0 %vm1239_vm4, %v18071_v62  ;;  %v17532_v37 = vpop.f32.mrf.mxu1 }
0x1298   : > { %17586 = vmatpush3.xpose.msk.msra.mxu0 %vm1239_vm4, %v18071_v62 }
0x1299   : > { %17587 = vmatprep.subr.msk.mxu0 %vm1239_vm4, %v18073_v63 }
0x129c   : > { %17588 = vmatpush3.xpose.msk.msra.mxu0 %vm1239_vm4, %v18073_v63 }
0x129d   : > { %3212 = vmatprep.subr.mxu0 %v3145_v60 }
0x129f   : > { %17590 = vmatmul.mubr.msk.f32.vlgmr.msra.gmra.mxu0 %vm1239_vm4, %v18059_v53  ;;  %v2350_v53 = vpop.f32.mrf.mxu1 }
0x12a0   : > { %17592 = vmatprep.mubr.msk.f32.mxu0 %vm1239_vm4, %v18065_v55  ;;  %3213 = vmatpush1.msra.mxu0 %v3144_v2 }
0x12a1   : > { %3214 = vmatprep.subr.mxu0 %v3137_v3  ;;  %v17551_v23 = vpop.f32.mrf.mxu1 }
0x12a2   : > { %3215 = vmatpush1.msra.mxu0 %v3136_v5  ;;  %v2648_v43 = vadd.f32 %v17551_v23, %v2517_v46  ;;  %v3872_v46 = vld [vmem:[%s24696_s12] sm:$0xff] }
0x12a3   : > { %17593 = vmatmul.mubr.msk.f32.gmra.mxu0 %vm1239_vm4, %v18063_v54  ;;  %3216 = vmatprep.subr.mxu0 %v3129_v8  ;;  %v2642_v28 = vpop.f32.mrf.mxu1 }
0x12a4   : > { %3217 = vmatpush1.msra.mxu0 %v3128_v11  ;;  %3252 = vmatprep.mubr.f32.mxu0 %v24717_v20  ;;  %v2643_v47 = vadd.f32 %v2642_v28, %v2516_v40  ;;  %v3873_v11 = vld [vmem:[%s24696_s12 + $0x8] sm:$0xf]  ;;  %v16723_v40 = vld [vmem:[%s24696_s12 + $0x10] sm:$0xff] }
0x12a5   : > { %3218 = vmatprep.subr.mxu0 %v3121_v14  ;;  %v17554_v9 = vpop.f32.mrf.mxu1 }
0x12a6   : > { %3219 = vmatpush1.msra.mxu0 %v3120_v17 }
0x12a7   : > { %3486 = vmatprep.subr.mxu0 %v3149_v21  ;;  %v2652_v29 = vpop.f32.mrf.mxu1 }
0x12a9   : > { %v17557_v30 = vpop.f32.mrf.mxu1 }
0x12aa   : > { %v2668_v39 = vadd.f32 %v17557_v30, %v2521_v32  ;;  %v16726_v30 = vld [vmem:[%s24696_s12 + $0x28] sm:$0xf] }
0x12ab   : > { %v2662_v31 = vpop.f32.mrf.mxu1 }
0x12ac   : > { %v2663_v44 = vadd.f32 %v2662_v31, %v2520_v38  ;;  %v3029_v48 = vmax.f32 %v2648_v43, %v2668_v39  ;;  %v16724_v31 = vld [vmem:[%s24696_s12 + $0x18] sm:$0xf] }
0x12ad   : > { %v17560_v33 = vpop.f32.mrf.mxu1 }
0x12ae   : > { %v3028_v52 = vmax.f32 %v2643_v47, %v2663_v44  ;;  %v2678_v58 = vadd.f32 %v17560_v33, %v2523_v49 }
0x12af   : > { %v2672_v41 = vpop.f32.mrf.mxu1 }
0x133f   : > { %v17537_v25 = vpop.f32.mrf.mxu0 }
0x1340   : > { %v2505_v27 = vsub.f32 %v17529_v24, %v17537_v25 }
0x1341   : > { %v2469_v34 = vpop.f32.mrf.mxu0 }
0x1342   : > { %v2504_v35 = vsub.f32 %v2340_v26, %v2469_v34  ;;  %v2509_v7 = vand.u32 2147483647, %v2505_v27 }
0x1344   : > { %v2508_v36 = vand.u32 2147483647, %v2504_v35  ;;  %v2518_v35 = vld [vmem:[%s25059_s27 + $0x10] sm:$0xff] }
0x1345   : > { %v2653_v3 = vadd.f32 %v2652_v29, %v2518_v35 }
0x1346   : > { %17561 = vmatprep.mubr.msk.f32.mxu1 %vm1239_vm4, %v2508_v36  ;;  %v2527_v36 = vld [vmem:[%s25059_s27 + $0x58] sm:$0xff] }
0x1347   : > { %v17540_v62 = vpop.f32.mrf.mxu0  ;;  %17562 = vmatmul.mubr.msk.f32.gmra.mxu1 %vm1239_vm4, %v2509_v7 }
0x1348   : > { %17595 = vmatprep.subr.msk.mxu1 %vm1239_vm4, %v17540_v62  ;;  %v2507_v55 = vsub.f32 %v17532_v37, %v17540_v62 }
0x1349   : > { %v2479_v63 = vpop.f32.mrf.mxu0  ;;  %17596 = vmatpush3.xpose.msk.msra.mxu1 %vm1239_vm4, %v17540_v62 }
0x134a   : > { %v2506_v54 = vsub.f32 %v2350_v53, %v2479_v63  ;;  %17597 = vmatprep.subr.msk.mxu1 %vm1239_vm4, %v2479_v63  ;;  %v2511_v1 = vand.u32 2147483647, %v2507_v55  ;;  %v2673_v55 = vadd.f32 %v2672_v41, %v2522_v59 }
0x134c   : > { %v2510_v0 = vand.u32 2147483647, %v2506_v54 }
0x134d   : > { %17598 = vmatpush3.xpose.msk.msra.mxu1 %vm1239_vm4, %v2479_v63 }
0x134e   : > { %17564 = vmatprep.mubr.msk.f32.mxu1 %vm1239_vm4, %v2510_v0  ;;  %17599 = vmatprep.subr.msk.mxu1 %vm1239_vm4, %v17537_v25 }
0x134f   : > { %17565 = vmatmul.mubr.msk.f32.gmra.mxu1 %vm1239_vm4, %v2511_v1  ;;  %v2526_v1 = vld [vmem:[%s25059_s27 + $0x50] sm:$0xff] }
0x1350   : > { %17603 = vmatprep.mubr.msk.f32.mxu1 %vm1239_vm4, %v2340_v26 }
0x1351   : > { %17600 = vmatpush3.xpose.msk.msra.mxu1 %vm1239_vm4, %v17537_v25 }
0x1352   : > { %17601 = vmatprep.subr.msk.mxu1 %vm1239_vm4, %v2469_v34 }
0x1355   : > { %17602 = vmatpush3.xpose.msk.msra.mxu1 %vm1239_vm4, %v2469_v34  ;;  %v2658_v34 = vadd.f32 %v17554_v9, %v2519_v51  ;;  %v4199_v51 = vld [vmem:[%s24697_s13 + $0x8] sm:$0xf] }
0x1356   : > { %3349 = vmatprep.subr.mxu1 %v3147_v61 }
0x1357   : > { %v3031_v60 = vmax.f32 %v2658_v34, %v2678_v58 }
0x1358   : > { %17604 = vmatmul.mubr.msk.f32.vlgmr.msra.gmra.mxu1 %vm1239_vm4, %v17529_v24 }
0x1359   : > { %17606 = vmatprep.mubr.msk.f32.mxu1 %vm1239_vm4, %v2350_v53  ;;  %3350 = vmatpush1.msra.mxu1 %v3146_v19  ;;  %v17758_v19 = vmov 0  }
0x135a   : > { %3351 = vmatprep.subr.mxu1 %v3139_v4  ;;  %17683 = vset.pattern.permute.xlu1 %v17758_v19 }
0x135b   : > { %3352 = vmatpush1.msra.mxu1 %v3138_v6  ;;  %17684 = vset.pattern.permute.xlu0 %v17758_v19  ;;  %v3143_v19 = vld [vmem:[%s24694_s10 + $0xb8] sm:$0xff] }
0x135c   : > { %17607 = vmatmul.mubr.msk.f32.gmra.mxu1 %vm1239_vm4, %v17532_v37  ;;  %3353 = vmatprep.subr.mxu1 %v3131_v10 }
0x135d   : > { %3354 = vmatpush1.msra.mxu1 %v3130_v12  ;;  %3389 = vmatprep.mubr.f32.mxu1 %v24717_v20  ;;  %v3030_v12 = vmax.f32 %v2653_v3, %v2673_v55 }
0x135e   : > { %3355 = vmatprep.subr.mxu1 %v3123_v16  ;;  %3881 = vperm.xlu1 %17683, %v3873_v11   ;;  %v3142_v11 = vld [vmem:[%s24694_s10 + $0xb0] sm:$0xff] }
0x135f   : > { %3356 = vmatpush1.msra.mxu1 %v3122_v18  ;;  %4014 = vperm.xlu0 %17684, %v16724_v31  }
0x1360   : > { %3623 = vmatprep.subr.mxu1 %v3151_v22 }
0x1362   : > { %4163 = vperm.xlu1 %17683, %v16726_v30  }
0x1366   : > { %3876 = vperm.xlu1 %17683, %v3872_v46   ;;  %v3124_v46 = vld [vmem:[%s24694_s10 + $0x20] sm:$0xff] }
0x136a   : > { %4009 = vperm.xlu1 %17683, %v16723_v40  }
0x1407   : > { %v17563_v45 = vpop.f32.mrf.mxu1 }
0x1408   : > { %v2688_v15 = vadd.f32 %v17563_v45, %v2525_v42 }
0x1409   : > { %v2682_v50 = vpop.f32.mrf.mxu1 }
0x140a   : > { %v3033_v56 = vmax.f32 %v3029_v48, %v2688_v15  ;;  %v2683_v57 = vadd.f32 %v2682_v50, %v2524_v13 }
0x140c   : > { %v3037_v24 = vsub.f32 %v2648_v43, %v3033_v56  ;;  %v3049_v25 = vsub.f32 %v2668_v39, %v3033_v56  ;;  %v3061_v26 = vsub.f32 %v2688_v15, %v3033_v56  ;;  %v3032_v27 = vmax.f32 %v3028_v52, %v2683_v57 }
0x140e   : > { %v3042_v37 = vmul.f32 1.442695, %v3037_v24  ;;  %v3054_v7 = vmul.f32 1.442695, %v3049_v25  ;;  %v3066_v62 = vmul.f32 1.442695, %v3061_v26  ;;  %v3036_v53 = vsub.f32 %v2643_v47, %v3032_v27 }
0x140f   : > { %v3048_v63 = vsub.f32 %v2663_v44, %v3032_v27  ;;  %v3060_v54 = vsub.f32 %v2683_v57, %v3032_v27  ;;  %v17566_v0 = vpop.f32.mrf.mxu1  ;;  %v16725_v47 = vld [vmem:[%s24696_s12 + $0x20] sm:$0xff] }
0x1410   : > { %17701 = vpow2.f32 %v3042_v37  ;;  %v3040_v61 = vmul.f32 1.442695, %v3036_v53  ;;  %v2698_v2 = vadd.f32 %v17566_v0, %v2527_v36  ;;  %4158 = vperm.xlu1 %17683, %v16725_v47   ;;  %v4198_v25 = vld [vmem:[%s24697_s13] sm:$0xff]  ;;  %v17577_v36 = vpop.f32.mrf.mxu0 }
0x1411   : > { %17703 = vpow2.f32 %v3054_v7  ;;  %v3052_v4 = vmul.f32 1.442695, %v3048_v63  ;;  %v2692_v5 = vpop.f32.mrf.mxu1  ;;  %v3064_v6 = vmul.f32 1.442695, %v3060_v54 }
0x1412   : > { %17705 = vpow2.f32 %v3066_v62  ;;  %v3035_v8 = vmax.f32 %v3031_v60, %v2698_v2  ;;  %v2693_v10 = vadd.f32 %v2692_v5, %v2526_v1  ;;  %v2791_v53 = vpop.f32.mrf.mxu0  ;;  %v3148_v60 = vld [vmem:[%s24694_s10 + $0xe0] sm:$0xff] }
0x1413   : > { %17707 = vpow2.f32 %v3040_v61  ;;  %v3150_v61 = vld [vmem:[%s24694_s10 + $0xf0] sm:$0xff] }
0x1414   : > { %17709 = vpow2.f32 %v3052_v4  ;;  %v3039_v14 = vsub.f32 %v2658_v34, %v3035_v8  ;;  %v3051_v16 = vsub.f32 %v2678_v58, %v3035_v8  ;;  %v3063_v17 = vsub.f32 %v2698_v2, %v3035_v8  ;;  %4207 = vperm.xlu1 %17683, %v4199_v51   ;;  %v17580_v1 = vpop.f32.mrf.mxu0  ;;  %v3141_v2 = vld [vmem:[%s24694_s10 + $0xa8] sm:$0xff] }
0x1415   : > { %v3034_v18 = vmax.f32 %v3030_v12, %v2693_v10  ;;  %17711 = vpow2.f32 %v3064_v6 }
0x1416   : > { %v3046_v21 = vmul.f32 1.442695, %v3039_v14  ;;  %v3058_v22 = vmul.f32 1.442695, %v3051_v16  ;;  %v3070_v23 = vmul.f32 1.442695, %v3063_v17  ;;  %v2801_v8 = vpop.f32.mrf.mxu0 }
0x1417   : > { %v3038_v28 = vsub.f32 %v2653_v3, %v3034_v18  ;;  %v3050_v9 = vsub.f32 %v2673_v55, %v3034_v18  ;;  %v3062_v29 = vsub.f32 %v2693_v10, %v3034_v18  ;;  %v3140_v10 = vld [vmem:[%s24694_s10 + $0xa0] sm:$0xff]  ;;  %v3133_v14 = vld [vmem:[%s24694_s10 + $0x68] sm:$0xff]  ;;  %v3135_v16 = vld [vmem:[%s24694_s10 + $0x78] sm:$0xff] }
0x1418   : > { %17713 = vpow2.f32 %v3046_v21  ;;  %4202 = vperm.xlu1 %17683, %v4198_v25   ;;  %v17591_v17 = vpop.f32.mrf.mxu0 }
0x1419   : > { %17715 = vpow2.f32 %v3058_v22  ;;  %v3044_v32 = vmul.f32 1.442695, %v3038_v28  ;;  %v3056_v33 = vmul.f32 1.442695, %v3050_v9  ;;  %v3068_v38 = vmul.f32 1.442695, %v3062_v29 }
0x141a   : > { %17717 = vpow2.f32 %v3070_v23  ;;  %v3132_v23 = vld [vmem:[%s24694_s10 + $0x60] sm:$0xff]  ;;  %v3134_v28 = vld [vmem:[%s24694_s10 + $0x70] sm:$0xff]  ;;  %v3125_v9 = vld [vmem:[%s24694_s10 + $0x28] sm:$0xff]  ;;  %v2900_v30 = vpop.f32.mrf.mxu0 }
0x141b   : > { %17719 = vpow2.f32 %v3044_v32  ;;  %v3127_v29 = vld [vmem:[%s24694_s10 + $0x38] sm:$0xff] }
0x141c   : > { %17721 = vpow2.f32 %v3056_v33 }
0x141d   : > { %v17702_v39 = vpop.eup %17701  ;;  %17723 = vpow2.f32 %v3068_v38  ;;  %v3126_v38 = vld [vmem:[%s24694_s10 + $0x30] sm:$0xff] }
0x141e   : > { %v18337_v41 = vpop.eup %17703 }
0x141f   : > { %v18339_v42 = vpop.eup %17705  ;;  %v3073_v43 = vadd.f32 %v18337_v41, %v17702_v39 }
0x1420   : > { %v17708_v44 = vpop.eup %17707 }
0x1421   : > { %v18342_v45 = vpop.eup %17709  ;;  %v3077_v13 = vadd.f32 %v18339_v42, %v3073_v43 }
0x1422   : > { %v3072_v48 = vadd.f32 %v18342_v45, %v17708_v44  ;;  %v18349_v49 = vpop.eup %17711 }
0x1423   : > { %17725 = vrcp.f32 %v3077_v13 }
0x1424   : > { %v3076_v15 = vadd.f32 %v18349_v49, %v3072_v48  ;;  %v17605_v48 = vpop.f32.mrf.mxu1 }
0x1425   : > { %v17714_v50 = vpop.eup %17713 }
0x1426   : > { %v18355_v52 = vpop.eup %17715  ;;  %17727 = vrcp.f32 %v3076_v15 }
0x1427   : > { %v18357_v56 = vpop.eup %17717  ;;  %v3075_v57 = vadd.f32 %v18355_v52, %v17714_v50 }
0x1428   : > { %v17720_v58 = vpop.eup %17719 }
0x1429   : > { %v18360_v59 = vpop.eup %17721  ;;  %v3079_v24 = vadd.f32 %v18357_v56, %v3075_v57 }
0x142a   : > { %v3074_v26 = vadd.f32 %v18360_v59, %v17720_v58  ;;  %v18367_v27 = vpop.eup %17723 }
0x142b   : > { %17729 = vrcp.f32 %v3079_v24 }
0x142c   : > { %v3078_v34 = vadd.f32 %v18367_v27, %v3074_v26 }
0x142e   : > { %17731 = vrcp.f32 %v3078_v34 }
0x1430   : > { %v18370_v35 = vpop.eup %17725 }
0x1431   : > { %v3085_v62 = vmul.f32 %v18370_v35, %v17702_v39  ;;  %v3097_v33 = vmul.f32 %v18370_v35, %v18337_v41  ;;  %v17594_v39 = vpop.f32.mrf.mxu0  ;;  %v3109_v57 = vmul.f32 %v18370_v35, %v18339_v42 }
0x1433   : > { %v18372_v37 = vpop.eup %17727  ;;  %v3089_v54 = vmul.f32 %v17577_v36, %v3085_v62  ;;  %v3101_v41 = vmul.f32 %v17591_v17, %v3097_v33  ;;  %v3113_v24 = vmul.f32 %v17605_v48, %v3109_v57 }
0x1434   : > { %v3084_v7 = vmul.f32 %v18372_v37, %v17708_v44  ;;  %v3096_v22 = vmul.f32 %v18372_v37, %v18342_v45  ;;  %v2910_v44 = vpop.f32.mrf.mxu0  ;;  %v3108_v15 = vmul.f32 %v18372_v37, %v18349_v49 }
0x1435   : > { %v18400_v4 = vmax.f32 %v3089_v54, 0.0  ;;  %v18470_v45 = vmax.f32 %v3101_v41, 0.0  ;;  %v3117_v34 = vmax.f32 %v3113_v24, 0.0 }
0x1436   : > { %v3088_v55 = vmul.f32 %v3084_v7, %v2791_v53  ;;  %v3100_v32 = vmul.f32 %v3096_v22, %v2900_v30  ;;  %v18581_v53 = vld [vmem:[%s24695_s11] sm:$0xff] }
0x1438   : > { %v18376_v63 = vmax.f32 %v3088_v55, 0.0  ;;  %v18378_v0 = vpop.eup %17729  ;;  %v18460_v40 = vmax.f32 %v3100_v32, 0.0  ;;  %v18586_v55 = vld [vmem:[%s24695_s11 + $0x10] sm:$0xff] }
0x1439   : > { %v3087_v6 = vmul.f32 %v18378_v0, %v17714_v50  ;;  %v3099_v47 = vmul.f32 %v18378_v0, %v18355_v52  ;;  %v3009_v52 = vpop.f32.mrf.mxu1  ;;  %v3111_v35 = vmul.f32 %v18378_v0, %v18357_v56  ;;  %v18591_v0 = vld [vmem:[%s24695_s11 + $0x40] sm:$0xff] }
0x143a   : > { %16675 = vmatmul.mubr.msk.f32.vlgmr.msra.gmra.mxu0 %vm1239_vm4, %v18376_v63  ;;  %16687 = vmatmul.mubr.msk.f32.vlgmr.msra.gmra.mxu1 %vm1239_vm4, %v18376_v63 }
0x143b   : > { %v18396_v3 = vpop.eup %17731  ;;  %3258 = vmatprep.mubr.f32.mxu0 %v24717_v20  ;;  %3395 = vmatprep.mubr.f32.mxu1 %v24717_v20  ;;  %v3091_v21 = vmul.f32 %v17580_v1, %v3087_v6  ;;  %v3103_v51 = vmul.f32 %v17594_v39, %v3099_v47  ;;  %v17608_v49 = vpop.f32.mrf.mxu1  ;;  %v18596_v1 = vld [vmem:[%s24695_s11 + $0x50] sm:$0xff]  ;;  %v18610_v6 = vld [vmem:[%s24695_s11 + $0x58] sm:$0xff]  ;;  %v18651_v39 = vld [vmem:[%s24695_s11 + $0xc0] sm:$0xff] }
0x143c   : > { %v3086_v5 = vmul.f32 %v18396_v3, %v17720_v58  ;;  %3487 = vmatpush1.msra.mxu0 %v3148_v60  ;;  %3624 = vmatpush1.msra.mxu1 %v3150_v61  ;;  %v3098_v43 = vmul.f32 %v18396_v3, %v18360_v59  ;;  %v3112_v58 = vmul.f32 %v3108_v15, %v3009_v52 }
0x143d   : > { %3488 = vmatprep.subr.mxu0 %v3141_v2  ;;  %3625 = vmatprep.subr.mxu1 %v3143_v19  ;;  %v18444_v31 = vmax.f32 %v3091_v21, 0.0  ;;  %v3107_v59 = vmax.f32 %v3103_v51, 0.0  ;;  %v3110_v26 = vmul.f32 %v18396_v3, %v18367_v27  ;;  %v3019_v42 = vpop.f32.mrf.mxu1  ;;  %v3115_v27 = vmul.f32 %v17608_v49, %v3111_v35  ;;  %v18668_v51 = vld [vmem:[%s24695_s11 + $0xd8] sm:$0xff] }
0x143e   : > { %16676 = vmatmul.mubr.msk.f32.gmra.mxu0 %vm1239_vm4, %v18400_v4  ;;  %16688 = vmatmul.mubr.msk.f32.gmra.mxu1 %vm1239_vm4, %v18400_v4  ;;  %v3090_v12 = vmul.f32 %v3086_v5, %v2801_v8  ;;  %v3102_v13 = vmul.f32 %v3098_v43, %v2910_v44  ;;  %v3116_v25 = vmax.f32 %v3112_v58, 0.0  ;;  %v18605_v5 = vld [vmem:[%s24695_s11 + $0x48] sm:$0xff] }
0x143f   : > { %3264 = vmatprep.mubr.f32.mxu0 %v24717_v20  ;;  %3401 = vmatprep.mubr.f32.mxu1 %v24717_v20  ;;  %v3114_v36 = vmul.f32 %v3110_v26, %v3019_v42  ;;  %v3119_v56 = vmax.f32 %v3115_v27, 0.0 }
0x1440   : > { %v18422_v18 = vmax.f32 %v3090_v12, 0.0  ;;  %3489 = vmatpush1.msra.mxu0 %v3140_v10  ;;  %3626 = vmatpush1.msra.mxu1 %v3142_v11  ;;  %v18482_v50 = vmax.f32 %v3102_v13, 0.0  ;;  %v18615_v11 = vld [vmem:[%s24695_s11 + $0x80] sm:$0xff]  ;;  %v18620_v12 = vld [vmem:[%s24695_s11 + $0x90] sm:$0xff] }
0x1441   : > { %3490 = vmatprep.subr.mxu0 %v3133_v14  ;;  %3627 = vmatprep.subr.mxu1 %v3135_v16  ;;  %v3118_v37 = vmax.f32 %v3114_v36, 0.0  ;;  %v18625_v14 = vld [vmem:[%s24695_s11 + $0x8] sm:$0xff]  ;;  %v18630_v16 = vld [vmem:[%s24695_s11 + $0x18] sm:$0xff] }
0x1442   : > { %16677 = vmatmul.mubr.msk.f32.gmra.mxu0 %vm1239_vm4, %v18422_v18  ;;  %16689 = vmatmul.mubr.msk.f32.gmra.mxu1 %vm1239_vm4, %v18422_v18 }
0x1443   : > { %3270 = vmatprep.mubr.f32.mxu0 %v24717_v20  ;;  %3407 = vmatprep.mubr.f32.mxu1 %v24717_v20 }
0x1444   : > { %3491 = vmatpush1.msra.mxu0 %v3132_v23  ;;  %3628 = vmatpush1.msra.mxu1 %v3134_v28 }
0x1445   : > { %3492 = vmatprep.subr.mxu0 %v3125_v9  ;;  %3629 = vmatprep.subr.mxu1 %v3127_v29  ;;  %v18637_v9 = vld [vmem:[%s24695_s11 + $0x88] sm:$0xff]  ;;  %v18642_v29 = vld [vmem:[%s24695_s11 + $0x98] sm:$0xff] }
0x1446   : > { %16678 = vmatmul.mubr.msk.f32.gmra.mxu0 %vm1239_vm4, %v18444_v31  ;;  %16690 = vmatmul.mubr.msk.f32.gmra.mxu1 %vm1239_vm4, %v18444_v31 }
0x1447   : > { %3276 = vmatprep.mubr.f32.mxu0 %v24717_v20  ;;  %3413 = vmatprep.mubr.f32.mxu1 %v24717_v20 }
0x1448   : > { %3493 = vmatpush1.msra.mxu0 %v3124_v46  ;;  %3630 = vmatpush1.msra.mxu1 %v3126_v38 }
0x144a   : > { %16679 = vmatmul.mubr.msk.f32.gmra.mxu0 %vm1239_vm4, %v18460_v40  ;;  %16691 = vmatmul.mubr.msk.f32.gmra.mxu1 %vm1239_vm4, %v18460_v40 }
0x144b   : > { %3282 = vmatprep.mubr.f32.mxu0 %v24717_v20  ;;  %3419 = vmatprep.mubr.f32.mxu1 %v24717_v20 }
0x144e   : > { %16680 = vmatmul.mubr.msk.f32.gmra.mxu0 %vm1239_vm4, %v18470_v45  ;;  %16692 = vmatmul.mubr.msk.f32.gmra.mxu1 %vm1239_vm4, %v18470_v45 }
0x144f   : > { %3288 = vmatprep.mubr.f32.mxu0 %v24717_v20  ;;  %3425 = vmatprep.mubr.f32.mxu1 %v24717_v20 }
0x1452   : > { %16681 = vmatmul.mubr.msk.f32.gmra.mxu0 %vm1239_vm4, %v18482_v50  ;;  %16693 = vmatmul.mubr.msk.f32.gmra.mxu1 %vm1239_vm4, %v18482_v50 }
0x1453   : > { %3294 = vmatprep.mubr.f32.mxu0 %v24717_v20  ;;  %3431 = vmatprep.mubr.f32.mxu1 %v24717_v20 }
0x1456   : > { %16682 = vmatmul.mubr.msk.f32.gmra.mxu0 %vm1239_vm4, %v3107_v59  ;;  %16694 = vmatmul.mubr.msk.f32.gmra.mxu1 %vm1239_vm4, %v3107_v59 }
0x1457   : > { %3300 = vmatprep.mubr.f32.mxu0 %v24717_v20  ;;  %3437 = vmatprep.mubr.f32.mxu1 %v24717_v20 }
0x145a   : > { %16683 = vmatmul.mubr.msk.f32.gmra.mxu0 %vm1239_vm4, %v3116_v25  ;;  %16695 = vmatmul.mubr.msk.f32.gmra.mxu1 %vm1239_vm4, %v3116_v25 }
0x145b   : > { %3306 = vmatprep.mubr.f32.mxu0 %v24717_v20  ;;  %3443 = vmatprep.mubr.f32.mxu1 %v24717_v20 }
0x145e   : > { %16684 = vmatmul.mubr.msk.f32.gmra.mxu0 %vm1239_vm4, %v3117_v34  ;;  %16696 = vmatmul.mubr.msk.f32.gmra.mxu1 %vm1239_vm4, %v3117_v34 }
0x145f   : > { %3312 = vmatprep.mubr.f32.mxu0 %v24717_v20  ;;  %3449 = vmatprep.mubr.f32.mxu1 %v24717_v20 }
0x1462   : > { %16685 = vmatmul.mubr.msk.f32.gmra.mxu0 %vm1239_vm4, %v3118_v37  ;;  %16697 = vmatmul.mubr.msk.f32.gmra.mxu1 %vm1239_vm4, %v3118_v37 }
0x1463   : > { %3318 = vmatprep.mubr.f32.mxu0 %v24717_v20  ;;  %3455 = vmatprep.mubr.f32.mxu1 %v24717_v20 }
0x1466   : > { %16686 = vmatmul.mubr.msk.f32.gmra.mxu0 %vm1239_vm4, %v3119_v56  ;;  %16698 = vmatmul.mubr.msk.f32.gmra.mxu1 %vm1239_vm4, %v3119_v56 }
0x1467   : > { %3526 = vmatprep.mubr.f32.mxu0 %v24717_v20  ;;  %3663 = vmatprep.mubr.f32.mxu1 %v24717_v20 }
0x146a   : > { %16699 = vmatmul.mubr.msk.f32.vlgmr.msra.gmra.mxu0 %vm1239_vm4, %v18376_v63  ;;  %16711 = vmatmul.mubr.msk.f32.vlgmr.msra.gmra.mxu1 %vm1239_vm4, %v18376_v63 }
0x146b   : > { %3532 = vmatprep.mubr.f32.mxu0 %v24717_v20  ;;  %3669 = vmatprep.mubr.f32.mxu1 %v24717_v20 }
0x146e   : > { %16700 = vmatmul.mubr.msk.f32.gmra.mxu0 %vm1239_vm4, %v18400_v4  ;;  %16712 = vmatmul.mubr.msk.f32.gmra.mxu1 %vm1239_vm4, %v18400_v4 }
0x146f   : > { %3538 = vmatprep.mubr.f32.mxu0 %v24717_v20  ;;  %3675 = vmatprep.mubr.f32.mxu1 %v24717_v20 }
0x1472   : > { %16701 = vmatmul.mubr.msk.f32.gmra.mxu0 %vm1239_vm4, %v18422_v18  ;;  %16713 = vmatmul.mubr.msk.f32.gmra.mxu1 %vm1239_vm4, %v18422_v18 }
0x1473   : > { %3544 = vmatprep.mubr.f32.mxu0 %v24717_v20  ;;  %3681 = vmatprep.mubr.f32.mxu1 %v24717_v20 }
0x1476   : > { %16702 = vmatmul.mubr.msk.f32.gmra.mxu0 %vm1239_vm4, %v18444_v31  ;;  %16714 = vmatmul.mubr.msk.f32.gmra.mxu1 %vm1239_vm4, %v18444_v31 }
0x1477   : > { %3550 = vmatprep.mubr.f32.mxu0 %v24717_v20  ;;  %3687 = vmatprep.mubr.f32.mxu1 %v24717_v20 }
0x147a   : > { %16703 = vmatmul.mubr.msk.f32.gmra.mxu0 %vm1239_vm4, %v18460_v40  ;;  %16715 = vmatmul.mubr.msk.f32.gmra.mxu1 %vm1239_vm4, %v18460_v40  ;;  %v18656_v40 = vld [vmem:[%s24695_s11 + $0xd0] sm:$0xff] }
0x147b   : > { %3556 = vmatprep.mubr.f32.mxu0 %v24717_v20  ;;  %3693 = vmatprep.mubr.f32.mxu1 %v24717_v20 }
0x147e   : > { %16704 = vmatmul.mubr.msk.f32.gmra.mxu0 %vm1239_vm4, %v18470_v45  ;;  %16716 = vmatmul.mubr.msk.f32.gmra.mxu1 %vm1239_vm4, %v18470_v45 }
0x147f   : > { %3562 = vmatprep.mubr.f32.mxu0 %v24717_v20  ;;  %3699 = vmatprep.mubr.f32.mxu1 %v24717_v20 }
0x1482   : > { %16705 = vmatmul.mubr.msk.f32.gmra.mxu0 %vm1239_vm4, %v18482_v50  ;;  %16717 = vmatmul.mubr.msk.f32.gmra.mxu1 %vm1239_vm4, %v18482_v50  ;;  %v18663_v50 = vld [vmem:[%s24695_s11 + $0xc8] sm:$0xff] }
0x1483   : > { %3568 = vmatprep.mubr.f32.mxu0 %v24717_v20  ;;  %3705 = vmatprep.mubr.f32.mxu1 %v24717_v20 }
0x1486   : > { %16706 = vmatmul.mubr.msk.f32.gmra.mxu0 %vm1239_vm4, %v3107_v59  ;;  %16718 = vmatmul.mubr.msk.f32.gmra.mxu1 %vm1239_vm4, %v3107_v59 }
0x1487   : > { %3574 = vmatprep.mubr.f32.mxu0 %v24717_v20  ;;  %3711 = vmatprep.mubr.f32.mxu1 %v24717_v20 }
0x148a   : > { %16707 = vmatmul.mubr.msk.f32.gmra.mxu0 %vm1239_vm4, %v3116_v25  ;;  %16719 = vmatmul.mubr.msk.f32.gmra.mxu1 %vm1239_vm4, %v3116_v25 }
0x148b   : > { %3580 = vmatprep.mubr.f32.mxu0 %v24717_v20  ;;  %3717 = vmatprep.mubr.f32.mxu1 %v24717_v20 }
0x148e   : > { %16708 = vmatmul.mubr.msk.f32.gmra.mxu0 %vm1239_vm4, %v3117_v34  ;;  %16720 = vmatmul.mubr.msk.f32.gmra.mxu1 %vm1239_vm4, %v3117_v34 }
0x148f   : > { %3586 = vmatprep.mubr.f32.mxu0 %v24717_v20  ;;  %3723 = vmatprep.mubr.f32.mxu1 %v24717_v20 }
0x1492   : > { %16709 = vmatmul.mubr.msk.f32.gmra.mxu0 %vm1239_vm4, %v3118_v37  ;;  %16721 = vmatmul.mubr.msk.f32.gmra.mxu1 %vm1239_vm4, %v3118_v37 }
0x1493   : > { %3592 = vmatprep.mubr.f32.mxu0 %v24717_v20  ;;  %3729 = vmatprep.mubr.f32.mxu1 %v24717_v20 }
0x1496   : > { %16710 = vmatmul.mubr.msk.f32.gmra.mxu0 %vm1239_vm4, %v3119_v56  ;;  %16722 = vmatmul.mubr.msk.f32.gmra.mxu1 %vm1239_vm4, %v3119_v56 }
0x1497   : > { %4704 = vmatprep.mubr.f32.mxu0 %v24717_v20  ;;  %4781 = vmatprep.mubr.f32.mxu1 %v24717_v20 }
0x14fa   : > { %v3254_v7 = vpop.f32.mrf.mxu0  ;;  %v3391_v62 = vpop.f32.mrf.mxu1 }
0x14fb   : > { %v3768_v2 = vmul.f32 %v18581_v53, %v3254_v7  ;;  %v3770_v19 = vmul.f32 %v18586_v55, %v3391_v62 }
0x14fc   : > { %v3256_v63 = vpop.f32.mrf.mxu0  ;;  %v3393_v54 = vpop.f32.mrf.mxu1 }
0x14fd   : > { %v3769_v32 = vmul.f32 %v18625_v14, %v3256_v63  ;;  %v3771_v33 = vmul.f32 %v18630_v16, %v3393_v54 }
0x14fe   : > { %v3260_v60 = vpop.f32.mrf.mxu0  ;;  %v3397_v61 = vpop.f32.mrf.mxu1 }
0x14ff   : > { %v3776_v3 = vmul.f32 %v18591_v0, %v3260_v60  ;;  %v3778_v4 = vmul.f32 %v18596_v1, %v3397_v61 }
0x1500   : > { %v3262_v8 = vpop.f32.mrf.mxu0  ;;  %v3399_v10 = vpop.f32.mrf.mxu1 }
0x1501   : > { %v3800_v17 = vadd.f32 %v3776_v3, %v3768_v2  ;;  %v3818_v18 = vadd.f32 %v3778_v4, %v3770_v19  ;;  %v3777_v21 = vmul.f32 %v18605_v5, %v3262_v8  ;;  %v3779_v22 = vmul.f32 %v18610_v6, %v3399_v10 }
0x1502   : > { %v3266_v23 = vpop.f32.mrf.mxu0  ;;  %v3403_v28 = vpop.f32.mrf.mxu1 }
0x1503   : > { %v3784_v30 = vmul.f32 %v18615_v11, %v3266_v23  ;;  %v3786_v31 = vmul.f32 %v18620_v12, %v3403_v28  ;;  %v3809_v13 = vadd.f32 %v3777_v21, %v3769_v32  ;;  %v3827_v47 = vadd.f32 %v3779_v22, %v3771_v33 }
0x1504   : > { %v3268_v46 = vpop.f32.mrf.mxu0  ;;  %v3405_v38 = vpop.f32.mrf.mxu1 }
0x1505   : > { %v3801_v41 = vadd.f32 %v3800_v17, %v3784_v30  ;;  %v3819_v43 = vadd.f32 %v3818_v18, %v3786_v31  ;;  %v3785_v44 = vmul.f32 %v18637_v9, %v3268_v46  ;;  %v3787_v45 = vmul.f32 %v18642_v29, %v3405_v38  ;;  %v18676_v30 = vpop.permute.xlu1 %3881 }
0x1506   : > { %v3272_v48 = vpop.f32.mrf.mxu0  ;;  %v3409_v15 = vpop.f32.mrf.mxu1 }
0x1507   : > { %v3792_v52 = vmul.f32 %v18651_v39, %v3272_v48  ;;  %v3794_v57 = vmul.f32 %v18656_v40, %v3409_v15  ;;  %v3810_v58 = vadd.f32 %v3809_v13, %v3785_v44  ;;  %v3828_v59 = vadd.f32 %v3827_v47, %v3787_v45 }
0x1508   : > { %v3274_v49 = vpop.f32.mrf.mxu0  ;;  %v3411_v24 = vpop.f32.mrf.mxu1 }
0x1509   : > { %v3802_v25 = vadd.f32 %v3801_v41, %v3792_v52  ;;  %v3820_v26 = vadd.f32 %v3819_v43, %v3794_v57  ;;  %v3793_v42 = vmul.f32 %v18663_v50, %v3274_v49  ;;  %v3795_v34 = vmul.f32 %v18668_v51, %v3411_v24 }
0x150a   : > { %v3278_v35 = vpop.f32.mrf.mxu0  ;;  %v3415_v36 = vpop.f32.mrf.mxu1 }
0x150b   : > { %v3803_v27 = vrot.slane %v3802_v25, 4  ;;  %v3821_v37 = vrot.slane %v3820_v26, 4  ;;  %v3811_v56 = vadd.f32 %v3810_v58, %v3793_v42  ;;  %v3829_v7 = vadd.f32 %v3828_v59, %v3795_v34 }
0x150c   : > { %v3280_v62 = vpop.f32.mrf.mxu0  ;;  %v3417_v63 = vpop.f32.mrf.mxu1  ;;  %v3900_v41 = vmul.f32 %v18581_v53, %v3278_v35  ;;  %v3902_v43 = vmul.f32 %v18586_v55, %v3415_v36 }
0x150d   : > { %v3804_v54 = vadd.f32 %v3803_v27, %v3802_v25  ;;  %v3822_v60 = vadd.f32 %v3821_v37, %v3820_v26  ;;  %v3812_v61 = vrot.slane %v3811_v56, 4  ;;  %v3830_v2 = vrot.slane %v3829_v7, 4  ;;  %v18688_v37 = vpop.permute.xlu1 %4163 }
0x150e   : > { %v3284_v19 = vpop.f32.mrf.mxu0  ;;  %v3421_v3 = vpop.f32.mrf.mxu1  ;;  %v3901_v44 = vmul.f32 %v18625_v14, %v3280_v62  ;;  %v3903_v58 = vmul.f32 %v18630_v16, %v3417_v63  ;;  %25060 = vst [vmem:[#allocation4_spill] sm:$0xff] %v18688_v37 }
0x150f   : > { %v3805_v4 = vrot.slane %v3804_v54, 2  ;;  %v3813_v8 = vadd.f32 %v3812_v61, %v3811_v56  ;;  %v3831_v10 = vadd.f32 %v3830_v2, %v3829_v7  ;;  %v3823_v21 = vrot.slane %v3822_v60, 2 }
0x1510   : > { %v3286_v17 = vpop.f32.mrf.mxu0  ;;  %v3423_v18 = vpop.f32.mrf.mxu1  ;;  %v3908_v23 = vmul.f32 %v18591_v0, %v3284_v19  ;;  %v3910_v28 = vmul.f32 %v18596_v1, %v3421_v3 }
0x1511   : > { %v3814_v22 = vrot.slane %v3813_v8, 2  ;;  %v3832_v31 = vrot.slane %v3831_v10, 2  ;;  %v3909_v32 = vmul.f32 %v18605_v5, %v3286_v17  ;;  %v3806_v38 = vadd.f32 %v3805_v4, %v3804_v54 }
0x1512   : > { %v3290_v33 = vpop.f32.mrf.mxu0  ;;  %v3427_v46 = vpop.f32.mrf.mxu1  ;;  %v3911_v13 = vmul.f32 %v18610_v6, %v3423_v18  ;;  %v3824_v57 = vadd.f32 %v3823_v21, %v3822_v60  ;;  %v3932_v59 = vadd.f32 %v3908_v23, %v3900_v41  ;;  %v3950_v49 = vadd.f32 %v3910_v28, %v3902_v43 }
0x1513   : > { %v3815_v45 = vadd.f32 %v3814_v22, %v3813_v8  ;;  %v3916_v47 = vmul.f32 %v18615_v11, %v3290_v33  ;;  %v3918_v48 = vmul.f32 %v18620_v12, %v3427_v46  ;;  %v3833_v24 = vadd.f32 %v3832_v31, %v3831_v10 }
0x1514   : > { %v3292_v15 = vpop.f32.mrf.mxu0  ;;  %v3429_v52 = vpop.f32.mrf.mxu1  ;;  %v3941_v25 = vadd.f32 %v3909_v32, %v3901_v44  ;;  %v3807_v62 = vrot.slane %v3806_v38, 1  ;;  %v3959_v54 = vadd.f32 %v3911_v13, %v3903_v58  ;;  %v3825_v8 = vrot.slane %v3824_v57, 1 }
0x1515   : > { %v3917_v26 = vmul.f32 %v18637_v9, %v3292_v15  ;;  %v3919_v42 = vmul.f32 %v18642_v29, %v3429_v52  ;;  %v3933_v36 = vadd.f32 %v3932_v59, %v3916_v47  ;;  %v3951_v27 = vadd.f32 %v3950_v49, %v3918_v48  ;;  %v18696_v47 = vpop.permute.xlu1 %3876 }
0x1516   : > { %v3296_v34 = vpop.f32.mrf.mxu0  ;;  %v3433_v35 = vpop.f32.mrf.mxu1  ;;  %v3816_v63 = vrot.slane %v3815_v45, 1  ;;  %v3834_v22 = vrot.slane %v3833_v24, 1  ;;  %v3808_v32 = vadd.f32 %v3807_v62, %v3806_v38  ;;  %v18698_v15 = vadd.f32 %v3825_v8, %v3824_v57 }
0x1517   : > { %v3924_v56 = vmul.f32 %v18651_v39, %v3296_v34  ;;  %v3926_v7 = vmul.f32 %v18656_v40, %v3433_v35  ;;  %v3942_v2 = vadd.f32 %v3941_v25, %v3917_v26  ;;  %v3960_v10 = vadd.f32 %v3959_v54, %v3919_v42 }
0x1518   : > { %v3298_v60 = vpop.f32.mrf.mxu0  ;;  %v3435_v61 = vpop.f32.mrf.mxu1  ;;  %v18694_v33 = vadd.f32 %v3816_v63, %v3815_v45  ;;  %v18700_v49 = vadd.f32 %v3834_v22, %v3833_v24  ;;  %v18703_v45 = vmul.f32 %v18696_v47, %v3808_v32  ;;  %v3892_v57 = vmul.f32 %v18676_v30, %v3808_v32 }
0x1519   : > { %v3934_v19 = vadd.f32 %v3933_v36, %v3924_v56  ;;  %v3952_v3 = vadd.f32 %v3951_v27, %v3926_v7  ;;  %v3925_v4 = vmul.f32 %v18663_v50, %v3298_v60  ;;  %v3927_v17 = vmul.f32 %v18668_v51, %v3435_v61 }
0x151a   : > { %v3302_v18 = vpop.f32.mrf.mxu0  ;;  %v3439_v21 = vpop.f32.mrf.mxu1  ;;  %v18707_v42 = vmul.f32 %v18696_v47, %v18694_v33 }
0x151b   : > { %v3935_v23 = vrot.slane %v3934_v19, 4  ;;  %v3953_v28 = vrot.slane %v3952_v3, 4  ;;  %v3943_v31 = vadd.f32 %v3942_v2, %v3925_v4  ;;  %v3961_v46 = vadd.f32 %v3960_v10, %v3927_v17  ;;  %v18715_v10 = vpop.permute.xlu0 %4014 }
0x151c   : > { %v3304_v41 = vpop.f32.mrf.mxu0  ;;  %v3441_v43 = vpop.f32.mrf.mxu1  ;;  %v4049_v63 = vmul.f32 %v18581_v53, %v3302_v18  ;;  %v4051_v54 = vmul.f32 %v18586_v55, %v3439_v21  ;;  %25061 = vst [vmem:[#allocation5_spill] sm:$0xff] %v18715_v10 }
0x151d   : > { %v3936_v44 = vadd.f32 %v3935_v23, %v3934_v19  ;;  %v3954_v13 = vadd.f32 %v3953_v28, %v3952_v3  ;;  %v3944_v48 = vrot.slane %v3943_v31, 4  ;;  %v3962_v52 = vrot.slane %v3961_v46, 4 }
0x151e   : > { %v3308_v58 = vpop.f32.mrf.mxu0  ;;  %v3445_v59 = vpop.f32.mrf.mxu1  ;;  %v4050_v17 = vmul.f32 %v18625_v14, %v3304_v41 }
0x151f   : > { %v3937_v25 = vrot.slane %v3936_v44, 2  ;;  %v3955_v26 = vrot.slane %v3954_v13, 2  ;;  %v3945_v38 = vadd.f32 %v3944_v48, %v3943_v31  ;;  %v3963_v34 = vadd.f32 %v3962_v52, %v3961_v46 }
0x1520   : > { %v3310_v35 = vpop.f32.mrf.mxu0  ;;  %v3447_v36 = vpop.f32.mrf.mxu1  ;;  %v4057_v24 = vmul.f32 %v18591_v0, %v3308_v58  ;;  %v4059_v60 = vmul.f32 %v18596_v1, %v3445_v59  ;;  %v4052_v0 = vmul.f32 %v18630_v16, %v3441_v43 }
0x1521   : > { %v3938_v27 = vadd.f32 %v3937_v25, %v3936_v44  ;;  %v3956_v56 = vadd.f32 %v3955_v26, %v3954_v13  ;;  %v3946_v7 = vrot.slane %v3945_v38, 2  ;;  %v3964_v62 = vrot.slane %v3963_v34, 2 }
0x1522   : > { %v3314_v61 = vpop.f32.mrf.mxu0  ;;  %v3451_v2 = vpop.f32.mrf.mxu1  ;;  %v4058_v22 = vmul.f32 %v18605_v5, %v3310_v35  ;;  %v4081_v23 = vadd.f32 %v4057_v24, %v4049_v63  ;;  %v4060_v28 = vmul.f32 %v18610_v6, %v3447_v36  ;;  %v4099_v32 = vadd.f32 %v4059_v60, %v4051_v54 }
0x1523   : > { %v3939_v19 = vrot.slane %v3938_v27, 1  ;;  %v3957_v3 = vrot.slane %v3956_v56, 1  ;;  %v3947_v4 = vadd.f32 %v3946_v7, %v3945_v38  ;;  %v4065_v8 = vmul.f32 %v18615_v11, %v3314_v61  ;;  %v18733_v38 = vpop.permute.xlu1 %4009 }
0x1524   : > { %v4067_v53 = vmul.f32 %v18620_v12, %v3451_v2  ;;  %v3316_v55 = vpop.f32.mrf.mxu0  ;;  %v3453_v18 = vpop.f32.mrf.mxu1  ;;  %v3965_v21 = vadd.f32 %v3964_v62, %v3963_v34  ;;  %v4090_v44 = vadd.f32 %v4058_v22, %v4050_v17  ;;  %v3894_v6 = vmul.f32 %v18676_v30, %v18698_v15  ;;  %25062 = vst [vmem:[#allocation6_spill] sm:$0xff] %v18733_v38  ;;  %v18764_v17 = vld [vmem:[%s24695_s11 + $0x20] sm:$0xff] }
0x1525   : > { %v3940_v1 = vadd.f32 %v3939_v19, %v3938_v27  ;;  %v18722_v31 = vadd.f32 %v3957_v3, %v3956_v56  ;;  %v3948_v11 = vrot.slane %v3947_v4, 1  ;;  %v4066_v46 = vmul.f32 %v18637_v9, %v3316_v55 }
0x1526   : > { %v3320_v14 = vpop.f32.mrf.mxu0  ;;  %v3457_v41 = vpop.f32.mrf.mxu1  ;;  %v4082_v16 = vadd.f32 %v4081_v23, %v4065_v8  ;;  %v4068_v5 = vmul.f32 %v18642_v29, %v3453_v18  ;;  %v4100_v13 = vadd.f32 %v4099_v32, %v4067_v53  ;;  %v3966_v59 = vrot.slane %v3965_v21, 1  ;;  %v18769_v53 = vld [vmem:[%s24695_s11 + $0x70] sm:$0xff] }
0x1527   : > { %v4025_v12 = vmul.f32 %v18715_v10, %v3940_v1  ;;  %v4073_v43 = vmul.f32 %v18651_v39, %v3320_v14  ;;  %v4075_v48 = vmul.f32 %v18656_v40, %v3457_v41  ;;  %v4108_v9 = vadd.f32 %v4060_v28, %v4052_v0  ;;  %v18784_v23 = vld [vmem:[%s24695_s11 + $0x30] sm:$0xff]  ;;  %v18789_v28 = vld [vmem:[%s24695_s11 + $0x28] sm:$0xff]  ;;  %v18795_v41 = vld [vmem:[%s24695_s11 + $0xa0] sm:$0xff] }
0x1528   : > { %v3322_v52 = vpop.f32.mrf.mxu0  ;;  %v3459_v58 = vpop.f32.mrf.mxu1  ;;  %v18735_v29 = vadd.f32 %v3948_v11, %v3947_v4  ;;  %v4091_v34 = vadd.f32 %v4090_v44, %v4066_v46  ;;  %v4027_v40 = vmul.f32 %v18715_v10, %v18722_v31  ;;  %v4017_v62 = vmul.f32 %v18733_v38, %v3940_v1 }
0x1529   : > { %v18731_v25 = vadd.f32 %v4025_v12, %v3892_v57  ;;  %v4083_v26 = vadd.f32 %v4082_v16, %v4073_v43  ;;  %v4101_v39 = vadd.f32 %v4100_v13, %v4075_v48  ;;  %v4074_v35 = vmul.f32 %v18663_v50, %v3322_v52  ;;  %v18800_v16 = vld [vmem:[%s24695_s11 + $0xb0] sm:$0xff]  ;;  %v18815_v48 = vld [vmem:[%s24695_s11 + $0x78] sm:$0xff] }
0x152a   : > { %v3528_v36 = vpop.f32.mrf.mxu0  ;;  %v3665_v27 = vpop.f32.mrf.mxu1  ;;  %v4109_v56 = vadd.f32 %v4108_v9, %v4068_v5  ;;  %v4076_v24 = vmul.f32 %v18668_v51, %v3459_v58  ;;  %v18744_v63 = vmul.f32 %v18676_v30, %v18694_v33  ;;  %v18748_v2 = vmul.f32 %v18676_v30, %v18700_v49  ;;  %v18753_v51 = vld [vmem:[%s24695_s11 + $0x60] sm:$0xff]  ;;  %25064 = vst [vmem:[#allocation8_spill] sm:$0xff] %v18815_v48  ;;  %v18822_v9 = vld [vmem:[%s24695_s11 + $0x38] sm:$0xff] }
0x152b   : > { %v4084_v7 = vrot.slane %v4083_v26, 4  ;;  %v4102_v57 = vrot.slane %v4101_v39, 4  ;;  %v4092_v54 = vadd.f32 %v4091_v34, %v4074_v35  ;;  %v18757_v3 = vmul.f32 %v18696_v47, %v18698_v15 }
0x152c   : > { %v3530_v60 = vpop.f32.mrf.mxu0  ;;  %v3667_v61 = vpop.f32.mrf.mxu1  ;;  %v4110_v19 = vadd.f32 %v4109_v56, %v4076_v24  ;;  %v18759_v33 = vadd.f32 %v3966_v59, %v3965_v21  ;;  %v18773_v15 = vmul.f32 %v18696_v47, %v18700_v49  ;;  %v18775_v18 = vadd.f32 %v4027_v40, %v3894_v6  ;;  %v18810_v6 = vld [vmem:[%s24695_s11 + $0x68] sm:$0xff] }
0x152d   : > { %v4085_v50 = vadd.f32 %v4084_v7, %v4083_v26  ;;  %v4103_v4 = vadd.f32 %v4102_v57, %v4101_v39  ;;  %v4093_v8 = vrot.slane %v4092_v54, 4  ;;  %v18779_v1 = vmul.f32 %v18733_v38, %v18735_v29  ;;  %v18829_v7 = vld [vmem:[%s24695_s11 + $0xa8] sm:$0xff] }
0x152e   : > { %v3534_v0 = vpop.f32.mrf.mxu0  ;;  %v3671_v22 = vpop.f32.mrf.mxu1  ;;  %v4111_v21 = vrot.slane %v4110_v19, 4  ;;  %v18803_v5 = vadd.f32 %v4017_v62, %v18703_v45  ;;  %v3772_v44 = vmul.f32 %v18764_v17, %v3528_v36  ;;  %v3774_v45 = vmul.f32 %v18784_v23, %v3665_v27  ;;  %v18834_v27 = vld [vmem:[%s24695_s11 + $0xb8] sm:$0xff] }
0x152f   : > { %v4086_v55 = vrot.slane %v4085_v50, 2  ;;  %v4104_v49 = vrot.slane %v4103_v4, 2  ;;  %v4094_v11 = vadd.f32 %v4093_v8, %v4092_v54  ;;  %v3780_v32 = vmul.f32 %v18753_v51, %v3534_v0 }
0x1530   : > { %v3536_v46 = vpop.f32.mrf.mxu0  ;;  %v3673_v14 = vpop.f32.mrf.mxu1  ;;  %25063 = vst [vmem:[#allocation7_spill] sm:$0xff] %v18803_v5  ;;  %v4112_v43 = vadd.f32 %v4111_v21, %v4110_v19  ;;  %v3782_v13 = vmul.f32 %v18769_v53, %v3671_v22  ;;  %v3773_v59 = vmul.f32 %v18789_v28, %v3530_v60  ;;  %v18846_v19 = vld [vmem:[%s24695_s11 + $0xf0] sm:$0xff]  ;;  %v3775_v0 = vmul.f32 %v18822_v9, %v3667_v61  ;;  %v18858_v61 = vld [vmem:[%s24695_s11 + $0xe8] sm:$0xff] }
0x1531   : > { %v4087_v12 = vadd.f32 %v4086_v55, %v4085_v50  ;;  %v4105_v52 = vadd.f32 %v4104_v49, %v4103_v4  ;;  %v4095_v58 = vrot.slane %v4094_v11, 2  ;;  %v3836_v24 = vadd.f32 %v3780_v32, %v3772_v44  ;;  %v18841_v50 = vld [vmem:[%s24695_s11 + $0xe0] sm:$0xff] }
0x1532   : > { %v3540_v26 = vpop.f32.mrf.mxu0  ;;  %v3677_v34 = vpop.f32.mrf.mxu1  ;;  %v4113_v35 = vrot.slane %v4112_v43, 2  ;;  %v3781_v57 = vmul.f32 %v18810_v6, %v3536_v46  ;;  %v3783_v62 = vmul.f32 %v18815_v48, %v3673_v14  ;;  %v3854_v22 = vadd.f32 %v3782_v13, %v3774_v45 }
0x1533   : > { %v4088_v39 = vrot.slane %v4087_v12, 1  ;;  %v3788_v36 = vmul.f32 %v18795_v41, %v3540_v26  ;;  %v3790_v56 = vmul.f32 %v18800_v16, %v3677_v34  ;;  %v4096_v40 = vadd.f32 %v4095_v58, %v4094_v11 }
0x1534   : > { %v3542_v54 = vpop.f32.mrf.mxu0  ;;  %v3679_v60 = vpop.f32.mrf.mxu1  ;;  %v4106_v4 = vrot.slane %v4105_v52, 1  ;;  %v4114_v8 = vadd.f32 %v4113_v35, %v4112_v43  ;;  %v4026_v43 = vmul.f32 %v18715_v10, %v18735_v29  ;;  %v3845_v45 = vadd.f32 %v3781_v57, %v3773_v59 }
0x1535   : > { %v18849_v55 = vadd.f32 %v4088_v39, %v4087_v12  ;;  %v3837_v21 = vadd.f32 %v3836_v24, %v3788_v36  ;;  %v3789_v49 = vmul.f32 %v18829_v7, %v3542_v54  ;;  %v3791_v11 = vmul.f32 %v18834_v27, %v3679_v60  ;;  %v18863_v12 = vld [vmem:[%s24695_s11 + $0xf8] sm:$0xff] }
0x1536   : > { %v3546_v32 = vpop.f32.mrf.mxu0  ;;  %v3683_v46 = vpop.f32.mrf.mxu1  ;;  %v4097_v14 = vrot.slane %v4096_v40, 1  ;;  %v3855_v44 = vadd.f32 %v3854_v22, %v3790_v56  ;;  %v4115_v13 = vrot.slane %v4114_v8, 1  ;;  %v3863_v34 = vadd.f32 %v3783_v62, %v3775_v0 }
0x1537   : > { %v3796_v58 = vmul.f32 %v18841_v50, %v3546_v32  ;;  %v3798_v26 = vmul.f32 %v18846_v19, %v3683_v46  ;;  %v18867_v36 = vadd.f32 %v4106_v4, %v4105_v52  ;;  %v4028_v56 = vmul.f32 %v18715_v10, %v18759_v33 }
0x1538   : > { %v3548_v39 = vpop.f32.mrf.mxu0  ;;  %v3685_v35 = vpop.f32.mrf.mxu1  ;;  %v3846_v60 = vadd.f32 %v3845_v45, %v3789_v49  ;;  %v3864_v22 = vadd.f32 %v3863_v34, %v3791_v11  ;;  %v4174_v59 = vmul.f32 %v18688_v37, %v18849_v55  ;;  %v18875_v57 = vadd.f32 %v4097_v14, %v4096_v40 }
0x1539   : > { %25065 = vst [vmem:[#allocation9_spill] sm:$0xff] %v18867_v36  ;;  %v3838_v24 = vadd.f32 %v3837_v21, %v3796_v58  ;;  %v3856_v54 = vadd.f32 %v3855_v44, %v3798_v26  ;;  %v3797_v32 = vmul.f32 %v18858_v61, %v3548_v39  ;;  %v3799_v46 = vmul.f32 %v18863_v12, %v3685_v35 }
0x153a   : > { %v3552_v20 = vpop.f32.mrf.mxu0  ;;  %v3689_v29 = vpop.f32.mrf.mxu1  ;;  %v4042_v4 = vadd.f32 %v4026_v43, %v18744_v63  ;;  %v18878_v0 = vadd.f32 %v4115_v13, %v4114_v8  ;;  %v18881_v58 = vadd.f32 %v4028_v56, %v18748_v2  ;;  %v18885_v34 = vmul.f32 %v18733_v38, %v18722_v31 }
0x153b   : > { %v3839_v52 = vrot.slane %v3838_v24, 4  ;;  %v3857_v62 = vrot.slane %v3856_v54, 4  ;;  %v3847_v21 = vadd.f32 %v3846_v60, %v3797_v32  ;;  %v3865_v49 = vadd.f32 %v3864_v22, %v3799_v46 }
0x153c   : > { %25066 = vst [vmem:[#allocation10_spill] sm:$0xff] %v18878_v0  ;;  %v3554_v11 = vpop.f32.mrf.mxu0  ;;  %v3691_v44 = vpop.f32.mrf.mxu1  ;;  %v4176_v40 = vmul.f32 %v18688_v37, %v18867_v36  ;;  %v18891_v13 = vmul.f32 %v18733_v38, %v18759_v33  ;;  %v18894_v2 = vadd.f32 %v4174_v59, %v18731_v25  ;;  %v4175_v39 = vmul.f32 %v18688_v37, %v18875_v57 }
0x153d   : > { %v3840_v26 = vadd.f32 %v3839_v52, %v3838_v24  ;;  %v3858_v45 = vadd.f32 %v3857_v62, %v3856_v54  ;;  %v3848_v14 = vrot.slane %v3847_v21, 4  ;;  %v3866_v63 = vrot.slane %v3865_v49, 4 }
0x153e   : > { %v3558_v8 = vpop.f32.mrf.mxu0  ;;  %v3695_v43 = vpop.f32.mrf.mxu1  ;;  %25067 = vst [vmem:[#allocation11_spill] sm:$0xff] %v18894_v2  ;;  %v4177_v56 = vmul.f32 %v18688_v37, %v18878_v0  ;;  %v3904_v60 = vmul.f32 %v18764_v17, %v3552_v20  ;;  %v3905_v20 = vmul.f32 %v18789_v28, %v3554_v11 }
0x153f   : > { %v3841_v35 = vrot.slane %v3840_v26, 2  ;;  %v3859_v31 = vrot.slane %v3858_v45, 2  ;;  %v3849_v24 = vadd.f32 %v3848_v14, %v3847_v21  ;;  %v3867_v54 = vadd.f32 %v3866_v63, %v3865_v49 }
0x1540   : > { %v3560_v22 = vpop.f32.mrf.mxu0  ;;  %v3697_v32 = vpop.f32.mrf.mxu1  ;;  %v3912_v52 = vmul.f32 %v18753_v51, %v3558_v8  ;;  %v3914_v25 = vmul.f32 %v18769_v53, %v3695_v43  ;;  %v3906_v49 = vmul.f32 %v18784_v23, %v3689_v29  ;;  %v3907_v63 = vmul.f32 %v18822_v9, %v3691_v44 }
0x1541   : > { %v3842_v46 = vadd.f32 %v3841_v35, %v3840_v26  ;;  %v3860_v33 = vadd.f32 %v3859_v31, %v3858_v45  ;;  %v3850_v59 = vrot.slane %v3849_v24, 2  ;;  %v3868_v62 = vrot.slane %v3867_v54, 2 }
0x1542   : > { %v3913_v2 = vmul.f32 %v18810_v6, %v3560_v22  ;;  %v3915_v10 = vmul.f32 %v18815_v48, %v3697_v32  ;;  %v3564_v38 = vpop.f32.mrf.mxu0  ;;  %v3701_v37 = vpop.f32.mrf.mxu1  ;;  %v3968_v22 = vadd.f32 %v3912_v52, %v3904_v60  ;;  %v3986_v32 = vadd.f32 %v3914_v25, %v3906_v49 }
0x1543   : > { %v3843_v21 = vrot.slane %v3842_v46, 1  ;;  %v3920_v26 = vmul.f32 %v18795_v41, %v3564_v38  ;;  %v3851_v45 = vadd.f32 %v3850_v59, %v3849_v24  ;;  %v3869_v14 = vadd.f32 %v3868_v62, %v3867_v54 }
0x1544   : > { %v3922_v8 = vmul.f32 %v18800_v16, %v3701_v37  ;;  %v3566_v43 = vpop.f32.mrf.mxu0  ;;  %v3703_v35 = vpop.f32.mrf.mxu1  ;;  %v3861_v31 = vrot.slane %v3860_v33, 1  ;;  %v3977_v5 = vadd.f32 %v3913_v2, %v3905_v20  ;;  %v3995_v36 = vadd.f32 %v3915_v10, %v3907_v63 }
0x1545   : > { %v3852_v0 = vrot.slane %v3851_v45, 1  ;;  %v3921_v29 = vmul.f32 %v18829_v7, %v3566_v43  ;;  %v3923_v11 = vmul.f32 %v18834_v27, %v3703_v35  ;;  %v18913_v24 = vadd.f32 %v4176_v40, %v18775_v18 }
0x1546   : > { %v3570_v48 = vpop.f32.mrf.mxu0  ;;  %v3707_v38 = vpop.f32.mrf.mxu1  ;;  %v18915_v44 = vadd.f32 %v4175_v39, %v4042_v4  ;;  %v3844_v37 = vadd.f32 %v3843_v21, %v3842_v46  ;;  %v3969_v54 = vadd.f32 %v3968_v22, %v3920_v26  ;;  %v3870_v59 = vrot.slane %v3869_v14, 1 }
0x1547   : > { %v3987_v62 = vadd.f32 %v3986_v32, %v3922_v8  ;;  %v3978_v60 = vadd.f32 %v3977_v5, %v3921_v29  ;;  %v3996_v52 = vadd.f32 %v3995_v36, %v3923_v11  ;;  %v3928_v10 = vmul.f32 %v18841_v50, %v3570_v48 }
0x1548   : > { %v3572_v2 = vpop.f32.mrf.mxu0  ;;  %v3709_v25 = vpop.f32.mrf.mxu1  ;;  %v3930_v49 = vmul.f32 %v18846_v19, %v3707_v38  ;;  %v18922_v18 = vadd.f32 %v4177_v56, %v18881_v58  ;;  %v3862_v4 = vadd.f32 %v3861_v31, %v3860_v33  ;;  %v3853_v40 = vadd.f32 %v3852_v0, %v3851_v45 }
0x1549   : > { %v3929_v20 = vmul.f32 %v18858_v61, %v3572_v2  ;;  %v3931_v63 = vmul.f32 %v18863_v12, %v3709_v25  ;;  %v18926_v5 = vadd.f32 %v18779_v1, %v18707_v42  ;;  %v3970_v36 = vadd.f32 %v3969_v54, %v3928_v10 }
0x154a   : > { %v3576_v39 = vpop.f32.mrf.mxu0  ;;  %v3713_v46 = vpop.f32.mrf.mxu1  ;;  %v3988_v21 = vadd.f32 %v3987_v62, %v3930_v49  ;;  %v18929_v8 = vmul.f32 %v18696_v47, %v3844_v37  ;;  %v3871_v43 = vadd.f32 %v3870_v59, %v3869_v14  ;;  %v18933_v58 = vadd.f32 %v18885_v34, %v18757_v3 }
0x154b   : > { %v3979_v48 = vadd.f32 %v3978_v60, %v3929_v20  ;;  %v3997_v26 = vadd.f32 %v3996_v52, %v3931_v63  ;;  %v18937_v0 = vadd.f32 %v18891_v13, %v18773_v15  ;;  %v3971_v42 = vrot.slane %v3970_v36, 4  ;;  %v18961_v52 = vpop.permute.xlu1 %4158 }
0x154c   : > { %v3578_v35 = vpop.f32.mrf.mxu0  ;;  %v3715_v22 = vpop.f32.mrf.mxu1  ;;  %v3989_v1 = vrot.slane %v3988_v21, 4  ;;  %v18940_v45 = vmul.f32 %v18676_v30, %v3844_v37  ;;  %v18943_v31 = vmul.f32 %v18696_v47, %v3862_v4  ;;  %v18946_v14 = vmul.f32 %v18676_v30, %v3862_v4 }
0x154d   : > { %v3980_v56 = vrot.slane %v3979_v48, 4  ;;  %v3998_v33 = vrot.slane %v3997_v26, 4  ;;  %v18949_v3 = vmul.f32 %v18696_v47, %v3853_v40  ;;  %v3972_v15 = vadd.f32 %v3971_v42, %v3970_v36 }
0x154e   : > { %v3582_v34 = vpop.f32.mrf.mxu0  ;;  %v3719_v32 = vpop.f32.mrf.mxu1  ;;  %v3990_v13 = vadd.f32 %v3989_v1, %v3988_v21  ;;  %v18952_v38 = vmul.f32 %v18676_v30, %v3853_v40  ;;  %v18955_v37 = vmul.f32 %v18696_v47, %v3871_v43  ;;  %v18958_v54 = vmul.f32 %v18676_v30, %v3871_v43 }
0x154f   : > { %v3981_v29 = vadd.f32 %v3980_v56, %v3979_v48  ;;  %v3999_v11 = vadd.f32 %v3998_v33, %v3997_v26  ;;  %v4053_v59 = vmul.f32 %v18764_v17, %v3576_v39  ;;  %v3973_v2 = vrot.slane %v3972_v15, 2  ;;  %v25068_v56 = vld [vmem:[#allocation8_spill] sm:$0xff] }
0x1550   : > { %v3584_v62 = vpop.f32.mrf.mxu0  ;;  %v3721_v60 = vpop.f32.mrf.mxu1  ;;  %v3991_v25 = vrot.slane %v3990_v13, 2  ;;  %v4055_v20 = vmul.f32 %v18784_v23, %v3713_v46  ;;  %v4061_v63 = vmul.f32 %v18753_v51, %v3582_v34  ;;  %v4166_v30 = vmul.f32 %v18961_v52, %v18849_v55 }
0x1551   : > { %v3982_v10 = vrot.slane %v3981_v29, 2  ;;  %v4000_v49 = vrot.slane %v3999_v11, 2  ;;  %v4167_v17 = vmul.f32 %v18961_v52, %v18875_v57  ;;  %v3974_v40 = vadd.f32 %v3973_v2, %v3972_v15 }
0x1552   : > { %v3588_v4 = vpop.f32.mrf.mxu0  ;;  %v3725_v47 = vpop.f32.mrf.mxu1  ;;  %v3992_v39 = vadd.f32 %v3991_v25, %v3990_v13  ;;  %v4054_v48 = vmul.f32 %v18789_v28, %v3578_v35  ;;  %v4056_v26 = vmul.f32 %v18822_v9, %v3715_v22  ;;  %v4063_v23 = vmul.f32 %v18769_v53, %v3719_v32  ;;  %v25069_v35 = vld [vmem:[#allocation9_spill] sm:$0xff] }
0x1553   : > { %v3983_v36 = vadd.f32 %v3982_v10, %v3981_v29  ;;  %v4001_v21 = vadd.f32 %v4000_v49, %v3999_v11  ;;  %v4062_v51 = vmul.f32 %v18810_v6, %v3584_v62  ;;  %v3975_v42 = vrot.slane %v3974_v40, 1  ;;  %v18980_v29 = vpop.permute.xlu1 %4207  ;;  %v25070_v10 = vld [vmem:[#allocation10_spill] sm:$0xff] }
0x1554   : > { %v3590_v46 = vpop.f32.mrf.mxu0  ;;  %v3727_v43 = vpop.f32.mrf.mxu1  ;;  %v3993_v1 = vrot.slane %v3992_v39, 1  ;;  %v4064_v33 = vmul.f32 %v25068_v56, %v3721_v60  ;;  %v4069_v34 = vmul.f32 %v18795_v41, %v3588_v4  ;;  %v4071_v15 = vmul.f32 %v18800_v16, %v3725_v47 }
0x1555   : > { %v3984_v55 = vrot.slane %v3983_v36, 1  ;;  %v4002_v57 = vrot.slane %v4001_v21, 1  ;;  %v4168_v9 = vmul.f32 %v18961_v52, %v25069_v35  ;;  %v3976_v53 = vadd.f32 %v3975_v42, %v3974_v40 }
0x1556   : > { %v3594_v13 = vpop.f32.mrf.mxu0  ;;  %v3731_v28 = vpop.f32.mrf.mxu1  ;;  %v4117_v22 = vadd.f32 %v4061_v63, %v4053_v59  ;;  %v4070_v6 = vmul.f32 %v18829_v7, %v3590_v46  ;;  %v4072_v32 = vmul.f32 %v18834_v27, %v3727_v43  ;;  %v3994_v11 = vadd.f32 %v3993_v1, %v3992_v39  ;;  %v25071_v27 = vld [vmem:[#allocation7_spill] sm:$0xff]  ;;  %v25072_v46 = vld [vmem:[#allocation6_spill] sm:$0xff] }
0x1557   : > { %v4135_v62 = vadd.f32 %v4063_v23, %v4055_v20  ;;  %v4077_v60 = vmul.f32 %v18841_v50, %v3594_v13  ;;  %v4079_v41 = vmul.f32 %v18846_v19, %v3731_v28  ;;  %v3985_v16 = vadd.f32 %v3984_v55, %v3983_v36  ;;  %v25073_v19 = vld [vmem:[#allocation5_spill] sm:$0xff]  ;;  %v18995_v1 = vpop.permute.xlu1 %4202 }
0x1558   : > { %v4126_v2 = vadd.f32 %v4062_v51, %v4054_v48  ;;  %v4144_v25 = vadd.f32 %v4064_v33, %v4056_v26  ;;  %v4169_v49 = vmul.f32 %v18961_v52, %v25070_v10  ;;  %v4003_v4 = vadd.f32 %v4002_v57, %v4001_v21  ;;  %v3596_v7 = vpop.f32.mrf.mxu0  ;;  %v3733_v47 = vpop.f32.mrf.mxu1 }
0x1559   : > { %v4118_v59 = vadd.f32 %v4117_v22, %v4069_v34  ;;  %v4136_v63 = vadd.f32 %v4135_v62, %v4071_v15  ;;  %v4182_v40 = vadd.f32 %v4166_v30, %v25071_v27  ;;  %v4021_v39 = vmul.f32 %v25072_v46, %v3976_v53 }
0x155a   : > { %v4127_v20 = vadd.f32 %v4126_v2, %v4070_v6  ;;  %v4145_v23 = vadd.f32 %v4144_v25, %v4072_v32  ;;  %v4183_v50 = vadd.f32 %v4167_v17, %v18926_v5  ;;  %v4029_v36 = vmul.f32 %v25073_v19, %v3976_v53 }
0x155b   : > { %v4023_v48 = vmul.f32 %v25072_v46, %v3994_v11  ;;  %v4119_v26 = vadd.f32 %v4118_v59, %v4077_v60  ;;  %v4137_v51 = vadd.f32 %v4136_v63, %v4079_v41  ;;  %v4031_v21 = vmul.f32 %v25073_v19, %v3994_v11 }
0x155c   : > { %v4022_v43 = vmul.f32 %v25072_v46, %v3985_v16  ;;  %v4078_v42 = vmul.f32 %v18858_v61, %v3596_v7  ;;  %v4080_v30 = vmul.f32 %v18863_v12, %v3733_v47  ;;  %v4030_v55 = vmul.f32 %v25073_v19, %v3985_v16 }
0x155d   : > { %v4024_v5 = vmul.f32 %v25072_v46, %v4003_v4  ;;  %v4120_v17 = vrot.slane %v4119_v26, 4  ;;  %v4138_v56 = vrot.slane %v4137_v51, 4  ;;  %v4184_v34 = vadd.f32 %v4168_v9, %v18933_v58 }
0x155e   : > { %v4128_v33 = vadd.f32 %v4127_v20, %v4078_v42  ;;  %v4146_v57 = vadd.f32 %v4145_v23, %v4080_v30  ;;  %v4211_v15 = vadd.f32 %v18995_v1, %v4183_v50  ;;  %v4032_v13 = vmul.f32 %v25073_v19, %v4003_v4 }
0x155f   : > { %v4121_v28 = vadd.f32 %v4120_v17, %v4119_v26  ;;  %v4139_v61 = vadd.f32 %v4138_v56, %v4137_v51  ;;  %v4185_v12 = vadd.f32 %v4169_v49, %v18937_v0  ;;  %v4037_v35 = vadd.f32 %v4021_v39, %v18929_v8 }
0x1560   : > { %v4129_v53 = vrot.slane %v4128_v33, 4  ;;  %v4147_v22 = vrot.slane %v4146_v57, 4  ;;  %v4210_v6 = vadd.f32 %v18995_v1, %v4182_v40  ;;  %v4045_v32 = vadd.f32 %v4029_v36, %v18940_v45 }
0x1561   : > { %v4039_v11 = vadd.f32 %v4023_v48, %v18943_v31  ;;  %v4122_v62 = vrot.slane %v4121_v28, 2  ;;  %v4140_v58 = vrot.slane %v4139_v61, 2  ;;  %v4212_v41 = vadd.f32 %v18995_v1, %v4184_v34 }
0x1562   : > { %v4130_v9 = vadd.f32 %v4129_v53, %v4128_v33  ;;  %v4148_v60 = vadd.f32 %v4147_v22, %v4146_v57  ;;  %v4243_v16 = vmul.f32 0.01, %v4211_v15  ;;  %v4213_v0 = vadd.f32 %v18995_v1, %v4185_v12 }
0x1563   : > { %v4123_v2 = vadd.f32 %v4122_v62, %v4121_v28  ;;  %v4141_v25 = vadd.f32 %v4140_v58, %v4139_v61  ;;  %vm4227_vm5 = vcmp.gt.f32.partialorder %v4211_v15, 0.0  ;;  %v4047_v8 = vadd.f32 %v4031_v21, %v18946_v14 }
0x1564   : > { %v4131_v10 = vrot.slane %v4130_v9, 2  ;;  %v4149_v49 = vrot.slane %v4148_v60, 2  ;;  %v4242_v4 = vmul.f32 0.01, %v4210_v6  ;;  %v4038_v45 = vadd.f32 %v4022_v43, %v18949_v3  ;;  %v25074_v43 = vld [vmem:[#allocation4_spill] sm:$0xff] }
0x1565   : > { %v4124_v31 = vrot.slane %v4123_v2, 1  ;;  %v4142_v59 = vrot.slane %v4141_v25, 1  ;;  %vm4226_vm6 = vcmp.gt.f32.partialorder %v4210_v6, 0.0  ;;  %v4244_v47 = vmul.f32 0.01, %v4212_v41 }
0x1566   : > { %v4132_v63 = vadd.f32 %v4131_v10, %v4130_v9  ;;  %v4150_v7 = vadd.f32 %v4149_v49, %v4148_v60  ;;  %v19011_v27 = vsel %vm4227_vm5, %v4211_v15, %v4243_v16  ;;  %vm4228_vm7 = vcmp.gt.f32.partialorder %v4212_v41, 0.0  ;;  %v25075_v15 = vld [vmem:[#allocation11_spill] sm:$0xff] }
0x1567   : > { %v4125_v40 = vadd.f32 %v4124_v31, %v4123_v2  ;;  %v4143_v46 = vadd.f32 %v4142_v59, %v4141_v25  ;;  %v4245_v39 = vmul.f32 0.01, %v4213_v0  ;;  %vm4229_vm8 = vcmp.gt.f32.partialorder %v4213_v0, 0.0 }
0x1568   : > { %v4133_v20 = vrot.slane %v4132_v63, 1  ;;  %v4151_v23 = vrot.slane %v4150_v7, 1  ;;  %v19013_v14 = vsel %vm4226_vm6, %v4210_v6, %v4242_v4  ;;  %v4046_v50 = vadd.f32 %v4030_v55, %v18952_v38 }
0x1569   : > { %v4170_v3 = vmul.f32 %v18961_v52, %v4125_v40  ;;  %v4172_v19 = vmul.f32 %v18961_v52, %v4143_v46  ;;  %v4274_v36 = vadd.f32 %v19011_v27, %v19013_v14  ;;  %v4040_v51 = vadd.f32 %v4024_v5, %v18955_v37 }
0x156a   : > { %v4134_v48 = vadd.f32 %v4133_v20, %v4132_v63  ;;  %v4152_v26 = vadd.f32 %v4151_v23, %v4150_v7  ;;  %v19021_v21 = vsel %vm4228_vm7, %v4212_v41, %v4244_v47  ;;  %v4178_v42 = vmul.f32 %v25074_v43, %v4125_v40 }
0x156b   : > { %v4186_v30 = vadd.f32 %v4170_v3, %v4037_v35  ;;  %v4188_v17 = vadd.f32 %v4172_v19, %v4039_v11  ;;  %v19024_v56 = vsel %vm4229_vm8, %v4213_v0, %v4245_v39  ;;  %v4048_v57 = vadd.f32 %v4032_v13, %v18958_v54 }
0x156c   : > { %v4171_v38 = vmul.f32 %v18961_v52, %v4134_v48  ;;  %v4179_v55 = vmul.f32 %v25074_v43, %v4134_v48  ;;  %v4173_v33 = vmul.f32 %v18961_v52, %v4152_v26  ;;  %v4180_v34 = vmul.f32 %v25074_v43, %v4143_v46 }
0x156d   : > { %v4214_v37 = vadd.f32 %v18995_v1, %v4186_v30  ;;  %v4275_v5 = vadd.f32 %v4274_v36, %v19021_v21  ;;  %v4218_v28 = vadd.f32 %v18980_v29, %v25075_v15  ;;  %v4216_v35 = vadd.f32 %v18995_v1, %v4188_v17 }
0x156e   : > { %v4187_v61 = vadd.f32 %v4171_v38, %v4038_v45  ;;  %v4189_v12 = vadd.f32 %v4173_v33, %v4040_v51  ;;  %v4219_v53 = vadd.f32 %v18980_v29, %v18915_v44  ;;  %v4194_v22 = vadd.f32 %v4178_v42, %v4045_v32 }
0x156f   : > { %v4195_v52 = vadd.f32 %v4179_v55, %v4046_v50  ;;  %vm4230_vm9 = vcmp.gt.f32.partialorder %v4214_v37, 0.0  ;;  %v4246_v54 = vmul.f32 0.01, %v4214_v37  ;;  %v4220_v11 = vadd.f32 %v18980_v29, %v18913_v24 }
0x1570   : > { %v4215_v13 = vadd.f32 %v18995_v1, %v4187_v61  ;;  %v4217_v6 = vadd.f32 %v18995_v1, %v4189_v12  ;;  %v4221_v62 = vadd.f32 %v18980_v29, %v18922_v18  ;;  %v4276_v9 = vadd.f32 %v4275_v5, %v19024_v56 }
0x1571   : > { %v19044_v58 = vsel %vm4230_vm9, %v4214_v37, %v4246_v54  ;;  %v4196_v60 = vadd.f32 %v4180_v34, %v4047_v8  ;;  %vm4234_vm10 = vcmp.gt.f32.partialorder %v4218_v28, 0.0  ;;  %v4181_v44 = vmul.f32 %v25074_v43, %v4152_v26 }
0x1572   : > { %vm4231_vm11 = vcmp.gt.f32.partialorder %v4215_v13, 0.0  ;;  %v4247_v32 = vmul.f32 0.01, %v4215_v13  ;;  %v4248_v41 = vmul.f32 0.01, %v4216_v35  ;;  %vm4232_vm12 = vcmp.gt.f32.partialorder %v4216_v35, 0.0 }
0x1573   : > { %v4277_v1 = vadd.f32 %v4276_v9, %v19044_v58  ;;  %v4222_v16 = vadd.f32 %v18980_v29, %v4194_v22  ;;  %v4223_v24 = vadd.f32 %v18980_v29, %v4195_v52  ;;  %vm4233_vm13 = vcmp.gt.f32.partialorder %v4217_v6, 0.0 }
0x1574   : > { %v4249_v18 = vmul.f32 0.01, %v4217_v6  ;;  %v4263_v2 = vsel %vm4231_vm11, %v4215_v13, %v4247_v32  ;;  %vm4235_vm14 = vcmp.gt.f32.partialorder %v4219_v53, 0.0  ;;  %v4250_v0 = vmul.f32 0.01, %v4218_v28 }
0x1575   : > { %v4278_v25 = vadd.f32 %v4277_v1, %v4263_v2  ;;  %v4251_v8 = vmul.f32 0.01, %v4219_v53  ;;  %v4252_v10 = vmul.f32 0.01, %v4220_v11  ;;  %v4264_v49 = vsel %vm4232_vm12, %v4216_v35, %v4248_v41 }
0x1576   : > { %v4197_v4 = vadd.f32 %v4181_v44, %v4048_v57  ;;  %vm4236_vm15 = vcmp.gt.f32.partialorder %v4220_v11, 0.0  ;;  %v4253_v31 = vmul.f32 0.01, %v4221_v62  ;;  %v4254_v59 = vmul.f32 0.01, %v4222_v16 }
0x1577   : > { %v4279_v45 = vadd.f32 %v4278_v25, %v4264_v49  ;;  %v19052_v63 = vsel %vm4234_vm10, %v4218_v28, %v4250_v0  ;;  %v4265_v7 = vsel %vm4233_vm13, %v4217_v6, %v4249_v18  ;;  %vm4237_vm1 = vcmp.gt.f32.partialorder %v4221_v62, 0.0 }
0x1578   : > { %vm4238_vm2 = vcmp.gt.f32.partialorder %v4222_v16, 0.0  ;;  %v4267_v47 = vsel %vm4235_vm14, %v4219_v53, %v4251_v8  ;;  %v4224_v46 = vadd.f32 %v18980_v29, %v4196_v60  ;;  %v4255_v39 = vmul.f32 0.01, %v4223_v24 }
0x1579   : > { %v4280_v40 = vadd.f32 %v4279_v45, %v4265_v7  ;;  %v4268_v20 = vsel %vm4236_vm15, %v4220_v11, %v4252_v10  ;;  %vm4239_vm4 = vcmp.gt.f32.partialorder %v4223_v24, 0.0  ;;  %v4283_v23 = vsel %vm804_vm0, %v19052_v63, 0.0 }
0x157a   : > { %v4284_v50 = vsel %vm804_vm0, %v4267_v47, 0.0  ;;  %v4225_v3 = vadd.f32 %v18980_v29, %v4197_v4  ;;  %v4269_v19 = vsel %vm4237_vm1, %v4221_v62, %v4253_v31  ;;  %v4270_v36 = vsel %vm4238_vm2, %v4222_v16, %v4254_v59 }
0x157b   : > { %4281 = vadd.xlane.f32.xlu0 %v4280_v40  ;;  %v4285_v48 = vadd.f32 %v4284_v50, %v4283_v23  ;;  %v4286_v26 = vsel %vm804_vm0, %v4268_v20, 0.0  ;;  %v4256_v51 = vmul.f32 0.01, %v4224_v46  ;;  %v4271_v43 = vsel %vm4239_vm4, %v4223_v24, %v4255_v39 }
0x157c   : > { %vm4240_vm5 = vcmp.gt.f32.partialorder %v4224_v46, 0.0  ;;  %v4288_v30 = vsel %vm804_vm0, %v4269_v19, 0.0  ;;  %v4290_v17 = vsel %vm804_vm0, %v4270_v36, 0.0  ;;  %v4257_v38 = vmul.f32 0.01, %v4225_v3 }
0x157d   : > { %v4287_v42 = vadd.f32 %v4286_v26, %v4285_v48  ;;  %vm4241_vm6 = vcmp.gt.f32.partialorder %v4225_v3, 0.0  ;;  %v4292_v33 = vsel %vm804_vm0, %v4271_v43, 0.0  ;;  %v4272_v57 = vsel %vm4240_vm5, %v4224_v46, %v4256_v51 }
0x157e   : > { %v4273_v34 = vsel %vm4241_vm6, %v4225_v3, %v4257_v38  ;;  %v4294_v5 = vsel %vm804_vm0, %v4272_v57, 0.0  ;;  %vm4609_vm8 = vcmask 97280  }
0x157f   : > { %v4289_v55 = vadd.f32 %v4288_v30, %v4287_v42  ;;  %v4296_v28 = vsel %vm804_vm0, %v4273_v34, 0.0 }
0x1581   : > { %v4291_v29 = vadd.f32 %v4290_v17, %v4289_v55 }
0x1583   : > { %v4293_v37 = vadd.f32 %v4292_v33, %v4291_v29 }
0x1585   : > { %v4295_v15 = vadd.f32 %v4294_v5, %v4293_v37 }
0x1587   : > { %v4297_v61 = vadd.f32 %v4296_v28, %v4295_v15 }
0x1589   : > { %4298 = vadd.xlane.f32.xlu1 %v4297_v61 }
0x1604   : > { %v4282_v12 = vpop.xlane.xlu0 %4281 }
0x1605   : > { %v4301_v35 = vmul.f32 0.0009765625, %v4282_v12 }
0x1607   : > { %v19066_v53 = vsub.f32 %v19013_v14, %v4301_v35  ;;  %v4304_v22 = vsub.f32 %v19011_v27, %v4301_v35  ;;  %v19070_v52 = vsub.f32 %v19021_v21, %v4301_v35  ;;  %v19073_v54 = vsub.f32 %v19024_v56, %v4301_v35 }
0x1608   : > { %v19078_v11 = vsub.f32 %v19044_v58, %v4301_v35  ;;  %v19082_v9 = vsub.f32 %v4263_v2, %v4301_v35  ;;  %v19086_v60 = vsub.f32 %v4264_v49, %v4301_v35  ;;  %v4310_v32 = vsub.f32 %v4265_v7, %v4301_v35 }
0x1609   : > { %v4319_v13 = vmul.f32 %v19066_v53, %v19066_v53  ;;  %v4320_v6 = vmul.f32 %v4304_v22, %v4304_v22  ;;  %v4321_v62 = vmul.f32 %v19070_v52, %v19070_v52  ;;  %v4322_v27 = vmul.f32 %v19073_v54, %v19073_v54 }
0x160a   : > { %v4323_v56 = vmul.f32 %v19078_v11, %v19078_v11  ;;  %v4324_v58 = vmul.f32 %v19082_v9, %v19082_v9  ;;  %v4325_v24 = vmul.f32 %v19086_v60, %v19086_v60  ;;  %v4326_v2 = vmul.f32 %v4310_v32, %v4310_v32 }
0x160b   : > { %v4335_v14 = vadd.f32 %v4320_v6, %v4319_v13 }
0x160d   : > { %v4336_v21 = vadd.f32 %v4335_v14, %v4321_v62 }
0x160f   : > { %v4337_v44 = vadd.f32 %v4336_v21, %v4322_v27 }
0x1611   : > { %v4338_v41 = vadd.f32 %v4337_v44, %v4323_v56 }
0x1612   : > { %v4299_v1 = vpop.xlane.xlu1 %4298 }
0x1613   : > { %v4302_v16 = vmul.f32 0.0009765625, %v4299_v1  ;;  %v4339_v18 = vadd.f32 %v4338_v41, %v4324_v58 }
0x1615   : > { %v4340_v25 = vadd.f32 %v4339_v18, %v4325_v24  ;;  %v19095_v0 = vsub.f32 %v19052_v63, %v4302_v16  ;;  %v19097_v8 = vsub.f32 %v4267_v47, %v4302_v16  ;;  %v19099_v10 = vsub.f32 %v4268_v20, %v4302_v16 }
0x1616   : > { %v19101_v49 = vsub.f32 %v4269_v19, %v4302_v16  ;;  %v19103_v45 = vsub.f32 %v4270_v36, %v4302_v16  ;;  %v19111_v63 = vsub.f32 %v4271_v43, %v4302_v16  ;;  %v19117_v20 = vsub.f32 %v4272_v57, %v4302_v16 }
0x1617   : > { %v4341_v4 = vadd.f32 %v4340_v25, %v4326_v2  ;;  %v4327_v31 = vmul.f32 %v19095_v0, %v19095_v0  ;;  %v4328_v59 = vmul.f32 %v19097_v8, %v19097_v8  ;;  %v4329_v7 = vmul.f32 %v19099_v10, %v19099_v10 }
0x1618   : > { %v4330_v47 = vmul.f32 %v19101_v49, %v19101_v49  ;;  %v4331_v23 = vmul.f32 %v19103_v45, %v19103_v45  ;;  %v19122_v19 = vsub.f32 %v4273_v34, %v4302_v16  ;;  %v4332_v36 = vmul.f32 %v19111_v63, %v19111_v63 }
0x1619   : > { %4342 = vadd.xlane.f32.xlu1 %v4341_v4  ;;  %v4344_v40 = vsel %vm804_vm0, %v4327_v31, 0.0  ;;  %v4345_v46 = vsel %vm804_vm0, %v4328_v59, 0.0  ;;  %v4347_v50 = vsel %vm804_vm0, %v4329_v7, 0.0  ;;  %v4333_v51 = vmul.f32 %v19117_v20, %v19117_v20 }
0x161a   : > { %v4346_v39 = vadd.f32 %v4345_v46, %v4344_v40  ;;  %v4349_v48 = vsel %vm804_vm0, %v4330_v47, 0.0  ;;  %v4351_v43 = vsel %vm804_vm0, %v4331_v23, 0.0  ;;  %v4334_v30 = vmul.f32 %v19122_v19, %v19122_v19 }
0x161b   : > { %v4353_v17 = vsel %vm804_vm0, %v4332_v36, 0.0  ;;  %v4355_v55 = vsel %vm804_vm0, %v4333_v51, 0.0 }
0x161c   : > { %v4348_v3 = vadd.f32 %v4347_v50, %v4346_v39  ;;  %v4357_v57 = vsel %vm804_vm0, %v4334_v30, 0.0 }
0x161e   : > { %v4350_v26 = vadd.f32 %v4349_v48, %v4348_v3 }
0x1620   : > { %v4352_v42 = vadd.f32 %v4351_v43, %v4350_v26 }
0x1622   : > { %v4354_v38 = vadd.f32 %v4353_v17, %v4352_v42 }
0x1624   : > { %v4356_v33 = vadd.f32 %v4355_v55, %v4354_v38 }
0x1626   : > { %v4358_v29 = vadd.f32 %v4357_v57, %v4356_v33 }
0x1628   : > { %4359 = vadd.xlane.f32.xlu0 %v4358_v29 }
0x16a2   : > { %v4343_v34 = vpop.xlane.xlu1 %4342 }
0x16a3   : > { %v4361_v37 = vmul.f32 0.0009765625, %v4343_v34 }
0x16a5   : > { %v4363_v5 = vadd.f32 1e-05, %v4361_v37 }
0x16a7   : > { %17733 = vrsqrt.f32 %v4363_v5 }
0x16b4   : > { %v17734_v15 = vpop.eup %17733 }
0x16b5   : > { %v19135_v28 = vmul.f32 %v17734_v15, %v4304_v22  ;;  %v19138_v61 = vmul.f32 %v17734_v15, %v19066_v53  ;;  %v19145_v12 = vmul.f32 %v17734_v15, %v19070_v52  ;;  %v19147_v35 = vmul.f32 %v17734_v15, %v4310_v32 }
0x16b6   : > { %v19154_v53 = vmul.f32 %v17734_v15, %v19078_v11  ;;  %v19157_v22 = vmul.f32 %v17734_v15, %v19073_v54  ;;  %v19164_v52 = vmul.f32 %v17734_v15, %v19082_v9  ;;  %v19171_v13 = vmul.f32 %v17734_v15, %v19086_v60  ;;  %v4360_v54 = vpop.xlane.xlu0 %4359 }
0x16b7   : > { %25076 = vst [vmem:[#allocation8_spill] sm:$0xff] %v19135_v28  ;;  %25077 = vst [vmem:[#allocation9_spill] sm:$0xff] %v19138_v61  ;;  %4500 = vrot.lane.b32.xlu1 %v19135_v28, %s24954_s4  ;;  %4496 = vrot.lane.b32.xlu0 %v19138_v61, %s24954_s4  ;;  %v4362_v6 = vmul.f32 0.0009765625, %v4360_v54 }
0x16b8   : > { %25078 = vst [vmem:[#allocation10_spill] sm:$0xff] %v19145_v12  ;;  %25079 = vst [vmem:[#allocation7_spill] sm:$0xff] %v19147_v35 }
0x16b9   : > { %25080 = vst [vmem:[#allocation6_spill] sm:$0xff] %v19154_v53  ;;  %25081 = vst [vmem:[#allocation5_spill] sm:$0xff] %v19157_v22  ;;  %v4364_v11 = vadd.f32 1e-05, %v4362_v6 }
0x16ba   : > { %25082 = vst [vmem:[#allocation4_spill] sm:$0xff] %v19164_v52  ;;  %25083 = vst [vmem:[#allocation11_spill] sm:$0xff] %v19171_v13 }
0x16bb   : > { %4504 = vrot.lane.b32.xlu1 %v19145_v12, %s24954_s4  ;;  %4524 = vrot.lane.b32.xlu0 %v19147_v35, %s24954_s4  ;;  %17735 = vrsqrt.f32 %v4364_v11 }
0x16bf   : > { %4512 = vrot.lane.b32.xlu1 %v19154_v53, %s24954_s4  ;;  %4508 = vrot.lane.b32.xlu0 %v19157_v22, %s24954_s4 }
0x16c3   : > { %4387 = vrot.lane.b32.xlu1 %v19135_v28, %s24952_s0  ;;  %4516 = vrot.lane.b32.xlu0 %v19164_v52, %s24954_s4 }
0x16c7   : > { %4391 = vrot.lane.b32.xlu1 %v19145_v12, %s24952_s0  ;;  %4520 = vrot.lane.b32.xlu0 %v19171_v13, %s24954_s4 }
0x16c8   : > { %v17736_v62 = vpop.eup %17735 }
0x16c9   : > { %v19226_v14 = vmul.f32 %v17736_v62, %v19097_v8  ;;  %v19233_v9 = vmul.f32 %v17736_v62, %v19122_v19  ;;  %v19240_v27 = vmul.f32 %v17736_v62, %v19099_v10  ;;  %v19247_v21 = vmul.f32 %v17736_v62, %v19103_v45 }
0x16ca   : > { %v19258_v60 = vmul.f32 %v17736_v62, %v19117_v20  ;;  %v19265_v56 = vmul.f32 %v17736_v62, %v19095_v0  ;;  %v19288_v44 = vmul.f32 %v17736_v62, %v19101_v49  ;;  %v19299_v41 = vmul.f32 %v17736_v62, %v19111_v63 }
0x16cb   : > { %4399 = vrot.lane.b32.xlu1 %v19154_v53, %s24952_s0  ;;  %4383 = vrot.lane.b32.xlu0 %v19138_v61, %s24952_s0  ;;  %25084 = vst [vmem:[#allocation12_spill] sm:$0xff] %v19226_v14  ;;  %25085 = vst [vmem:[#allocation13_spill] sm:$0xff] %v19233_v9 }
0x16cc   : > { %25086 = vst [vmem:[#allocation14_spill] sm:$0xff] %v19240_v27  ;;  %25087 = vst [vmem:[#allocation15_spill] sm:$0xff] %v19247_v21 }
0x16cd   : > { %25088 = vst [vmem:[#allocation16_spill] sm:$0xff] %v19258_v60  ;;  %25089 = vst [vmem:[#allocation17_spill] sm:$0xff] %v19265_v56 }
0x16ce   : > { %25090 = vst [vmem:[#allocation18_spill] sm:$0xff] %v19288_v44  ;;  %25091 = vst [vmem:[#allocation19_spill] sm:$0xff] %v19299_v41 }
0x16cf   : > { %5290 = vrot.lane.b32.xlu1 %v19135_v28, %s24773_s2  ;;  %4411 = vrot.lane.b32.xlu0 %v19147_v35, %s24952_s0 }
0x16d3   : > { %5294 = vrot.lane.b32.xlu1 %v19145_v12, %s24773_s2  ;;  %4395 = vrot.lane.b32.xlu0 %v19157_v22, %s24952_s0 }
0x16d7   : > { %5302 = vrot.lane.b32.xlu1 %v19154_v53, %s24773_s2  ;;  %4403 = vrot.lane.b32.xlu0 %v19164_v52, %s24952_s0 }
0x16db   : > { %5757 = vrot.lane.b32.xlu1 %v19135_v28, %s24737_s6  ;;  %4407 = vrot.lane.b32.xlu0 %v19171_v13, %s24952_s0 }
0x16df   : > { %5761 = vrot.lane.b32.xlu1 %v19145_v12, %s24737_s6  ;;  %5286 = vrot.lane.b32.xlu0 %v19138_v61, %s24773_s2 }
0x16e3   : > { %5769 = vrot.lane.b32.xlu1 %v19154_v53, %s24737_s6  ;;  %5314 = vrot.lane.b32.xlu0 %v19147_v35, %s24773_s2 }
0x16e7   : > { %6585 = vrot.lane.b32.xlu1 %v19145_v12, %s24735_s5  ;;  %5298 = vrot.lane.b32.xlu0 %v19157_v22, %s24773_s2 }
0x16eb   : > { %6589 = vrot.lane.b32.xlu1 %v19157_v22, %s24735_s5  ;;  %5306 = vrot.lane.b32.xlu0 %v19164_v52, %s24773_s2 }
0x16ef   : > { %6597 = vrot.lane.b32.xlu1 %v19164_v52, %s24735_s5  ;;  %5310 = vrot.lane.b32.xlu0 %v19171_v13, %s24773_s2 }
0x16f3   : > { %7052 = vrot.lane.b32.xlu1 %v19145_v12, %s24771_s30  ;;  %5753 = vrot.lane.b32.xlu0 %v19138_v61, %s24737_s6 }
0x16f7   : > { %7056 = vrot.lane.b32.xlu1 %v19157_v22, %s24771_s30  ;;  %5781 = vrot.lane.b32.xlu0 %v19147_v35, %s24737_s6 }
0x16fb   : > { %4502 = vrot.lane.b32.xlu1 %v19226_v14, %s24954_s4  ;;  %5765 = vrot.lane.b32.xlu0 %v19157_v22, %s24737_s6 }
0x16ff   : > { %4526 = vrot.lane.b32.xlu1 %v19233_v9, %s24954_s4  ;;  %5773 = vrot.lane.b32.xlu0 %v19164_v52, %s24737_s6 }
0x1703   : > { %4506 = vrot.lane.b32.xlu1 %v19240_v27, %s24954_s4  ;;  %5777 = vrot.lane.b32.xlu0 %v19171_v13, %s24737_s6 }
0x1707   : > { %4514 = vrot.lane.b32.xlu1 %v19247_v21, %s24954_s4  ;;  %6581 = vrot.lane.b32.xlu0 %v19135_v28, %s24735_s5 }
0x170b   : > { %7064 = vrot.lane.b32.xlu1 %v19164_v52, %s24771_s30  ;;  %6577 = vrot.lane.b32.xlu0 %v19138_v61, %s24735_s5 }
0x170f   : > { %4522 = vrot.lane.b32.xlu1 %v19258_v60, %s24954_s4  ;;  %6593 = vrot.lane.b32.xlu0 %v19154_v53, %s24735_s5 }
0x1713   : > { %4385 = vrot.lane.b32.xlu1 %v19265_v56, %s24952_s0  ;;  %6601 = vrot.lane.b32.xlu0 %v19171_v13, %s24735_s5 }
0x1717   : > { %4413 = vrot.lane.b32.xlu1 %v19233_v9, %s24952_s0  ;;  %6605 = vrot.lane.b32.xlu0 %v19147_v35, %s24735_s5 }
0x171b   : > { %4393 = vrot.lane.b32.xlu1 %v19240_v27, %s24952_s0  ;;  %7048 = vrot.lane.b32.xlu0 %v19135_v28, %s24771_s30 }
0x171f   : > { %4401 = vrot.lane.b32.xlu1 %v19247_v21, %s24952_s0  ;;  %7044 = vrot.lane.b32.xlu0 %v19138_v61, %s24771_s30 }
0x1723   : > { %4409 = vrot.lane.b32.xlu1 %v19258_v60, %s24952_s0  ;;  %4498 = vrot.lane.b32.xlu0 %v19265_v56, %s24954_s4 }
0x1727   : > { %5288 = vrot.lane.b32.xlu1 %v19265_v56, %s24773_s2  ;;  %4510 = vrot.lane.b32.xlu0 %v19288_v44, %s24954_s4 }
0x1729   : > { %v19294_v32 = vpop.permute.xlu1 %4500  ;;  %v19296_v58 = vpop.permute.xlu0 %4496 }
0x172b   : > { %5316 = vrot.lane.b32.xlu1 %v19233_v9, %s24773_s2  ;;  %4518 = vrot.lane.b32.xlu0 %v19299_v41, %s24954_s4 }
0x172d   : > { %v19305_v1 = vpop.permute.xlu1 %4504  ;;  %v19307_v16 = vpop.permute.xlu0 %4524 }
0x172f   : > { %5296 = vrot.lane.b32.xlu1 %v19240_v27, %s24773_s2  ;;  %7060 = vrot.lane.b32.xlu0 %v19154_v53, %s24771_s30 }
0x1731   : > { %v19313_v24 = vpop.permute.xlu1 %4512  ;;  %v19315_v18 = vpop.permute.xlu0 %4508 }
0x1733   : > { %5304 = vrot.lane.b32.xlu1 %v19247_v21, %s24773_s2  ;;  %4389 = vrot.lane.b32.xlu0 %v19226_v14, %s24952_s0 }
0x1735   : > { %v19321_v2 = vpop.permute.xlu1 %4387  ;;  %v19323_v25 = vpop.permute.xlu0 %4516 }
0x1737   : > { %5312 = vrot.lane.b32.xlu1 %v19258_v60, %s24773_s2  ;;  %4397 = vrot.lane.b32.xlu0 %v19288_v44, %s24952_s0 }
0x1739   : > { %v19329_v0 = vpop.permute.xlu1 %4391  ;;  %v19331_v8 = vpop.permute.xlu0 %4520 }
0x173b   : > { %5755 = vrot.lane.b32.xlu1 %v19265_v56, %s24737_s6  ;;  %4405 = vrot.lane.b32.xlu0 %v19299_v41, %s24952_s0 }
0x173d   : > { %v19337_v10 = vpop.permute.xlu1 %4399  ;;  %v19339_v49 = vpop.permute.xlu0 %4383 }
0x173f   : > { %5783 = vrot.lane.b32.xlu1 %v19233_v9, %s24737_s6  ;;  %7068 = vrot.lane.b32.xlu0 %v19171_v13, %s24771_s30 }
0x1741   : > { %v19345_v4 = vpop.permute.xlu1 %5290  ;;  %v19347_v45 = vpop.permute.xlu0 %4411 }
0x1743   : > { %5763 = vrot.lane.b32.xlu1 %v19240_v27, %s24737_s6  ;;  %5292 = vrot.lane.b32.xlu0 %v19226_v14, %s24773_s2 }
0x1745   : > { %v19353_v31 = vpop.permute.xlu1 %5294  ;;  %v19355_v59 = vpop.permute.xlu0 %4395 }
0x1746   : > { %25092 = vst [vmem:[#allocation20_spill] sm:$0xff] %v19353_v31 }
0x1747   : > { %5771 = vrot.lane.b32.xlu1 %v19247_v21, %s24737_s6  ;;  %5300 = vrot.lane.b32.xlu0 %v19288_v44, %s24773_s2 }
0x1749   : > { %v19361_v7 = vpop.permute.xlu1 %5302  ;;  %v19363_v63 = vpop.permute.xlu0 %4403 }
0x174a   : > { %25093 = vst [vmem:[#allocation21_spill] sm:$0xff] %v19361_v7 }
0x174b   : > { %7519 = vrot.lane.b32.xlu1 %v19145_v12, %s24785_s19  ;;  %5308 = vrot.lane.b32.xlu0 %v19299_v41, %s24773_s2  ;;  %s25302_s2 = smov 127  }
0x174d   : > { %v19369_v47 = vpop.permute.xlu1 %5757  ;;  %v19371_v40 = vpop.permute.xlu0 %4407 }
0x174e   : > { %25094 = vst [vmem:[#allocation22_spill] sm:$0xff] %v19369_v47 }
0x174f   : > { %7523 = vrot.lane.b32.xlu1 %v19157_v22, %s24785_s19  ;;  %7072 = vrot.lane.b32.xlu0 %v19147_v35, %s24771_s30 }
0x1751   : > { %v19377_v46 = vpop.permute.xlu1 %5761  ;;  %v19379_v39 = vpop.permute.xlu0 %5286 }
0x1752   : > { %25095 = vst [vmem:[#allocation23_spill] sm:$0xff] %v19377_v46 }
0x1753   : > { %7531 = vrot.lane.b32.xlu1 %v19164_v52, %s24785_s19  ;;  %5759 = vrot.lane.b32.xlu0 %v19226_v14, %s24737_s6 }
0x1755   : > { %v19385_v20 = vpop.permute.xlu1 %5769  ;;  %v19387_v23 = vpop.permute.xlu0 %5314 }
0x1756   : > { %25096 = vst [vmem:[#allocation24_spill] sm:$0xff] %v19385_v20  ;;  %25097 = vst [vmem:[#allocation25_spill] sm:$0xff] %v19387_v23 }
0x1757   : > { %5779 = vrot.lane.b32.xlu1 %v19258_v60, %s24737_s6  ;;  %5767 = vrot.lane.b32.xlu0 %v19288_v44, %s24737_s6 }
0x1759   : > { %v19393_v50 = vpop.permute.xlu1 %6585  ;;  %v19395_v3 = vpop.permute.xlu0 %5298 }
0x175a   : > { %25098 = vst [vmem:[#allocation26_spill] sm:$0xff] %v19393_v50  ;;  %25099 = vst [vmem:[#allocation27_spill] sm:$0xff] %v19395_v3 }
0x175b   : > { %6583 = vrot.lane.b32.xlu1 %v19226_v14, %s24735_s5  ;;  %5775 = vrot.lane.b32.xlu0 %v19299_v41, %s24737_s6  ;;  %s25300_s6 = smov 31  }
0x175d   : > { %v19401_v19 = vpop.permute.xlu1 %6589  ;;  %v19403_v36 = vpop.permute.xlu0 %5306 }
0x175e   : > { %25100 = vst [vmem:[#allocation28_spill] sm:$0xff] %v19401_v19  ;;  %25101 = vst [vmem:[#allocation29_spill] sm:$0xff] %v19403_v36 }
0x175f   : > { %6579 = vrot.lane.b32.xlu1 %v19265_v56, %s24735_s5  ;;  %7515 = vrot.lane.b32.xlu0 %v19135_v28, %s24785_s19 }
0x1761   : > { %v19409_v48 = vpop.permute.xlu1 %6597  ;;  %v19411_v26 = vpop.permute.xlu0 %5310 }
0x1762   : > { %25102 = vst [vmem:[#allocation30_spill] sm:$0xff] %v19409_v48  ;;  %25103 = vst [vmem:[#allocation31_spill] sm:$0xff] %v19411_v26 }
0x1763   : > { %6591 = vrot.lane.b32.xlu1 %v19288_v44, %s24735_s5  ;;  %7511 = vrot.lane.b32.xlu0 %v19138_v61, %s24785_s19 }
0x1765   : > { %v19417_v51 = vpop.permute.xlu1 %7052  ;;  %v19419_v43 = vpop.permute.xlu0 %5753 }
0x1766   : > { %25104 = vst [vmem:[#allocation32_spill] sm:$0xff] %v19417_v51  ;;  %25105 = vst [vmem:[#allocation33_spill] sm:$0xff] %v19419_v43 }
0x1767   : > { %6599 = vrot.lane.b32.xlu1 %v19299_v41, %s24735_s5  ;;  %7527 = vrot.lane.b32.xlu0 %v19154_v53, %s24785_s19 }
0x1769   : > { %v19425_v42 = vpop.permute.xlu1 %7056  ;;  %v19427_v30 = vpop.permute.xlu0 %5781 }
0x176a   : > { %25106 = vst [vmem:[#allocation34_spill] sm:$0xff] %v19425_v42  ;;  %25107 = vst [vmem:[#allocation35_spill] sm:$0xff] %v19427_v30 }
0x176b   : > { %7986 = vrot.lane.b32.xlu1 %v19145_v12, %s24783_s26  ;;  %7535 = vrot.lane.b32.xlu0 %v19171_v13, %s24785_s19 }
0x176d   : > { %v19433_v17 = vpop.permute.xlu1 %4502  ;;  %v19435_v38 = vpop.permute.xlu0 %5765 }
0x176e   : > { %25108 = vst [vmem:[#allocation36_spill] sm:$0xff] %v19435_v38 }
0x176f   : > { %6607 = vrot.lane.b32.xlu1 %v19233_v9, %s24735_s5  ;;  %7539 = vrot.lane.b32.xlu0 %v19147_v35, %s24785_s19 }
0x1771   : > { %v19441_v55 = vpop.permute.xlu1 %4526  ;;  %v19443_v33 = vpop.permute.xlu0 %5773 }
0x1772   : > { %25109 = vst [vmem:[#allocation37_spill] sm:$0xff] %v19443_v33 }
0x1773   : > { %7050 = vrot.lane.b32.xlu1 %v19226_v14, %s24771_s30  ;;  %6587 = vrot.lane.b32.xlu0 %v19240_v27, %s24735_s5 }
0x1775   : > { %v19449_v57 = vpop.permute.xlu1 %4506  ;;  %v19451_v29 = vpop.permute.xlu0 %5777 }
0x1776   : > { %25110 = vst [vmem:[#allocation38_spill] sm:$0xff] %v19451_v29 }
0x1777   : > { %7046 = vrot.lane.b32.xlu1 %v19265_v56, %s24771_s30  ;;  %6595 = vrot.lane.b32.xlu0 %v19247_v21, %s24735_s5 }
0x1779   : > { %v19457_v34 = vpop.permute.xlu1 %4514  ;;  %v19459_v37 = vpop.permute.xlu0 %6581 }
0x177a   : > { %25111 = vst [vmem:[#allocation39_spill] sm:$0xff] %v19459_v37 }
0x177b   : > { %7058 = vrot.lane.b32.xlu1 %v19288_v44, %s24771_s30  ;;  %6603 = vrot.lane.b32.xlu0 %v19258_v60, %s24735_s5  ;;  %s25301_s5 = smov 1  }
0x177d   : > { %v19465_v5 = vpop.permute.xlu1 %7064  ;;  %v19467_v15 = vpop.permute.xlu0 %6577 }
0x177e   : > { %25112 = vst [vmem:[#allocation40_spill] sm:$0xff] %v19465_v5  ;;  %25113 = vst [vmem:[#allocation41_spill] sm:$0xff] %v19467_v15  ;;  %v4415_v5 = vlaneseq  ;;  %v16728_v15 = vld [vmem:[%s24704_s20 + $0x1] ss:$8 sm:$0xf0] }
0x177f   : > { %7066 = vrot.lane.b32.xlu1 %v19299_v41, %s24771_s30  ;;  %7982 = vrot.lane.b32.xlu0 %v19135_v28, %s24783_s26 }
0x1780   : > { %v4439_v48 = vshrl.u32 %v4415_v5, 7 }
0x1781   : > { %v19473_v54 = vpop.permute.xlu1 %4522  ;;  %v19475_v6 = vpop.permute.xlu0 %6593 }
0x1782   : > { %25114 = vst [vmem:[#allocation42_spill] sm:$0xff] %v19475_v6  ;;  %v16727_v6 = vld [vmem:[%s24704_s20 + $0x1] ss:$8 sm:$0xf]  ;;  %v19513_v50 = vsub.s32 0, %v4439_v48  ;;  %v19536_v28 = vsub.s32 2, %v4439_v48 }
0x1783   : > { %7990 = vrot.lane.b32.xlu1 %v19157_v22, %s24783_s26  ;;  %7054 = vrot.lane.b32.xlu0 %v19240_v27, %s24771_s30  ;;  %v4548_v37 = vor.u32 %v16728_v15, %v16727_v6  ;;  %v19519_v22 = vsub.s32 1, %v4439_v48  ;;  %v19558_v30 = vsub.s32 4, %v4439_v48  ;;  %v19560_v43 = vsub.s32 6, %v4439_v48 }
0x1784   : > { %25119 = vst [vmem:[#allocation47_spill] sm:$0xff] %v19513_v50  ;;  %v19572_v7 = vsub.s32 5, %v4439_v48  ;;  %v19587_v3 = vsub.s32 7, %v4439_v48 }
0x1785   : > { %v19481_v11 = vpop.permute.xlu1 %4385  ;;  %v19483_v62 = vpop.permute.xlu0 %6601  ;;  %v19532_v6 = vrot.slane %v4548_v37, %v19519_v22 }
0x1786   : > { %25115 = vst [vmem:[#allocation43_spill] sm:$0xff] %v19483_v62 }
0x1787   : > { %7074 = vrot.lane.b32.xlu1 %v19233_v9, %s24771_s30  ;;  %7062 = vrot.lane.b32.xlu0 %v19247_v21, %s24771_s30  ;;  %25122 = vst [vmem:[#allocation50_spill] sm:$0xff] %v19532_v6 }
0x1789   : > { %v19489_v42 = vpop.permute.xlu1 %4413  ;;  %v19491_v51 = vpop.permute.xlu0 %6605 }
0x178a   : > { %25116 = vst [vmem:[#allocation44_spill] sm:$0xff] %v19491_v51  ;;  %v19511_v51 = vand.u32 127, %v4415_v5  ;;  %v19527_v5 = vrot.slane %v4548_v37, %v19513_v50 }
0x178b   : > { %7517 = vrot.lane.b32.xlu1 %v19226_v14, %s24785_s19  ;;  %7070 = vrot.lane.b32.xlu0 %v19258_v60, %s24771_s30  ;;  %s25303_s30 = smov 97  }
0x178c   : > { %25118 = vst [vmem:[#allocation46_spill] sm:$0xff] %v19511_v51  ;;  %vm4528_vm7 = vcmp.lt.s32.totalorder %v19511_v51, 32  ;;  %25121 = vst [vmem:[#allocation49_spill] sm:$0xff] %v19527_v5  ;;  %vm4417_vm9 = vcmp.lt.s32.totalorder %v19511_v51, 33  ;;  %vm5318_vm10 = vcmp.lt.s32.totalorder %v19511_v51, 31  ;;  %vm5785_vm11 = vcmp.lt.s32.totalorder %v19511_v51, 1 }
0x178d   : > { %v19497_v19 = vpop.permute.xlu1 %4393  ;;  %v19499_v62 = vpop.permute.xlu0 %7048  ;;  %v4541_v33 = vsel %vm4528_vm7, %v19296_v58, %v19294_v32  ;;  %v4537_v36 = vsel %vm4528_vm7, %v19305_v1, %v19315_v18  ;;  %vm6609_vm12 = vcmp.lt.s32.totalorder %v19511_v51, 127  ;;  %vm7076_vm13 = vcmp.lt.s32.totalorder %v19511_v51, 97 }
0x178e   : > { %25117 = vst [vmem:[#allocation45_spill] sm:$0xff] %v19499_v62  ;;  %vm7543_vm14 = vcmp.lt.s32.totalorder %v19511_v51, 96  ;;  %vm8010_vm15 = vcmp.lt.s32.totalorder %v19511_v51, 95 }
0x178f   : > { %7513 = vrot.lane.b32.xlu1 %v19265_v56, %s24785_s19  ;;  %7978 = vrot.lane.b32.xlu0 %v19138_v61, %s24783_s26 }
0x1791   : > { %v19515_v62 = vpop.permute.xlu1 %4401  ;;  %v19517_v12 = vpop.permute.xlu0 %7044 }
0x1792   : > { %25120 = vst [vmem:[#allocation48_spill] sm:$0xff] %v19517_v12  ;;  %v19534_v12 = vsub.s32 3, %v4439_v48  ;;  %v19604_v48 = vrot.slane %v4548_v37, %v19558_v30 }
0x1793   : > { %7525 = vrot.lane.b32.xlu1 %v19288_v44, %s24785_s19  ;;  %7521 = vrot.lane.b32.xlu0 %v19240_v27, %s24785_s19 }
0x1794   : > { %v19570_v47 = vrot.slane %v4548_v37, %v19534_v12  ;;  %25125 = vst [vmem:[#allocation53_spill] sm:$0xff] %v19604_v48 }
0x1795   : > { %v19529_v15 = vpop.permute.xlu1 %4409  ;;  %v4499_v61 = vpop.permute.xlu0 %4498 }
0x1796   : > { %v4542_v29 = vsel %vm4528_vm7, %v4499_v61, %v19433_v17  ;;  %v4544_v20 = vsel %vm4528_vm7, %v19441_v55, %v4499_v61  ;;  %v4543_v61 = vsel %vm4528_vm7, %v19307_v16, %v19296_v58  ;;  %25123 = vst [vmem:[#allocation51_spill] sm:$0xff] %v19570_v47  ;;  %v19575_v58 = vrot.slane %v4548_v37, %v19536_v28 }
0x1797   : > { %v4598_v46 = vmul.f32 %v19527_v5, %v4544_v20  ;;  %v4599_v38 = vmul.f32 %v19532_v6, %v4542_v29  ;;  %7533 = vrot.lane.b32.xlu1 %v19299_v41, %s24785_s19  ;;  %7529 = vrot.lane.b32.xlu0 %v19247_v21, %s24785_s19  ;;  %v4540_v20 = vsel %vm4528_vm7, %v19433_v17, %v19449_v57 }
0x1798   : > { %25124 = vst [vmem:[#allocation52_spill] sm:$0xff] %v19575_v58  ;;  %v4590_v31 = vmul.f32 %v19527_v5, %v4543_v61  ;;  %v4600_v61 = vmul.f32 %v19575_v58, %v4540_v20  ;;  %v4593_v5 = vmul.f32 %v19570_v47, %v4537_v36  ;;  %v19635_v36 = vrot.slane %v4548_v37, %v19587_v3 }
0x1799   : > { %v19566_v29 = vpop.permute.xlu1 %5288  ;;  %16731 = vmatprep.subr.msk.mxu0 %vm804_vm0, %v4599_v38  ;;  %v4511_v26 = vpop.permute.xlu0 %4510  ;;  %v4591_v38 = vmul.f32 %v19532_v6, %v4541_v33  ;;  %v19607_v33 = vrot.slane %v4548_v37, %v19560_v43 }
0x179a   : > { %v4538_v17 = vsel %vm4528_vm7, %v19449_v57, %v4511_v26  ;;  %16732 = vmatpush1.msk.msra.mxu0 %vm804_vm0, %v4598_v46  ;;  %v19597_v57 = vld [vmem:[%s24698_s14 + $0x10] sm:$0xff]  ;;  %v4539_v46 = vsel %vm4528_vm7, %v19294_v32, %v19305_v1  ;;  %v19618_v32 = vrot.slane %v4548_v37, %v19572_v7  ;;  %v4536_v20 = vsel %vm4528_vm7, %v4511_v26, %v19457_v34 }
0x179b   : > { %v4601_v23 = vmul.f32 %v19570_v47, %v4538_v17  ;;  %7998 = vrot.lane.b32.xlu1 %v19164_v52, %s24783_s26  ;;  %7537 = vrot.lane.b32.xlu0 %v19258_v60, %s24785_s19  ;;  %25126 = vst [vmem:[#allocation54_spill] sm:$0xff] %v19607_v33  ;;  %v4530_v17 = vsel %vm4528_vm7, %v19473_v54, %v19441_v55  ;;  %25128 = vst [vmem:[#allocation56_spill] sm:$0xff] %v19635_v36  ;;  %v4434_v37 = vld [vmem:[%s24704_s20] ss:$8 sm:$0xf] }
0x179c   : > { %4670 = vmatprep.subr.mxu0 %v4591_v38  ;;  %25127 = vst [vmem:[#allocation55_spill] sm:$0xff] %v19618_v32  ;;  %v4592_v55 = vmul.f32 %v19575_v58, %v4539_v46  ;;  %v4435_v38 = vld [vmem:[%s24704_s20] ss:$8 sm:$0xf0]  ;;  %v4602_v58 = vmul.f32 %v19604_v48, %v4536_v20 }
0x179d   : > { %4671 = vmatpush1.msra.mxu0 %v4590_v31  ;;  %v19614_v6 = vpop.permute.xlu1 %5316  ;;  %16735 = vmatprep.subr.msk.mxu1 %vm804_vm0, %v4601_v23  ;;  %v4519_v1 = vpop.permute.xlu0 %4518 }
0x179e   : > { %16733 = vmatmul.mubr.msk.f32.vlgmr.msra.gmra.mxu0 %vm4609_vm8, %v19597_v57  ;;  %v4532_v31 = vsel %vm4528_vm7, %v4519_v1, %v19473_v54  ;;  %v4534_v23 = vsel %vm4528_vm7, %v19457_v34, %v4519_v1  ;;  %16736 = vmatpush1.msk.msra.mxu1 %vm804_vm0, %v4600_v61  ;;  %v19645_v54 = vld [vmem:[%s24698_s14 + $0x18] sm:$0xf]  ;;  %v4533_v34 = vsel %vm4528_vm7, %v19313_v24, %v19323_v25  ;;  %v25129_v61 = vmov 0.0  }
0x179f   : > { %v4603_v26 = vmul.f32 %v19618_v32, %v4534_v23  ;;  %7541 = vrot.lane.b32.xlu1 %v19233_v9, %s24785_s19  ;;  %7994 = vrot.lane.b32.xlu0 %v19154_v53, %s24783_s26  ;;  %v4604_v46 = vmul.f32 %v19607_v33, %v4532_v31  ;;  %v4529_v1 = vsel %vm4528_vm7, %v19331_v8, %v19307_v16  ;;  %s25312_s19 = smov 96  }
0x17a0   : > { %4747 = vmatprep.subr.mxu1 %v4593_v5  ;;  %4710 = vmatprep.mubr.f32.mxu0 %v25129_v61  ;;  %v4605_v23 = vmul.f32 %v19635_v36, %v4530_v17  ;;  %v4535_v5 = vsel %vm4528_vm7, %v19315_v18, %v19313_v24  ;;  %v19678_v16 = vor.u32 %v4435_v38, %v4434_v37 }
0x17a1   : > { %4748 = vmatpush1.msra.mxu1 %v4592_v55  ;;  %v19665_v47 = vpop.permute.xlu1 %5296  ;;  %16739 = vmatprep.subr.msk.mxu0 %vm804_vm0, %v4603_v26  ;;  %v19668_v53 = vpop.permute.xlu0 %7060  ;;  %v4531_v17 = vsel %vm4528_vm7, %v19323_v25, %v19331_v8  ;;  %v4595_v20 = vmul.f32 %v19618_v32, %v4533_v34  ;;  %v4597_v24 = vmul.f32 %v19635_v36, %v4529_v1 }
0x17a2   : > { %16734 = vmatmul.mubr.msk.f32.gmra.mxu0 %vm4609_vm8, %v19645_v54  ;;  %16737 = vmatmul.mubr.msk.f32.vlgmr.msra.gmra.mxu1 %vm4609_vm8, %v19597_v57  ;;  %v4594_v18 = vmul.f32 %v19604_v48, %v4535_v5  ;;  %v19699_v8 = vrot.slane %v19678_v16, %v19519_v22  ;;  %v4596_v31 = vmul.f32 %v19607_v33, %v4531_v17  ;;  %v25178_v48 = vld [vmem:[#allocation41_spill] sm:$0xff] }
0x17a3   : > { %16743 = vmatprep.subr.msk.mxu1 %vm804_vm0, %v4605_v23  ;;  %16740 = vmatpush1.msk.msra.mxu0 %vm804_vm0, %v4602_v58  ;;  %v4433_v34 = vsel %vm4417_vm9, %v19489_v42, %v19481_v11  ;;  %v19716_v37 = vrot.slane %v19678_v16, %v19513_v50  ;;  %v4432_v1 = vsel %vm4417_vm9, %v19347_v45, %v19339_v49 }
0x17a4   : > { %16744 = vmatpush1.msk.msra.mxu1 %vm804_vm0, %v4604_v46  ;;  %7984 = vrot.lane.b32.xlu1 %v19226_v14, %s24783_s26  ;;  %25130 = vst [vmem:[#allocation57_spill] sm:$0xff] %v19699_v8  ;;  %v19745_v17 = vrot.slane %v19678_v16, %v19534_v12 }
0x17a5   : > { %7988 = vrot.lane.b32.xlu0 %v19240_v27, %s24783_s26  ;;  %4824 = vmatprep.subr.mxu0 %v4595_v20  ;;  %v19695_v25 = vpop.permute.xlu1 %5304  ;;  %v4390_v58 = vpop.permute.xlu0 %4389  ;;  %25131 = vst [vmem:[#allocation58_spill] sm:$0xff] %v19716_v37  ;;  %v4486_v23 = vmul.f32 %v19716_v37, %v4433_v34  ;;  %v19782_v34 = vrot.slane %v19678_v16, %v19560_v43 }
0x17a6   : > { %4901 = vmatprep.subr.mxu1 %v4597_v24  ;;  %4787 = vmatprep.mubr.f32.mxu1 %v25129_v61  ;;  %v4431_v55 = vsel %vm4417_vm9, %v19481_v11, %v4390_v58  ;;  %v4430_v11 = vsel %vm4417_vm9, %v19339_v49, %v19321_v2  ;;  %25132 = vst [vmem:[#allocation59_spill] sm:$0xff] %v19745_v17 }
0x17a7   : > { %4825 = vmatpush1.msra.mxu0 %v4594_v18  ;;  %4858 = vmatprep.mubr.f32.mxu0 %v25129_v61  ;;  %v4487_v26 = vmul.f32 %v19699_v8, %v4431_v55  ;;  %v4479_v49 = vmul.f32 %v19699_v8, %v4430_v11  ;;  %v4478_v18 = vmul.f32 %v19716_v37, %v4432_v1 }
0x17a8   : > { %4902 = vmatpush1.msra.mxu1 %v4596_v31  ;;  %16741 = vmatmul.mubr.msk.f32.vlgmr.msra.gmra.mxu0 %vm4609_vm8, %v19597_v57  ;;  %v4429_v31 = vsel %vm4417_vm9, %v4390_v58, %v19497_v19  ;;  %v4428_v58 = vsel %vm4417_vm9, %v19321_v2, %v19329_v0  ;;  %25134 = vst [vmem:[#allocation61_spill] sm:$0xff] %v19782_v34 }
0x17a9   : > { %16738 = vmatmul.mubr.msk.f32.gmra.mxu1 %vm4609_vm8, %v19645_v54  ;;  %7980 = vrot.lane.b32.xlu1 %v19265_v56, %s24783_s26  ;;  %v19722_v38 = vpop.permute.xlu1 %5312  ;;  %v4398_v46 = vpop.permute.xlu0 %4397  ;;  %v19795_v2 = vrot.slane %v19678_v16, %v19572_v7 }
0x17aa   : > { %7996 = vrot.lane.b32.xlu0 %v19247_v21, %s24783_s26  ;;  %4864 = vmatprep.mubr.f32.mxu0 %v25129_v61  ;;  %v4427_v5 = vsel %vm4417_vm9, %v19497_v19, %v4398_v46  ;;  %v4426_v19 = vsel %vm4417_vm9, %v19329_v0, %v19355_v59 }
0x17ab   : > { %4935 = vmatprep.mubr.f32.mxu1 %v25129_v61  ;;  %16747 = vmatprep.subr.msk.mxu0 %vm804_vm0, %v4487_v26  ;;  %v4489_v55 = vmul.f32 %v19745_v17, %v4427_v5  ;;  %v19769_v26 = vrot.slane %v19678_v16, %v19536_v28  ;;  %25135 = vst [vmem:[#allocation62_spill] sm:$0xff] %v19795_v2 }
0x17ac   : > { %16742 = vmatmul.mubr.msk.f32.gmra.mxu0 %vm4609_vm8, %v19645_v54 }
0x17ad   : > { %16745 = vmatmul.mubr.msk.f32.vlgmr.msra.gmra.mxu1 %vm4609_vm8, %v19597_v57  ;;  %16748 = vmatpush1.msk.msra.mxu0 %vm804_vm0, %v4486_v23  ;;  %v19751_v20 = vpop.permute.xlu1 %5755  ;;  %v4406_v24 = vpop.permute.xlu0 %4405  ;;  %v19765_v57 = vld [vmem:[%s24698_s14] sm:$0xff]  ;;  %25133 = vst [vmem:[#allocation60_spill] sm:$0xff] %v19769_v26  ;;  %v4488_v1 = vmul.f32 %v19769_v26, %v4429_v31  ;;  %v4425_v31 = vsel %vm4417_vm9, %v4398_v46, %v19515_v62 }
0x17ae   : > { %7992 = vrot.lane.b32.xlu1 %v19288_v44, %s24783_s26  ;;  %8004 = vrot.lane.b32.xlu0 %v19258_v60, %s24783_s26  ;;  %v4423_v11 = vsel %vm4417_vm9, %v19515_v62, %v4406_v24  ;;  %v4421_v0 = vsel %vm4417_vm9, %v4406_v24, %v19529_v15  ;;  %v4481_v24 = vmul.f32 %v19745_v17, %v4426_v19  ;;  %v16764_v62 = vld [vmem:[%s24704_s20 + $0x2] ss:$8 sm:$0xf0] }
0x17af   : > { %5008 = vmatprep.subr.mxu0 %v4479_v49  ;;  %4941 = vmatprep.mubr.f32.mxu1 %v25129_v61  ;;  %v19806_v49 = vrot.slane %v19678_v16, %v19587_v3  ;;  %v4491_v37 = vmul.f32 %v19795_v2, %v4423_v11  ;;  %v19837_v46 = vrot.slane %v19678_v16, %v19558_v30 }
0x17b0   : > { %5009 = vmatpush1.msra.mxu0 %v4478_v18  ;;  %5042 = vmatprep.mubr.f32.mxu0 %v25129_v61  ;;  %v4480_v18 = vmul.f32 %v19769_v26, %v4428_v58  ;;  %v4422_v19 = vsel %vm4417_vm9, %v19337_v10, %v19363_v63  ;;  %v4418_v58 = vsel %vm4417_vm9, %v19371_v40, %v19347_v45 }
0x17b1   : > { %16746 = vmatmul.mubr.msk.f32.gmra.mxu1 %vm4609_vm8, %v19645_v54  ;;  %16749 = vmatmul.mubr.msk.f32.vlgmr.msra.gmra.mxu0 %vm4609_vm8, %v19765_v57  ;;  %v19800_v23 = vpop.permute.xlu1 %5783  ;;  %v19802_v5 = vpop.permute.xlu0 %7068  ;;  %25136 = vst [vmem:[#allocation63_spill] sm:$0xff] %v19806_v49  ;;  %v4419_v54 = vsel %vm4417_vm9, %v19529_v15, %v19489_v42  ;;  %v19827_v42 = vld [vmem:[%s24698_s14 + $0x8] sm:$0xf]  ;;  %25137 = vst [vmem:[#allocation64_spill] sm:$0xff] %v19837_v46 }
0x17b2   : > { %16751 = vmatprep.subr.msk.mxu1 %vm804_vm0, %v4489_v55  ;;  %8000 = vrot.lane.b32.xlu1 %v19299_v41, %s24783_s26  ;;  %v16763_v15 = vld [vmem:[%s24704_s20 + $0x2] ss:$8 sm:$0xf]  ;;  %v4492_v55 = vmul.f32 %v19782_v34, %v4421_v0  ;;  %v4493_v11 = vmul.f32 %v19806_v49, %v4419_v54  ;;  %v4424_v0 = vsel %vm4417_vm9, %v19355_v59, %v19337_v10 }
0x17b3   : > { %16752 = vmatpush1.msk.msra.mxu1 %vm804_vm0, %v4488_v1  ;;  %8002 = vrot.lane.b32.xlu0 %v19171_v13, %s24783_s26  ;;  %v19862_v45 = vor.u32 %v16764_v62, %v16763_v15  ;;  %v4420_v54 = vsel %vm4417_vm9, %v19363_v63, %v19371_v40  ;;  %v4483_v10 = vmul.f32 %v19795_v2, %v4422_v19  ;;  %v8462_v19 = vld [vmem:[%s24699_s15 + $0x8] sm:$0xf] }
0x17b4   : > { %5085 = vmatprep.subr.mxu1 %v4481_v24  ;;  %5048 = vmatprep.mubr.f32.mxu0 %v25129_v61  ;;  %v4490_v24 = vmul.f32 %v19837_v46, %v4425_v31  ;;  %v4485_v59 = vmul.f32 %v19806_v49, %v4418_v58  ;;  %v4484_v15 = vmul.f32 %v19782_v34, %v4420_v54  ;;  %v8461_v58 = vld [vmem:[%s24699_s15] sm:$0xff] }
0x17b5   : > { %5086 = vmatpush1.msra.mxu1 %v4480_v18  ;;  %5119 = vmatprep.mubr.f32.mxu1 %v25129_v61  ;;  %v19851_v16 = vpop.permute.xlu1 %5763  ;;  %v5293_v1 = vpop.permute.xlu0 %5292  ;;  %v4482_v18 = vmul.f32 %v19837_v46, %v4424_v0  ;;  %v19882_v63 = vrot.slane %v19862_v45, %v19519_v22  ;;  %v19892_v62 = vrot.slane %v19862_v45, %v19534_v12  ;;  %v16784_v0 = vld [vmem:[%s24704_s20 + $0x3] ss:$8 sm:$0xf0] }
0x17b6   : > { %16750 = vmatmul.mubr.msk.f32.gmra.mxu0 %vm4609_vm8, %v19827_v42  ;;  %16753 = vmatmul.mubr.msk.f32.vlgmr.msra.gmra.mxu1 %vm4609_vm8, %v19765_v57  ;;  %v5332_v40 = vsel %vm5318_vm10, %v19566_v29, %v5293_v1  ;;  %v25142_v46 = vld [vmem:[#allocation25_spill] sm:$0xff]  ;;  %v5330_v34 = vsel %vm5318_vm10, %v5293_v1, %v19665_v47  ;;  %v19948_v2 = vrot.slane %v19862_v45, %v19558_v30 }
0x17b7   : > { %16755 = vmatprep.subr.msk.mxu0 %vm804_vm0, %v4491_v37  ;;  %16759 = vmatprep.subr.msk.mxu1 %vm804_vm0, %v4493_v11  ;;  %25138 = vst [vmem:[#allocation65_spill] sm:$0xff] %v19882_v63  ;;  %25139 = vst [vmem:[#allocation66_spill] sm:$0xff] %v19892_v62  ;;  %v16783_v11 = vld [vmem:[%s24704_s20 + $0x3] ss:$8 sm:$0xf]  ;;  %v5333_v49 = vsel %vm5318_vm10, %v25142_v46, %v19379_v39 }
0x17b8   : > { %16756 = vmatpush1.msk.msra.mxu0 %vm804_vm0, %v4490_v24  ;;  %16760 = vmatpush1.msk.msra.mxu1 %vm804_vm0, %v4492_v55  ;;  %v5389_v24 = vmul.f32 %v19882_v63, %v5332_v40  ;;  %v5331_v40 = vsel %vm5318_vm10, %v19379_v39, %v19345_v4  ;;  %25143 = vst [vmem:[#allocation25_spill] sm:$0xff] %v19948_v2 }
0x17b9   : > { %8008 = vrot.lane.b32.xlu1 %v19233_v9, %s24783_s26  ;;  %8006 = vrot.lane.b32.xlu0 %v19147_v35, %s24783_s26  ;;  %v19887_v37 = vpop.permute.xlu1 %5771  ;;  %v5301_v31 = vpop.permute.xlu0 %5300  ;;  %v19955_v39 = vrot.slane %v19862_v45, %v19572_v7  ;;  %s25320_s26 = smov 95  }
0x17ba   : > { %5162 = vmatprep.subr.mxu0 %v4483_v10  ;;  %5239 = vmatprep.subr.mxu1 %v4485_v59  ;;  %v5328_v55 = vsel %vm5318_vm10, %v19665_v47, %v5301_v31  ;;  %v5334_v10 = vsel %vm5318_vm10, %v19614_v6, %v19566_v29  ;;  %v19933_v29 = vrot.slane %v19862_v45, %v19513_v50  ;;  %v25146_v47 = vld [vmem:[#allocation20_spill] sm:$0xff] }
0x17bb   : > { %5125 = vmatprep.mubr.f32.mxu1 %v25129_v61  ;;  %5163 = vmatpush1.msra.mxu0 %v4482_v18  ;;  %v5391_v54 = vmul.f32 %v19892_v62, %v5328_v55  ;;  %v19935_v55 = vor.u32 %v16784_v0, %v16783_v11  ;;  %25144 = vst [vmem:[#allocation69_spill] sm:$0xff] %v19955_v39 }
0x17bc   : > { %5196 = vmatprep.mubr.f32.mxu0 %v25129_v61  ;;  %5240 = vmatpush1.msra.mxu1 %v4484_v15  ;;  %v19925_v15 = vrot.slane %v19862_v45, %v19536_v28  ;;  %25141 = vst [vmem:[#allocation68_spill] sm:$0xff] %v19933_v29  ;;  %v5381_v11 = vmul.f32 %v19882_v63, %v5331_v40 }
0x17bd   : > { %16754 = vmatmul.mubr.msk.f32.gmra.mxu1 %vm4609_vm8, %v19827_v42  ;;  %16757 = vmatmul.mubr.msk.f32.vlgmr.msra.gmra.mxu0 %vm4609_vm8, %v19765_v57  ;;  %v19921_v59 = vpop.permute.xlu1 %7519  ;;  %v5309_v18 = vpop.permute.xlu0 %5308  ;;  %v5380_v26 = vmul.f32 %v19933_v29, %v5333_v49  ;;  %v19988_v40 = vrot.slane %v19862_v45, %v19560_v43  ;;  %v20000_v49 = vrot.slane %v19862_v45, %v19587_v3  ;;  %v25151_v45 = vld [vmem:[#allocation31_spill] sm:$0xff] }
0x17be   : > { %25140 = vst [vmem:[#allocation67_spill] sm:$0xff] %v19925_v15  ;;  %8470 = vperm.xlu1 %17683, %v8462_v19   ;;  %8465 = vperm.xlu0 %17684, %v8461_v58   ;;  %v5388_v19 = vmul.f32 %v19933_v29, %v5334_v10  ;;  %v25145_v58 = vld [vmem:[#allocation27_spill] sm:$0xff]  ;;  %v5324_v0 = vsel %vm5318_vm10, %v19695_v25, %v5309_v18  ;;  %v25150_v29 = vld [vmem:[#allocation21_spill] sm:$0xff] }
0x17bf   : > { %5202 = vmatprep.mubr.f32.mxu0 %v25129_v61  ;;  %5273 = vmatprep.mubr.f32.mxu1 %v25129_v61  ;;  %v5327_v1 = vsel %vm5318_vm10, %v25146_v47, %v25145_v58  ;;  %v5329_v10 = vsel %vm5318_vm10, %v19345_v4, %v25146_v47  ;;  %v5390_v17 = vmul.f32 %v19925_v15, %v5330_v34 }
0x17c0   : > { %16767 = vmatprep.subr.msk.mxu0 %vm804_vm0, %v5389_v24  ;;  %16771 = vmatprep.subr.msk.mxu1 %vm804_vm0, %v5391_v54  ;;  %25147 = vst [vmem:[#allocation27_spill] sm:$0xff] %v19988_v40  ;;  %v5320_v4 = vsel %vm5318_vm10, %v19722_v38, %v19614_v6  ;;  %v5322_v34 = vsel %vm5318_vm10, %v5309_v18, %v19722_v38  ;;  %25148 = vst [vmem:[#allocation20_spill] sm:$0xff] %v20000_v49 }
0x17c1   : > { %16758 = vmatmul.mubr.msk.f32.gmra.mxu0 %vm4609_vm8, %v19827_v42  ;;  %16761 = vmatmul.mubr.msk.f32.vlgmr.msra.gmra.mxu1 %vm4609_vm8, %v19765_v57  ;;  %v19969_v24 = vpop.permute.xlu1 %7523  ;;  %v19971_v54 = vpop.permute.xlu0 %7072  ;;  %v19984_v57 = vld [vmem:[%s24698_s14 + $0x20] sm:$0xff]  ;;  %v5383_v47 = vmul.f32 %v19892_v62, %v5327_v1  ;;  %v5382_v6 = vmul.f32 %v19925_v15, %v5329_v10  ;;  %v5326_v38 = vsel %vm5318_vm10, %v5301_v31, %v19695_v25  ;;  %v20029_v25 = vld [vmem:[%s24698_s14 + $0x28] sm:$0xf] }
0x17c2   : > { %16768 = vmatpush1.msk.msra.mxu0 %vm804_vm0, %v5388_v19  ;;  %5279 = vmatprep.mubr.f32.mxu1 %v25129_v61  ;;  %v5393_v19 = vmul.f32 %v19955_v39, %v5324_v0  ;;  %v5319_v18 = vsel %vm5318_vm10, %v25151_v45, %v25142_v46  ;;  %v5395_v1 = vmul.f32 %v20000_v49, %v5320_v4 }
0x17c3   : > { %5459 = vmatprep.subr.mxu0 %v5381_v11  ;;  %5493 = vmatprep.mubr.f32.mxu0 %v25129_v61  ;;  %v25149_v11 = vld [vmem:[#allocation29_spill] sm:$0xff]  ;;  %v5394_v0 = vmul.f32 %v19988_v40, %v5322_v34  ;;  %v5392_v31 = vmul.f32 %v19948_v2, %v5326_v38  ;;  %v20046_v10 = vrot.slane %v19935_v55, %v19519_v22 }
0x17c4   : > { %5460 = vmatpush1.msra.mxu0 %v5380_v26  ;;  %16772 = vmatpush1.msk.msra.mxu1 %vm804_vm0, %v5390_v17  ;;  %v5323_v63 = vsel %vm5318_vm10, %v25150_v29, %v25149_v11  ;;  %v5321_v46 = vsel %vm5318_vm10, %v25149_v11, %v25151_v45  ;;  %v5801_v38 = vsel %vm5785_vm11, %v19800_v23, %v19751_v20 }
0x17c5   : > { %16762 = vmatmul.mubr.msk.f32.gmra.mxu1 %vm4609_vm8, %v19827_v42  ;;  %16769 = vmatmul.mubr.msk.f32.vlgmr.msra.gmra.mxu0 %vm4609_vm8, %v19984_v57  ;;  %v20017_v17 = vpop.permute.xlu1 %7531  ;;  %v5760_v26 = vpop.permute.xlu0 %5759  ;;  %v5325_v42 = vsel %vm5318_vm10, %v25145_v58, %v25150_v29  ;;  %25152 = vst [vmem:[#allocation29_spill] sm:$0xff] %v20046_v10  ;;  %v5385_v29 = vmul.f32 %v19955_v39, %v5323_v63  ;;  %v25176_v39 = vld [vmem:[#allocation39_spill] sm:$0xff] }
0x17c6   : > { %5536 = vmatprep.subr.mxu1 %v5383_v47  ;;  %5499 = vmatprep.mubr.f32.mxu0 %v25129_v61  ;;  %v5387_v58 = vmul.f32 %v20000_v49, %v5319_v18  ;;  %v5799_v4 = vsel %vm5785_vm11, %v19751_v20, %v5760_v26  ;;  %v5384_v47 = vmul.f32 %v19948_v2, %v5325_v42 }
0x17c7   : > { %5537 = vmatpush1.msra.mxu1 %v5382_v6  ;;  %5570 = vmatprep.mubr.f32.mxu1 %v25129_v61  ;;  %v20062_v6 = vrot.slane %v19935_v55, %v19534_v12  ;;  %v5386_v11 = vmul.f32 %v19988_v40, %v5321_v46  ;;  %v5856_v45 = vmul.f32 %v20046_v10, %v5799_v4  ;;  %v25155_v46 = vld [vmem:[#allocation22_spill] sm:$0xff] }
0x17c8   : > { %16775 = vmatprep.subr.msk.mxu0 %vm804_vm0, %v5393_v19  ;;  %16779 = vmatprep.subr.msk.mxu1 %vm804_vm0, %v5395_v1  ;;  %v20077_v1 = vrot.slane %v19935_v55, %v19513_v50  ;;  %v6622_v36 = vsel %vm6609_vm12, %v25178_v48, %v25176_v39 }
0x17c9   : > { %16770 = vmatmul.mubr.msk.f32.gmra.mxu0 %vm4609_vm8, %v20029_v25  ;;  %16773 = vmatmul.mubr.msk.f32.vlgmr.msra.gmra.mxu1 %vm4609_vm8, %v19984_v57  ;;  %v5780_v34 = vpop.permute.xlu1 %5779  ;;  %v5768_v19 = vpop.permute.xlu0 %5767  ;;  %25153 = vst [vmem:[#allocation21_spill] sm:$0xff] %v20062_v6 }
0x17ca   : > { %16776 = vmatpush1.msk.msra.mxu0 %vm804_vm0, %v5392_v31  ;;  %16780 = vmatpush1.msk.msra.mxu1 %vm804_vm0, %v5394_v0  ;;  %v5795_v63 = vsel %vm5785_vm11, %v19851_v16, %v5768_v19  ;;  %25154 = vst [vmem:[#allocation31_spill] sm:$0xff] %v20077_v1  ;;  %v25156_v31 = vld [vmem:[#allocation33_spill] sm:$0xff] }
0x17cb   : > { %5613 = vmatprep.subr.mxu0 %v5385_v29  ;;  %5690 = vmatprep.subr.mxu1 %v5387_v58  ;;  %v5858_v18 = vmul.f32 %v20062_v6, %v5795_v63  ;;  %v5798_v20 = vsel %vm5785_vm11, %v25156_v31, %v25155_v46  ;;  %v25157_v58 = vld [vmem:[#allocation35_spill] sm:$0xff]  ;;  %v20102_v63 = vrot.slane %v19935_v55, %v19572_v7 }
0x17cc   : > { %5576 = vmatprep.mubr.f32.mxu1 %v25129_v61  ;;  %5614 = vmatpush1.msra.mxu0 %v5384_v47  ;;  %v5800_v4 = vsel %vm5785_vm11, %v25157_v58, %v25156_v31  ;;  %v5855_v47 = vmul.f32 %v20077_v1, %v5801_v38  ;;  %v20111_v31 = vrot.slane %v19935_v55, %v19536_v28 }
0x17cd   : > { %5647 = vmatprep.mubr.f32.mxu0 %v25129_v61  ;;  %5691 = vmatpush1.msra.mxu1 %v5386_v11  ;;  %v20080_v0 = vpop.permute.xlu1 %6583  ;;  %v5776_v42 = vpop.permute.xlu0 %5775  ;;  %25158 = vst [vmem:[#allocation22_spill] sm:$0xff] %v20102_v63  ;;  %v5797_v11 = vsel %vm5785_vm11, %v5760_v26, %v19851_v16  ;;  %v5848_v38 = vmul.f32 %v20046_v10, %v5798_v20  ;;  %v25160_v26 = vld [vmem:[#allocation36_spill] sm:$0xff] }
0x17ce   : > { %16774 = vmatmul.mubr.msk.f32.gmra.mxu1 %vm4609_vm8, %v20029_v25  ;;  %16777 = vmatmul.mubr.msk.f32.vlgmr.msra.gmra.mxu0 %vm4609_vm8, %v19984_v57  ;;  %v5791_v29 = vsel %vm5785_vm11, %v19887_v37, %v5776_v42  ;;  %25159 = vst [vmem:[#allocation33_spill] sm:$0xff] %v20111_v31  ;;  %v5847_v16 = vmul.f32 %v20077_v1, %v5800_v4 }
0x17cf   : > { %5653 = vmatprep.mubr.f32.mxu0 %v25129_v61  ;;  %5724 = vmatprep.mubr.f32.mxu1 %v25129_v61  ;;  %v5860_v2 = vmul.f32 %v20102_v63, %v5791_v29  ;;  %v20135_v29 = vrot.slane %v19935_v55, %v19558_v30  ;;  %v5857_v4 = vmul.f32 %v20111_v31, %v5797_v11 }
0x17d0   : > { %16787 = vmatprep.subr.msk.mxu0 %vm804_vm0, %v5856_v45  ;;  %16791 = vmatprep.subr.msk.mxu1 %vm804_vm0, %v5858_v18  ;;  %v25161_v45 = vld [vmem:[#allocation23_spill] sm:$0xff]  ;;  %v5789_v11 = vsel %vm5785_vm11, %v5776_v42, %v5780_v34  ;;  %v25165_v42 = vld [vmem:[#allocation37_spill] sm:$0xff] }
0x17d1   : > { %16788 = vmatpush1.msk.msra.mxu0 %vm804_vm0, %v5855_v47  ;;  %v20116_v40 = vpop.permute.xlu1 %6579  ;;  %v20118_v49 = vpop.permute.xlu0 %7515  ;;  %v5794_v18 = vsel %vm5785_vm11, %v25161_v45, %v25160_v26  ;;  %v5796_v20 = vsel %vm5785_vm11, %v25155_v46, %v25161_v45  ;;  %25162 = vst [vmem:[#allocation35_spill] sm:$0xff] %v20135_v29  ;;  %v16785_v47 = vld [vmem:[%s24698_s14 + $0x30] sm:$0xff]  ;;  %v5793_v46 = vsel %vm5785_vm11, %v5768_v19, %v19887_v37 }
0x17d2   : > { %16778 = vmatmul.mubr.msk.f32.gmra.mxu0 %vm4609_vm8, %v20029_v25  ;;  %16781 = vmatmul.mubr.msk.f32.vlgmr.msra.gmra.mxu1 %vm4609_vm8, %v19984_v57  ;;  %v5787_v57 = vsel %vm5785_vm11, %v5780_v34, %v19800_v23  ;;  %v20157_v45 = vrot.slane %v19935_v55, %v19587_v3  ;;  %v5850_v23 = vmul.f32 %v20062_v6, %v5794_v18 }
0x17d3   : > { %5926 = vmatprep.subr.mxu0 %v5848_v38  ;;  %5730 = vmatprep.mubr.f32.mxu1 %v25129_v61  ;;  %v20153_v38 = vrot.slane %v19935_v55, %v19560_v43  ;;  %v5849_v34 = vmul.f32 %v20111_v31, %v5796_v20  ;;  %v25167_v55 = vld [vmem:[#allocation38_spill] sm:$0xff]  ;;  %v5859_v18 = vmul.f32 %v20135_v29, %v5793_v46 }
0x17d4   : > { %5927 = vmatpush1.msra.mxu0 %v5847_v16  ;;  %5960 = vmatprep.mubr.f32.mxu0 %v25129_v61  ;;  %25164 = vst [vmem:[#allocation23_spill] sm:$0xff] %v20157_v45  ;;  %v25166_v16 = vld [vmem:[#allocation24_spill] sm:$0xff]  ;;  %v16786_v31 = vld [vmem:[%s24698_s14 + $0x38] sm:$0xf]  ;;  %v6623_v6 = vsel %vm6609_vm12, %v20116_v40, %v20080_v0 }
0x17d5   : > { %25163 = vst [vmem:[#allocation36_spill] sm:$0xff] %v20153_v38  ;;  %16792 = vmatpush1.msk.msra.mxu1 %vm804_vm0, %v5857_v4  ;;  %16795 = vmatprep.subr.msk.mxu0 %vm804_vm0, %v5860_v2  ;;  %v20162_v37 = vpop.permute.xlu1 %6591  ;;  %v20164_v19 = vpop.permute.xlu0 %7511  ;;  %v5790_v1 = vsel %vm5785_vm11, %v25166_v16, %v25165_v42  ;;  %v5786_v4 = vsel %vm5785_vm11, %v25167_v55, %v25157_v58 }
0x17d6   : > { %16782 = vmatmul.mubr.msk.f32.gmra.mxu1 %vm4609_vm8, %v20029_v25  ;;  %16789 = vmatmul.mubr.msk.f32.vlgmr.msra.gmra.mxu0 %vm4609_vm8, %v16785_v47  ;;  %v5862_v2 = vmul.f32 %v20157_v45, %v5787_v57  ;;  %v5861_v20 = vmul.f32 %v20153_v38, %v5789_v11  ;;  %v5792_v25 = vsel %vm5785_vm11, %v25160_v26, %v25166_v16  ;;  %v25168_v16 = vld [vmem:[#allocation8_spill] sm:$0xff] }
0x17d7   : > { %6003 = vmatprep.subr.mxu1 %v5850_v23  ;;  %5966 = vmatprep.mubr.f32.mxu0 %v25129_v61  ;;  %v5788_v58 = vsel %vm5785_vm11, %v25165_v42, %v25167_v55  ;;  %v5852_v57 = vmul.f32 %v20102_v63, %v5790_v1  ;;  %v5854_v26 = vmul.f32 %v20157_v45, %v5786_v4 }
0x17d8   : > { %6004 = vmatpush1.msra.mxu1 %v5849_v34  ;;  %6037 = vmatprep.mubr.f32.mxu1 %v25129_v61  ;;  %v5851_v23 = vmul.f32 %v20135_v29, %v5792_v25  ;;  %v5853_v34 = vmul.f32 %v20153_v38, %v5788_v58  ;;  %v25170_v25 = vld [vmem:[#allocation5_spill] sm:$0xff]  ;;  %v25173_v29 = vld [vmem:[#allocation6_spill] sm:$0xff] }
0x17d9   : > { %16799 = vmatprep.subr.msk.mxu1 %vm804_vm0, %v5862_v2  ;;  %16796 = vmatpush1.msk.msra.mxu0 %vm804_vm0, %v5859_v18  ;;  %v20197_v46 = vpop.permute.xlu1 %6599  ;;  %v20199_v11 = vpop.permute.xlu0 %7527  ;;  %v25169_v2 = vld [vmem:[#allocation9_spill] sm:$0xff] }
0x17da   : > { %16790 = vmatmul.mubr.msk.f32.gmra.mxu0 %vm4609_vm8, %v16786_v31  ;;  %16793 = vmatmul.mubr.msk.f32.vlgmr.msra.gmra.mxu1 %vm4609_vm8, %v16785_v47  ;;  %v16821_v18 = vld [vmem:[%s24704_s20 + $0x5] ss:$8 sm:$0xf] }
0x17db   : > { %16800 = vmatpush1.msk.msra.mxu1 %vm804_vm0, %v5861_v20  ;;  %6080 = vmatprep.subr.mxu0 %v5852_v57  ;;  %v16822_v20 = vld [vmem:[%s24704_s20 + $0x5] ss:$8 sm:$0xf0] }
0x17dc   : > { %6157 = vmatprep.subr.mxu1 %v5854_v26  ;;  %6043 = vmatprep.mubr.f32.mxu1 %v25129_v61  ;;  %v25171_v26 = vld [vmem:[#allocation10_spill] sm:$0xff] }
0x17dd   : > { %6081 = vmatpush1.msra.mxu0 %v5851_v23  ;;  %6114 = vmatprep.mubr.f32.mxu0 %v25129_v61  ;;  %v20209_v1 = vpop.permute.xlu1 %7986  ;;  %v20211_v42 = vpop.permute.xlu0 %7535  ;;  %v20251_v23 = vor.u32 %v16822_v20, %v16821_v18  ;;  %v20267_v18 = vld [vmem:[%s24698_s14 + $0x48] sm:$0xf] }
0x17de   : > { %6158 = vmatpush1.msra.mxu1 %v5853_v34  ;;  %16797 = vmatmul.mubr.msk.f32.vlgmr.msra.gmra.mxu0 %vm4609_vm8, %v16785_v47 }
0x17df   : > { %16794 = vmatmul.mubr.msk.f32.gmra.mxu1 %vm4609_vm8, %v16786_v31  ;;  %16805 = vmatprep.subr.msk.mxu0 %vm804_vm0, %v19226_v14  ;;  %v20292_v10 = vrot.slane %v20251_v23, %v19534_v12  ;;  %v20300_v62 = vrot.slane %v20251_v23, %v19513_v50 }
0x17e0   : > { %16809 = vmatprep.subr.msk.mxu1 %vm804_vm0, %v19288_v44  ;;  %16806 = vmatpush1.msk.msra.mxu0 %vm804_vm0, %v19265_v56 }
0x17e1   : > { %6283 = vmatprep.subr.mxu0 %v25168_v16  ;;  %6120 = vmatprep.mubr.f32.mxu0 %v25129_v61  ;;  %v20223_v55 = vpop.permute.xlu1 %6607  ;;  %v20225_v4 = vpop.permute.xlu0 %7539  ;;  %25174 = vst [vmem:[#allocation24_spill] sm:$0xff] %v20292_v10  ;;  %25177 = vst [vmem:[#allocation38_spill] sm:$0xff] %v20300_v62  ;;  %v6679_v32 = vmul.f32 %v20300_v62, %v6623_v6  ;;  %v20328_v6 = vrot.slane %v20251_v23, %v19572_v7 }
0x17e2   : > { %6191 = vmatprep.mubr.f32.mxu1 %v25129_v61  ;;  %6284 = vmatpush1.msra.mxu0 %v25169_v2 }
0x17e3   : > { %16798 = vmatmul.mubr.msk.f32.gmra.mxu0 %vm4609_vm8, %v16786_v31  ;;  %16801 = vmatmul.mubr.msk.f32.vlgmr.msra.gmra.mxu1 %vm4609_vm8, %v16785_v47  ;;  %v16803_v47 = vld [vmem:[%s24698_s14 + $0x40] sm:$0xff] }
0x17e4   : > { %16810 = vmatpush1.msk.msra.mxu1 %vm804_vm0, %v19240_v27  ;;  %16813 = vmatprep.subr.msk.mxu0 %vm804_vm0, %v19299_v41  ;;  %v25182_v41 = vld [vmem:[#allocation28_spill] sm:$0xff] }
0x17e5   : > { %6360 = vmatprep.subr.mxu1 %v25170_v25  ;;  %6197 = vmatprep.mubr.f32.mxu1 %v25129_v61  ;;  %v20246_v58 = vpop.permute.xlu1 %7050  ;;  %v6588_v57 = vpop.permute.xlu0 %6587 }
0x17e6   : > { %6361 = vmatpush1.msra.mxu1 %v25171_v26  ;;  %6317 = vmatprep.mubr.f32.mxu0 %v25129_v61  ;;  %v6621_v34 = vsel %vm6609_vm12, %v20080_v0, %v6588_v57 }
0x17e7   : > { %16817 = vmatprep.subr.msk.mxu1 %vm804_vm0, %v19233_v9  ;;  %16802 = vmatmul.mubr.msk.f32.gmra.mxu1 %vm4609_vm8, %v16786_v31  ;;  %v20271_v31 = vrot.slane %v20251_v23, %v19519_v22 }
0x17e8   : > { %16807 = vmatmul.mubr.msk.f32.vlgmr.msra.gmra.mxu0 %vm4609_vm8, %v16803_v47  ;;  %6394 = vmatprep.mubr.f32.mxu1 %v25129_v61 }
0x17e9   : > { %16814 = vmatpush1.msk.msra.mxu0 %vm804_vm0, %v19247_v21  ;;  %6323 = vmatprep.mubr.f32.mxu0 %v25129_v61  ;;  %25172 = vst [vmem:[#allocation37_spill] sm:$0xff] %v20271_v31  ;;  %v20273_v20 = vpop.permute.xlu1 %7046  ;;  %v6596_v38 = vpop.permute.xlu0 %6595  ;;  %v6680_v45 = vmul.f32 %v20271_v31, %v6621_v34  ;;  %v25175_v34 = vld [vmem:[#allocation26_spill] sm:$0xff]  ;;  %v20397_v21 = vrot.slane %v20251_v23, %v19560_v43 }
0x17ea   : > { %6437 = vmatprep.subr.mxu0 %v19164_v52  ;;  %v6617_v63 = vsel %vm6609_vm12, %v20162_v37, %v6596_v38  ;;  %v6620_v15 = vsel %vm6609_vm12, %v25176_v39, %v25175_v34  ;;  %v6619_v39 = vsel %vm6609_vm12, %v6588_v57, %v20162_v37  ;;  %25179 = vst [vmem:[#allocation26_spill] sm:$0xff] %v20328_v6 }
0x17eb   : > { %6438 = vmatpush1.msra.mxu0 %v25173_v29  ;;  %16811 = vmatmul.mubr.msk.f32.vlgmr.msra.gmra.mxu1 %vm4609_vm8, %v16803_v47  ;;  %v6682_v33 = vmul.f32 %v20292_v10, %v6617_v63  ;;  %v6672_v63 = vmul.f32 %v20271_v31, %v6620_v15  ;;  %v25185_v31 = vld [vmem:[#allocation43_spill] sm:$0xff]  ;;  %25187 = vst [vmem:[#allocation28_spill] sm:$0xff] %v20397_v21 }
0x17ec   : > { %16808 = vmatmul.mubr.msk.f32.gmra.mxu0 %vm4609_vm8, %v20267_v18  ;;  %16818 = vmatpush1.msk.msra.mxu1 %vm804_vm0, %v19258_v60  ;;  %v6671_v60 = vmul.f32 %v20300_v62, %v6622_v36  ;;  %v6618_v36 = vsel %vm6609_vm12, %v25175_v34, %v25182_v41  ;;  %v6615_v34 = vsel %vm6609_vm12, %v6596_v38, %v20197_v46  ;;  %v25186_v38 = vld [vmem:[#allocation30_spill] sm:$0xff] }
0x17ed   : > { %6514 = vmatprep.subr.mxu1 %v19147_v35  ;;  %6400 = vmatprep.mubr.f32.mxu1 %v25129_v61  ;;  %v20304_v0 = vpop.permute.xlu1 %7058  ;;  %v6604_v8 = vpop.permute.xlu0 %6603  ;;  %v25181_v35 = vld [vmem:[#allocation42_spill] sm:$0xff] }
0x17ee   : > { %6515 = vmatpush1.msra.mxu1 %v19171_v13  ;;  %6471 = vmatprep.mubr.f32.mxu0 %v25129_v61  ;;  %v6613_v9 = vsel %vm6609_vm12, %v20197_v46, %v6604_v8  ;;  %v6616_v13 = vsel %vm6609_vm12, %v25182_v41, %v25181_v35  ;;  %v6625_v41 = vsel %vm6609_vm12, %v20223_v55, %v20116_v40  ;;  %v20382_v40 = vld [vmem:[%s24698_s14 + $0x50] sm:$0xff] }
0x17ef   : > { %16812 = vmatmul.mubr.msk.f32.gmra.mxu1 %vm4609_vm8, %v20267_v18  ;;  %16825 = vmatprep.subr.msk.mxu0 %vm804_vm0, %v6680_v45  ;;  %v20332_v45 = vrot.slane %v20251_v23, %v19536_v28  ;;  %v6684_v57 = vmul.f32 %v20328_v6, %v6613_v9  ;;  %v20361_v9 = vrot.slane %v20251_v23, %v19558_v30 }
0x17f0   : > { %16815 = vmatmul.mubr.msk.f32.vlgmr.msra.gmra.mxu0 %vm4609_vm8, %v16803_v47  ;;  %6548 = vmatprep.mubr.f32.mxu1 %v25129_v61  ;;  %v6612_v46 = vsel %vm6609_vm12, %v25186_v38, %v25185_v31 }
0x17f1   : > { %25180 = vst [vmem:[#allocation39_spill] sm:$0xff] %v20332_v45  ;;  %6477 = vmatprep.mubr.f32.mxu0 %v25129_v61  ;;  %16826 = vmatpush1.msk.msra.mxu0 %vm804_vm0, %v6679_v32  ;;  %v20341_v15 = vpop.permute.xlu1 %7066  ;;  %v20343_v37 = vpop.permute.xlu0 %7982  ;;  %v6681_v62 = vmul.f32 %v20332_v45, %v6619_v39  ;;  %v16841_v32 = vld [vmem:[%s24704_s20 + $0x6] ss:$8 sm:$0xf]  ;;  %25183 = vst [vmem:[#allocation41_spill] sm:$0xff] %v20361_v9  ;;  %v6611_v39 = vsel %vm6609_vm12, %v6604_v8, %v20223_v55 }
0x17f2   : > { %6750 = vmatprep.subr.mxu0 %v6672_v63  ;;  %16829 = vmatprep.subr.msk.mxu1 %vm804_vm0, %v6682_v33  ;;  %v16842_v33 = vld [vmem:[%s24704_s20 + $0x6] ss:$8 sm:$0xf0] }
0x17f3   : > { %16819 = vmatmul.mubr.msk.f32.vlgmr.msra.gmra.mxu1 %vm4609_vm8, %v16803_v47  ;;  %6751 = vmatpush1.msra.mxu0 %v6671_v60  ;;  %v6674_v60 = vmul.f32 %v20292_v10, %v6616_v13  ;;  %v20373_v47 = vrot.slane %v20251_v23, %v19587_v3  ;;  %v6673_v10 = vmul.f32 %v20332_v45, %v6618_v36 }
0x17f4   : > { %16816 = vmatmul.mubr.msk.f32.gmra.mxu0 %vm4609_vm8, %v20267_v18  ;;  %6554 = vmatprep.mubr.f32.mxu1 %v25129_v61  ;;  %v20401_v8 = vor.u32 %v16842_v33, %v16841_v32  ;;  %v6683_v23 = vmul.f32 %v20361_v9, %v6615_v34 }
0x17f5   : > { %25184 = vst [vmem:[#allocation42_spill] sm:$0xff] %v20373_v47  ;;  %6784 = vmatprep.mubr.f32.mxu0 %v25129_v61  ;;  %16830 = vmatpush1.msk.msra.mxu1 %vm804_vm0, %v6681_v62  ;;  %v20388_v13 = vpop.permute.xlu1 %7990  ;;  %v7055_v63 = vpop.permute.xlu0 %7054  ;;  %v25188_v62 = vld [vmem:[#allocation44_spill] sm:$0xff]  ;;  %v6686_v36 = vmul.f32 %v20373_v47, %v6625_v41 }
0x17f6   : > { %6827 = vmatprep.subr.mxu1 %v6674_v60  ;;  %16833 = vmatprep.subr.msk.mxu0 %vm804_vm0, %v6684_v57  ;;  %v6624_v55 = vsel %vm6609_vm12, %v25188_v62, %v25178_v48  ;;  %v6685_v57 = vmul.f32 %v20397_v21, %v6611_v39  ;;  %v7088_v32 = vsel %vm7076_vm13, %v20246_v58, %v7055_v63 }
0x17f7   : > { %16820 = vmatmul.mubr.msk.f32.gmra.mxu1 %vm4609_vm8, %v20267_v18  ;;  %v6614_v48 = vsel %vm6609_vm12, %v25181_v35, %v25186_v38  ;;  %v20426_v18 = vld [vmem:[%s24698_s14 + $0x58] sm:$0xf]  ;;  %v20431_v33 = vrot.slane %v20401_v8, %v19519_v22  ;;  %v6610_v35 = vsel %vm6609_vm12, %v25185_v31, %v25188_v62  ;;  %v6678_v34 = vmul.f32 %v20373_v47, %v6624_v55 }
0x17f8   : > { %16827 = vmatmul.mubr.msk.f32.vlgmr.msra.gmra.mxu0 %vm4609_vm8, %v20382_v40  ;;  %6828 = vmatpush1.msra.mxu1 %v6673_v10  ;;  %v6676_v10 = vmul.f32 %v20328_v6, %v6612_v46  ;;  %v6675_v46 = vmul.f32 %v20361_v9, %v6614_v48  ;;  %v20452_v31 = vrot.slane %v20401_v8, %v19534_v12  ;;  %v25192_v48 = vld [vmem:[#allocation45_spill] sm:$0xff] }
0x17f9   : > { %6790 = vmatprep.mubr.f32.mxu0 %v25129_v61  ;;  %6861 = vmatprep.mubr.f32.mxu1 %v25129_v61  ;;  %25189 = vst [vmem:[#allocation43_spill] sm:$0xff] %v20431_v33  ;;  %v7075_v41 = vpop.permute.xlu1 %7074  ;;  %v7063_v60 = vpop.permute.xlu0 %7062  ;;  %v7147_v39 = vmul.f32 %v20431_v33, %v7088_v32  ;;  %v6677_v62 = vmul.f32 %v20397_v21, %v6610_v35  ;;  %v25191_v32 = vld [vmem:[#allocation32_spill] sm:$0xff] }
0x17fa   : > { %16837 = vmatprep.subr.msk.mxu1 %vm804_vm0, %v6686_v36  ;;  %16834 = vmatpush1.msk.msra.mxu0 %vm804_vm0, %v6683_v23  ;;  %v7084_v38 = vsel %vm7076_vm13, %v20304_v0, %v7063_v60  ;;  %25190 = vst [vmem:[#allocation30_spill] sm:$0xff] %v20452_v31  ;;  %v7090_v55 = vsel %vm7076_vm13, %v20273_v20, %v20246_v58  ;;  %v25194_v35 = vld [vmem:[#allocation48_spill] sm:$0xff] }
0x17fb   : > { %16831 = vmatmul.mubr.msk.f32.vlgmr.msra.gmra.mxu1 %vm4609_vm8, %v20382_v40  ;;  %6904 = vmatprep.subr.mxu0 %v6676_v10  ;;  %v20468_v10 = vrot.slane %v20401_v8, %v19513_v50  ;;  %v7149_v58 = vmul.f32 %v20452_v31, %v7084_v38  ;;  %v20501_v9 = vrot.slane %v20401_v8, %v19536_v28 }
0x17fc   : > { %16828 = vmatmul.mubr.msk.f32.gmra.mxu0 %vm4609_vm8, %v20426_v18  ;;  %16838 = vmatpush1.msk.msra.mxu1 %vm804_vm0, %v6685_v57  ;;  %v7087_v57 = vsel %vm7076_vm13, %v25192_v48, %v25191_v32 }
0x17fd   : > { %6981 = vmatprep.subr.mxu1 %v6678_v34  ;;  %6867 = vmatprep.mubr.f32.mxu1 %v25129_v61  ;;  %v20460_v36 = vpop.permute.xlu1 %7517  ;;  %v7071_v23 = vpop.permute.xlu0 %7070  ;;  %25193 = vst [vmem:[#allocation44_spill] sm:$0xff] %v20468_v10  ;;  %v7089_v34 = vsel %vm7076_vm13, %v25194_v35, %v25192_v48  ;;  %v7146_v21 = vmul.f32 %v20468_v10, %v7090_v55  ;;  %25196 = vst [vmem:[#allocation45_spill] sm:$0xff] %v20501_v9 }
0x17fe   : > { %6905 = vmatpush1.msra.mxu0 %v6675_v46  ;;  %6938 = vmatprep.mubr.f32.mxu0 %v25129_v61  ;;  %v7080_v38 = vsel %vm7076_vm13, %v20341_v15, %v7071_v23  ;;  %v7139_v46 = vmul.f32 %v20431_v33, %v7087_v57  ;;  %v7138_v57 = vmul.f32 %v20468_v10, %v7089_v34 }
0x17ff   : > { %6982 = vmatpush1.msra.mxu1 %v6677_v62  ;;  %16845 = vmatprep.subr.msk.mxu0 %vm804_vm0, %v7147_v39  ;;  %v7086_v39 = vsel %vm7076_vm13, %v7055_v63, %v20304_v0  ;;  %v20493_v62 = vrot.slane %v20401_v8, %v19572_v7  ;;  %v25197_v0 = vld [vmem:[#allocation34_spill] sm:$0xff] }
0x1800   : > { %16832 = vmatmul.mubr.msk.f32.gmra.mxu1 %vm4609_vm8, %v20426_v18  ;;  %16835 = vmatmul.mubr.msk.f32.vlgmr.msra.gmra.mxu0 %vm4609_vm8, %v20382_v40  ;;  %v7083_v63 = vsel %vm7076_vm13, %v25197_v0, %v19668_v53  ;;  %v7085_v47 = vsel %vm7076_vm13, %v25191_v32, %v25197_v0  ;;  %v7148_v45 = vmul.f32 %v20501_v9, %v7086_v39 }
0x1801   : > { %6944 = vmatprep.mubr.f32.mxu0 %v25129_v61  ;;  %7015 = vmatprep.mubr.f32.mxu1 %v25129_v61  ;;  %25195 = vst [vmem:[#allocation32_spill] sm:$0xff] %v20493_v62  ;;  %v20495_v55 = vpop.permute.xlu1 %7513  ;;  %v20497_v48 = vpop.permute.xlu0 %7978  ;;  %v7151_v33 = vmul.f32 %v20493_v62, %v7080_v38  ;;  %v7141_v32 = vmul.f32 %v20452_v31, %v7083_v63  ;;  %v16861_v63 = vld [vmem:[%s24704_s20 + $0x7] ss:$8 sm:$0xf] }
0x1802   : > { %16846 = vmatpush1.msk.msra.mxu0 %vm804_vm0, %v7146_v21  ;;  %16849 = vmatprep.subr.msk.mxu1 %vm804_vm0, %v7149_v58  ;;  %v7092_v21 = vsel %vm7076_vm13, %v7075_v41, %v20273_v20  ;;  %v20527_v58 = vld [vmem:[%s24698_s14 + $0x60] sm:$0xff]  ;;  %v7082_v20 = vsel %vm7076_vm13, %v7063_v60, %v20341_v15  ;;  %v7078_v39 = vsel %vm7076_vm13, %v7071_v23, %v7075_v41 }
0x1803   : > { %7217 = vmatprep.subr.mxu0 %v7139_v46  ;;  %v7140_v46 = vmul.f32 %v20501_v9, %v7085_v47  ;;  %v20548_v0 = vrot.slane %v20401_v8, %v19558_v30  ;;  %v16862_v15 = vld [vmem:[%s24704_s20 + $0x7] ss:$8 sm:$0xf0]  ;;  %v20558_v60 = vrot.slane %v20401_v8, %v19560_v43  ;;  %v7550_v9 = vsel %vm7543_vm14, %v19969_v24, %v20199_v11 }
0x1804   : > { %16836 = vmatmul.mubr.msk.f32.gmra.mxu0 %vm4609_vm8, %v20426_v18  ;;  %16839 = vmatmul.mubr.msk.f32.vlgmr.msra.gmra.mxu1 %vm4609_vm8, %v20382_v40  ;;  %v20536_v40 = vrot.slane %v20401_v8, %v19587_v3  ;;  %v7091_v8 = vsel %vm7076_vm13, %v19971_v54, %v25194_v35 }
0x1805   : > { %7021 = vmatprep.mubr.f32.mxu1 %v25129_v61  ;;  %7218 = vmatpush1.msra.mxu0 %v7138_v57  ;;  %v20530_v34 = vpop.permute.xlu1 %7525  ;;  %v20532_v38 = vpop.permute.xlu0 %7521  ;;  %25199 = vst [vmem:[#allocation34_spill] sm:$0xff] %v20548_v0  ;;  %25200 = vst [vmem:[#allocation70_spill] sm:$0xff] %v20558_v60  ;;  %v7152_v23 = vmul.f32 %v20558_v60, %v7078_v39  ;;  %v20580_v57 = vld [vmem:[%s24698_s14 + $0x68] sm:$0xf] }
0x1806   : > { %25198 = vst [vmem:[#allocation48_spill] sm:$0xff] %v20536_v40  ;;  %7251 = vmatprep.mubr.f32.mxu0 %v25129_v61  ;;  %16850 = vmatpush1.msk.msra.mxu1 %vm804_vm0, %v7148_v45  ;;  %v25201_v45 = vld [vmem:[#allocation40_spill] sm:$0xff]  ;;  %v7153_v41 = vmul.f32 %v20536_v40, %v7092_v21 }
0x1807   : > { %7294 = vmatprep.subr.mxu1 %v7141_v32  ;;  %16853 = vmatprep.subr.msk.mxu0 %vm804_vm0, %v7151_v33  ;;  %v7079_v47 = vsel %vm7076_vm13, %v25201_v45, %v19802_v5  ;;  %v7150_v33 = vmul.f32 %v20548_v0, %v7082_v20  ;;  %v7081_v35 = vsel %vm7076_vm13, %v19668_v53, %v25201_v45 }
0x1808   : > { %16840 = vmatmul.mubr.msk.f32.gmra.mxu1 %vm4609_vm8, %v20426_v18  ;;  %16847 = vmatmul.mubr.msk.f32.vlgmr.msra.gmra.mxu0 %vm4609_vm8, %v20527_v58  ;;  %v20591_v32 = vor.u32 %v16862_v15, %v16861_v63  ;;  %v7077_v20 = vsel %vm7076_vm13, %v19802_v5, %v19971_v54  ;;  %v7143_v39 = vmul.f32 %v20493_v62, %v7079_v47 }
0x1809   : > { %7257 = vmatprep.mubr.f32.mxu0 %v25129_v61  ;;  %7295 = vmatpush1.msra.mxu1 %v7140_v46  ;;  %v20582_v18 = vpop.permute.xlu1 %7533  ;;  %v20584_v21 = vpop.permute.xlu0 %7529  ;;  %v7555_v53 = vsel %vm7543_vm14, %v20460_v36, %v20532_v38  ;;  %v7145_v46 = vmul.f32 %v20536_v40, %v7091_v8  ;;  %v7142_v63 = vmul.f32 %v20548_v0, %v7081_v35 }
0x180a   : > { %7328 = vmatprep.mubr.f32.mxu1 %v25129_v61  ;;  %16857 = vmatprep.subr.msk.mxu1 %vm804_vm0, %v7153_v41  ;;  %v20612_v5 = vrot.slane %v20591_v32, %v19519_v22  ;;  %v7551_v54 = vsel %vm7543_vm14, %v20530_v34, %v20584_v21  ;;  %v20622_v15 = vrot.slane %v20591_v32, %v19534_v12 }
0x180b   : > { %16854 = vmatpush1.msk.msra.mxu0 %vm804_vm0, %v7150_v33  ;;  %v7144_v41 = vmul.f32 %v20558_v60, %v7077_v20  ;;  %v7557_v8 = vsel %vm7543_vm14, %v20495_v55, %v20460_v36  ;;  %v20639_v35 = vrot.slane %v20591_v32, %v19513_v50  ;;  %v7556_v36 = vsel %vm7543_vm14, %v20164_v19, %v20118_v49 }
0x180c   : > { %16848 = vmatmul.mubr.msk.f32.gmra.mxu0 %vm4609_vm8, %v20580_v57  ;;  %16851 = vmatmul.mubr.msk.f32.vlgmr.msra.gmra.mxu1 %vm4609_vm8, %v20527_v58  ;;  %25202 = vst [vmem:[#allocation40_spill] sm:$0xff] %v20612_v5  ;;  %25203 = vst [vmem:[#allocation71_spill] sm:$0xff] %v20622_v15  ;;  %v7614_v33 = vmul.f32 %v20612_v5, %v7555_v53  ;;  %v7616_v20 = vmul.f32 %v20622_v15, %v7551_v54  ;;  %v16881_v53 = vld [vmem:[%s24704_s20 + $0x40] ss:$8 sm:$0xf] }
0x180d   : > { %16858 = vmatpush1.msk.msra.mxu1 %vm804_vm0, %v7152_v23  ;;  %7371 = vmatprep.subr.mxu0 %v7143_v39  ;;  %v20624_v45 = vpop.permute.xlu1 %7998  ;;  %v7538_v47 = vpop.permute.xlu0 %7537  ;;  %v7554_v23 = vsel %vm7543_vm14, %v20118_v49, %v19921_v59  ;;  %25204 = vst [vmem:[#allocation72_spill] sm:$0xff] %v20639_v35  ;;  %v7613_v54 = vmul.f32 %v20639_v35, %v7557_v8 }
0x180e   : > { %7448 = vmatprep.subr.mxu1 %v7145_v46  ;;  %7334 = vmatprep.mubr.f32.mxu1 %v25129_v61  ;;  %v7547_v39 = vsel %vm7543_vm14, %v20582_v18, %v7538_v47  ;;  %v16882_v46 = vld [vmem:[%s24704_s20 + $0x40] ss:$8 sm:$0xf0]  ;;  %v20664_v49 = vrot.slane %v20591_v32, %v19572_v7  ;;  %v20670_v60 = vrot.slane %v20591_v32, %v19536_v28 }
0x180f   : > { %7372 = vmatpush1.msra.mxu0 %v7142_v63  ;;  %7405 = vmatprep.mubr.f32.mxu0 %v25129_v61  ;;  %v7553_v8 = vsel %vm7543_vm14, %v20532_v38, %v20530_v34  ;;  %v7606_v0 = vmul.f32 %v20612_v5, %v7554_v23  ;;  %v7605_v40 = vmul.f32 %v20639_v35, %v7556_v36 }
0x1810   : > { %7449 = vmatpush1.msra.mxu1 %v7144_v41  ;;  %16855 = vmatmul.mubr.msk.f32.vlgmr.msra.gmra.mxu0 %vm4609_vm8, %v20527_v58  ;;  %25205 = vst [vmem:[#allocation73_spill] sm:$0xff] %v20664_v49  ;;  %25206 = vst [vmem:[#allocation74_spill] sm:$0xff] %v20670_v60  ;;  %v7618_v62 = vmul.f32 %v20664_v49, %v7547_v39  ;;  %v20687_v34 = vor.u32 %v16882_v46, %v16881_v53 }
0x1811   : > { %16852 = vmatmul.mubr.msk.f32.gmra.mxu1 %vm4609_vm8, %v20580_v57  ;;  %7411 = vmatprep.mubr.f32.mxu0 %v25129_v61  ;;  %v7542_v63 = vpop.permute.xlu1 %7541  ;;  %v20666_v41 = vpop.permute.xlu0 %7994  ;;  %v7615_v23 = vmul.f32 %v20670_v60, %v7553_v8  ;;  %v7546_v36 = vsel %vm7543_vm14, %v20017_v17, %v20211_v42 }
0x1812   : > { %7482 = vmatprep.mubr.f32.mxu1 %v25129_v61  ;;  %16865 = vmatprep.subr.msk.mxu0 %vm804_vm0, %v7614_v33  ;;  %v7559_v38 = vsel %vm7543_vm14, %v7542_v63, %v20495_v55  ;;  %v7552_v33 = vsel %vm7543_vm14, %v19921_v59, %v19969_v24  ;;  %v20712_v55 = vrot.slane %v20591_v32, %v19558_v30 }
0x1813   : > { %16866 = vmatpush1.msk.msra.mxu0 %vm804_vm0, %v7613_v54  ;;  %16869 = vmatprep.subr.msk.mxu1 %vm804_vm0, %v7616_v20  ;;  %v20704_v20 = vld [vmem:[%s24698_s14 + $0x70] sm:$0xff]  ;;  %v7549_v59 = vsel %vm7543_vm14, %v20584_v21, %v20582_v18  ;;  %v7608_v24 = vmul.f32 %v20622_v15, %v7550_v9  ;;  %v7607_v21 = vmul.f32 %v20670_v60, %v7552_v33 }
0x1814   : > { %16856 = vmatmul.mubr.msk.f32.gmra.mxu0 %vm4609_vm8, %v20580_v57  ;;  %7684 = vmatprep.subr.mxu0 %v7606_v0  ;;  %v20708_v0 = vrot.slane %v20591_v32, %v19587_v3  ;;  %25208 = vst [vmem:[#allocation76_spill] sm:$0xff] %v20712_v55  ;;  %v7617_v53 = vmul.f32 %v20712_v55, %v7549_v59 }
0x1815   : > { %16859 = vmatmul.mubr.msk.f32.vlgmr.msra.gmra.mxu1 %vm4609_vm8, %v20527_v58  ;;  %7685 = vmatpush1.msra.mxu0 %v7605_v40  ;;  %v7548_v40 = vsel %vm7543_vm14, %v20199_v11, %v20017_v17  ;;  %v7545_v11 = vsel %vm7543_vm14, %v7538_v47, %v7542_v63  ;;  %v20742_v17 = vrot.slane %v20591_v32, %v19560_v43 }
0x1816   : > { %25207 = vst [vmem:[#allocation75_spill] sm:$0xff] %v20708_v0  ;;  %7488 = vmatprep.mubr.f32.mxu1 %v25129_v61  ;;  %7718 = vmatprep.mubr.f32.mxu0 %v25129_v61  ;;  %v7985_v58 = vpop.permute.xlu1 %7984  ;;  %v7620_v18 = vmul.f32 %v20708_v0, %v7559_v38  ;;  %v20755_v47 = vrot.slane %v20687_v34, %v19519_v22 }
0x1817   : > { %16870 = vmatpush1.msk.msra.mxu1 %vm804_vm0, %v7615_v23  ;;  %16873 = vmatprep.subr.msk.mxu0 %vm804_vm0, %v7618_v62  ;;  %v7989_v9 = vpop.permute.xlu0 %7988  ;;  %25209 = vst [vmem:[#allocation77_spill] sm:$0xff] %v20742_v17  ;;  %v20751_v62 = vld [vmem:[%s24698_s14 + $0x78] sm:$0xf]  ;;  %v7609_v46 = vmul.f32 %v20712_v55, %v7548_v40  ;;  %v7610_v32 = vmul.f32 %v20664_v49, %v7546_v36 }
0x1818   : > { %16867 = vmatmul.mubr.msk.f32.vlgmr.msra.gmra.mxu0 %vm4609_vm8, %v20704_v20  ;;  %7761 = vmatprep.subr.mxu1 %v7608_v24  ;;  %v8022_v39 = vsel %vm8010_vm15, %v7985_v58, %v7989_v9  ;;  %25210 = vst [vmem:[#allocation78_spill] sm:$0xff] %v20755_v47  ;;  %v7619_v54 = vmul.f32 %v20742_v17, %v7545_v11 }
0x1819   : > { %16860 = vmatmul.mubr.msk.f32.gmra.mxu1 %vm4609_vm8, %v20580_v57  ;;  %7724 = vmatprep.mubr.f32.mxu0 %v25129_v61  ;;  %v7558_v57 = vsel %vm7543_vm14, %v20225_v4, %v20164_v19  ;;  %v8081_v22 = vmul.f32 %v20755_v47, %v8022_v39  ;;  %v7544_v19 = vsel %vm7543_vm14, %v20211_v42, %v20225_v4 }
0x181a   : > { %7762 = vmatpush1.msra.mxu1 %v7607_v21  ;;  %7795 = vmatprep.mubr.f32.mxu1 %v25129_v61  ;;  %v20781_v33 = vrot.slane %v20687_v34, %v19513_v50  ;;  %v7612_v23 = vmul.f32 %v20708_v0, %v7558_v57  ;;  %v8021_v59 = vsel %vm8010_vm15, %v20343_v37, %v20209_v1 }
0x181b   : > { %16874 = vmatpush1.msk.msra.mxu0 %vm804_vm0, %v7617_v53  ;;  %16877 = vmatprep.subr.msk.mxu1 %vm804_vm0, %v7620_v18  ;;  %v20768_v63 = vpop.permute.xlu1 %7980  ;;  %v7611_v4 = vmul.f32 %v20742_v17, %v7544_v19  ;;  %v8023_v24 = vsel %vm8010_vm15, %v20497_v48, %v20343_v37  ;;  %v20807_v36 = vrot.slane %v20687_v34, %v19534_v12 }
0x181c   : > { %16868 = vmatmul.mubr.msk.f32.gmra.mxu0 %vm4609_vm8, %v20751_v62  ;;  %7838 = vmatprep.subr.mxu0 %v7610_v32  ;;  %v8024_v8 = vsel %vm8010_vm15, %v20768_v63, %v7985_v58  ;;  %v7997_v38 = vpop.permute.xlu0 %7996  ;;  %25211 = vst [vmem:[#allocation79_spill] sm:$0xff] %v20781_v33  ;;  %v20815_v21 = vrot.slane %v20687_v34, %v19536_v28 }
0x181d   : > { %16871 = vmatmul.mubr.msk.f32.vlgmr.msra.gmra.mxu1 %vm4609_vm8, %v20704_v20  ;;  %7839 = vmatpush1.msra.mxu0 %v7609_v46  ;;  %v8080_v42 = vmul.f32 %v20781_v33, %v8024_v8  ;;  %25212 = vst [vmem:[#allocation80_spill] sm:$0xff] %v20807_v36  ;;  %v8073_v11 = vmul.f32 %v20755_v47, %v8021_v59 }
0x181e   : > { %7801 = vmatprep.mubr.f32.mxu1 %v25129_v61  ;;  %7872 = vmatprep.mubr.f32.mxu0 %v25129_v61  ;;  %25213 = vst [vmem:[#allocation81_spill] sm:$0xff] %v20815_v21  ;;  %v8072_v39 = vmul.f32 %v20781_v33, %v8023_v24  ;;  %v20824_v53 = vrot.slane %v20687_v34, %v19572_v7  ;;  %v16883_v7 = vld [vmem:[%s24698_s14 + $0x80] sm:$0xff] }
0x181f   : > { %16878 = vmatpush1.msk.msra.mxu1 %vm804_vm0, %v7619_v54  ;;  %16885 = vmatprep.subr.msk.mxu0 %vm804_vm0, %v8081_v22  ;;  %v8017_v46 = vsel %vm8010_vm15, %v20388_v13, %v20666_v41  ;;  %v8019_v54 = vsel %vm8010_vm15, %v20209_v1, %v20388_v13  ;;  %v20850_v22 = vrot.slane %v20687_v34, %v19558_v30 }
0x1820   : > { %16875 = vmatmul.mubr.msk.f32.vlgmr.msra.gmra.mxu0 %vm4609_vm8, %v20704_v20  ;;  %7915 = vmatprep.subr.mxu1 %v7612_v23  ;;  %v7993_v58 = vpop.permute.xlu1 %7992  ;;  %v8005_v40 = vpop.permute.xlu0 %8004  ;;  %25214 = vst [vmem:[#allocation82_spill] sm:$0xff] %v20824_v53  ;;  %v8075_v1 = vmul.f32 %v20807_v36, %v8017_v46  ;;  %v20859_v13 = vrot.slane %v20687_v34, %v19587_v3  ;;  %v16884_v23 = vld [vmem:[%s24698_s14 + $0x88] sm:$0xf] }
0x1821   : > { %16872 = vmatmul.mubr.msk.f32.gmra.mxu1 %vm4609_vm8, %v20751_v62  ;;  %7878 = vmatprep.mubr.f32.mxu0 %v25129_v61  ;;  %v8018_v18 = vsel %vm8010_vm15, %v7993_v58, %v7997_v38  ;;  %v8020_v37 = vsel %vm8010_vm15, %v7989_v9, %v7993_v58  ;;  %25215 = vst [vmem:[#allocation83_spill] sm:$0xff] %v20850_v22 }
0x1822   : > { %7916 = vmatpush1.msra.mxu1 %v7611_v4  ;;  %7949 = vmatprep.mubr.f32.mxu1 %v25129_v61  ;;  %v8083_v12 = vmul.f32 %v20807_v36, %v8018_v18  ;;  %v8082_v28 = vmul.f32 %v20815_v21, %v8020_v37  ;;  %25216 = vst [vmem:[#allocation84_spill] sm:$0xff] %v20859_v13 }
0x1823   : > { %16886 = vmatpush1.msk.msra.mxu0 %vm804_vm0, %v8080_v42  ;;  %v8015_v3 = vsel %vm8010_vm15, %v20666_v41, %v20624_v45 }
0x1824   : > { %16876 = vmatmul.mubr.msk.f32.gmra.mxu0 %vm4609_vm8, %v20751_v62  ;;  %8151 = vmatprep.subr.mxu0 %v8073_v11  ;;  %v8001_v9 = vpop.permute.xlu1 %8000  ;;  %v8076_v24 = vmul.f32 %v20850_v22, %v8015_v3 }
0x1825   : > { %16879 = vmatmul.mubr.msk.f32.vlgmr.msra.gmra.mxu1 %vm4609_vm8, %v20704_v20  ;;  %8152 = vmatpush1.msra.mxu0 %v8072_v39  ;;  %v8014_v32 = vsel %vm8010_vm15, %v8001_v9, %v8005_v40  ;;  %v8003_v57 = vpop.permute.xlu0 %8002  ;;  %v8016_v20 = vsel %vm8010_vm15, %v7997_v38, %v8001_v9  ;;  %v8074_v38 = vmul.f32 %v20815_v21, %v8019_v54 }
0x1826   : > { %7955 = vmatprep.mubr.f32.mxu1 %v25129_v61  ;;  %8185 = vmatprep.mubr.f32.mxu0 %v25129_v61  ;;  %v8085_v8 = vmul.f32 %v20824_v53, %v8014_v32  ;;  %v8084_v30 = vmul.f32 %v20850_v22, %v8016_v20  ;;  %v8013_v19 = vsel %vm8010_vm15, %v20624_v45, %v8003_v57 }
0x1827   : > { %16889 = vmatprep.subr.msk.mxu1 %vm804_vm0, %v8083_v12  ;;  %v8077_v41 = vmul.f32 %v20824_v53, %v8013_v19 }
0x1828   : > { %16887 = vmatmul.mubr.msk.f32.vlgmr.msra.gmra.mxu0 %vm4609_vm8, %v16883_v7  ;;  %16890 = vmatpush1.msk.msra.mxu1 %vm804_vm0, %v8082_v28 }
0x1829   : > { %16880 = vmatmul.mubr.msk.f32.gmra.mxu1 %vm4609_vm8, %v20751_v62  ;;  %8191 = vmatprep.mubr.f32.mxu0 %v25129_v61  ;;  %v20879_v62 = vrot.slane %v20687_v34, %v19560_v43 }
0x182a   : > { %8228 = vmatprep.subr.mxu1 %v8075_v1  ;;  %8262 = vmatprep.mubr.f32.mxu1 %v25129_v61 }
0x182b   : > { %25217 = vst [vmem:[#allocation85_spill] sm:$0xff] %v20879_v62  ;;  %8229 = vmatpush1.msra.mxu1 %v8074_v38  ;;  %v8009_v59 = vpop.permute.xlu1 %8008  ;;  %16893 = vmatprep.subr.msk.mxu0 %vm804_vm0, %v8085_v8  ;;  %v8007_v42 = vpop.permute.xlu0 %8006 }
0x182c   : > { %16888 = vmatmul.mubr.msk.f32.gmra.mxu0 %vm4609_vm8, %v16884_v23  ;;  %v8012_v4 = vsel %vm8010_vm15, %v8005_v40, %v8009_v59  ;;  %v8026_v45 = vsel %vm8010_vm15, %v8009_v59, %v20768_v63  ;;  %v8025_v58 = vsel %vm8010_vm15, %v8007_v42, %v20497_v48  ;;  %v8011_v63 = vsel %vm8010_vm15, %v8003_v57, %v8007_v42 }
0x182d   : > { %v8087_v43 = vmul.f32 %v20859_v13, %v8026_v45  ;;  %16891 = vmatmul.mubr.msk.f32.vlgmr.msra.gmra.mxu1 %vm4609_vm8, %v16883_v7  ;;  %16894 = vmatpush1.msk.msra.mxu0 %vm804_vm0, %v8084_v30  ;;  %v8086_v34 = vmul.f32 %v20879_v62, %v8012_v4  ;;  %v8079_v40 = vmul.f32 %v20859_v13, %v8025_v58 }
0x182e   : > { %8305 = vmatprep.subr.mxu0 %v8077_v41  ;;  %8268 = vmatprep.mubr.f32.mxu1 %v25129_v61  ;;  %v8078_v48 = vmul.f32 %v20879_v62, %v8011_v63 }
0x182f   : > { %8306 = vmatpush1.msra.mxu0 %v8076_v24  ;;  %8339 = vmatprep.mubr.f32.mxu0 %v25129_v61 }
0x1830   : > { %16895 = vmatmul.mubr.msk.f32.vlgmr.msra.gmra.mxu0 %vm4609_vm8, %v16883_v7  ;;  %16897 = vmatprep.subr.msk.mxu1 %vm804_vm0, %v8087_v43 }
0x1831   : > { %16892 = vmatmul.mubr.msk.f32.gmra.mxu1 %vm4609_vm8, %v16884_v23  ;;  %8345 = vmatprep.mubr.f32.mxu0 %v25129_v61 }
0x1832   : > { %16898 = vmatpush1.msk.msra.mxu1 %vm804_vm0, %v8086_v34  ;;  %8416 = vmatprep.mubr.f32.mxu1 %v25129_v61 }
0x1833   : > { %8382 = vmatprep.subr.mxu1 %v8079_v40 }
0x1834   : > { %8383 = vmatpush1.msra.mxu1 %v8078_v48  ;;  %16896 = vmatmul.mubr.msk.f32.gmra.mxu0 %vm4609_vm8, %v16884_v23 }
0x1835   : > { %16899 = vmatmul.mubr.msk.f32.vlgmr.msra.gmra.mxu1 %vm4609_vm8, %v16883_v7  ;;  %8872 = vmatprep.mubr.f32.mxu0 %v25129_v61 }
0x1836   : > { %8422 = vmatprep.mubr.f32.mxu1 %v25129_v61 }
0x1839   : > { %16900 = vmatmul.mubr.msk.f32.gmra.mxu1 %vm4609_vm8, %v16884_v23 }
0x183a   : > { %8949 = vmatprep.mubr.f32.mxu1 %v25129_v61 }
0x185e   : > { %v4706_v18 = vpop.f32.mrf.mxu0 }
0x1860   : > { %v20915_v37 = vpop.f32.mrf.mxu0 }
0x1862   : > { %v4712_v11 = vpop.f32.mrf.mxu0  ;;  %v4783_v39 = vpop.f32.mrf.mxu1 }
0x1864   : > { %v20917_v12 = vpop.f32.mrf.mxu0  ;;  %v20919_v28 = vpop.f32.mrf.mxu1 }
0x1868   : > { %v4860_v9 = vpop.f32.mrf.mxu0 }
0x1869   : > { %v4789_v46 = vpop.f32.mrf.mxu1 }
0x186a   : > { %v20921_v7 = vpop.f32.mrf.mxu0 }
0x186b   : > { %v20923_v32 = vpop.f32.mrf.mxu1 }
0x186c   : > { %v4866_v57 = vpop.f32.mrf.mxu0 }
0x186d   : > { %v4937_v54 = vpop.f32.mrf.mxu1 }
0x186e   : > { %v20925_v20 = vpop.f32.mrf.mxu0 }
0x186f   : > { %v20927_v8 = vpop.f32.mrf.mxu1 }
0x1871   : > { %v4943_v1 = vpop.f32.mrf.mxu1  ;;  %v5044_v38 = vpop.f32.mrf.mxu0 }
0x1872   : > { %v5045_v30 = vadd.f32 %v5044_v38, %v4706_v18 }
0x1873   : > { %v20929_v19 = vpop.f32.mrf.mxu1  ;;  %v20931_v23 = vpop.f32.mrf.mxu0 }
0x1876   : > { %v5050_v3 = vpop.f32.mrf.mxu0  ;;  %v5121_v59 = vpop.f32.mrf.mxu1 }
0x1877   : > { %v5051_v42 = vadd.f32 %v5050_v3, %v4712_v11  ;;  %v5122_v4 = vadd.f32 %v5121_v59, %v4783_v39 }
0x1878   : > { %v20933_v45 = vpop.f32.mrf.mxu0  ;;  %v20935_v41 = vpop.f32.mrf.mxu1 }
0x187d   : > { %v5127_v24 = vpop.f32.mrf.mxu1  ;;  %v5198_v43 = vpop.f32.mrf.mxu0 }
0x187e   : > { %v5128_v34 = vadd.f32 %v5127_v24, %v4789_v46  ;;  %v5199_v58 = vadd.f32 %v5198_v43, %v4860_v9 }
0x187f   : > { %v20937_v63 = vpop.f32.mrf.mxu1  ;;  %v20939_v40 = vpop.f32.mrf.mxu0 }
0x1881   : > { %v5204_v48 = vpop.f32.mrf.mxu0  ;;  %v5275_v18 = vpop.f32.mrf.mxu1 }
0x1882   : > { %v5205_v38 = vadd.f32 %v5204_v48, %v4866_v57  ;;  %v5276_v50 = vadd.f32 %v5275_v18, %v4937_v54 }
0x1883   : > { %v20941_v62 = vpop.f32.mrf.mxu0  ;;  %v20943_v11 = vpop.f32.mrf.mxu1 }
0x1885   : > { %v5281_v39 = vpop.f32.mrf.mxu1  ;;  %v5495_v3 = vpop.f32.mrf.mxu0 }
0x1886   : > { %v5282_v59 = vadd.f32 %v5281_v39, %v4943_v1  ;;  %v5737_v13 = vadd.f32 %v5495_v3, %v5045_v30 }
0x1887   : > { %v20945_v22 = vpop.f32.mrf.mxu1  ;;  %v20947_v46 = vpop.f32.mrf.mxu0 }
0x1889   : > { %v5501_v9 = vpop.f32.mrf.mxu0  ;;  %v5572_v24 = vpop.f32.mrf.mxu1 }
0x188a   : > { %v5745_v43 = vadd.f32 %v5501_v9, %v5051_v42  ;;  %v5739_v53 = vadd.f32 %v5572_v24, %v5122_v4 }
0x188b   : > { %v20949_v21 = vpop.f32.mrf.mxu0  ;;  %v20951_v57 = vpop.f32.mrf.mxu1 }
0x188e   : > { %v5578_v54 = vpop.f32.mrf.mxu1  ;;  %v5649_v48 = vpop.f32.mrf.mxu0 }
0x188f   : > { %v5747_v18 = vadd.f32 %v5578_v54, %v5128_v34  ;;  %v5741_v36 = vadd.f32 %v5649_v48, %v5199_v58 }
0x1890   : > { %v20953_v33 = vpop.f32.mrf.mxu1  ;;  %v20955_v1 = vpop.f32.mrf.mxu0 }
0x1892   : > { %v5655_v30 = vpop.f32.mrf.mxu0  ;;  %v5726_v39 = vpop.f32.mrf.mxu1 }
0x1893   : > { %v5749_v3 = vadd.f32 %v5655_v30, %v5205_v38  ;;  %v5743_v47 = vadd.f32 %v5726_v39, %v5276_v50 }
0x1894   : > { %v20957_v17 = vpop.f32.mrf.mxu0  ;;  %v20959_v42 = vpop.f32.mrf.mxu1 }
0x1896   : > { %v5732_v4 = vpop.f32.mrf.mxu1  ;;  %v5962_v9 = vpop.f32.mrf.mxu0 }
0x1897   : > { %v5751_v24 = vadd.f32 %v5732_v4, %v5282_v59  ;;  %v20961_v55 = vadd.f32 %v5962_v9, %v5737_v13 }
0x1898   : > { %v20963_v0 = vpop.f32.mrf.mxu1  ;;  %v20965_v34 = vpop.f32.mrf.mxu0 }
0x189a   : > { %v5968_v58 = vpop.f32.mrf.mxu0  ;;  %v6039_v54 = vpop.f32.mrf.mxu1 }
0x189b   : > { %v20967_v48 = vadd.f32 %v5968_v58, %v5745_v43  ;;  %v20969_v60 = vadd.f32 %v6039_v54, %v5739_v53 }
0x189c   : > { %v20971_v50 = vpop.f32.mrf.mxu0  ;;  %v20973_v38 = vpop.f32.mrf.mxu1 }
0x189e   : > { %v6116_v30 = vpop.f32.mrf.mxu0 }
0x189f   : > { %v6045_v39 = vpop.f32.mrf.mxu1  ;;  %v20975_v49 = vadd.f32 %v6116_v30, %v5741_v36 }
0x18a0   : > { %v20977_v13 = vadd.f32 %v6045_v39, %v5747_v18  ;;  %v20979_v59 = vpop.f32.mrf.mxu0 }
0x18a1   : > { %v20981_v4 = vpop.f32.mrf.mxu1 }
0x18a3   : > { %v6122_v9 = vpop.f32.mrf.mxu0  ;;  %v6193_v35 = vpop.f32.mrf.mxu1 }
0x18a4   : > { %v20983_v43 = vadd.f32 %v6122_v9, %v5749_v3  ;;  %v20985_v53 = vadd.f32 %v6193_v35, %v5743_v47 }
0x18a5   : > { %v20987_v58 = vpop.f32.mrf.mxu0  ;;  %v20989_v54 = vpop.f32.mrf.mxu1 }
0x18a7   : > { %v6199_v15 = vpop.f32.mrf.mxu1 }
0x18a8   : > { %v20991_v5 = vadd.f32 %v6199_v15, %v5751_v24  ;;  %v20993_v36 = vpop.f32.mrf.mxu0 }
0x18a9   : > { %v20995_v18 = vpop.f32.mrf.mxu1 }
0x18aa   : > { %25218 = vst [vmem:[#allocation86_spill] sm:$0xff] %v20991_v5  ;;  %v20997_v30 = vpop.f32.mrf.mxu0 }
0x18ab   : > { %v20999_v39 = vpop.f32.mrf.mxu1 }
0x18ac   : > { %v21001_v10 = vpop.f32.mrf.mxu0 }
0x18ad   : > { %v21003_v3 = vpop.f32.mrf.mxu1 }
0x18ae   : > { %v21005_v35 = vpop.f32.mrf.mxu0 }
0x18af   : > { %v21007_v47 = vpop.f32.mrf.mxu1 }
0x18b0   : > { %v21009_v9 = vpop.f32.mrf.mxu0 }
0x18b1   : > { %v21011_v15 = vpop.f32.mrf.mxu1 }
0x18b2   : > { %v21013_v24 = vpop.f32.mrf.mxu0 }
0x18b3   : > { %v21015_v31 = vpop.f32.mrf.mxu1 }
0x18b4   : > { %v21017_v6 = vpop.f32.mrf.mxu0 }
0x18b5   : > { %v21019_v61 = vpop.f32.mrf.mxu1 }
0x18b6   : > { %v21021_v51 = vpop.f32.mrf.mxu0 }
0x18b7   : > { %v21023_v52 = vpop.f32.mrf.mxu1 }
0x18b8   : > { %25219 = vst [vmem:[#allocation87_spill] sm:$0xff] %v21023_v52  ;;  %v21025_v44 = vpop.f32.mrf.mxu0 }
0x18b9   : > { %25220 = vst [vmem:[#allocation88_spill] sm:$0xff] %v21025_v44  ;;  %v21027_v29 = vpop.f32.mrf.mxu1 }
0x18ba   : > { %25221 = vst [vmem:[#allocation89_spill] sm:$0xff] %v21027_v29  ;;  %v21029_v27 = vpop.f32.mrf.mxu0 }
0x18bb   : > { %25222 = vst [vmem:[#allocation90_spill] sm:$0xff] %v21029_v27  ;;  %v21031_v25 = vpop.f32.mrf.mxu1 }
0x18bc   : > { %25223 = vst [vmem:[#allocation91_spill] sm:$0xff] %v21031_v25  ;;  %v21033_v14 = vpop.f32.mrf.mxu0 }
0x18bd   : > { %25224 = vst [vmem:[#allocation92_spill] sm:$0xff] %v21033_v14  ;;  %v21035_v26 = vpop.f32.mrf.mxu1 }
0x18be   : > { %25225 = vst [vmem:[#allocation93_spill] sm:$0xff] %v21035_v26  ;;  %v21037_v56 = vpop.f32.mrf.mxu0 }
0x18bf   : > { %25226 = vst [vmem:[#allocation94_spill] sm:$0xff] %v21037_v56 }
0x18c0   : > { %v21039_v16 = vpop.f32.mrf.mxu1  ;;  %v21041_v2 = vpop.f32.mrf.mxu0 }
0x18c1   : > { %25227 = vst [vmem:[#allocation95_spill] sm:$0xff] %v21039_v16  ;;  %25228 = vst [vmem:[#allocation96_spill] sm:$0xff] %v21041_v2 }
0x18c2   : > { %v21043_v5 = vpop.f32.mrf.mxu1  ;;  %v21045_v52 = vpop.f32.mrf.mxu0 }
0x18c3   : > { %25229 = vst [vmem:[#allocation97_spill] sm:$0xff] %v21043_v5  ;;  %25230 = vst [vmem:[#allocation98_spill] sm:$0xff] %v21045_v52 }
0x18c4   : > { %v21047_v44 = vpop.f32.mrf.mxu0  ;;  %v21049_v29 = vpop.f32.mrf.mxu1 }
0x18c5   : > { %25231 = vst [vmem:[#allocation99_spill] sm:$0xff] %v21047_v44  ;;  %25232 = vst [vmem:[#allocation100_spill] sm:$0xff] %v21049_v29 }
0x18c6   : > { %v21051_v27 = vpop.f32.mrf.mxu0  ;;  %v21053_v25 = vpop.f32.mrf.mxu1 }
0x18c7   : > { %25233 = vst [vmem:[#allocation101_spill] sm:$0xff] %v21051_v27  ;;  %25234 = vst [vmem:[#allocation102_spill] sm:$0xff] %v21053_v25 }
0x18c8   : > { %v21055_v14 = vpop.f32.mrf.mxu1  ;;  %v21057_v26 = vpop.f32.mrf.mxu0 }
0x18c9   : > { %25235 = vst [vmem:[#allocation103_spill] sm:$0xff] %v21055_v14  ;;  %25236 = vst [vmem:[#allocation104_spill] sm:$0xff] %v21057_v26 }
0x18ca   : > { %v21059_v56 = vpop.f32.mrf.mxu1  ;;  %v21061_v16 = vpop.f32.mrf.mxu0 }
0x18cb   : > { %25237 = vst [vmem:[#allocation105_spill] sm:$0xff] %v21059_v56  ;;  %25238 = vst [vmem:[#allocation106_spill] sm:$0xff] %v21061_v16 }
0x18cc   : > { %v21063_v2 = vpop.f32.mrf.mxu0  ;;  %v21065_v5 = vpop.f32.mrf.mxu1 }
0x18cd   : > { %25239 = vst [vmem:[#allocation107_spill] sm:$0xff] %v21065_v5  ;;  %v5047_v5 = vadd.f32 %v20931_v23, %v20915_v37  ;;  %v5278_v37 = vadd.f32 %v20943_v11, %v20927_v8  ;;  %v6569_v11 = vadd.f32 %v21001_v10, %v20967_v48  ;;  %v6573_v10 = vadd.f32 %v21017_v6, %v20983_v43  ;;  %v25253_v43 = vld [vmem:[#allocation91_spill] sm:$0xff] }
0x18ce   : > { %v21067_v52 = vpop.f32.mrf.mxu0  ;;  %v21069_v44 = vpop.f32.mrf.mxu1 }
0x18cf   : > { %25240 = vst [vmem:[#allocation108_spill] sm:$0xff] %v21067_v52  ;;  %25241 = vst [vmem:[#allocation109_spill] sm:$0xff] %v21069_v44  ;;  %v5053_v44 = vadd.f32 %v20933_v45, %v20917_v12  ;;  %v5284_v12 = vadd.f32 %v20945_v22, %v20929_v19  ;;  %v5738_v23 = vadd.f32 %v20947_v46, %v5047_v5 }
0x18d0   : > { %v21071_v29 = vpop.f32.mrf.mxu0  ;;  %v5744_v8 = vadd.f32 %v20959_v42, %v5278_v37  ;;  %v6563_v46 = vadd.f32 %v20999_v39, %v20969_v60  ;;  %v6567_v60 = vadd.f32 %v21015_v31, %v20985_v53  ;;  %v25254_v31 = vld [vmem:[#allocation94_spill] sm:$0xff]  ;;  %v25256_v37 = vld [vmem:[#allocation95_spill] sm:$0xff] }
0x18d1   : > { %25242 = vst [vmem:[#allocation110_spill] sm:$0xff] %v21071_v29  ;;  %v21073_v27 = vpop.f32.mrf.mxu1  ;;  %v5124_v29 = vadd.f32 %v20935_v41, %v20919_v28  ;;  %v5746_v28 = vadd.f32 %v20949_v21, %v5053_v44  ;;  %v5752_v22 = vadd.f32 %v20963_v0, %v5284_v12  ;;  %v6205_v5 = vadd.f32 %v20965_v34, %v5738_v23  ;;  %v25257_v23 = vld [vmem:[#allocation96_spill] sm:$0xff] }
0x18d2   : > { %v21075_v25 = vpop.f32.mrf.mxu0  ;;  %v6561_v0 = vadd.f32 %v20993_v36, %v20961_v55  ;;  %v6571_v55 = vadd.f32 %v21007_v47, %v20977_v13  ;;  %v6565_v34 = vadd.f32 %v21009_v9, %v20975_v49  ;;  %v25247_v13 = vld [vmem:[#allocation86_spill] sm:$0xff]  ;;  %v25249_v49 = vld [vmem:[#allocation88_spill] sm:$0xff] }
0x18d3   : > { %v21077_v14 = vpop.f32.mrf.mxu1  ;;  %v6213_v44 = vadd.f32 %v20971_v50, %v5746_v28  ;;  %v6219_v19 = vadd.f32 %v20995_v18, %v5752_v22  ;;  %v25252_v9 = vld [vmem:[#allocation92_spill] sm:$0xff]  ;;  %v25260_v22 = vld [vmem:[#allocation99_spill] sm:$0xff] }
0x18d4   : > { %25243 = vst [vmem:[#allocation111_spill] sm:$0xff] %v21077_v14  ;;  %v21079_v26 = vpop.f32.mrf.mxu0  ;;  %v5130_v14 = vadd.f32 %v20937_v63, %v20923_v32  ;;  %v5740_v32 = vadd.f32 %v20951_v57, %v5124_v29  ;;  %v6562_v63 = vadd.f32 %v20997_v30, %v6205_v5  ;;  %v7028_v18 = vadd.f32 %v25249_v49, %v6561_v0  ;;  %v25250_v30 = vld [vmem:[#allocation89_spill] sm:$0xff] }
0x18d5   : > { %25244 = vst [vmem:[#allocation112_spill] sm:$0xff] %v21079_v26  ;;  %v21081_v56 = vpop.f32.mrf.mxu1  ;;  %v5201_v26 = vadd.f32 %v20939_v40, %v20921_v7  ;;  %v6570_v57 = vadd.f32 %v21005_v35, %v6213_v44  ;;  %v6576_v39 = vadd.f32 %v25250_v30, %v6219_v19  ;;  %v7036_v6 = vadd.f32 %v25252_v9, %v6569_v11  ;;  %v25261_v44 = vld [vmem:[#allocation100_spill] sm:$0xff]  ;;  %v25264_v19 = vld [vmem:[#allocation103_spill] sm:$0xff] }
0x18d6   : > { %25245 = vst [vmem:[#allocation113_spill] sm:$0xff] %v21081_v56  ;;  %v21083_v16 = vpop.f32.mrf.mxu0  ;;  %v5748_v7 = vadd.f32 %v20953_v33, %v5130_v14  ;;  %v6207_v29 = vadd.f32 %v20973_v38, %v5740_v32  ;;  %v6211_v33 = vadd.f32 %v20989_v54, %v5744_v8  ;;  %v25248_v54 = vld [vmem:[#allocation87_spill] sm:$0xff]  ;;  %v7038_v12 = vadd.f32 %v25256_v37, %v6571_v55  ;;  %v25258_v32 = vld [vmem:[#allocation97_spill] sm:$0xff]  ;;  %v25265_v11 = vld [vmem:[#allocation104_spill] sm:$0xff] }
0x18d7   : > { %25246 = vst [vmem:[#allocation114_spill] sm:$0xff] %v21083_v16  ;;  %v21089_v52 = vpop.f32.mrf.mxu1  ;;  %v5207_v16 = vadd.f32 %v20941_v62, %v20925_v20  ;;  %v5742_v62 = vadd.f32 %v20955_v1, %v5201_v26  ;;  %v6575_v36 = vadd.f32 %v25248_v54, %v25247_v13  ;;  %v7037_v53 = vadd.f32 %v25254_v31, %v6570_v57  ;;  %v25266_v57 = vld [vmem:[#allocation105_spill] sm:$0xff]  ;;  %v25267_v55 = vld [vmem:[#allocation106_spill] sm:$0xff]  ;;  %v25268_v13 = vld [vmem:[#allocation107_spill] sm:$0xff] }
0x18d8   : > { %v21099_v56 = vpop.f32.mrf.mxu0  ;;  %v6215_v14 = vadd.f32 %v20981_v4, %v5748_v7  ;;  %v6564_v1 = vadd.f32 %v21003_v3, %v6207_v29  ;;  %v6568_v4 = vadd.f32 %v21019_v61, %v6211_v33  ;;  %v25251_v3 = vld [vmem:[#allocation90_spill] sm:$0xff]  ;;  %v7032_v28 = vadd.f32 %v25257_v23, %v6565_v34  ;;  %v25269_v54 = vld [vmem:[#allocation108_spill] sm:$0xff]  ;;  %v25270_v49 = vld [vmem:[#allocation109_spill] sm:$0xff] }
0x18d9   : > { %v21107_v45 = vpop.f32.mrf.mxu1  ;;  %v5750_v20 = vadd.f32 %v20957_v17, %v5207_v16  ;;  %v6209_v26 = vadd.f32 %v20979_v59, %v5742_v62  ;;  %v7029_v35 = vadd.f32 %v25251_v3, %v6562_v63  ;;  %v25259_v62 = vld [vmem:[#allocation98_spill] sm:$0xff]  ;;  %v7040_v5 = vadd.f32 %v25260_v22, %v6573_v10 }
0x18da   : > { %v21113_v41 = vpop.f32.mrf.mxu0  ;;  %v6572_v50 = vadd.f32 %v21011_v15, %v6215_v14  ;;  %v7030_v15 = vadd.f32 %v25253_v43, %v6563_v46  ;;  %v7034_v29 = vadd.f32 %v25261_v44, %v6567_v60  ;;  %v25262_v14 = vld [vmem:[#allocation101_spill] sm:$0xff]  ;;  %v7042_v63 = vadd.f32 %v25264_v19, %v6575_v36  ;;  %v25271_v3 = vld [vmem:[#allocation110_spill] sm:$0xff] }
0x18db   : > { %v21119_v21 = vpop.f32.mrf.mxu1  ;;  %v6217_v16 = vadd.f32 %v20987_v58, %v5750_v20  ;;  %v6566_v38 = vadd.f32 %v21013_v24, %v6209_v26  ;;  %v7495_v46 = vadd.f32 %v25265_v11, %v7028_v18  ;;  %v7496_v34 = vadd.f32 %v25267_v55, %v7029_v35  ;;  %v25272_v35 = vld [vmem:[#allocation111_spill] sm:$0xff]  ;;  %v25276_v44 = vld [vmem:[#allocation9_spill] sm:$0xff]  ;;  %v21208_v55 = vpop.permute.xlu1 %8470 }
0x18dc   : > { %v21125_v17 = vpop.f32.mrf.mxu0  ;;  %v7039_v7 = vadd.f32 %v25258_v32, %v6572_v50  ;;  %v7497_v10 = vadd.f32 %v25268_v13, %v7030_v15  ;;  %v7504_v60 = vadd.f32 %v25269_v54, %v7037_v53  ;;  %v7499_v36 = vadd.f32 %v25271_v3, %v7032_v28  ;;  %v25273_v31 = vld [vmem:[#allocation112_spill] sm:$0xff] }
0x18dd   : > { %v21132_v40 = vpop.f32.mrf.mxu1  ;;  %v6574_v48 = vadd.f32 %v21021_v51, %v6217_v16  ;;  %v25255_v51 = vld [vmem:[#allocation93_spill] sm:$0xff]  ;;  %v7033_v20 = vadd.f32 %v25259_v62, %v6566_v38  ;;  %v25263_v16 = vld [vmem:[#allocation102_spill] sm:$0xff]  ;;  %v7503_v38 = vadd.f32 %v21063_v2, %v7036_v6  ;;  %v7507_v2 = vadd.f32 %v25273_v31, %v7040_v5  ;;  %v25280_v3 = vld [vmem:[#allocation12_spill] sm:$0xff] }
0x18de   : > { %v7728_v42 = vpop.f32.mrf.mxu0  ;;  %v7031_v24 = vadd.f32 %v25255_v51, %v6564_v1  ;;  %v7035_v33 = vadd.f32 %v25263_v16, %v6568_v4  ;;  %v7043_v1 = vadd.f32 %v25266_v57, %v6576_v39  ;;  %v7505_v4 = vadd.f32 %v21073_v27, %v7038_v12  ;;  %v25274_v6 = vld [vmem:[#allocation113_spill] sm:$0xff]  ;;  %v25275_v51 = vld [vmem:[#allocation114_spill] sm:$0xff] }
0x18df   : > { %v7799_v59 = vpop.f32.mrf.mxu1  ;;  %v7041_v26 = vadd.f32 %v25262_v14, %v6574_v48  ;;  %v7500_v18 = vadd.f32 %v21075_v25, %v7033_v20  ;;  %v7962_v39 = vadd.f32 %v21099_v56, %v7495_v46  ;;  %v7506_v43 = vadd.f32 %v25272_v35, %v7039_v7  ;;  %v21192_v14 = vpop.permute.xlu0 %8465  ;;  %v25278_v46 = vld [vmem:[#allocation17_spill] sm:$0xff] }
0x18e0   : > { %v7874_v58 = vpop.f32.mrf.mxu0  ;;  %v7498_v48 = vadd.f32 %v25270_v49, %v7031_v24  ;;  %v7501_v15 = vadd.f32 %v25274_v6, %v7034_v29  ;;  %v7502_v24 = vadd.f32 %v21089_v52, %v7035_v33  ;;  %v7509_v27 = vadd.f32 %v21107_v45, %v7042_v63 }
0x18e1   : > { %v7803_v47 = vpop.f32.mrf.mxu1  ;;  %v7508_v53 = vadd.f32 %v25275_v51, %v7041_v26  ;;  %v7963_v12 = vadd.f32 %v21113_v41, %v7496_v34  ;;  %v7510_v56 = vadd.f32 %v21119_v21, %v7043_v1  ;;  %v7970_v28 = vadd.f32 %v21125_v17, %v7503_v38 }
0x18e2   : > { %v7876_v61 = vpop.f32.mrf.mxu0  ;;  %v7964_v32 = vadd.f32 %v21132_v40, %v7497_v10  ;;  %v7971_v7 = vadd.f32 %v7728_v42, %v7504_v60  ;;  %v7965_v20 = vadd.f32 %v7799_v59, %v7498_v48  ;;  %v7966_v22 = vadd.f32 %v7874_v58, %v7499_v36  ;;  %v25277_v40 = vld [vmem:[#allocation8_spill] sm:$0xff] }
0x18e3   : > { %v7805_v8 = vpop.f32.mrf.mxu1  ;;  %v7972_v45 = vadd.f32 %v7803_v47, %v7505_v4  ;;  %v7967_v26 = vadd.f32 %v7876_v61, %v7500_v18  ;;  %v25281_v18 = vld [vmem:[#allocation5_spill] sm:$0xff] }
0x18e4   : > { %v7880_v0 = vpop.f32.mrf.mxu0  ;;  %v7973_v41 = vadd.f32 %v7805_v8, %v7506_v43 }
0x18e5   : > { %v7951_v50 = vpop.f32.mrf.mxu1  ;;  %v21194_v16 = vadd.f32 %v7880_v0, %v7507_v2 }
0x18e6   : > { %v7882_v30 = vpop.f32.mrf.mxu0  ;;  %v21196_v33 = vadd.f32 %v7951_v50, %v7501_v15  ;;  %v25279_v50 = vld [vmem:[#allocation10_spill] sm:$0xff] }
0x18e7   : > { %v7953_v9 = vpop.f32.mrf.mxu1  ;;  %v21200_v19 = vadd.f32 %v7882_v30, %v7508_v53 }
0x18e8   : > { %v8187_v37 = vpop.f32.mrf.mxu0  ;;  %v21202_v63 = vadd.f32 %v7953_v9, %v7502_v24 }
0x18e9   : > { %v7957_v23 = vpop.f32.mrf.mxu1  ;;  %v8429_v25 = vadd.f32 %v8187_v37, %v7962_v39 }
0x18ea   : > { %v8189_v62 = vpop.f32.mrf.mxu0  ;;  %v21204_v11 = vadd.f32 %v7957_v23, %v7509_v27  ;;  %v25282_v27 = vld [vmem:[#allocation14_spill] sm:$0xff] }
0x18eb   : > { %v7959_v5 = vpop.f32.mrf.mxu1  ;;  %v8445_v29 = vadd.f32 %v8429_v25, %v25276_v44  ;;  %v8430_v52 = vadd.f32 %v8189_v62, %v7963_v12  ;;  %v25283_v23 = vld [vmem:[#allocation6_spill] sm:$0xff] }
0x18ec   : > { %v8193_v21 = vpop.f32.mrf.mxu0  ;;  %v21210_v34 = vadd.f32 %v7959_v5, %v7510_v56 }
0x18ed   : > { %v8473_v17 = vadd.f32 %v21192_v14, %v8445_v29  ;;  %v8446_v42 = vadd.f32 %v8430_v52, %v25277_v40  ;;  %v8437_v59 = vadd.f32 %v8193_v21, %v7970_v28  ;;  %v8264_v58 = vpop.f32.mrf.mxu1 }
0x18ee   : > { %v8431_v47 = vadd.f32 %v8264_v58, %v7964_v32  ;;  %v8195_v8 = vpop.f32.mrf.mxu0 }
0x18ef   : > { %vm8489_vm1 = vcmp.gt.f32.partialorder %v8473_v17, 0.0  ;;  %v8505_v61 = vmul.f32 0.01, %v8473_v17  ;;  %v8474_v0 = vadd.f32 %v21192_v14, %v8446_v42  ;;  %v8453_v57 = vadd.f32 %v8437_v59, %v25278_v46  ;;  %v8266_v1 = vpop.f32.mrf.mxu1  ;;  %v25284_v46 = vld [vmem:[#allocation18_spill] sm:$0xff] }
0x18f0   : > { %v8447_v38 = vadd.f32 %v8431_v47, %v25279_v50  ;;  %v8438_v13 = vadd.f32 %v8195_v8, %v7971_v7  ;;  %v8432_v10 = vadd.f32 %v8266_v1, %v7965_v20  ;;  %v8341_v54 = vpop.f32.mrf.mxu0 }
0x18f1   : > { %v21213_v60 = vsel %vm8489_vm1, %v8473_v17, %v8505_v61  ;;  %vm8490_vm2 = vcmp.gt.f32.partialorder %v8474_v0, 0.0  ;;  %v8506_v49 = vmul.f32 0.01, %v8474_v0  ;;  %v8481_v48 = vadd.f32 %v21208_v55, %v8453_v57  ;;  %v8270_v30 = vpop.f32.mrf.mxu1 }
0x18f2   : > { %v8475_v4 = vadd.f32 %v21192_v14, %v8447_v38  ;;  %v8454_v36 = vadd.f32 %v8438_v13, %v25280_v3  ;;  %v8448_v39 = vadd.f32 %v8432_v10, %v25281_v18  ;;  %v8439_v9 = vadd.f32 %v8270_v30, %v7972_v45  ;;  %v8343_v35 = vpop.f32.mrf.mxu0  ;;  %v25286_v30 = vld [vmem:[#allocation15_spill] sm:$0xff] }
0x18f3   : > { %v21219_v43 = vsel %vm8490_vm2, %v8474_v0, %v8506_v49  ;;  %vm8497_vm4 = vcmp.gt.f32.partialorder %v8481_v48, 0.0  ;;  %v8513_v31 = vmul.f32 0.01, %v8481_v48  ;;  %v8433_v2 = vadd.f32 %v8341_v54, %v7966_v22  ;;  %v8272_v6 = vpop.f32.mrf.mxu1  ;;  %v25287_v3 = vld [vmem:[#allocation11_spill] sm:$0xff] }
0x18f4   : > { %v8537_v15 = vadd.f32 %v21219_v43, %v21213_v60  ;;  %vm8491_vm5 = vcmp.gt.f32.partialorder %v8475_v4, 0.0  ;;  %v8507_v51 = vmul.f32 0.01, %v8475_v4  ;;  %v8482_v53 = vadd.f32 %v21208_v55, %v8454_v36  ;;  %v8347_v56 = vpop.f32.mrf.mxu0  ;;  %v25288_v18 = vld [vmem:[#allocation19_spill] sm:$0xff] }
0x18f5   : > { %v21224_v37 = vsel %vm8497_vm4, %v8481_v48, %v8513_v31  ;;  %v8476_v24 = vadd.f32 %v21192_v14, %v8448_v39  ;;  %v8455_v12 = vadd.f32 %v8439_v9, %v25282_v27  ;;  %v8449_v25 = vadd.f32 %v8433_v2, %v25283_v23  ;;  %v8418_v28 = vpop.f32.mrf.mxu1 }
0x18f6   : > { %v8546_v32 = vsel %vm804_vm0, %v21224_v37, 0.0  ;;  %v21231_v7 = vsel %vm8491_vm5, %v8475_v4, %v8507_v51  ;;  %vm8498_vm6 = vcmp.gt.f32.partialorder %v8482_v53, 0.0  ;;  %v8514_v62 = vmul.f32 0.01, %v8482_v53  ;;  %v8349_v59 = vpop.f32.mrf.mxu0 }
0x18f7   : > { %v8538_v20 = vadd.f32 %v8537_v15, %v21231_v7  ;;  %vm8492_vm1 = vcmp.gt.f32.partialorder %v8476_v24, 0.0  ;;  %v8508_v22 = vmul.f32 0.01, %v8476_v24  ;;  %v8483_v5 = vadd.f32 %v21208_v55, %v8455_v12  ;;  %v8420_v44 = vpop.f32.mrf.mxu1  ;;  %v25289_v15 = vld [vmem:[#allocation7_spill] sm:$0xff] }
0x18f8   : > { %v21235_v29 = vsel %vm8498_vm6, %v8482_v53, %v8514_v62  ;;  %v8477_v52 = vadd.f32 %v21192_v14, %v8449_v25  ;;  %v8440_v45 = vadd.f32 %v8272_v6, %v7973_v41  ;;  %v8434_v21 = vadd.f32 %v8343_v35, %v7967_v26  ;;  %v25285_v41 = vld [vmem:[#allocation4_spill] sm:$0xff] }
0x18f9   : > { %v8547_v17 = vsel %vm804_vm0, %v21235_v29, 0.0  ;;  %v21240_v40 = vsel %vm8492_vm1, %v8476_v24, %v8508_v22  ;;  %vm8499_vm2 = vcmp.gt.f32.partialorder %v8483_v5, 0.0  ;;  %v8515_v42 = vmul.f32 0.01, %v8483_v5  ;;  %v8424_v61 = vpop.f32.mrf.mxu1  ;;  %v25290_v24 = vld [vmem:[#allocation16_spill] sm:$0xff] }
0x18fa   : > { %v8548_v58 = vadd.f32 %v8547_v17, %v8546_v32  ;;  %v8539_v47 = vadd.f32 %v8538_v20, %v21240_v40  ;;  %vm8493_vm4 = vcmp.gt.f32.partialorder %v8477_v52, 0.0  ;;  %v8509_v8 = vmul.f32 0.01, %v8477_v52  ;;  %v25291_v20 = vld [vmem:[#allocation13_spill] sm:$0xff] }
0x18fb   : > { %v21243_v0 = vsel %vm8499_vm2, %v8483_v5, %v8515_v42  ;;  %v8456_v57 = vadd.f32 %v8440_v45, %v25284_v46  ;;  %v8450_v26 = vadd.f32 %v8434_v21, %v25285_v41  ;;  %v8441_v1 = vadd.f32 %v8347_v56, %v21194_v16  ;;  %v8426_v35 = vpop.f32.mrf.mxu1 }
0x18fc   : > { %v8549_v50 = vsel %vm804_vm0, %v21243_v0, 0.0  ;;  %v21250_v38 = vsel %vm8493_vm4, %v8477_v52, %v8509_v8  ;;  %v8435_v13 = vadd.f32 %v8418_v28, %v21196_v33  ;;  %v8442_v10 = vadd.f32 %v8349_v59, %v21200_v19 }
0x18fd   : > { %v8550_v54 = vadd.f32 %v8549_v50, %v8548_v58  ;;  %v8484_v49 = vadd.f32 %v21208_v55, %v8456_v57  ;;  %v8478_v48 = vadd.f32 %v21192_v14, %v8450_v26  ;;  %v8457_v4 = vadd.f32 %v8441_v1, %v25286_v30 }
0x18fe   : > { %v8451_v36 = vadd.f32 %v8435_v13, %v25287_v3  ;;  %v8458_v16 = vadd.f32 %v8442_v10, %v25288_v18  ;;  %v8436_v39 = vadd.f32 %v8420_v44, %v21202_v63  ;;  %v8443_v9 = vadd.f32 %v8424_v61, %v21204_v11 }
0x18ff   : > { %vm8500_vm5 = vcmp.gt.f32.partialorder %v8484_v49, 0.0  ;;  %v8516_v33 = vmul.f32 0.01, %v8484_v49  ;;  %vm8494_vm6 = vcmp.gt.f32.partialorder %v8478_v48, 0.0  ;;  %v8510_v19 = vmul.f32 0.01, %v8478_v48 }
0x1900   : > { %v8485_v31 = vadd.f32 %v21208_v55, %v8457_v4  ;;  %v8479_v2 = vadd.f32 %v21192_v14, %v8451_v36  ;;  %v8486_v6 = vadd.f32 %v21208_v55, %v8458_v16  ;;  %v8452_v51 = vadd.f32 %v8436_v39, %v25289_v15 }
0x1901   : > { %v8532_v53 = vsel %vm8500_vm5, %v8484_v49, %v8516_v33  ;;  %v8459_v27 = vadd.f32 %v8443_v9, %v25290_v24  ;;  %v8444_v63 = vadd.f32 %v8426_v35, %v21210_v34  ;;  %v8526_v12 = vsel %vm8494_vm6, %v8478_v48, %v8510_v19 }
0x1902   : > { %v8551_v11 = vsel %vm804_vm0, %v8532_v53, 0.0  ;;  %vm8501_vm1 = vcmp.gt.f32.partialorder %v8485_v31, 0.0  ;;  %v8517_v23 = vmul.f32 0.01, %v8485_v31  ;;  %vm8495_vm2 = vcmp.gt.f32.partialorder %v8479_v2, 0.0 }
0x1903   : > { %v8511_v25 = vmul.f32 0.01, %v8479_v2  ;;  %vm8502_vm4 = vcmp.gt.f32.partialorder %v8486_v6, 0.0  ;;  %v8518_v56 = vmul.f32 0.01, %v8486_v6  ;;  %v8480_v28 = vadd.f32 %v21192_v14, %v8452_v51 }
0x1904   : > { %v8533_v32 = vsel %vm8501_vm1, %v8485_v31, %v8517_v23  ;;  %v8487_v62 = vadd.f32 %v21208_v55, %v8459_v27  ;;  %v8460_v22 = vadd.f32 %v8444_v63, %v25291_v20  ;;  %v8540_v5 = vadd.f32 %v8539_v47, %v21250_v38 }
0x1905   : > { %v8553_v34 = vsel %vm804_vm0, %v8533_v32, 0.0  ;;  %vm8496_vm5 = vcmp.gt.f32.partialorder %v8480_v28, 0.0  ;;  %v8512_v44 = vmul.f32 0.01, %v8480_v28  ;;  %v8527_v52 = vsel %vm8495_vm2, %v8479_v2, %v8511_v25 }
0x1906   : > { %vm8503_vm6 = vcmp.gt.f32.partialorder %v8487_v62, 0.0  ;;  %v8519_v45 = vmul.f32 0.01, %v8487_v62  ;;  %v8488_v21 = vadd.f32 %v21208_v55, %v8460_v22  ;;  %v8541_v17 = vadd.f32 %v8540_v5, %v8526_v12 }
0x1907   : > { %v8528_v42 = vsel %vm8496_vm5, %v8480_v28, %v8512_v44  ;;  %v8534_v14 = vsel %vm8502_vm4, %v8486_v6, %v8518_v56  ;;  %v8552_v59 = vadd.f32 %v8551_v11, %v8550_v54 }
0x1908   : > { %v8520_v58 = vmul.f32 0.01, %v8488_v21  ;;  %v8542_v8 = vadd.f32 %v8541_v17, %v8527_v52  ;;  %vm8504_vm1 = vcmp.gt.f32.partialorder %v8488_v21, 0.0  ;;  %v8535_v61 = vsel %vm8503_vm6, %v8487_v62, %v8519_v45 }
0x1909   : > { %v8554_v46 = vadd.f32 %v8553_v34, %v8552_v59  ;;  %v8555_v47 = vsel %vm804_vm0, %v8534_v14, 0.0  ;;  %v8557_v26 = vsel %vm804_vm0, %v8535_v61, 0.0 }
0x190a   : > { %v8543_v57 = vadd.f32 %v8542_v8, %v8528_v42  ;;  %v8536_v41 = vsel %vm8504_vm1, %v8488_v21, %v8520_v58 }
0x190b   : > { %v8556_v1 = vadd.f32 %v8555_v47, %v8554_v46  ;;  %v8559_v55 = vsel %vm804_vm0, %v8536_v41, 0.0 }
0x190c   : > { %8544 = vadd.xlane.f32.xlu0 %v8543_v57 }
0x190d   : > { %v8558_v50 = vadd.f32 %v8557_v26, %v8556_v1 }
0x190f   : > { %v8560_v13 = vadd.f32 %v8559_v55, %v8558_v50 }
0x1911   : > { %8561 = vadd.xlane.f32.xlu1 %v8560_v13 }
0x1995   : > { %v8545_v10 = vpop.xlane.xlu0 %8544 }
0x1996   : > { %v8563_v54 = vmul.f32 0.0009765625, %v8545_v10 }
0x1998   : > { %v21279_v49 = vsub.f32 %v21213_v60, %v8563_v54  ;;  %v8566_v48 = vsub.f32 %v21219_v43, %v8563_v54  ;;  %v21283_v30 = vsub.f32 %v21231_v7, %v8563_v54  ;;  %v21286_v3 = vsub.f32 %v21240_v40, %v8563_v54 }
0x1999   : > { %v21291_v39 = vsub.f32 %v21250_v38, %v8563_v54  ;;  %v8570_v33 = vsub.f32 %v8526_v12, %v8563_v54  ;;  %v8572_v63 = vsub.f32 %v8528_v42, %v8563_v54 }
0x199a   : > { %v8562_v4 = vpop.xlane.xlu1 %8561  ;;  %v8581_v36 = vmul.f32 %v21279_v49, %v21279_v49  ;;  %v8582_v18 = vmul.f32 %v8566_v48, %v8566_v48  ;;  %v8583_v60 = vmul.f32 %v21283_v30, %v21283_v30  ;;  %v8584_v38 = vmul.f32 %v21286_v3, %v21286_v3 }
0x199b   : > { %v8564_v16 = vmul.f32 0.0009765625, %v8562_v4  ;;  %v8585_v6 = vmul.f32 %v21291_v39, %v21291_v39  ;;  %v8586_v12 = vmul.f32 %v8570_v33, %v8570_v33  ;;  %v8588_v44 = vmul.f32 %v8572_v63, %v8572_v63 }
0x199c   : > { %v8597_v9 = vadd.f32 %v8582_v18, %v8581_v36 }
0x199d   : > { %v21296_v43 = vsub.f32 %v21224_v37, %v8564_v16  ;;  %v21299_v7 = vsub.f32 %v21235_v29, %v8564_v16  ;;  %v21302_v40 = vsub.f32 %v21243_v0, %v8564_v16  ;;  %v21304_v35 = vsub.f32 %v8532_v53, %v8564_v16 }
0x199e   : > { %v8598_v19 = vadd.f32 %v8597_v9, %v8583_v60  ;;  %v21308_v31 = vsub.f32 %v8533_v32, %v8564_v16  ;;  %v8571_v0 = vsub.f32 %v8527_v52, %v8563_v54  ;;  %v21318_v51 = vsub.f32 %v8534_v14, %v8564_v16 }
0x199f   : > { %v8589_v2 = vmul.f32 %v21296_v43, %v21296_v43  ;;  %v8590_v37 = vmul.f32 %v21299_v7, %v21299_v7  ;;  %v8591_v29 = vmul.f32 %v21302_v40, %v21302_v40  ;;  %v8592_v53 = vmul.f32 %v21304_v35, %v21304_v35 }
0x19a0   : > { %v8599_v15 = vadd.f32 %v8598_v19, %v8584_v38  ;;  %v21324_v25 = vsub.f32 %v8535_v61, %v8564_v16  ;;  %v8593_v56 = vmul.f32 %v21308_v31, %v21308_v31  ;;  %v8587_v32 = vmul.f32 %v8571_v0, %v8571_v0 }
0x19a1   : > { %v8606_v24 = vsel %vm804_vm0, %v8589_v2, 0.0  ;;  %v8607_v27 = vsel %vm804_vm0, %v8590_v37, 0.0  ;;  %v8609_v28 = vsel %vm804_vm0, %v8591_v29, 0.0  ;;  %v21329_v22 = vsub.f32 %v8536_v41, %v8564_v16 }
0x19a2   : > { %v8600_v11 = vadd.f32 %v8599_v15, %v8585_v6  ;;  %v8608_v23 = vadd.f32 %v8607_v27, %v8606_v24  ;;  %v8594_v5 = vmul.f32 %v21318_v51, %v21318_v51  ;;  %v8611_v34 = vsel %vm804_vm0, %v8592_v53, 0.0 }
0x19a3   : > { %v8595_v21 = vmul.f32 %v21324_v25, %v21324_v25  ;;  %v8613_v17 = vsel %vm804_vm0, %v8593_v56, 0.0  ;;  %v8596_v59 = vmul.f32 %v21329_v22, %v21329_v22 }
0x19a4   : > { %v8601_v62 = vadd.f32 %v8600_v11, %v8586_v12  ;;  %v8610_v20 = vadd.f32 %v8609_v28, %v8608_v23  ;;  %v8615_v58 = vsel %vm804_vm0, %v8594_v5, 0.0 }
0x19a5   : > { %v8617_v61 = vsel %vm804_vm0, %v8595_v21, 0.0  ;;  %v8619_v47 = vsel %vm804_vm0, %v8596_v59, 0.0 }
0x19a6   : > { %v8602_v52 = vadd.f32 %v8601_v62, %v8587_v32  ;;  %v8612_v45 = vadd.f32 %v8611_v34, %v8610_v20 }
0x19a8   : > { %v8603_v42 = vadd.f32 %v8602_v52, %v8588_v44  ;;  %v8614_v14 = vadd.f32 %v8613_v17, %v8612_v45 }
0x19aa   : > { %8604 = vadd.xlane.f32.xlu1 %v8603_v42  ;;  %v8616_v8 = vadd.f32 %v8615_v58, %v8614_v14 }
0x19ac   : > { %v8618_v46 = vadd.f32 %v8617_v61, %v8616_v8 }
0x19ae   : > { %v8620_v57 = vadd.f32 %v8619_v47, %v8618_v46 }
0x19b0   : > { %8621 = vadd.xlane.f32.xlu0 %v8620_v57 }
0x1a33   : > { %v8605_v41 = vpop.xlane.xlu1 %8604 }
0x1a34   : > { %v8623_v26 = vmul.f32 0.0009765625, %v8605_v41 }
0x1a36   : > { %v8625_v1 = vadd.f32 1e-05, %v8623_v26 }
0x1a38   : > { %17737 = vrsqrt.f32 %v8625_v1 }
0x1a45   : > { %v17738_v55 = vpop.eup %17737 }
0x1a46   : > { %v21342_v50 = vmul.f32 %v17738_v55, %v8566_v48  ;;  %v21345_v13 = vmul.f32 %v17738_v55, %v21279_v49  ;;  %v21352_v10 = vmul.f32 %v17738_v55, %v21283_v30  ;;  %v21354_v54 = vmul.f32 %v17738_v55, %v8572_v63 }
0x1a47   : > { %v21361_v49 = vmul.f32 %v17738_v55, %v21291_v39  ;;  %v21364_v48 = vmul.f32 %v17738_v55, %v21286_v3  ;;  %v21370_v30 = vmul.f32 %v17738_v55, %v8570_v33  ;;  %v21376_v4 = vmul.f32 %v17738_v55, %v8571_v0  ;;  %v8622_v3 = vpop.xlane.xlu0 %8621 }
0x1a48   : > { %25292 = vst [vmem:[#allocation86_spill] sm:$0xff] %v21342_v50  ;;  %25293 = vst [vmem:[#allocation87_spill] sm:$0xff] %v21345_v13  ;;  %8715 = vrot.lane.b32.xlu1 %v21342_v50, %s24954_s4  ;;  %8711 = vrot.lane.b32.xlu0 %v21345_v13, %s24954_s4  ;;  %v8624_v36 = vmul.f32 0.0009765625, %v8622_v3 }
0x1a49   : > { %25294 = vst [vmem:[#allocation88_spill] sm:$0xff] %v21352_v10  ;;  %25295 = vst [vmem:[#allocation89_spill] sm:$0xff] %v21354_v54 }
0x1a4a   : > { %25296 = vst [vmem:[#allocation90_spill] sm:$0xff] %v21361_v49  ;;  %25297 = vst [vmem:[#allocation92_spill] sm:$0xff] %v21364_v48  ;;  %v8626_v18 = vadd.f32 1e-05, %v8624_v36 }
0x1a4b   : > { %25298 = vst [vmem:[#allocation91_spill] sm:$0xff] %v21370_v30  ;;  %25299 = vst [vmem:[#allocation94_spill] sm:$0xff] %v21376_v4 }
0x1a4c   : > { %8719 = vrot.lane.b32.xlu1 %v21352_v10, %s24954_s4  ;;  %8739 = vrot.lane.b32.xlu0 %v21354_v54, %s24954_s4  ;;  %17739 = vrsqrt.f32 %v8626_v18 }
0x1a50   : > { %8727 = vrot.lane.b32.xlu1 %v21361_v49, %s24954_s4  ;;  %8723 = vrot.lane.b32.xlu0 %v21364_v48, %s24954_s4 }
0x1a54   : > { %8649 = vrot.lane.b32.xlu1 %v21342_v50, %s24952_s0  ;;  %8731 = vrot.lane.b32.xlu0 %v21370_v30, %s24954_s4 }
0x1a58   : > { %8653 = vrot.lane.b32.xlu1 %v21352_v10, %s24952_s0  ;;  %8735 = vrot.lane.b32.xlu0 %v21376_v4, %s24954_s4 }
0x1a59   : > { %v17740_v16 = vpop.eup %17739 }
0x1a5a   : > { %v21431_v39 = vmul.f32 %v17740_v16, %v21299_v7  ;;  %v21438_v60 = vmul.f32 %v17740_v16, %v21329_v22  ;;  %v21445_v9 = vmul.f32 %v17740_v16, %v21302_v40  ;;  %v21452_v7 = vmul.f32 %v17740_v16, %v21308_v31 }
0x1a5b   : > { %v21463_v40 = vmul.f32 %v17740_v16, %v21324_v25  ;;  %v21470_v33 = vmul.f32 %v17740_v16, %v21296_v43  ;;  %v21493_v43 = vmul.f32 %v17740_v16, %v21304_v35  ;;  %v21504_v31 = vmul.f32 %v17740_v16, %v21318_v51 }
0x1a5c   : > { %8661 = vrot.lane.b32.xlu1 %v21361_v49, %s24952_s0  ;;  %8645 = vrot.lane.b32.xlu0 %v21345_v13, %s24952_s0  ;;  %25304 = vst [vmem:[#allocation93_spill] sm:$0xff] %v21431_v39  ;;  %25305 = vst [vmem:[#allocation95_spill] sm:$0xff] %v21438_v60 }
0x1a5d   : > { %25306 = vst [vmem:[#allocation96_spill] sm:$0xff] %v21445_v9  ;;  %25307 = vst [vmem:[#allocation97_spill] sm:$0xff] %v21452_v7 }
0x1a5e   : > { %25308 = vst [vmem:[#allocation98_spill] sm:$0xff] %v21463_v40  ;;  %25309 = vst [vmem:[#allocation99_spill] sm:$0xff] %v21470_v33 }
0x1a5f   : > { %25310 = vst [vmem:[#allocation100_spill] sm:$0xff] %v21493_v43  ;;  %25311 = vst [vmem:[#allocation101_spill] sm:$0xff] %v21504_v31 }
0x1a60   : > { %9458 = vrot.lane.b32.xlu1 %v21342_v50, %s25300_s6  ;;  %8673 = vrot.lane.b32.xlu0 %v21354_v54, %s24952_s0 }
0x1a64   : > { %9462 = vrot.lane.b32.xlu1 %v21352_v10, %s25300_s6  ;;  %8657 = vrot.lane.b32.xlu0 %v21364_v48, %s24952_s0 }
0x1a68   : > { %9470 = vrot.lane.b32.xlu1 %v21361_v49, %s25300_s6  ;;  %8665 = vrot.lane.b32.xlu0 %v21370_v30, %s24952_s0 }
0x1a6c   : > { %9879 = vrot.lane.b32.xlu1 %v21342_v50, %s25301_s5  ;;  %8669 = vrot.lane.b32.xlu0 %v21376_v4, %s24952_s0 }
0x1a70   : > { %9883 = vrot.lane.b32.xlu1 %v21352_v10, %s25301_s5  ;;  %9454 = vrot.lane.b32.xlu0 %v21345_v13, %s25300_s6 }
0x1a74   : > { %9891 = vrot.lane.b32.xlu1 %v21361_v49, %s25301_s5  ;;  %9482 = vrot.lane.b32.xlu0 %v21354_v54, %s25300_s6 }
0x1a78   : > { %10661 = vrot.lane.b32.xlu1 %v21352_v10, %s25302_s2  ;;  %9466 = vrot.lane.b32.xlu0 %v21364_v48, %s25300_s6 }
0x1a7c   : > { %10665 = vrot.lane.b32.xlu1 %v21364_v48, %s25302_s2  ;;  %9474 = vrot.lane.b32.xlu0 %v21370_v30, %s25300_s6 }
0x1a80   : > { %10673 = vrot.lane.b32.xlu1 %v21370_v30, %s25302_s2  ;;  %9478 = vrot.lane.b32.xlu0 %v21376_v4, %s25300_s6 }
0x1a84   : > { %11082 = vrot.lane.b32.xlu1 %v21352_v10, %s25303_s30  ;;  %9875 = vrot.lane.b32.xlu0 %v21345_v13, %s25301_s5 }
0x1a88   : > { %11086 = vrot.lane.b32.xlu1 %v21364_v48, %s25303_s30  ;;  %9903 = vrot.lane.b32.xlu0 %v21354_v54, %s25301_s5 }
0x1a8c   : > { %9887 = vrot.lane.b32.xlu0 %v21364_v48, %s25301_s5  ;;  %8717 = vrot.lane.b32.xlu1 %v21431_v39, %s24954_s4 }
0x1a90   : > { %9895 = vrot.lane.b32.xlu0 %v21370_v30, %s25301_s5  ;;  %8741 = vrot.lane.b32.xlu1 %v21438_v60, %s24954_s4 }
0x1a94   : > { %9899 = vrot.lane.b32.xlu0 %v21376_v4, %s25301_s5  ;;  %8721 = vrot.lane.b32.xlu1 %v21445_v9, %s24954_s4 }
0x1a98   : > { %10657 = vrot.lane.b32.xlu0 %v21342_v50, %s25302_s2  ;;  %8729 = vrot.lane.b32.xlu1 %v21452_v7, %s24954_s4 }
0x1a9c   : > { %10653 = vrot.lane.b32.xlu0 %v21345_v13, %s25302_s2  ;;  %11094 = vrot.lane.b32.xlu1 %v21370_v30, %s25303_s30 }
0x1aa0   : > { %10669 = vrot.lane.b32.xlu0 %v21361_v49, %s25302_s2  ;;  %8737 = vrot.lane.b32.xlu1 %v21463_v40, %s24954_s4 }
0x1aa4   : > { %10677 = vrot.lane.b32.xlu0 %v21376_v4, %s25302_s2  ;;  %8647 = vrot.lane.b32.xlu1 %v21470_v33, %s24952_s0 }
0x1aa8   : > { %10681 = vrot.lane.b32.xlu0 %v21354_v54, %s25302_s2  ;;  %8675 = vrot.lane.b32.xlu1 %v21438_v60, %s24952_s0 }
0x1aac   : > { %11078 = vrot.lane.b32.xlu0 %v21342_v50, %s25303_s30  ;;  %8655 = vrot.lane.b32.xlu1 %v21445_v9, %s24952_s0 }
0x1ab0   : > { %11074 = vrot.lane.b32.xlu0 %v21345_v13, %s25303_s30  ;;  %8663 = vrot.lane.b32.xlu1 %v21452_v7, %s24952_s0 }
0x1ab4   : > { %8671 = vrot.lane.b32.xlu1 %v21463_v40, %s24952_s0  ;;  %8713 = vrot.lane.b32.xlu0 %v21470_v33, %s24954_s4 }
0x1ab8   : > { %9456 = vrot.lane.b32.xlu1 %v21470_v33, %s25300_s6  ;;  %8725 = vrot.lane.b32.xlu0 %v21493_v43, %s24954_s4 }
0x1aba   : > { %v21499_v38 = vpop.permute.xlu1 %8715  ;;  %v21501_v19 = vpop.permute.xlu0 %8711 }
0x1abc   : > { %9484 = vrot.lane.b32.xlu1 %v21438_v60, %s25300_s6  ;;  %8733 = vrot.lane.b32.xlu0 %v21504_v31, %s24954_s4  ;;  %s25465_s4 = smov 32  }
0x1abe   : > { %v21510_v35 = vpop.permute.xlu1 %8719  ;;  %v21512_v2 = vpop.permute.xlu0 %8739 }
0x1ac0   : > { %9464 = vrot.lane.b32.xlu1 %v21445_v9, %s25300_s6  ;;  %11090 = vrot.lane.b32.xlu0 %v21361_v49, %s25303_s30 }
0x1ac2   : > { %v21518_v37 = vpop.permute.xlu1 %8727  ;;  %v21520_v29 = vpop.permute.xlu0 %8723 }
0x1ac4   : > { %9472 = vrot.lane.b32.xlu1 %v21452_v7, %s25300_s6  ;;  %8651 = vrot.lane.b32.xlu0 %v21431_v39, %s24952_s0 }
0x1ac6   : > { %v21526_v0 = vpop.permute.xlu1 %8649  ;;  %v21528_v6 = vpop.permute.xlu0 %8731 }
0x1ac8   : > { %9480 = vrot.lane.b32.xlu1 %v21463_v40, %s25300_s6  ;;  %8659 = vrot.lane.b32.xlu0 %v21493_v43, %s24952_s0 }
0x1aca   : > { %v21534_v15 = vpop.permute.xlu1 %8653  ;;  %v21536_v51 = vpop.permute.xlu0 %8735 }
0x1acc   : > { %9877 = vrot.lane.b32.xlu1 %v21470_v33, %s25301_s5  ;;  %8667 = vrot.lane.b32.xlu0 %v21504_v31, %s24952_s0  ;;  %s25468_s0 = smov 33  }
0x1ace   : > { %v21542_v53 = vpop.permute.xlu1 %8661  ;;  %v21544_v24 = vpop.permute.xlu0 %8645 }
0x1ad0   : > { %9905 = vrot.lane.b32.xlu1 %v21438_v60, %s25301_s5  ;;  %11098 = vrot.lane.b32.xlu0 %v21376_v4, %s25303_s30 }
0x1ad2   : > { %v21550_v27 = vpop.permute.xlu1 %9458  ;;  %v21552_v63 = vpop.permute.xlu0 %8673 }
0x1ad4   : > { %9885 = vrot.lane.b32.xlu1 %v21445_v9, %s25301_s5  ;;  %9460 = vrot.lane.b32.xlu0 %v21431_v39, %s25300_s6 }
0x1ad6   : > { %v21558_v12 = vpop.permute.xlu1 %9462  ;;  %v21560_v11 = vpop.permute.xlu0 %8657 }
0x1ad8   : > { %9893 = vrot.lane.b32.xlu1 %v21452_v7, %s25301_s5  ;;  %9468 = vrot.lane.b32.xlu0 %v21493_v43, %s25300_s6 }
0x1ada   : > { %v21566_v23 = vpop.permute.xlu1 %9470  ;;  %v21568_v25 = vpop.permute.xlu0 %8665 }
0x1adc   : > { %11503 = vrot.lane.b32.xlu1 %v21352_v10, %s25312_s19  ;;  %9476 = vrot.lane.b32.xlu0 %v21504_v31, %s25300_s6 }
0x1ade   : > { %v21574_v56 = vpop.permute.xlu1 %9879  ;;  %v21576_v28 = vpop.permute.xlu0 %8669 }
0x1ae0   : > { %11507 = vrot.lane.b32.xlu1 %v21364_v48, %s25312_s19  ;;  %11102 = vrot.lane.b32.xlu0 %v21354_v54, %s25303_s30 }
0x1ae2   : > { %v21582_v32 = vpop.permute.xlu1 %9883  ;;  %v21584_v62 = vpop.permute.xlu0 %9454 }
0x1ae3   : > { %25313 = vst [vmem:[#allocation102_spill] sm:$0xff] %v21582_v32 }
0x1ae4   : > { %11515 = vrot.lane.b32.xlu1 %v21370_v30, %s25312_s19  ;;  %9881 = vrot.lane.b32.xlu0 %v21431_v39, %s25301_s5 }
0x1ae6   : > { %v21590_v20 = vpop.permute.xlu1 %9891  ;;  %v21592_v22 = vpop.permute.xlu0 %9482 }
0x1ae7   : > { %25314 = vst [vmem:[#allocation103_spill] sm:$0xff] %v21590_v20 }
0x1ae8   : > { %9901 = vrot.lane.b32.xlu1 %v21463_v40, %s25301_s5  ;;  %9889 = vrot.lane.b32.xlu0 %v21493_v43, %s25301_s5 }
0x1aea   : > { %v21598_v5 = vpop.permute.xlu1 %10661  ;;  %v21600_v34 = vpop.permute.xlu0 %9466 }
0x1aeb   : > { %25315 = vst [vmem:[#allocation104_spill] sm:$0xff] %v21598_v5  ;;  %v25332_v5 = vld [vmem:[#allocation49_spill] sm:$0xff] }
0x1aec   : > { %10659 = vrot.lane.b32.xlu1 %v21431_v39, %s25302_s2  ;;  %9897 = vrot.lane.b32.xlu0 %v21504_v31, %s25301_s5 }
0x1aee   : > { %v21606_v44 = vpop.permute.xlu1 %10665  ;;  %v21608_v52 = vpop.permute.xlu0 %9474 }
0x1aef   : > { %25316 = vst [vmem:[#allocation105_spill] sm:$0xff] %v21606_v44 }
0x1af0   : > { %10655 = vrot.lane.b32.xlu1 %v21470_v33, %s25302_s2  ;;  %11499 = vrot.lane.b32.xlu0 %v21342_v50, %s25312_s19 }
0x1af2   : > { %v21614_v45 = vpop.permute.xlu1 %10673  ;;  %v21616_v21 = vpop.permute.xlu0 %9478 }
0x1af3   : > { %25317 = vst [vmem:[#allocation106_spill] sm:$0xff] %v21614_v45 }
0x1af4   : > { %10667 = vrot.lane.b32.xlu1 %v21493_v43, %s25302_s2  ;;  %11495 = vrot.lane.b32.xlu0 %v21345_v13, %s25312_s19 }
0x1af6   : > { %v21622_v17 = vpop.permute.xlu1 %11082  ;;  %v21624_v42 = vpop.permute.xlu0 %9875 }
0x1af7   : > { %25318 = vst [vmem:[#allocation107_spill] sm:$0xff] %v21622_v17 }
0x1af8   : > { %10675 = vrot.lane.b32.xlu1 %v21504_v31, %s25302_s2  ;;  %11511 = vrot.lane.b32.xlu0 %v21361_v49, %s25312_s19 }
0x1afa   : > { %v21630_v14 = vpop.permute.xlu1 %11086  ;;  %v21632_v59 = vpop.permute.xlu0 %9903 }
0x1afb   : > { %25319 = vst [vmem:[#allocation108_spill] sm:$0xff] %v21630_v14 }
0x1afc   : > { %11924 = vrot.lane.b32.xlu1 %v21352_v10, %s25320_s26  ;;  %11519 = vrot.lane.b32.xlu0 %v21376_v4, %s25312_s19 }
0x1afe   : > { %v8718_v58 = vpop.permute.xlu1 %8717  ;;  %v21638_v8 = vpop.permute.xlu0 %9887 }
0x1b00   : > { %10683 = vrot.lane.b32.xlu1 %v21438_v60, %s25302_s2  ;;  %11523 = vrot.lane.b32.xlu0 %v21354_v54, %s25312_s19 }
0x1b02   : > { %v21644_v61 = vpop.permute.xlu1 %8741  ;;  %v21646_v46 = vpop.permute.xlu0 %9895 }
0x1b03   : > { %25321 = vst [vmem:[#allocation109_spill] sm:$0xff] %v21646_v46 }
0x1b04   : > { %11080 = vrot.lane.b32.xlu1 %v21431_v39, %s25303_s30  ;;  %10663 = vrot.lane.b32.xlu0 %v21445_v9, %s25302_s2 }
0x1b06   : > { %v8722_v47 = vpop.permute.xlu1 %8721  ;;  %v21652_v57 = vpop.permute.xlu0 %9899 }
0x1b07   : > { %25322 = vst [vmem:[#allocation110_spill] sm:$0xff] %v21652_v57 }
0x1b08   : > { %11076 = vrot.lane.b32.xlu1 %v21470_v33, %s25303_s30  ;;  %10671 = vrot.lane.b32.xlu0 %v21452_v7, %s25302_s2 }
0x1b0a   : > { %v21658_v41 = vpop.permute.xlu1 %8729  ;;  %v21660_v26 = vpop.permute.xlu0 %10657 }
0x1b0b   : > { %25323 = vst [vmem:[#allocation111_spill] sm:$0xff] %v21660_v26 }
0x1b0c   : > { %11088 = vrot.lane.b32.xlu1 %v21493_v43, %s25303_s30  ;;  %10679 = vrot.lane.b32.xlu0 %v21463_v40, %s25302_s2 }
0x1b0e   : > { %v21666_v1 = vpop.permute.xlu1 %11094  ;;  %v21668_v55 = vpop.permute.xlu0 %10653 }
0x1b0f   : > { %25324 = vst [vmem:[#allocation112_spill] sm:$0xff] %v21666_v1  ;;  %25325 = vst [vmem:[#allocation113_spill] sm:$0xff] %v21668_v55 }
0x1b10   : > { %11096 = vrot.lane.b32.xlu1 %v21504_v31, %s25303_s30  ;;  %11920 = vrot.lane.b32.xlu0 %v21342_v50, %s25320_s26  ;;  %v8754_v50 = vsel %vm4528_vm7, %v8718_v58, %v8722_v47 }
0x1b12   : > { %v8738_v3 = vpop.permute.xlu1 %8737  ;;  %v21674_v36 = vpop.permute.xlu0 %10669 }
0x1b13   : > { %25326 = vst [vmem:[#allocation114_spill] sm:$0xff] %v21674_v36 }
0x1b14   : > { %11928 = vrot.lane.b32.xlu1 %v21364_v48, %s25320_s26  ;;  %11084 = vrot.lane.b32.xlu0 %v21445_v9, %s25303_s30  ;;  %v25333_v48 = vld [vmem:[#allocation50_spill] sm:$0xff] }
0x1b16   : > { %v21680_v18 = vpop.permute.xlu1 %8647  ;;  %v21682_v16 = vpop.permute.xlu0 %10677 }
0x1b17   : > { %25327 = vst [vmem:[#allocation9_spill] sm:$0xff] %v21682_v16 }
0x1b18   : > { %11104 = vrot.lane.b32.xlu1 %v21438_v60, %s25303_s30  ;;  %11092 = vrot.lane.b32.xlu0 %v21452_v7, %s25303_s30 }
0x1b1a   : > { %v21688_v1 = vpop.permute.xlu1 %8675  ;;  %v21690_v14 = vpop.permute.xlu0 %10681 }
0x1b1b   : > { %25328 = vst [vmem:[#allocation8_spill] sm:$0xff] %v21690_v14 }
0x1b1c   : > { %11501 = vrot.lane.b32.xlu1 %v21431_v39, %s25312_s19  ;;  %11100 = vrot.lane.b32.xlu0 %v21463_v40, %s25303_s30 }
0x1b1e   : > { %v21696_v17 = vpop.permute.xlu1 %8655  ;;  %v21698_v45 = vpop.permute.xlu0 %11078 }
0x1b1f   : > { %25329 = vst [vmem:[#allocation17_spill] sm:$0xff] %v21698_v45 }
0x1b20   : > { %11497 = vrot.lane.b32.xlu1 %v21470_v33, %s25312_s19  ;;  %11916 = vrot.lane.b32.xlu0 %v21345_v13, %s25320_s26 }
0x1b22   : > { %v21704_v16 = vpop.permute.xlu1 %8663  ;;  %v21706_v44 = vpop.permute.xlu0 %11074 }
0x1b23   : > { %25330 = vst [vmem:[#allocation10_spill] sm:$0xff] %v21706_v44  ;;  %v8755_v44 = vsel %vm4528_vm7, %v21501_v19, %v21499_v38 }
0x1b24   : > { %11509 = vrot.lane.b32.xlu1 %v21493_v43, %s25312_s19  ;;  %11505 = vrot.lane.b32.xlu0 %v21445_v9, %s25312_s19 }
0x1b26   : > { %v21712_v14 = vpop.permute.xlu1 %8671  ;;  %v8714_v36 = vpop.permute.xlu0 %8713 }
0x1b27   : > { %v8756_v55 = vsel %vm4528_vm7, %v8714_v36, %v8718_v58  ;;  %v8758_v26 = vsel %vm4528_vm7, %v21644_v61, %v8714_v36  ;;  %v8757_v36 = vsel %vm4528_vm7, %v21512_v2, %v21501_v19  ;;  %v8760_v19 = vmul.f32 %v8755_v44, %v25333_v48  ;;  %v25334_v58 = vld [vmem:[#allocation51_spill] sm:$0xff]  ;;  %v25335_v44 = vld [vmem:[#allocation52_spill] sm:$0xff] }
0x1b28   : > { %v8767_v10 = vmul.f32 %v8758_v26, %v25332_v5  ;;  %v8768_v13 = vmul.f32 %v8756_v55, %v25333_v48  ;;  %11517 = vrot.lane.b32.xlu1 %v21504_v31, %s25312_s19  ;;  %11513 = vrot.lane.b32.xlu0 %v21452_v7, %s25312_s19  ;;  %v8751_v55 = vsel %vm4528_vm7, %v21510_v35, %v21520_v29 }
0x1b29   : > { %v8759_v46 = vmul.f32 %v8757_v36, %v25332_v5  ;;  %v8762_v5 = vmul.f32 %v8751_v55, %v25334_v58  ;;  %v8743_v55 = vsel %vm4528_vm7, %v21536_v51, %v21512_v2 }
0x1b2a   : > { %v21735_v57 = vpop.permute.xlu1 %9456  ;;  %16903 = vmatprep.subr.msk.mxu0 %vm804_vm0, %v8768_v13  ;;  %v8726_v26 = vpop.permute.xlu0 %8725  ;;  %v21755_v13 = vld [vmem:[%s24700_s16 + $0x10] sm:$0xff] }
0x1b2b   : > { %v8752_v20 = vsel %vm4528_vm7, %v8722_v47, %v8726_v26  ;;  %16904 = vmatpush1.msk.msra.mxu0 %vm804_vm0, %v8767_v10  ;;  %v8753_v10 = vsel %vm4528_vm7, %v21499_v38, %v21510_v35  ;;  %v8769_v47 = vmul.f32 %v8754_v50, %v25335_v44 }
0x1b2c   : > { %v8770_v32 = vmul.f32 %v8752_v20, %v25334_v58  ;;  %11936 = vrot.lane.b32.xlu1 %v21370_v30, %s25320_s26  ;;  %11521 = vrot.lane.b32.xlu0 %v21463_v40, %s25312_s19  ;;  %v8744_v20 = vsel %vm4528_vm7, %v8738_v3, %v21644_v61  ;;  %v8750_v30 = vsel %vm4528_vm7, %v8726_v26, %v21658_v41  ;;  %v25338_v26 = vmov 0.0  }
0x1b2d   : > { %8838 = vmatprep.subr.mxu0 %v8760_v19  ;;  %v8761_v35 = vmul.f32 %v8753_v10, %v25335_v44  ;;  %v25339_v19 = vld [vmem:[#allocation56_spill] sm:$0xff] }
0x1b2e   : > { %8839 = vmatpush1.msra.mxu0 %v8759_v46  ;;  %v21765_v36 = vpop.permute.xlu1 %9484  ;;  %16907 = vmatprep.subr.msk.mxu1 %vm804_vm0, %v8770_v32  ;;  %v8734_v48 = vpop.permute.xlu0 %8733  ;;  %v25336_v32 = vld [vmem:[#allocation55_spill] sm:$0xff]  ;;  %v8774_v10 = vmul.f32 %v8744_v20, %v25339_v19 }
0x1b2f   : > { %16905 = vmatmul.mubr.msk.f32.vlgmr.msra.gmra.mxu0 %vm4609_vm8, %v21755_v13  ;;  %v8746_v50 = vsel %vm4528_vm7, %v8734_v48, %v8738_v3  ;;  %v8748_v38 = vsel %vm4528_vm7, %v21658_v41, %v8734_v48  ;;  %16908 = vmatpush1.msk.msra.mxu1 %vm804_vm0, %v8769_v47  ;;  %v21789_v46 = vld [vmem:[%s24700_s16 + $0x18] sm:$0xf]  ;;  %v8747_v48 = vsel %vm4528_vm7, %v21518_v37, %v21528_v6  ;;  %v25340_v47 = vld [vmem:[#allocation53_spill] sm:$0xff] }
0x1b30   : > { %v8772_v61 = vmul.f32 %v8748_v38, %v25336_v32  ;;  %11525 = vrot.lane.b32.xlu1 %v21438_v60, %s25312_s19  ;;  %11932 = vrot.lane.b32.xlu0 %v21361_v49, %s25320_s26  ;;  %v25337_v41 = vld [vmem:[#allocation54_spill] sm:$0xff]  ;;  %v8771_v38 = vmul.f32 %v8750_v30, %v25340_v47  ;;  %v8745_v30 = vsel %vm4528_vm7, %v21528_v6, %v21536_v51 }
0x1b31   : > { %v8773_v3 = vmul.f32 %v8746_v50, %v25337_v41  ;;  %8915 = vmatprep.subr.mxu1 %v8762_v5  ;;  %8878 = vmatprep.mubr.f32.mxu0 %v25338_v26  ;;  %v8749_v5 = vsel %vm4528_vm7, %v21520_v29, %v21518_v37  ;;  %v8764_v2 = vmul.f32 %v8747_v48, %v25336_v32 }
0x1b32   : > { %8916 = vmatpush1.msra.mxu1 %v8761_v35  ;;  %v21803_v44 = vpop.permute.xlu1 %9464  ;;  %16911 = vmatprep.subr.msk.mxu0 %vm804_vm0, %v8772_v61  ;;  %v21806_v58 = vpop.permute.xlu0 %11090  ;;  %v8766_v37 = vmul.f32 %v8743_v55, %v25339_v19  ;;  %v8763_v29 = vmul.f32 %v8749_v5, %v25340_v47  ;;  %v8765_v20 = vmul.f32 %v8745_v30, %v25337_v41  ;;  %v25341_v35 = vld [vmem:[#allocation57_spill] sm:$0xff] }
0x1b33   : > { %16906 = vmatmul.mubr.msk.f32.gmra.mxu0 %vm4609_vm8, %v21789_v46  ;;  %16909 = vmatmul.mubr.msk.f32.vlgmr.msra.gmra.mxu1 %vm4609_vm8, %v21755_v13  ;;  %v8692_v48 = vsel %vm4417_vm9, %v21688_v1, %v21680_v18 }
0x1b34   : > { %16915 = vmatprep.subr.msk.mxu1 %vm804_vm0, %v8774_v10  ;;  %16912 = vmatpush1.msk.msra.mxu0 %vm804_vm0, %v8771_v38  ;;  %v8689_v10 = vsel %vm4417_vm9, %v21544_v24, %v21526_v0  ;;  %v25342_v38 = vld [vmem:[#allocation58_spill] sm:$0xff] }
0x1b35   : > { %16916 = vmatpush1.msk.msra.mxu1 %vm804_vm0, %v8773_v3  ;;  %11922 = vrot.lane.b32.xlu1 %v21431_v39, %s25320_s26  ;;  %v8701_v5 = vmul.f32 %v8692_v48, %v25342_v38  ;;  %v8685_v48 = vsel %vm4417_vm9, %v21534_v15, %v21560_v11 }
0x1b36   : > { %11926 = vrot.lane.b32.xlu0 %v21445_v9, %s25320_s26  ;;  %8992 = vmatprep.subr.mxu0 %v8764_v2  ;;  %v21830_v6 = vpop.permute.xlu1 %9472  ;;  %v8652_v51 = vpop.permute.xlu0 %8651 }
0x1b37   : > { %9069 = vmatprep.subr.mxu1 %v8766_v37  ;;  %8955 = vmatprep.mubr.f32.mxu1 %v25338_v26  ;;  %v8690_v50 = vsel %vm4417_vm9, %v21680_v18, %v8652_v51  ;;  %v8691_v18 = vsel %vm4417_vm9, %v21552_v63, %v21544_v24  ;;  %v8694_v24 = vmul.f32 %v8689_v10, %v25341_v35  ;;  %v25344_v10 = vld [vmem:[#allocation60_spill] sm:$0xff] }
0x1b38   : > { %8993 = vmatpush1.msra.mxu0 %v8763_v29  ;;  %9026 = vmatprep.mubr.f32.mxu0 %v25338_v26  ;;  %v8702_v61 = vmul.f32 %v8690_v50, %v25341_v35  ;;  %v8693_v29 = vmul.f32 %v8691_v18, %v25342_v38  ;;  %v25343_v50 = vld [vmem:[#allocation59_spill] sm:$0xff] }
0x1b39   : > { %9070 = vmatpush1.msra.mxu1 %v8765_v20  ;;  %16913 = vmatmul.mubr.msk.f32.vlgmr.msra.gmra.mxu0 %vm4609_vm8, %v21755_v13  ;;  %v8688_v20 = vsel %vm4417_vm9, %v8652_v51, %v21696_v17 }
0x1b3a   : > { %16910 = vmatmul.mubr.msk.f32.gmra.mxu1 %vm4609_vm8, %v21789_v46  ;;  %11918 = vrot.lane.b32.xlu1 %v21470_v33, %s25320_s26  ;;  %v21849_v3 = vpop.permute.xlu1 %9480  ;;  %v8660_v55 = vpop.permute.xlu0 %8659  ;;  %v8703_v18 = vmul.f32 %v8688_v20, %v25344_v10 }
0x1b3b   : > { %11934 = vrot.lane.b32.xlu0 %v21452_v7, %s25320_s26  ;;  %9032 = vmatprep.mubr.f32.mxu0 %v25338_v26  ;;  %v8686_v30 = vsel %vm4417_vm9, %v21696_v17, %v8660_v55  ;;  %v8687_v17 = vsel %vm4417_vm9, %v21526_v0, %v21534_v15 }
0x1b3c   : > { %9103 = vmatprep.mubr.f32.mxu1 %v25338_v26  ;;  %16919 = vmatprep.subr.msk.mxu0 %vm804_vm0, %v8702_v61  ;;  %v8704_v61 = vmul.f32 %v8686_v30, %v25343_v50  ;;  %v8678_v30 = vsel %vm4417_vm9, %v21712_v14, %v21688_v1  ;;  %v25346_v1 = vld [vmem:[#allocation61_spill] sm:$0xff] }
0x1b3d   : > { %16914 = vmatmul.mubr.msk.f32.gmra.mxu0 %vm4609_vm8, %v21789_v46 }
0x1b3e   : > { %16917 = vmatmul.mubr.msk.f32.vlgmr.msra.gmra.mxu1 %vm4609_vm8, %v21755_v13  ;;  %16920 = vmatpush1.msk.msra.mxu0 %vm804_vm0, %v8701_v5  ;;  %v21874_v2 = vpop.permute.xlu1 %9877  ;;  %v8668_v37 = vpop.permute.xlu0 %8667  ;;  %v21888_v13 = vld [vmem:[%s24700_s16] sm:$0xff] }
0x1b3f   : > { %11930 = vrot.lane.b32.xlu1 %v21493_v43, %s25320_s26  ;;  %11942 = vrot.lane.b32.xlu0 %v21463_v40, %s25320_s26  ;;  %v8682_v51 = vsel %vm4417_vm9, %v21704_v16, %v8668_v37  ;;  %v8680_v5 = vsel %vm4417_vm9, %v8668_v37, %v21712_v14  ;;  %v8684_v37 = vsel %vm4417_vm9, %v8660_v55, %v21704_v16  ;;  %v21934_v14 = vld [vmem:[%s24700_s16 + $0x8] sm:$0xf] }
0x1b40   : > { %9176 = vmatprep.subr.mxu0 %v8694_v24  ;;  %9109 = vmatprep.mubr.f32.mxu1 %v25338_v26  ;;  %v8695_v24 = vmul.f32 %v8687_v17, %v25344_v10  ;;  %v8681_v16 = vsel %vm4417_vm9, %v21542_v53, %v21568_v25  ;;  %v8677_v55 = vsel %vm4417_vm9, %v21576_v28, %v21552_v63 }
0x1b41   : > { %9177 = vmatpush1.msra.mxu0 %v8693_v29  ;;  %9210 = vmatprep.mubr.f32.mxu0 %v25338_v26  ;;  %v25345_v29 = vld [vmem:[#allocation62_spill] sm:$0xff]  ;;  %v8679_v63 = vsel %vm4417_vm9, %v21568_v25, %v21576_v28 }
0x1b42   : > { %16918 = vmatmul.mubr.msk.f32.gmra.mxu1 %vm4609_vm8, %v21789_v46  ;;  %16921 = vmatmul.mubr.msk.f32.vlgmr.msra.gmra.mxu0 %vm4609_vm8, %v21888_v13  ;;  %v21911_v0 = vpop.permute.xlu1 %9905  ;;  %v21913_v15 = vpop.permute.xlu0 %11098  ;;  %v8696_v46 = vmul.f32 %v8685_v48, %v25343_v50  ;;  %v8706_v20 = vmul.f32 %v8682_v51, %v25345_v29  ;;  %v25347_v48 = vld [vmem:[#allocation63_spill] sm:$0xff]  ;;  %v25381_v50 = vld [vmem:[#allocation105_spill] sm:$0xff] }
0x1b43   : > { %16923 = vmatprep.subr.msk.mxu1 %vm804_vm0, %v8704_v61  ;;  %11938 = vrot.lane.b32.xlu1 %v21504_v31, %s25320_s26  ;;  %v8707_v61 = vmul.f32 %v8680_v5, %v25346_v1  ;;  %v8708_v17 = vmul.f32 %v8678_v30, %v25347_v48  ;;  %v8683_v5 = vsel %vm4417_vm9, %v21560_v11, %v21542_v53 }
0x1b44   : > { %16924 = vmatpush1.msk.msra.mxu1 %vm804_vm0, %v8703_v18  ;;  %11940 = vrot.lane.b32.xlu0 %v21376_v4, %s25320_s26  ;;  %v8698_v53 = vmul.f32 %v8681_v16, %v25345_v29  ;;  %v8700_v11 = vmul.f32 %v8677_v55, %v25347_v48  ;;  %v25349_v16 = vld [vmem:[#allocation65_spill] sm:$0xff]  ;;  %v25380_v48 = vld [vmem:[#allocation114_spill] sm:$0xff] }
0x1b45   : > { %9253 = vmatprep.subr.mxu1 %v8696_v46  ;;  %9216 = vmatprep.mubr.f32.mxu0 %v25338_v26  ;;  %v25348_v46 = vld [vmem:[#allocation64_spill] sm:$0xff] }
0x1b46   : > { %9254 = vmatpush1.msra.mxu1 %v8695_v24  ;;  %9287 = vmatprep.mubr.f32.mxu1 %v25338_v26  ;;  %v21948_v51 = vpop.permute.xlu1 %9885  ;;  %v9461_v18 = vpop.permute.xlu0 %9460  ;;  %v8705_v10 = vmul.f32 %v8684_v37, %v25348_v46  ;;  %v8697_v30 = vmul.f32 %v8683_v5, %v25348_v46  ;;  %v8699_v24 = vmul.f32 %v8679_v63, %v25346_v1 }
0x1b47   : > { %16922 = vmatmul.mubr.msk.f32.gmra.mxu0 %vm4609_vm8, %v21934_v14  ;;  %16925 = vmatmul.mubr.msk.f32.vlgmr.msra.gmra.mxu1 %vm4609_vm8, %v21888_v13  ;;  %v9499_v25 = vsel %vm5318_vm10, %v21735_v57, %v9461_v18  ;;  %v9501_v63 = vsel %vm5318_vm10, %v21765_v36, %v21735_v57  ;;  %v9500_v57 = vsel %vm5318_vm10, %v21592_v22, %v21584_v62 }
0x1b48   : > { %16927 = vmatprep.subr.msk.mxu0 %vm804_vm0, %v8706_v20  ;;  %16931 = vmatprep.subr.msk.mxu1 %vm804_vm0, %v8708_v17  ;;  %v12354_v20 = vld [vmem:[%s24701_s17 + $0x8] sm:$0xf]  ;;  %v9511_v55 = vmul.f32 %v9499_v25, %v25349_v16  ;;  %v25350_v17 = vld [vmem:[#allocation66_spill] sm:$0xff]  ;;  %v9497_v25 = vsel %vm5318_vm10, %v9461_v18, %v21803_v44 }
0x1b49   : > { %16928 = vmatpush1.msk.msra.mxu0 %vm804_vm0, %v8705_v10  ;;  %16932 = vmatpush1.msk.msra.mxu1 %vm804_vm0, %v8707_v61  ;;  %v12353_v61 = vld [vmem:[%s24701_s17] sm:$0xff] }
0x1b4a   : > { %11946 = vrot.lane.b32.xlu1 %v21438_v60, %s25320_s26  ;;  %11944 = vrot.lane.b32.xlu0 %v21354_v54, %s25320_s26  ;;  %v21977_v28 = vpop.permute.xlu1 %9893  ;;  %v9469_v10 = vpop.permute.xlu0 %9468 }
0x1b4b   : > { %9330 = vmatprep.subr.mxu0 %v8698_v53  ;;  %9407 = vmatprep.subr.mxu1 %v8700_v11  ;;  %v9495_v37 = vsel %vm5318_vm10, %v21803_v44, %v9469_v10 }
0x1b4c   : > { %9293 = vmatprep.mubr.f32.mxu1 %v25338_v26  ;;  %9331 = vmatpush1.msra.mxu0 %v8697_v30  ;;  %v9513_v5 = vmul.f32 %v9495_v37, %v25350_v17  ;;  %v9498_v30 = vsel %vm5318_vm10, %v21584_v62, %v21550_v27 }
0x1b4d   : > { %9364 = vmatprep.mubr.f32.mxu0 %v25338_v26  ;;  %9408 = vmatpush1.msra.mxu1 %v8699_v24  ;;  %v25351_v24 = vld [vmem:[#allocation68_spill] sm:$0xff]  ;;  %v9503_v62 = vmul.f32 %v9498_v30, %v25349_v16  ;;  %v9487_v30 = vsel %vm5318_vm10, %v21849_v3, %v21765_v36  ;;  %v9490_v36 = vsel %vm5318_vm10, %v21566_v23, %v21608_v52  ;;  %v25379_v16 = vld [vmem:[#allocation38_spill] sm:$0xff] }
0x1b4e   : > { %16926 = vmatmul.mubr.msk.f32.gmra.mxu1 %vm4609_vm8, %v21934_v14  ;;  %16929 = vmatmul.mubr.msk.f32.vlgmr.msra.gmra.mxu0 %vm4609_vm8, %v21888_v13  ;;  %v22001_v53 = vpop.permute.xlu1 %11503  ;;  %v9477_v11 = vpop.permute.xlu0 %9476  ;;  %v9510_v37 = vmul.f32 %v9501_v63, %v25351_v24  ;;  %v25352_v63 = vld [vmem:[#allocation67_spill] sm:$0xff] }
0x1b4f   : > { %12362 = vperm.xlu1 %17683, %v12354_v20   ;;  %12357 = vperm.xlu0 %17684, %v12353_v61   ;;  %v9494_v20 = vsel %vm5318_vm10, %v21558_v12, %v21600_v34  ;;  %v9491_v44 = vsel %vm5318_vm10, %v21830_v6, %v9477_v11  ;;  %v9512_v46 = vmul.f32 %v9497_v25, %v25352_v63 }
0x1b50   : > { %9370 = vmatprep.mubr.f32.mxu0 %v25338_v26  ;;  %9441 = vmatprep.mubr.f32.mxu1 %v25338_v26  ;;  %v9505_v25 = vmul.f32 %v9494_v20, %v25350_v17  ;;  %v25354_v20 = vld [vmem:[#allocation20_spill] sm:$0xff] }
0x1b51   : > { %16937 = vmatprep.subr.msk.mxu0 %vm804_vm0, %v9511_v55  ;;  %16941 = vmatprep.subr.msk.mxu1 %vm804_vm0, %v9513_v5  ;;  %v9496_v55 = vsel %vm5318_vm10, %v21550_v27, %v21558_v12  ;;  %v9502_v5 = vmul.f32 %v9500_v57, %v25351_v24  ;;  %v9489_v27 = vsel %vm5318_vm10, %v9477_v11, %v21849_v3  ;;  %v25353_v12 = vld [vmem:[#allocation69_spill] sm:$0xff]  ;;  %v25378_v17 = vld [vmem:[#allocation24_spill] sm:$0xff] }
0x1b52   : > { %16930 = vmatmul.mubr.msk.f32.gmra.mxu0 %vm4609_vm8, %v21934_v14  ;;  %16933 = vmatmul.mubr.msk.f32.vlgmr.msra.gmra.mxu1 %vm4609_vm8, %v21888_v13  ;;  %v22031_v18 = vpop.permute.xlu1 %11507  ;;  %v22033_v61 = vpop.permute.xlu0 %11102  ;;  %v22046_v13 = vld [vmem:[%s24700_s16 + $0x20] sm:$0xff]  ;;  %v9515_v57 = vmul.f32 %v9491_v44, %v25353_v12  ;;  %v9486_v11 = vsel %vm5318_vm10, %v21616_v21, %v21592_v22  ;;  %v9517_v44 = vmul.f32 %v9487_v30, %v25354_v20 }
0x1b53   : > { %16938 = vmatpush1.msk.msra.mxu0 %vm804_vm0, %v9510_v37  ;;  %9447 = vmatprep.mubr.f32.mxu1 %v25338_v26  ;;  %v9504_v37 = vmul.f32 %v9496_v55, %v25352_v63  ;;  %v25355_v55 = vld [vmem:[#allocation27_spill] sm:$0xff]  ;;  %v9488_v22 = vsel %vm5318_vm10, %v21608_v52, %v21616_v21  ;;  %v25377_v63 = vld [vmem:[#allocation113_spill] sm:$0xff] }
0x1b54   : > { %9581 = vmatprep.subr.mxu0 %v9503_v62  ;;  %9615 = vmatprep.mubr.f32.mxu0 %v25338_v26  ;;  %v9493_v62 = vsel %vm5318_vm10, %v9469_v10, %v21830_v6  ;;  %v22083_v6 = vld [vmem:[%s24700_s16 + $0x28] sm:$0xf] }
0x1b55   : > { %9582 = vmatpush1.msra.mxu0 %v9502_v5  ;;  %16942 = vmatpush1.msk.msra.mxu1 %vm804_vm0, %v9512_v46  ;;  %v9516_v5 = vmul.f32 %v9489_v27, %v25355_v55  ;;  %v25356_v10 = vld [vmem:[#allocation25_spill] sm:$0xff] }
0x1b56   : > { %16934 = vmatmul.mubr.msk.f32.gmra.mxu1 %vm4609_vm8, %v21934_v14  ;;  %16939 = vmatmul.mubr.msk.f32.vlgmr.msra.gmra.mxu0 %vm4609_vm8, %v22046_v13  ;;  %v22071_v3 = vpop.permute.xlu1 %11515  ;;  %v9882_v46 = vpop.permute.xlu0 %9881  ;;  %v9492_v14 = vsel %vm5318_vm10, %v21600_v34, %v21566_v23  ;;  %v9514_v30 = vmul.f32 %v9493_v62, %v25356_v10  ;;  %v9507_v23 = vmul.f32 %v9490_v36, %v25353_v12  ;;  %v25357_v62 = vld [vmem:[#allocation29_spill] sm:$0xff]  ;;  %v25361_v12 = vld [vmem:[#allocation102_spill] sm:$0xff] }
0x1b57   : > { %9658 = vmatprep.subr.mxu1 %v9505_v25  ;;  %9621 = vmatprep.mubr.f32.mxu0 %v25338_v26  ;;  %v9509_v34 = vmul.f32 %v9486_v11, %v25354_v20  ;;  %v9920_v52 = vsel %vm5785_vm11, %v21874_v2, %v9882_v46  ;;  %v9922_v36 = vsel %vm5785_vm11, %v21911_v0, %v21874_v2 }
0x1b58   : > { %9659 = vmatpush1.msra.mxu1 %v9504_v37  ;;  %9692 = vmatprep.mubr.f32.mxu1 %v25338_v26  ;;  %v9508_v37 = vmul.f32 %v9488_v22, %v25355_v55  ;;  %v9932_v11 = vmul.f32 %v9920_v52, %v25357_v62 }
0x1b59   : > { %16945 = vmatprep.subr.msk.mxu0 %vm804_vm0, %v9515_v57  ;;  %16949 = vmatprep.subr.msk.mxu1 %vm804_vm0, %v9517_v44  ;;  %v9506_v57 = vmul.f32 %v9492_v14, %v25356_v10  ;;  %v25358_v44 = vld [vmem:[#allocation21_spill] sm:$0xff] }
0x1b5a   : > { %16940 = vmatmul.mubr.msk.f32.gmra.mxu0 %vm4609_vm8, %v22083_v6  ;;  %16943 = vmatmul.mubr.msk.f32.vlgmr.msra.gmra.mxu1 %vm4609_vm8, %v22046_v13  ;;  %v9902_v21 = vpop.permute.xlu1 %9901  ;;  %v9890_v27 = vpop.permute.xlu0 %9889 }
0x1b5b   : > { %16946 = vmatpush1.msk.msra.mxu0 %vm804_vm0, %v9514_v30  ;;  %16950 = vmatpush1.msk.msra.mxu1 %vm804_vm0, %v9516_v5  ;;  %v9916_v25 = vsel %vm5785_vm11, %v21948_v51, %v9890_v27  ;;  %v9919_v30 = vsel %vm5785_vm11, %v21624_v42, %v21574_v56 }
0x1b5c   : > { %9735 = vmatprep.subr.mxu0 %v9507_v23  ;;  %9812 = vmatprep.subr.mxu1 %v9509_v34  ;;  %v9934_v5 = vmul.f32 %v9916_v25, %v25358_v44  ;;  %v9921_v23 = vsel %vm5785_vm11, %v21632_v59, %v21624_v42  ;;  %v25359_v34 = vld [vmem:[#allocation31_spill] sm:$0xff]  ;;  %v9924_v25 = vmul.f32 %v9919_v30, %v25357_v62  ;;  %v16953_v30 = vld [vmem:[%s24700_s16 + $0x30] sm:$0xff] }
0x1b5d   : > { %9698 = vmatprep.mubr.f32.mxu1 %v25338_v26  ;;  %9736 = vmatpush1.msra.mxu0 %v9506_v57  ;;  %v9931_v52 = vmul.f32 %v9922_v36, %v25359_v34  ;;  %v9918_v57 = vsel %vm5785_vm11, %v9882_v46, %v21948_v51  ;;  %v9923_v55 = vmul.f32 %v9921_v23, %v25359_v34  ;;  %v25376_v34 = vld [vmem:[#allocation111_spill] sm:$0xff] }
0x1b5e   : > { %9769 = vmatprep.mubr.f32.mxu0 %v25338_v26  ;;  %9813 = vmatpush1.msra.mxu1 %v9508_v37  ;;  %v22121_v14 = vpop.permute.xlu1 %10659  ;;  %v9898_v22 = vpop.permute.xlu0 %9897  ;;  %v25360_v37 = vld [vmem:[#allocation22_spill] sm:$0xff]  ;;  %v9915_v51 = vsel %vm5785_vm11, %v25361_v12, %v21638_v8  ;;  %v9917_v46 = vsel %vm5785_vm11, %v21574_v56, %v25361_v12 }
0x1b5f   : > { %16944 = vmatmul.mubr.msk.f32.gmra.mxu1 %vm4609_vm8, %v22083_v6  ;;  %16947 = vmatmul.mubr.msk.f32.vlgmr.msra.gmra.mxu0 %vm4609_vm8, %v22046_v13  ;;  %v9912_v2 = vsel %vm5785_vm11, %v21977_v28, %v9898_v22  ;;  %v9910_v56 = vsel %vm5785_vm11, %v9898_v22, %v9902_v21  ;;  %v9926_v12 = vmul.f32 %v9915_v51, %v25358_v44  ;;  %v25366_v22 = vld [vmem:[#allocation23_spill] sm:$0xff]  ;;  %v25375_v44 = vld [vmem:[#allocation104_spill] sm:$0xff] }
0x1b60   : > { %9775 = vmatprep.mubr.f32.mxu0 %v25338_v26  ;;  %9846 = vmatprep.mubr.f32.mxu1 %v25338_v26  ;;  %v9936_v42 = vmul.f32 %v9912_v2, %v25360_v37  ;;  %v9908_v2 = vsel %vm5785_vm11, %v9902_v21, %v21911_v0  ;;  %v10695_v62 = vsel %vm6609_vm12, %v25376_v34, %v25375_v44 }
0x1b61   : > { %16955 = vmatprep.subr.msk.mxu0 %vm804_vm0, %v9932_v11  ;;  %16959 = vmatprep.subr.msk.mxu1 %vm804_vm0, %v9934_v5  ;;  %v25362_v11 = vld [vmem:[#allocation33_spill] sm:$0xff] }
0x1b62   : > { %16956 = vmatpush1.msk.msra.mxu0 %vm804_vm0, %v9931_v52  ;;  %v22149_v10 = vpop.permute.xlu1 %10655  ;;  %v22151_v36 = vpop.permute.xlu0 %11499  ;;  %v9933_v5 = vmul.f32 %v9918_v57, %v25362_v11  ;;  %v9925_v0 = vmul.f32 %v9917_v46, %v25362_v11  ;;  %v25363_v57 = vld [vmem:[#allocation109_spill] sm:$0xff]  ;;  %v25368_v46 = vld [vmem:[#allocation36_spill] sm:$0xff]  ;;  %v16954_v11 = vld [vmem:[%s24700_s16 + $0x38] sm:$0xf] }
0x1b63   : > { %16948 = vmatmul.mubr.msk.f32.gmra.mxu0 %vm4609_vm8, %v22083_v6  ;;  %16951 = vmatmul.mubr.msk.f32.vlgmr.msra.gmra.mxu1 %vm4609_vm8, %v22046_v13  ;;  %v9914_v13 = vsel %vm5785_vm11, %v9890_v27, %v21977_v28  ;;  %v25364_v28 = vld [vmem:[#allocation103_spill] sm:$0xff]  ;;  %v25365_v27 = vld [vmem:[#allocation110_spill] sm:$0xff] }
0x1b64   : > { %10002 = vmatprep.subr.mxu0 %v9924_v25  ;;  %9852 = vmatprep.mubr.f32.mxu1 %v25338_v26  ;;  %v9907_v21 = vsel %vm5785_vm11, %v25365_v27, %v21632_v59  ;;  %v9938_v25 = vmul.f32 %v9908_v2, %v25366_v22  ;;  %v9913_v59 = vsel %vm5785_vm11, %v21638_v8, %v25364_v28 }
0x1b65   : > { %10003 = vmatpush1.msra.mxu0 %v9923_v55  ;;  %10036 = vmatprep.mubr.f32.mxu0 %v25338_v26  ;;  %v9911_v55 = vsel %vm5785_vm11, %v25364_v28, %v25363_v57  ;;  %v9930_v8 = vmul.f32 %v9907_v21, %v25366_v22  ;;  %v10698_v22 = vsel %vm6609_vm12, %v22149_v10, %v22121_v14 }
0x1b66   : > { %16960 = vmatpush1.msk.msra.mxu1 %vm804_vm0, %v9933_v5  ;;  %16963 = vmatprep.subr.msk.mxu0 %vm804_vm0, %v9936_v42  ;;  %v22183_v23 = vpop.permute.xlu1 %10667  ;;  %v22185_v52 = vpop.permute.xlu0 %11495  ;;  %v25367_v42 = vld [vmem:[#allocation35_spill] sm:$0xff]  ;;  %v9937_v5 = vmul.f32 %v9910_v56, %v25368_v46  ;;  %v9928_v2 = vmul.f32 %v9911_v55, %v25360_v37  ;;  %v25369_v55 = vld [vmem:[#allocation86_spill] sm:$0xff]  ;;  %v10709_v1 = vmul.f32 %v10698_v22, %v25379_v16 }
0x1b67   : > { %16952 = vmatmul.mubr.msk.f32.gmra.mxu1 %vm4609_vm8, %v22083_v6  ;;  %16957 = vmatmul.mubr.msk.f32.vlgmr.msra.gmra.mxu0 %vm4609_vm8, %v16953_v30  ;;  %v9935_v51 = vmul.f32 %v9914_v13, %v25367_v42  ;;  %v9909_v6 = vsel %vm5785_vm11, %v25363_v57, %v25365_v27 }
0x1b68   : > { %10079 = vmatprep.subr.mxu1 %v9926_v12  ;;  %10042 = vmatprep.mubr.f32.mxu0 %v25338_v26  ;;  %v9927_v12 = vmul.f32 %v9913_v59, %v25367_v42  ;;  %v25374_v42 = vld [vmem:[#allocation37_spill] sm:$0xff] }
0x1b69   : > { %10080 = vmatpush1.msra.mxu1 %v9925_v0  ;;  %10113 = vmatprep.mubr.f32.mxu1 %v25338_v26  ;;  %v9929_v0 = vmul.f32 %v9909_v6, %v25368_v46 }
0x1b6a   : > { %16967 = vmatprep.subr.msk.mxu1 %vm804_vm0, %v9938_v25  ;;  %16964 = vmatpush1.msk.msra.mxu0 %vm804_vm0, %v9935_v51  ;;  %v22218_v13 = vpop.permute.xlu1 %10675  ;;  %v22220_v56 = vpop.permute.xlu0 %11511  ;;  %v25370_v25 = vld [vmem:[#allocation87_spill] sm:$0xff]  ;;  %v25371_v51 = vld [vmem:[#allocation92_spill] sm:$0xff] }
0x1b6b   : > { %16958 = vmatmul.mubr.msk.f32.gmra.mxu0 %vm4609_vm8, %v16954_v11  ;;  %16961 = vmatmul.mubr.msk.f32.vlgmr.msra.gmra.mxu1 %vm4609_vm8, %v16953_v30 }
0x1b6c   : > { %16968 = vmatpush1.msk.msra.mxu1 %vm804_vm0, %v9937_v5  ;;  %10156 = vmatprep.subr.mxu0 %v9928_v2  ;;  %v16971_v5 = vld [vmem:[%s24700_s16 + $0x40] sm:$0xff] }
0x1b6d   : > { %10233 = vmatprep.subr.mxu1 %v9930_v8  ;;  %10119 = vmatprep.mubr.f32.mxu1 %v25338_v26  ;;  %v25372_v2 = vld [vmem:[#allocation88_spill] sm:$0xff] }
0x1b6e   : > { %10157 = vmatpush1.msra.mxu0 %v9927_v12  ;;  %10190 = vmatprep.mubr.f32.mxu0 %v25338_v26  ;;  %v22230_v57 = vpop.permute.xlu1 %11924  ;;  %v22232_v28 = vpop.permute.xlu0 %11519  ;;  %v16972_v8 = vld [vmem:[%s24700_s16 + $0x48] sm:$0xf] }
0x1b6f   : > { %10234 = vmatpush1.msra.mxu1 %v9929_v0  ;;  %16965 = vmatmul.mubr.msk.f32.vlgmr.msra.gmra.mxu0 %vm4609_vm8, %v16953_v30  ;;  %v25373_v0 = vld [vmem:[#allocation91_spill] sm:$0xff] }
0x1b70   : > { %16962 = vmatmul.mubr.msk.f32.gmra.mxu1 %vm4609_vm8, %v16954_v11  ;;  %16973 = vmatprep.subr.msk.mxu0 %vm804_vm0, %v21431_v39 }
0x1b71   : > { %16977 = vmatprep.subr.msk.mxu1 %vm804_vm0, %v21493_v43  ;;  %16974 = vmatpush1.msk.msra.mxu0 %vm804_vm0, %v21470_v33 }
0x1b72   : > { %10359 = vmatprep.subr.mxu0 %v25369_v55  ;;  %10196 = vmatprep.mubr.f32.mxu0 %v25338_v26  ;;  %v22244_v27 = vpop.permute.xlu1 %10683  ;;  %v22246_v21 = vpop.permute.xlu0 %11523 }
0x1b73   : > { %10267 = vmatprep.mubr.f32.mxu1 %v25338_v26  ;;  %10360 = vmatpush1.msra.mxu0 %v25370_v25 }
0x1b74   : > { %16966 = vmatmul.mubr.msk.f32.gmra.mxu0 %vm4609_vm8, %v16954_v11  ;;  %16969 = vmatmul.mubr.msk.f32.vlgmr.msra.gmra.mxu1 %vm4609_vm8, %v16953_v30 }
0x1b75   : > { %16978 = vmatpush1.msk.msra.mxu1 %vm804_vm0, %v21445_v9  ;;  %16981 = vmatprep.subr.msk.mxu0 %vm804_vm0, %v21504_v31 }
0x1b76   : > { %10436 = vmatprep.subr.mxu1 %v25371_v51  ;;  %10273 = vmatprep.mubr.f32.mxu1 %v25338_v26  ;;  %v22261_v59 = vpop.permute.xlu1 %11080  ;;  %v10664_v6 = vpop.permute.xlu0 %10663 }
0x1b77   : > { %10437 = vmatpush1.msra.mxu1 %v25372_v2  ;;  %10393 = vmatprep.mubr.f32.mxu0 %v25338_v26  ;;  %v10696_v30 = vsel %vm6609_vm12, %v22121_v14, %v10664_v6  ;;  %v10697_v14 = vsel %vm6609_vm12, %v25377_v63, %v25376_v34  ;;  %v10694_v34 = vsel %vm6609_vm12, %v10664_v6, %v22183_v23 }
0x1b78   : > { %16985 = vmatprep.subr.msk.mxu1 %vm804_vm0, %v21438_v60  ;;  %16970 = vmatmul.mubr.msk.f32.gmra.mxu1 %vm4609_vm8, %v16954_v11  ;;  %v10710_v46 = vmul.f32 %v10696_v30, %v25374_v42  ;;  %v10701_v22 = vmul.f32 %v10697_v14, %v25379_v16  ;;  %v10693_v6 = vsel %vm6609_vm12, %v25375_v44, %v25381_v50  ;;  %v25383_v14 = vld [vmem:[#allocation39_spill] sm:$0xff] }
0x1b79   : > { %16975 = vmatmul.mubr.msk.f32.vlgmr.msra.gmra.mxu0 %vm4609_vm8, %v16971_v5  ;;  %10470 = vmatprep.mubr.f32.mxu1 %v25338_v26  ;;  %v10711_v16 = vmul.f32 %v10694_v34, %v25383_v14  ;;  %v10703_v34 = vmul.f32 %v10693_v6, %v25383_v14  ;;  %v25389_v6 = vld [vmem:[#allocation28_spill] sm:$0xff] }
0x1b7a   : > { %16982 = vmatpush1.msk.msra.mxu0 %vm804_vm0, %v21452_v7  ;;  %10399 = vmatprep.mubr.f32.mxu0 %v25338_v26  ;;  %v22279_v12 = vpop.permute.xlu1 %11076  ;;  %v10672_v11 = vpop.permute.xlu0 %10671 }
0x1b7b   : > { %10513 = vmatprep.subr.mxu0 %v25373_v0  ;;  %v10692_v37 = vsel %vm6609_vm12, %v22183_v23, %v10672_v11  ;;  %v25382_v23 = vld [vmem:[#allocation26_spill] sm:$0xff] }
0x1b7c   : > { %10514 = vmatpush1.msra.mxu0 %v21361_v49  ;;  %16979 = vmatmul.mubr.msk.f32.vlgmr.msra.gmra.mxu1 %vm4609_vm8, %v16971_v5  ;;  %v10712_v24 = vmul.f32 %v10692_v37, %v25378_v17  ;;  %v10702_v37 = vmul.f32 %v10695_v62, %v25374_v42 }
0x1b7d   : > { %16976 = vmatmul.mubr.msk.f32.gmra.mxu0 %vm4609_vm8, %v16972_v8  ;;  %16986 = vmatpush1.msk.msra.mxu1 %vm804_vm0, %v21463_v40 }
0x1b7e   : > { %10590 = vmatprep.subr.mxu1 %v21354_v54  ;;  %10476 = vmatprep.mubr.f32.mxu1 %v25338_v26  ;;  %v22301_v30 = vpop.permute.xlu1 %11088  ;;  %v10680_v20 = vpop.permute.xlu0 %10679 }
0x1b7f   : > { %10591 = vmatpush1.msra.mxu1 %v21376_v4  ;;  %10547 = vmatprep.mubr.f32.mxu0 %v25338_v26  ;;  %v10688_v29 = vsel %vm6609_vm12, %v22218_v13, %v10680_v20 }
0x1b80   : > { %16980 = vmatmul.mubr.msk.f32.gmra.mxu1 %vm4609_vm8, %v16972_v8  ;;  %16991 = vmatprep.subr.msk.mxu0 %vm804_vm0, %v10710_v46  ;;  %v10691_v46 = vsel %vm6609_vm12, %v25381_v50, %v25380_v48  ;;  %v10714_v62 = vmul.f32 %v10688_v29, %v25382_v23  ;;  %v10690_v50 = vsel %vm6609_vm12, %v10672_v11, %v22218_v13  ;;  %v25385_v13 = vld [vmem:[#allocation106_spill] sm:$0xff] }
0x1b81   : > { %16983 = vmatmul.mubr.msk.f32.vlgmr.msra.gmra.mxu0 %vm4609_vm8, %v16971_v5  ;;  %10624 = vmatprep.mubr.f32.mxu1 %v25338_v26  ;;  %v10704_v29 = vmul.f32 %v10691_v46, %v25378_v17  ;;  %v25388_v46 = vld [vmem:[#allocation41_spill] sm:$0xff] }
0x1b82   : > { %10553 = vmatprep.mubr.f32.mxu0 %v25338_v26  ;;  %16992 = vmatpush1.msk.msra.mxu0 %vm804_vm0, %v10709_v1  ;;  %v22329_v38 = vpop.permute.xlu1 %11096  ;;  %v22331_v35 = vpop.permute.xlu0 %11920  ;;  %v10700_v1 = vsel %vm6609_vm12, %v22244_v27, %v22149_v10  ;;  %v10686_v10 = vsel %vm6609_vm12, %v10680_v20, %v22244_v27  ;;  %v25387_v27 = vld [vmem:[#allocation42_spill] sm:$0xff]  ;;  %v10713_v42 = vmul.f32 %v10690_v50, %v25388_v46 }
0x1b83   : > { %10780 = vmatprep.subr.mxu0 %v10702_v37  ;;  %16995 = vmatprep.subr.msk.mxu1 %vm804_vm0, %v10712_v24  ;;  %v22355_v24 = vld [vmem:[%s24700_s16 + $0x50] sm:$0xff]  ;;  %v10715_v14 = vmul.f32 %v10686_v10, %v25389_v6 }
0x1b84   : > { %16987 = vmatmul.mubr.msk.f32.vlgmr.msra.gmra.mxu1 %vm4609_vm8, %v16971_v5  ;;  %10781 = vmatpush1.msra.mxu0 %v10701_v22  ;;  %v25384_v37 = vld [vmem:[#allocation9_spill] sm:$0xff]  ;;  %v25386_v22 = vld [vmem:[#allocation8_spill] sm:$0xff] }
0x1b85   : > { %16984 = vmatmul.mubr.msk.f32.gmra.mxu0 %vm4609_vm8, %v16972_v8  ;;  %10630 = vmatprep.mubr.f32.mxu1 %v25338_v26  ;;  %v10687_v11 = vsel %vm6609_vm12, %v25385_v13, %v25384_v37  ;;  %v10699_v20 = vsel %vm6609_vm12, %v25386_v22, %v25377_v63  ;;  %v10689_v63 = vsel %vm6609_vm12, %v25380_v48, %v25385_v13 }
0x1b86   : > { %10814 = vmatprep.mubr.f32.mxu0 %v25338_v26  ;;  %16996 = vmatpush1.msk.msra.mxu1 %vm804_vm0, %v10711_v16  ;;  %v22361_v44 = vpop.permute.xlu1 %11928  ;;  %v11085_v5 = vpop.permute.xlu0 %11084  ;;  %v10716_v16 = vmul.f32 %v10700_v1, %v25387_v27  ;;  %v10706_v1 = vmul.f32 %v10687_v11, %v25382_v23  ;;  %v10685_v10 = vsel %vm6609_vm12, %v25384_v37, %v25386_v22 }
0x1b87   : > { %10857 = vmatprep.subr.mxu1 %v10704_v29  ;;  %16999 = vmatprep.subr.msk.mxu0 %vm804_vm0, %v10714_v62  ;;  %v11117_v62 = vsel %vm7076_vm13, %v22261_v59, %v11085_v5  ;;  %v10708_v48 = vmul.f32 %v10699_v20, %v25387_v27  ;;  %v10705_v23 = vmul.f32 %v10689_v63, %v25388_v46 }
0x1b88   : > { %16988 = vmatmul.mubr.msk.f32.gmra.mxu1 %vm4609_vm8, %v16972_v8  ;;  %v22391_v8 = vld [vmem:[%s24700_s16 + $0x58] sm:$0xf]  ;;  %v11119_v37 = vsel %vm7076_vm13, %v22279_v12, %v22261_v59 }
0x1b89   : > { %16993 = vmatmul.mubr.msk.f32.vlgmr.msra.gmra.mxu0 %vm4609_vm8, %v22355_v24  ;;  %10858 = vmatpush1.msra.mxu1 %v10703_v34  ;;  %v25390_v34 = vld [vmem:[#allocation43_spill] sm:$0xff]  ;;  %v25394_v59 = vld [vmem:[#allocation10_spill] sm:$0xff] }
0x1b8a   : > { %10820 = vmatprep.mubr.f32.mxu0 %v25338_v26  ;;  %10891 = vmatprep.mubr.f32.mxu1 %v25338_v26  ;;  %v11105_v29 = vpop.permute.xlu1 %11104  ;;  %v11093_v50 = vpop.permute.xlu0 %11092  ;;  %v11131_v13 = vmul.f32 %v11117_v62, %v25390_v34  ;;  %v25392_v62 = vld [vmem:[#allocation17_spill] sm:$0xff] }
0x1b8b   : > { %17003 = vmatprep.subr.msk.mxu1 %vm804_vm0, %v10716_v16  ;;  %17000 = vmatpush1.msk.msra.mxu0 %vm804_vm0, %v10713_v42  ;;  %v11113_v11 = vsel %vm7076_vm13, %v22301_v30, %v11093_v50  ;;  %v10707_v42 = vmul.f32 %v10685_v10, %v25389_v6  ;;  %v25391_v16 = vld [vmem:[#allocation107_spill] sm:$0xff]  ;;  %v11118_v10 = vsel %vm7076_vm13, %v25394_v59, %v25392_v62 }
0x1b8c   : > { %16997 = vmatmul.mubr.msk.f32.vlgmr.msra.gmra.mxu1 %vm4609_vm8, %v22355_v24  ;;  %10934 = vmatprep.subr.mxu0 %v10706_v1  ;;  %v11116_v63 = vsel %vm7076_vm13, %v25392_v62, %v25391_v16  ;;  %v25396_v62 = vld [vmem:[#allocation108_spill] sm:$0xff] }
0x1b8d   : > { %16994 = vmatmul.mubr.msk.f32.gmra.mxu0 %vm4609_vm8, %v22391_v8  ;;  %17004 = vmatpush1.msk.msra.mxu1 %vm804_vm0, %v10715_v14  ;;  %v25393_v14 = vld [vmem:[#allocation30_spill] sm:$0xff]  ;;  %v11112_v27 = vsel %vm7076_vm13, %v25396_v62, %v21806_v58 }
0x1b8e   : > { %11011 = vmatprep.subr.mxu1 %v10708_v48  ;;  %10897 = vmatprep.mubr.f32.mxu1 %v25338_v26  ;;  %v22417_v22 = vpop.permute.xlu1 %11501  ;;  %v11101_v20 = vpop.permute.xlu0 %11100  ;;  %v11133_v1 = vmul.f32 %v11113_v11, %v25393_v14  ;;  %v25395_v48 = vld [vmem:[#allocation44_spill] sm:$0xff]  ;;  %v11123_v11 = vmul.f32 %v11116_v63, %v25390_v34  ;;  %v11114_v63 = vsel %vm7076_vm13, %v25391_v16, %v25396_v62  ;;  %v25398_v34 = vld [vmem:[#allocation45_spill] sm:$0xff] }
0x1b8f   : > { %10935 = vmatpush1.msra.mxu0 %v10705_v23  ;;  %10968 = vmatprep.mubr.f32.mxu0 %v25338_v26  ;;  %v11130_v6 = vmul.f32 %v11119_v37, %v25395_v48  ;;  %v11109_v23 = vsel %vm7076_vm13, %v22329_v38, %v11101_v20  ;;  %v11125_v16 = vmul.f32 %v11112_v27, %v25393_v14  ;;  %v25399_v27 = vld [vmem:[#allocation112_spill] sm:$0xff] }
0x1b90   : > { %11012 = vmatpush1.msra.mxu1 %v10707_v42  ;;  %17009 = vmatprep.subr.msk.mxu0 %vm804_vm0, %v11131_v13  ;;  %v11115_v13 = vsel %vm7076_vm13, %v11085_v5, %v22301_v30  ;;  %v11122_v30 = vmul.f32 %v11118_v10, %v25395_v48  ;;  %v25397_v5 = vld [vmem:[#allocation32_spill] sm:$0xff] }
0x1b91   : > { %16998 = vmatmul.mubr.msk.f32.gmra.mxu1 %vm4609_vm8, %v22391_v8  ;;  %17001 = vmatmul.mubr.msk.f32.vlgmr.msra.gmra.mxu0 %vm4609_vm8, %v22355_v24  ;;  %v11135_v46 = vmul.f32 %v11109_v23, %v25397_v5  ;;  %v11132_v17 = vmul.f32 %v11115_v13, %v25398_v34  ;;  %v11124_v13 = vmul.f32 %v11114_v63, %v25398_v34  ;;  %v25400_v62 = vld [vmem:[#allocation48_spill] sm:$0xff] }
0x1b92   : > { %10974 = vmatprep.mubr.f32.mxu0 %v25338_v26  ;;  %11045 = vmatprep.mubr.f32.mxu1 %v25338_v26  ;;  %v22444_v42 = vpop.permute.xlu1 %11497  ;;  %v22446_v37 = vpop.permute.xlu0 %11916 }
0x1b93   : > { %17010 = vmatpush1.msk.msra.mxu0 %vm804_vm0, %v11130_v6  ;;  %17013 = vmatprep.subr.msk.mxu1 %vm804_vm0, %v11133_v1  ;;  %v11121_v6 = vsel %vm7076_vm13, %v11105_v29, %v22279_v12  ;;  %v22472_v1 = vld [vmem:[%s24700_s16 + $0x60] sm:$0xff]  ;;  %v11107_v12 = vsel %vm7076_vm13, %v11101_v20, %v11105_v29  ;;  %v25402_v29 = vld [vmem:[#allocation70_spill] sm:$0xff]  ;;  %v22503_v20 = vld [vmem:[%s24700_s16 + $0x68] sm:$0xf] }
0x1b94   : > { %11201 = vmatprep.subr.mxu0 %v11123_v11  ;;  %v11108_v11 = vsel %vm7076_vm13, %v25399_v27, %v21913_v15 }
0x1b95   : > { %17002 = vmatmul.mubr.msk.f32.gmra.mxu0 %vm4609_vm8, %v22391_v8  ;;  %17005 = vmatmul.mubr.msk.f32.vlgmr.msra.gmra.mxu1 %vm4609_vm8, %v22355_v24  ;;  %v11111_v24 = vsel %vm7076_vm13, %v11093_v50, %v22329_v38  ;;  %v11120_v38 = vsel %vm7076_vm13, %v22033_v61, %v25394_v59  ;;  %v11136_v50 = vmul.f32 %v11107_v12, %v25402_v29 }
0x1b96   : > { %11051 = vmatprep.mubr.f32.mxu1 %v25338_v26  ;;  %11202 = vmatpush1.msra.mxu0 %v11122_v30  ;;  %v11510_v10 = vpop.permute.xlu1 %11509  ;;  %v11506_v23 = vpop.permute.xlu0 %11505  ;;  %v11137_v30 = vmul.f32 %v11121_v6, %v25400_v62  ;;  %v11110_v6 = vsel %vm7076_vm13, %v21806_v58, %v25399_v27  ;;  %v11106_v59 = vsel %vm7076_vm13, %v21913_v15, %v22033_v61 }
0x1b97   : > { %11235 = vmatprep.mubr.f32.mxu0 %v25338_v26  ;;  %17014 = vmatpush1.msk.msra.mxu1 %vm804_vm0, %v11132_v17  ;;  %v25401_v17 = vld [vmem:[#allocation34_spill] sm:$0xff]  ;;  %v11129_v58 = vmul.f32 %v11120_v38, %v25400_v62  ;;  %v11128_v27 = vmul.f32 %v11106_v59, %v25402_v29  ;;  %v25406_v62 = vld [vmem:[#allocation73_spill] sm:$0xff] }
0x1b98   : > { %11278 = vmatprep.subr.mxu1 %v11125_v16  ;;  %17017 = vmatprep.subr.msk.mxu0 %vm804_vm0, %v11135_v46  ;;  %v11134_v46 = vmul.f32 %v11111_v24, %v25401_v17  ;;  %v11127_v16 = vmul.f32 %v11108_v11, %v25397_v5  ;;  %v11538_v24 = vsel %vm7543_vm14, %v22417_v22, %v11506_v23 }
0x1b99   : > { %17006 = vmatmul.mubr.msk.f32.gmra.mxu1 %vm4609_vm8, %v22391_v8  ;;  %17011 = vmatmul.mubr.msk.f32.vlgmr.msra.gmra.mxu0 %vm4609_vm8, %v22472_v1  ;;  %v11126_v15 = vmul.f32 %v11110_v6, %v25401_v17  ;;  %v11540_v11 = vsel %vm7543_vm14, %v22444_v42, %v22417_v22  ;;  %v11539_v22 = vsel %vm7543_vm14, %v22185_v52, %v22151_v36 }
0x1b9a   : > { %11241 = vmatprep.mubr.f32.mxu0 %v25338_v26  ;;  %11279 = vmatpush1.msra.mxu1 %v11124_v13  ;;  %v11518_v8 = vpop.permute.xlu1 %11517  ;;  %v11514_v63 = vpop.permute.xlu0 %11513 }
0x1b9b   : > { %11312 = vmatprep.mubr.f32.mxu1 %v25338_v26  ;;  %17021 = vmatprep.subr.msk.mxu1 %vm804_vm0, %v11137_v30  ;;  %v11534_v12 = vsel %vm7543_vm14, %v11510_v10, %v11514_v63  ;;  %v25403_v30 = vld [vmem:[#allocation40_spill] sm:$0xff] }
0x1b9c   : > { %17018 = vmatpush1.msk.msra.mxu0 %vm804_vm0, %v11134_v46  ;;  %v11552_v38 = vmul.f32 %v11538_v24, %v25403_v30  ;;  %v11537_v46 = vsel %vm7543_vm14, %v22151_v36, %v22001_v53  ;;  %v11536_v36 = vsel %vm7543_vm14, %v11506_v23, %v11510_v10  ;;  %v11535_v23 = vsel %vm7543_vm14, %v22001_v53, %v22031_v18 }
0x1b9d   : > { %17012 = vmatmul.mubr.msk.f32.gmra.mxu0 %vm4609_vm8, %v22503_v20  ;;  %17015 = vmatmul.mubr.msk.f32.vlgmr.msra.gmra.mxu1 %vm4609_vm8, %v22472_v1 }
0x1b9e   : > { %17022 = vmatpush1.msk.msra.mxu1 %vm804_vm0, %v11136_v50  ;;  %11355 = vmatprep.subr.mxu0 %v11127_v16  ;;  %v22529_v61 = vpop.permute.xlu1 %11936  ;;  %v11522_v13 = vpop.permute.xlu0 %11521  ;;  %v25404_v50 = vld [vmem:[#allocation71_spill] sm:$0xff]  ;;  %v25405_v16 = vld [vmem:[#allocation72_spill] sm:$0xff] }
0x1b9f   : > { %11432 = vmatprep.subr.mxu1 %v11129_v58  ;;  %11318 = vmatprep.mubr.f32.mxu1 %v25338_v26  ;;  %v11554_v6 = vmul.f32 %v11534_v12, %v25404_v50  ;;  %v11530_v59 = vsel %vm7543_vm14, %v11518_v8, %v11522_v13  ;;  %v11551_v24 = vmul.f32 %v11540_v11, %v25405_v16 }
0x1ba0   : > { %11356 = vmatpush1.msra.mxu0 %v11126_v15  ;;  %11389 = vmatprep.mubr.f32.mxu0 %v25338_v26  ;;  %v11544_v15 = vmul.f32 %v11537_v46, %v25403_v30  ;;  %v11533_v11 = vsel %vm7543_vm14, %v22031_v18, %v22220_v56  ;;  %v11556_v29 = vmul.f32 %v11530_v59, %v25406_v62 }
0x1ba1   : > { %11433 = vmatpush1.msra.mxu1 %v11128_v27  ;;  %17019 = vmatmul.mubr.msk.f32.vlgmr.msra.gmra.mxu0 %vm4609_vm8, %v22472_v1  ;;  %v11543_v27 = vmul.f32 %v11539_v22, %v25405_v16  ;;  %v11532_v22 = vsel %vm7543_vm14, %v11514_v63, %v11518_v8  ;;  %v11546_v53 = vmul.f32 %v11533_v11, %v25404_v50  ;;  %v25408_v8 = vld [vmem:[#allocation75_spill] sm:$0xff]  ;;  %v25410_v11 = vld [vmem:[#allocation77_spill] sm:$0xff] }
0x1ba2   : > { %17016 = vmatmul.mubr.msk.f32.gmra.mxu1 %vm4609_vm8, %v22503_v20  ;;  %11395 = vmatprep.mubr.f32.mxu0 %v25338_v26  ;;  %v11526_v58 = vpop.permute.xlu1 %11525  ;;  %v22556_v12 = vpop.permute.xlu0 %11932 }
0x1ba3   : > { %11466 = vmatprep.mubr.f32.mxu1 %v25338_v26  ;;  %17027 = vmatprep.subr.msk.mxu0 %vm804_vm0, %v11552_v38  ;;  %v11542_v10 = vsel %vm7543_vm14, %v11526_v58, %v22444_v42  ;;  %v25407_v38 = vld [vmem:[#allocation74_spill] sm:$0xff]  ;;  %v11531_v42 = vsel %vm7543_vm14, %v22220_v56, %v22071_v3  ;;  %v11528_v56 = vsel %vm7543_vm14, %v11522_v13, %v11526_v58 }
0x1ba4   : > { %17028 = vmatpush1.msk.msra.mxu0 %vm804_vm0, %v11551_v24  ;;  %17031 = vmatprep.subr.msk.mxu1 %vm804_vm0, %v11554_v6  ;;  %v11553_v46 = vmul.f32 %v11536_v36, %v25407_v38  ;;  %v22586_v6 = vld [vmem:[%s24700_s16 + $0x70] sm:$0xff]  ;;  %v11558_v63 = vmul.f32 %v11542_v10, %v25408_v8  ;;  %v11545_v24 = vmul.f32 %v11535_v23, %v25407_v38 }
0x1ba5   : > { %17020 = vmatmul.mubr.msk.f32.gmra.mxu0 %vm4609_vm8, %v22503_v20  ;;  %11622 = vmatprep.subr.mxu0 %v11544_v15  ;;  %v11541_v58 = vsel %vm7543_vm14, %v22246_v21, %v22185_v52  ;;  %v25411_v10 = vld [vmem:[#allocation78_spill] sm:$0xff]  ;;  %v11527_v52 = vsel %vm7543_vm14, %v22232_v28, %v22246_v21  ;;  %v11960_v21 = vsel %vm8010_vm15, %v22446_v37, %v22331_v35 }
0x1ba6   : > { %17023 = vmatmul.mubr.msk.f32.vlgmr.msra.gmra.mxu1 %vm4609_vm8, %v22472_v1  ;;  %11623 = vmatpush1.msra.mxu0 %v11543_v27  ;;  %v11529_v1 = vsel %vm7543_vm14, %v22071_v3, %v22232_v28  ;;  %v25409_v3 = vld [vmem:[#allocation76_spill] sm:$0xff]  ;;  %v11549_v28 = vmul.f32 %v11527_v52, %v25410_v11 }
0x1ba7   : > { %11472 = vmatprep.mubr.f32.mxu1 %v25338_v26  ;;  %11656 = vmatprep.mubr.f32.mxu0 %v25338_v26  ;;  %v11923_v18 = vpop.permute.xlu1 %11922  ;;  %v11555_v15 = vmul.f32 %v11532_v22, %v25409_v3  ;;  %v11547_v27 = vmul.f32 %v11531_v42, %v25409_v3  ;;  %v11548_v13 = vmul.f32 %v11529_v1, %v25406_v62  ;;  %v25412_v1 = vld [vmem:[#allocation79_spill] sm:$0xff] }
0x1ba8   : > { %17032 = vmatpush1.msk.msra.mxu1 %vm804_vm0, %v11553_v46  ;;  %17035 = vmatprep.subr.msk.mxu0 %vm804_vm0, %v11556_v29  ;;  %v11927_v59 = vpop.permute.xlu0 %11926  ;;  %v17026_v29 = vld [vmem:[%s24700_s16 + $0x78] sm:$0xf]  ;;  %v11550_v42 = vmul.f32 %v11541_v58, %v25408_v8  ;;  %v17043_v52 = vld [vmem:[%s24700_s16 + $0x80] sm:$0xff] }
0x1ba9   : > { %17029 = vmatmul.mubr.msk.f32.vlgmr.msra.gmra.mxu0 %vm4609_vm8, %v22586_v6  ;;  %11699 = vmatprep.subr.mxu1 %v11546_v53  ;;  %v11959_v36 = vsel %vm8010_vm15, %v11923_v18, %v11927_v59 }
0x1baa   : > { %17024 = vmatmul.mubr.msk.f32.gmra.mxu1 %vm4609_vm8, %v22503_v20  ;;  %11662 = vmatprep.mubr.f32.mxu0 %v25338_v26  ;;  %v11557_v20 = vmul.f32 %v11528_v56, %v25410_v11  ;;  %v11973_v23 = vmul.f32 %v11959_v36, %v25411_v10 }
0x1bab   : > { %11700 = vmatpush1.msra.mxu1 %v11545_v24  ;;  %11733 = vmatprep.mubr.f32.mxu1 %v25338_v26 }
0x1bac   : > { %17036 = vmatpush1.msk.msra.mxu0 %vm804_vm0, %v11555_v15  ;;  %17039 = vmatprep.subr.msk.mxu1 %vm804_vm0, %v11558_v63  ;;  %v22629_v46 = vpop.permute.xlu1 %11918 }
0x1bad   : > { %17030 = vmatmul.mubr.msk.f32.gmra.mxu0 %vm4609_vm8, %v17026_v29  ;;  %11776 = vmatprep.subr.mxu0 %v11548_v13  ;;  %v11961_v22 = vsel %vm8010_vm15, %v22629_v46, %v11923_v18  ;;  %v11935_v53 = vpop.permute.xlu0 %11934  ;;  %v11958_v18 = vsel %vm8010_vm15, %v22331_v35, %v22230_v57  ;;  %v25413_v13 = vld [vmem:[#allocation80_spill] sm:$0xff] }
0x1bae   : > { %17033 = vmatmul.mubr.msk.f32.vlgmr.msra.gmra.mxu1 %vm4609_vm8, %v22586_v6  ;;  %11777 = vmatpush1.msra.mxu0 %v11547_v27  ;;  %v11972_v63 = vmul.f32 %v11961_v22, %v25412_v1  ;;  %v11965_v35 = vmul.f32 %v11958_v18, %v25411_v10  ;;  %v11964_v27 = vmul.f32 %v11960_v21, %v25412_v1 }
0x1baf   : > { %11739 = vmatprep.mubr.f32.mxu1 %v25338_v26  ;;  %11810 = vmatprep.mubr.f32.mxu0 %v25338_v26 }
0x1bb0   : > { %17040 = vmatpush1.msk.msra.mxu1 %vm804_vm0, %v11557_v20  ;;  %17045 = vmatprep.subr.msk.mxu0 %vm804_vm0, %v11973_v23  ;;  %v25414_v20 = vld [vmem:[#allocation81_spill] sm:$0xff] }
0x1bb1   : > { %17037 = vmatmul.mubr.msk.f32.vlgmr.msra.gmra.mxu0 %vm4609_vm8, %v22586_v6  ;;  %11853 = vmatprep.subr.mxu1 %v11550_v42  ;;  %v11931_v24 = vpop.permute.xlu1 %11930  ;;  %v11943_v56 = vpop.permute.xlu0 %11942 }
0x1bb2   : > { %17034 = vmatmul.mubr.msk.f32.gmra.mxu1 %vm4609_vm8, %v17026_v29  ;;  %11816 = vmatprep.mubr.f32.mxu0 %v25338_v26  ;;  %v11955_v36 = vsel %vm8010_vm15, %v11931_v24, %v11935_v53  ;;  %v11957_v15 = vsel %vm8010_vm15, %v11927_v59, %v11931_v24  ;;  %v11954_v59 = vsel %vm8010_vm15, %v22361_v44, %v22556_v12 }
0x1bb3   : > { %11854 = vmatpush1.msra.mxu1 %v11549_v28  ;;  %11887 = vmatprep.mubr.f32.mxu1 %v25338_v26  ;;  %v11975_v58 = vmul.f32 %v11955_v36, %v25413_v13  ;;  %v11974_v23 = vmul.f32 %v11957_v15, %v25414_v20  ;;  %v25415_v28 = vld [vmem:[#allocation82_spill] sm:$0xff]  ;;  %v11967_v24 = vmul.f32 %v11954_v59, %v25413_v13  ;;  %v17044_v15 = vld [vmem:[%s24700_s16 + $0x88] sm:$0xf] }
0x1bb4   : > { %17046 = vmatpush1.msk.msra.mxu0 %vm804_vm0, %v11972_v63  ;;  %v11956_v63 = vsel %vm8010_vm15, %v22230_v57, %v22361_v44  ;;  %v25416_v57 = vld [vmem:[#allocation83_spill] sm:$0xff] }
0x1bb5   : > { %17038 = vmatmul.mubr.msk.f32.gmra.mxu0 %vm4609_vm8, %v17026_v29  ;;  %12043 = vmatprep.subr.mxu0 %v11965_v35  ;;  %v11939_v22 = vpop.permute.xlu1 %11938  ;;  %v11966_v36 = vmul.f32 %v11956_v63, %v25414_v20  ;;  %v11952_v35 = vsel %vm8010_vm15, %v22556_v12, %v22529_v61  ;;  %v25417_v12 = vld [vmem:[#allocation84_spill] sm:$0xff] }
0x1bb6   : > { %17041 = vmatmul.mubr.msk.f32.vlgmr.msra.gmra.mxu1 %vm4609_vm8, %v22586_v6  ;;  %12044 = vmatpush1.msra.mxu0 %v11964_v27  ;;  %v11951_v42 = vsel %vm8010_vm15, %v11939_v22, %v11943_v56  ;;  %v11941_v18 = vpop.permute.xlu0 %11940  ;;  %v11953_v6 = vsel %vm8010_vm15, %v11935_v53, %v11939_v22 }
0x1bb7   : > { %11893 = vmatprep.mubr.f32.mxu1 %v25338_v26  ;;  %12077 = vmatprep.mubr.f32.mxu0 %v25338_v26  ;;  %v11977_v21 = vmul.f32 %v11951_v42, %v25415_v28  ;;  %v11976_v44 = vmul.f32 %v11953_v6, %v25416_v57  ;;  %v11950_v53 = vsel %vm8010_vm15, %v22529_v61, %v11941_v18  ;;  %v25418_v42 = vld [vmem:[#allocation85_spill] sm:$0xff] }
0x1bb8   : > { %17049 = vmatprep.subr.msk.mxu1 %vm804_vm0, %v11975_v58  ;;  %v11969_v22 = vmul.f32 %v11950_v53, %v25415_v28  ;;  %v11968_v61 = vmul.f32 %v11952_v35, %v25416_v57 }
0x1bb9   : > { %17047 = vmatmul.mubr.msk.f32.vlgmr.msra.gmra.mxu0 %vm4609_vm8, %v17043_v52  ;;  %17050 = vmatpush1.msk.msra.mxu1 %vm804_vm0, %v11974_v23 }
0x1bba   : > { %17042 = vmatmul.mubr.msk.f32.gmra.mxu1 %vm4609_vm8, %v17026_v29  ;;  %12083 = vmatprep.mubr.f32.mxu0 %v25338_v26 }
0x1bbb   : > { %12120 = vmatprep.subr.mxu1 %v11967_v24  ;;  %12154 = vmatprep.mubr.f32.mxu1 %v25338_v26 }
0x1bbc   : > { %12121 = vmatpush1.msra.mxu1 %v11966_v36  ;;  %v11947_v29 = vpop.permute.xlu1 %11946  ;;  %17053 = vmatprep.subr.msk.mxu0 %vm804_vm0, %v11977_v21  ;;  %v11945_v27 = vpop.permute.xlu0 %11944 }
0x1bbd   : > { %17048 = vmatmul.mubr.msk.f32.gmra.mxu0 %vm4609_vm8, %v17044_v15  ;;  %v11949_v58 = vsel %vm8010_vm15, %v11943_v56, %v11947_v29  ;;  %v11963_v23 = vsel %vm8010_vm15, %v11947_v29, %v22629_v46  ;;  %v11962_v56 = vsel %vm8010_vm15, %v11945_v27, %v22446_v37  ;;  %v11948_v46 = vsel %vm8010_vm15, %v11941_v18, %v11945_v27 }
0x1bbe   : > { %v11979_v59 = vmul.f32 %v11963_v23, %v25417_v12  ;;  %17051 = vmatmul.mubr.msk.f32.vlgmr.msra.gmra.mxu1 %vm4609_vm8, %v17043_v52  ;;  %17054 = vmatpush1.msk.msra.mxu0 %vm804_vm0, %v11976_v44  ;;  %v11978_v63 = vmul.f32 %v11949_v58, %v25418_v42  ;;  %v11971_v6 = vmul.f32 %v11962_v56, %v25417_v12 }
0x1bbf   : > { %12197 = vmatprep.subr.mxu0 %v11969_v22  ;;  %12160 = vmatprep.mubr.f32.mxu1 %v25338_v26  ;;  %v11970_v37 = vmul.f32 %v11948_v46, %v25418_v42 }
0x1bc0   : > { %12198 = vmatpush1.msra.mxu0 %v11968_v61  ;;  %12231 = vmatprep.mubr.f32.mxu0 %v25338_v26 }
0x1bc1   : > { %17055 = vmatmul.mubr.msk.f32.vlgmr.msra.gmra.mxu0 %vm4609_vm8, %v17043_v52  ;;  %17057 = vmatprep.subr.msk.mxu1 %vm804_vm0, %v11979_v59 }
0x1bc2   : > { %17052 = vmatmul.mubr.msk.f32.gmra.mxu1 %vm4609_vm8, %v17044_v15  ;;  %12237 = vmatprep.mubr.f32.mxu0 %v25338_v26 }
0x1bc3   : > { %17058 = vmatpush1.msk.msra.mxu1 %vm804_vm0, %v11978_v63  ;;  %12308 = vmatprep.mubr.f32.mxu1 %v25338_v26 }
0x1bc4   : > { %12274 = vmatprep.subr.mxu1 %v11971_v6 }
0x1bc5   : > { %12275 = vmatpush1.msra.mxu1 %v11970_v37  ;;  %17056 = vmatmul.mubr.msk.f32.gmra.mxu0 %vm4609_vm8, %v17044_v15 }
0x1bc6   : > { %17059 = vmatmul.mubr.msk.f32.vlgmr.msra.gmra.mxu1 %vm4609_vm8, %v17043_v52  ;;  %12759 = vmatprep.mubr.f32.mxu0 %v25338_v26 }
0x1bc7   : > { %12314 = vmatprep.mubr.f32.mxu1 %v25338_v26 }
0x1bca   : > { %17060 = vmatmul.mubr.msk.f32.gmra.mxu1 %vm4609_vm8, %v17044_v15 }
0x1bcb   : > { %12901 = vmatprep.mubr.f32.mxu1 %v25338_v26 }
0x1bef   : > { %v8874_v18 = vpop.f32.mrf.mxu0 }
0x1bf1   : > { %v8876_v21 = vpop.f32.mrf.mxu0 }
0x1bf3   : > { %v8880_v24 = vpop.f32.mrf.mxu0  ;;  %v8951_v36 = vpop.f32.mrf.mxu1 }
0x1bf5   : > { %v8882_v44 = vpop.f32.mrf.mxu0  ;;  %v8953_v53 = vpop.f32.mrf.mxu1 }
0x1bf9   : > { %v9028_v35 = vpop.f32.mrf.mxu0 }
0x1bfa   : > { %v8957_v29 = vpop.f32.mrf.mxu1 }
0x1bfb   : > { %v9030_v27 = vpop.f32.mrf.mxu0 }
0x1bfc   : > { %v8959_v58 = vpop.f32.mrf.mxu1 }
0x1bfd   : > { %v9034_v23 = vpop.f32.mrf.mxu0 }
0x1bfe   : > { %v9105_v52 = vpop.f32.mrf.mxu1 }
0x1bff   : > { %v9036_v22 = vpop.f32.mrf.mxu0 }
0x1c00   : > { %v9107_v61 = vpop.f32.mrf.mxu1 }
0x1c02   : > { %v9111_v59 = vpop.f32.mrf.mxu1  ;;  %v9212_v63 = vpop.f32.mrf.mxu0 }
0x1c03   : > { %v9213_v56 = vadd.f32 %v9212_v63, %v8874_v18 }
0x1c04   : > { %v9113_v15 = vpop.f32.mrf.mxu1  ;;  %v9214_v46 = vpop.f32.mrf.mxu0 }
0x1c07   : > { %v9218_v6 = vpop.f32.mrf.mxu0  ;;  %v9289_v37 = vpop.f32.mrf.mxu1 }
0x1c08   : > { %v9219_v12 = vadd.f32 %v9218_v6, %v8880_v24  ;;  %v9290_v42 = vadd.f32 %v9289_v37, %v8951_v36 }
0x1c09   : > { %v9220_v28 = vpop.f32.mrf.mxu0  ;;  %v9291_v57 = vpop.f32.mrf.mxu1 }
0x1c0a   : > { %v9221_v13 = vadd.f32 %v9220_v28, %v8882_v44  ;;  %v9292_v20 = vadd.f32 %v9291_v57, %v8953_v53  ;;  %v9215_v28 = vadd.f32 %v9214_v46, %v8876_v21 }
0x1c0e   : > { %v9295_v1 = vpop.f32.mrf.mxu1  ;;  %v9366_v10 = vpop.f32.mrf.mxu0 }
0x1c0f   : > { %v9296_v8 = vadd.f32 %v9295_v1, %v8957_v29  ;;  %v9367_v11 = vadd.f32 %v9366_v10, %v9028_v35 }
0x1c10   : > { %v9297_v62 = vpop.f32.mrf.mxu1  ;;  %v9368_v3 = vpop.f32.mrf.mxu0 }
0x1c11   : > { %v9298_v50 = vadd.f32 %v9297_v62, %v8959_v58  ;;  %v9369_v38 = vadd.f32 %v9368_v3, %v9030_v27 }
0x1c12   : > { %v9372_v16 = vpop.f32.mrf.mxu0  ;;  %v9443_v18 = vpop.f32.mrf.mxu1 }
0x1c13   : > { %v9373_v63 = vadd.f32 %v9372_v16, %v9034_v23  ;;  %v9444_v30 = vadd.f32 %v9443_v18, %v9105_v52 }
0x1c14   : > { %v9374_v17 = vpop.f32.mrf.mxu0  ;;  %v9445_v5 = vpop.f32.mrf.mxu1 }
0x1c15   : > { %v9375_v24 = vadd.f32 %v9374_v17, %v9036_v22  ;;  %v9446_v36 = vadd.f32 %v9445_v5, %v9107_v61 }
0x1c16   : > { %v9449_v6 = vpop.f32.mrf.mxu1  ;;  %v9617_v37 = vpop.f32.mrf.mxu0 }
0x1c17   : > { %v9450_v57 = vadd.f32 %v9449_v6, %v9111_v59  ;;  %v9859_v44 = vadd.f32 %v9617_v37, %v9213_v56 }
0x1c18   : > { %v9451_v53 = vpop.f32.mrf.mxu1  ;;  %v9619_v1 = vpop.f32.mrf.mxu0 }
0x1c19   : > { %v9452_v10 = vadd.f32 %v9451_v53, %v9113_v15  ;;  %v9860_v35 = vadd.f32 %v9619_v1, %v9215_v28 }
0x1c1a   : > { %v9623_v29 = vpop.f32.mrf.mxu0  ;;  %v9694_v62 = vpop.f32.mrf.mxu1 }
0x1c1b   : > { %v9867_v3 = vadd.f32 %v9623_v29, %v9219_v12  ;;  %v9861_v27 = vadd.f32 %v9694_v62, %v9290_v42 }
0x1c1c   : > { %v9625_v58 = vpop.f32.mrf.mxu0  ;;  %v9696_v16 = vpop.f32.mrf.mxu1 }
0x1c1d   : > { %v9868_v23 = vadd.f32 %v9625_v58, %v9221_v13  ;;  %v9862_v52 = vadd.f32 %v9696_v16, %v9292_v20 }
0x1c1f   : > { %v9700_v18 = vpop.f32.mrf.mxu1  ;;  %v9771_v17 = vpop.f32.mrf.mxu0 }
0x1c20   : > { %v9869_v5 = vadd.f32 %v9700_v18, %v9296_v8  ;;  %v9863_v22 = vadd.f32 %v9771_v17, %v9367_v11 }
0x1c21   : > { %v9702_v61 = vpop.f32.mrf.mxu1  ;;  %v9773_v21 = vpop.f32.mrf.mxu0 }
0x1c22   : > { %v9870_v59 = vadd.f32 %v9702_v61, %v9298_v50  ;;  %v9864_v56 = vadd.f32 %v9773_v21, %v9369_v38 }
0x1c23   : > { %v9777_v46 = vpop.f32.mrf.mxu0  ;;  %v9848_v6 = vpop.f32.mrf.mxu1 }
0x1c24   : > { %v9871_v15 = vadd.f32 %v9777_v46, %v9373_v63  ;;  %v9865_v37 = vadd.f32 %v9848_v6, %v9444_v30 }
0x1c25   : > { %v9779_v28 = vpop.f32.mrf.mxu0  ;;  %v9850_v53 = vpop.f32.mrf.mxu1 }
0x1c26   : > { %v9872_v12 = vadd.f32 %v9779_v28, %v9375_v24  ;;  %v9866_v42 = vadd.f32 %v9850_v53, %v9446_v36 }
0x1c27   : > { %v9854_v1 = vpop.f32.mrf.mxu1  ;;  %v10038_v29 = vpop.f32.mrf.mxu0 }
0x1c28   : > { %v9873_v13 = vadd.f32 %v9854_v1, %v9450_v57  ;;  %v22744_v20 = vadd.f32 %v10038_v29, %v9859_v44 }
0x1c29   : > { %v9856_v62 = vpop.f32.mrf.mxu1  ;;  %v10040_v8 = vpop.f32.mrf.mxu0 }
0x1c2a   : > { %v9874_v11 = vadd.f32 %v9856_v62, %v9452_v10  ;;  %v22746_v58 = vadd.f32 %v10040_v8, %v9860_v35 }
0x1c2b   : > { %v10044_v50 = vpop.f32.mrf.mxu0  ;;  %v10115_v38 = vpop.f32.mrf.mxu1 }
0x1c2c   : > { %v22748_v16 = vadd.f32 %v10044_v50, %v9867_v3  ;;  %v22750_v63 = vadd.f32 %v10115_v38, %v9861_v27 }
0x1c2d   : > { %v10046_v30 = vpop.f32.mrf.mxu0  ;;  %v10117_v18 = vpop.f32.mrf.mxu1 }
0x1c2e   : > { %v22752_v24 = vadd.f32 %v10046_v30, %v9868_v23  ;;  %v22754_v36 = vadd.f32 %v10117_v18, %v9862_v52 }
0x1c2f   : > { %v10192_v57 = vpop.f32.mrf.mxu0 }
0x1c30   : > { %v10121_v44 = vpop.f32.mrf.mxu1  ;;  %v22756_v17 = vadd.f32 %v10192_v57, %v9863_v22 }
0x1c31   : > { %v22758_v61 = vadd.f32 %v10121_v44, %v9869_v5  ;;  %v10194_v10 = vpop.f32.mrf.mxu0 }
0x1c32   : > { %v10123_v35 = vpop.f32.mrf.mxu1  ;;  %v22760_v21 = vadd.f32 %v10194_v10, %v9864_v56 }
0x1c33   : > { %v22762_v3 = vadd.f32 %v10123_v35, %v9870_v59 }
0x1c34   : > { %v10198_v27 = vpop.f32.mrf.mxu0  ;;  %v10269_v46 = vpop.f32.mrf.mxu1 }
0x1c35   : > { %v22764_v6 = vadd.f32 %v10198_v27, %v9871_v15  ;;  %v22766_v23 = vadd.f32 %v10269_v46, %v9865_v37 }
0x1c36   : > { %v10200_v52 = vpop.f32.mrf.mxu0  ;;  %v10271_v28 = vpop.f32.mrf.mxu1 }
0x1c37   : > { %25419 = vst [vmem:[#allocation12_spill] sm:$0xff] %v22766_v23  ;;  %v22768_v53 = vadd.f32 %v10200_v52, %v9872_v12  ;;  %v22770_v22 = vadd.f32 %v10271_v28, %v9866_v42 }
0x1c38   : > { %v10275_v5 = vpop.f32.mrf.mxu1 }
0x1c39   : > { %25420 = vst [vmem:[#allocation5_spill] sm:$0xff] %v22768_v53  ;;  %25421 = vst [vmem:[#allocation14_spill] sm:$0xff] %v22770_v22  ;;  %v22772_v1 = vadd.f32 %v10275_v5, %v9873_v13  ;;  %v10395_v29 = vpop.f32.mrf.mxu0 }
0x1c3a   : > { %v10277_v56 = vpop.f32.mrf.mxu1  ;;  %v10637_v53 = vadd.f32 %v10395_v29, %v22744_v20 }
0x1c3b   : > { %25422 = vst [vmem:[#allocation6_spill] sm:$0xff] %v22772_v1  ;;  %v22774_v62 = vadd.f32 %v10277_v56, %v9874_v11  ;;  %v10397_v59 = vpop.f32.mrf.mxu0 }
0x1c3c   : > { %v10472_v8 = vpop.f32.mrf.mxu1 }
0x1c3d   : > { %25423 = vst [vmem:[#allocation18_spill] sm:$0xff] %v22774_v62  ;;  %v10401_v50 = vpop.f32.mrf.mxu0 }
0x1c3e   : > { %v10474_v15 = vpop.f32.mrf.mxu1 }
0x1c3f   : > { %v10403_v38 = vpop.f32.mrf.mxu0 }
0x1c40   : > { %v10478_v37 = vpop.f32.mrf.mxu1 }
0x1c41   : > { %v10549_v30 = vpop.f32.mrf.mxu0 }
0x1c42   : > { %v10480_v18 = vpop.f32.mrf.mxu1 }
0x1c43   : > { %v10551_v57 = vpop.f32.mrf.mxu0 }
0x1c44   : > { %v10626_v12 = vpop.f32.mrf.mxu1  ;;  %v10642_v20 = vadd.f32 %v10551_v57, %v22760_v21 }
0x1c45   : > { %v10555_v44 = vpop.f32.mrf.mxu0 }
0x1c46   : > { %v10628_v42 = vpop.f32.mrf.mxu1  ;;  %v10649_v29 = vadd.f32 %v10555_v44, %v22764_v6 }
0x1c47   : > { %v10557_v10 = vpop.f32.mrf.mxu0 }
0x1c48   : > { %v10632_v35 = vpop.f32.mrf.mxu1 }
0x1c49   : > { %v10816_v13 = vpop.f32.mrf.mxu0 }
0x1c4a   : > { %v10634_v27 = vpop.f32.mrf.mxu1 }
0x1c4b   : > { %v10818_v46 = vpop.f32.mrf.mxu0 }
0x1c4c   : > { %v10893_v52 = vpop.f32.mrf.mxu1 }
0x1c4d   : > { %v10822_v11 = vpop.f32.mrf.mxu0 }
0x1c4e   : > { %v10895_v28 = vpop.f32.mrf.mxu1 }
0x1c4f   : > { %v10824_v5 = vpop.f32.mrf.mxu0 }
0x1c51   : > { %v10899_v56 = vpop.f32.mrf.mxu1  ;;  %v10970_v34 = vpop.f32.mrf.mxu0 }
0x1c53   : > { %v10901_v48 = vpop.f32.mrf.mxu1  ;;  %v10972_v14 = vpop.f32.mrf.mxu0 }
0x1c55   : > { %v10976_v19 = vpop.f32.mrf.mxu0  ;;  %v11047_v41 = vpop.f32.mrf.mxu1 }
0x1c57   : > { %v10978_v26 = vpop.f32.mrf.mxu0  ;;  %v11049_v47 = vpop.f32.mrf.mxu1 }
0x1c59   : > { %v11053_v32 = vpop.f32.mrf.mxu1  ;;  %v11237_v45 = vpop.f32.mrf.mxu0 }
0x1c5b   : > { %v11055_v60 = vpop.f32.mrf.mxu1  ;;  %v11239_v40 = vpop.f32.mrf.mxu0 }
0x1c5d   : > { %v11243_v54 = vpop.f32.mrf.mxu0  ;;  %v11314_v31 = vpop.f32.mrf.mxu1 }
0x1c5f   : > { %v11245_v4 = vpop.f32.mrf.mxu0  ;;  %v11316_v7 = vpop.f32.mrf.mxu1 }
0x1c61   : > { %v11391_v0 = vpop.f32.mrf.mxu0 }
0x1c62   : > { %v11320_v43 = vpop.f32.mrf.mxu1 }
0x1c63   : > { %v11393_v49 = vpop.f32.mrf.mxu0 }
0x1c64   : > { %v22776_v9 = vpop.f32.mrf.mxu1 }
0x1c65   : > { %25424 = vst [vmem:[#allocation4_spill] sm:$0xff] %v22776_v9  ;;  %v22778_v51 = vpop.f32.mrf.mxu0  ;;  %v10638_v9 = vadd.f32 %v10397_v59, %v22746_v58  ;;  %v25434_v59 = vld [vmem:[#allocation12_spill] sm:$0xff] }
0x1c66   : > { %25425 = vst [vmem:[#allocation15_spill] sm:$0xff] %v22778_v51  ;;  %v22780_v39 = vpop.f32.mrf.mxu1 }
0x1c67   : > { %25426 = vst [vmem:[#allocation11_spill] sm:$0xff] %v22780_v39  ;;  %v22782_v2 = vpop.f32.mrf.mxu0  ;;  %v10645_v39 = vadd.f32 %v10401_v50, %v22748_v16  ;;  %v10643_v16 = vadd.f32 %v10626_v12, %v25434_v59  ;;  %v25435_v50 = vld [vmem:[#allocation5_spill] sm:$0xff] }
0x1c68   : > { %25427 = vst [vmem:[#allocation19_spill] sm:$0xff] %v22782_v2  ;;  %v22784_v33 = vpop.f32.mrf.mxu1  ;;  %v10639_v2 = vadd.f32 %v10472_v8, %v22750_v63  ;;  %v10650_v63 = vadd.f32 %v10557_v10, %v25435_v50  ;;  %v25436_v8 = vld [vmem:[#allocation14_spill] sm:$0xff]  ;;  %v11063_v10 = vadd.f32 %v10972_v14, %v10642_v20 }
0x1c69   : > { %25428 = vst [vmem:[#allocation7_spill] sm:$0xff] %v22784_v33  ;;  %v11658_v55 = vpop.f32.mrf.mxu0  ;;  %v10646_v33 = vadd.f32 %v10403_v38, %v22752_v24  ;;  %v10644_v24 = vadd.f32 %v10628_v42, %v25436_v8  ;;  %v11070_v8 = vadd.f32 %v10976_v19, %v10649_v29  ;;  %v11064_v42 = vadd.f32 %v11047_v41, %v10643_v16 }
0x1c6a   : > { %v22786_v25 = vpop.f32.mrf.mxu1 }
0x1c6b   : > { %25429 = vst [vmem:[#allocation16_spill] sm:$0xff] %v22786_v25  ;;  %v22788_v62 = vpop.f32.mrf.mxu0  ;;  %v10640_v25 = vadd.f32 %v10474_v15, %v22754_v36  ;;  %v25437_v36 = vld [vmem:[#allocation6_spill] sm:$0xff]  ;;  %v11067_v21 = vadd.f32 %v10824_v5, %v10646_v33 }
0x1c6c   : > { %25430 = vst [vmem:[#allocation13_spill] sm:$0xff] %v22788_v62  ;;  %v22790_v1 = vpop.f32.mrf.mxu1  ;;  %v10647_v62 = vadd.f32 %v10478_v37, %v22758_v61  ;;  %v10651_v15 = vadd.f32 %v10632_v35, %v25437_v36  ;;  %v25438_v61 = vld [vmem:[#allocation18_spill] sm:$0xff]  ;;  %v11071_v35 = vadd.f32 %v10978_v26, %v10650_v63  ;;  %v11065_v36 = vadd.f32 %v11049_v47, %v10644_v24  ;;  %v25439_v19 = vld [vmem:[#allocation4_spill] sm:$0xff] }
0x1c6d   : > { %25431 = vst [vmem:[#allocation102_spill] sm:$0xff] %v22790_v1  ;;  %v22792_v22 = vpop.f32.mrf.mxu0  ;;  %v10641_v1 = vadd.f32 %v10549_v30, %v22756_v17  ;;  %v10652_v37 = vadd.f32 %v10634_v27, %v25438_v61  ;;  %v11059_v17 = vadd.f32 %v10818_v46, %v10638_v9  ;;  %v11061_v57 = vadd.f32 %v10895_v28, %v10640_v25  ;;  %v25440_v26 = vld [vmem:[#allocation15_spill] sm:$0xff] }
0x1c6e   : > { %25432 = vst [vmem:[#allocation109_spill] sm:$0xff] %v22792_v22  ;;  %v22796_v51 = vpop.f32.mrf.mxu1  ;;  %v10648_v22 = vadd.f32 %v10480_v18, %v22762_v3  ;;  %v11066_v3 = vadd.f32 %v10822_v11, %v10645_v39  ;;  %v11060_v18 = vadd.f32 %v10893_v52, %v10639_v2  ;;  %v11068_v44 = vadd.f32 %v10899_v56, %v10647_v62 }
0x1c6f   : > { %25433 = vst [vmem:[#allocation103_spill] sm:$0xff] %v22796_v51  ;;  %v11666_v23 = vpop.f32.mrf.mxu0  ;;  %v11058_v51 = vadd.f32 %v10816_v13, %v10637_v53  ;;  %v11062_v12 = vadd.f32 %v10970_v34, %v10641_v1  ;;  %v11072_v53 = vadd.f32 %v11053_v32, %v10651_v15  ;;  %v11073_v61 = vadd.f32 %v11055_v60, %v10652_v37  ;;  %v25441_v1 = vld [vmem:[#allocation11_spill] sm:$0xff] }
0x1c70   : > { %v11737_v58 = vpop.f32.mrf.mxu1  ;;  %v11069_v59 = vadd.f32 %v10901_v48, %v10648_v22  ;;  %v11480_v9 = vadd.f32 %v11239_v40, %v11059_v17  ;;  %v11487_v39 = vadd.f32 %v11243_v54, %v11066_v3  ;;  %v11481_v2 = vadd.f32 %v11314_v31, %v11060_v18  ;;  %v25449_v37 = vld [vmem:[#allocation87_spill] sm:$0xff]  ;;  %v22823_v18 = vpop.permute.xlu0 %12357 }
0x1c71   : > { %v11812_v38 = vpop.f32.mrf.mxu0  ;;  %v11479_v27 = vadd.f32 %v11237_v45, %v11058_v51  ;;  %v11488_v33 = vadd.f32 %v11245_v4, %v11067_v21  ;;  %v11482_v25 = vadd.f32 %v11316_v7, %v11061_v57  ;;  %v11489_v62 = vadd.f32 %v11320_v43, %v11068_v44  ;;  %v25442_v45 = vld [vmem:[#allocation19_spill] sm:$0xff] }
0x1c72   : > { %v11741_v30 = vpop.f32.mrf.mxu1  ;;  %v11483_v34 = vadd.f32 %v11391_v0, %v11062_v12  ;;  %v11484_v48 = vadd.f32 %v11393_v49, %v11063_v10  ;;  %v11490_v41 = vadd.f32 %v25439_v19, %v11069_v59  ;;  %v11491_v47 = vadd.f32 %v25440_v26, %v11070_v8  ;;  %v25443_v51 = vld [vmem:[#allocation7_spill] sm:$0xff]  ;;  %v25444_v31 = vld [vmem:[#allocation16_spill] sm:$0xff] }
0x1c73   : > { %v11814_v6 = vpop.f32.mrf.mxu0  ;;  %v11900_v14 = vadd.f32 %v11658_v55, %v11479_v27  ;;  %v11485_v32 = vadd.f32 %v25441_v1, %v11064_v42  ;;  %v11492_v60 = vadd.f32 %v25442_v45, %v11071_v35  ;;  %v11486_v54 = vadd.f32 %v25443_v51, %v11065_v36  ;;  %v25445_v7 = vld [vmem:[#allocation13_spill] sm:$0xff]  ;;  %v25451_v27 = vld [vmem:[#allocation99_spill] sm:$0xff] }
0x1c74   : > { %v11743_v50 = vpop.f32.mrf.mxu1  ;;  %v11493_v4 = vadd.f32 %v25444_v31, %v11072_v53  ;;  %v11901_v11 = vadd.f32 %v25445_v7, %v11480_v9  ;;  %v25446_v49 = vld [vmem:[#allocation102_spill] sm:$0xff]  ;;  %v11909_v29 = vadd.f32 %v11666_v23, %v11488_v33  ;;  %v11903_v63 = vadd.f32 %v11737_v58, %v11482_v25 }
0x1c75   : > { %v11818_v13 = vpop.f32.mrf.mxu0  ;;  %v11494_v55 = vadd.f32 %v25446_v49, %v11073_v61  ;;  %v25447_v28 = vld [vmem:[#allocation109_spill] sm:$0xff]  ;;  %v11904_v24 = vadd.f32 %v11812_v38, %v11483_v34  ;;  %v11910_v21 = vadd.f32 %v11741_v30, %v11489_v62  ;;  %v11911_v57 = vadd.f32 %v11743_v50, %v11490_v41  ;;  %v25450_v23 = vld [vmem:[#allocation86_spill] sm:$0xff] }
0x1c76   : > { %v11889_v46 = vpop.f32.mrf.mxu1  ;;  %v11908_v5 = vadd.f32 %v25447_v28, %v11487_v39  ;;  %v25448_v56 = vld [vmem:[#allocation103_spill] sm:$0xff]  ;;  %v11905_v44 = vadd.f32 %v11814_v6, %v11484_v48  ;;  %v22825_v12 = vadd.f32 %v11818_v13, %v11491_v47  ;;  %v25453_v41 = vld [vmem:[#allocation93_spill] sm:$0xff]  ;;  %v25454_v47 = vld [vmem:[#allocation92_spill] sm:$0xff] }
0x1c77   : > { %v11820_v52 = vpop.f32.mrf.mxu0  ;;  %v11902_v20 = vadd.f32 %v25448_v56, %v11481_v2  ;;  %v22827_v10 = vadd.f32 %v11889_v46, %v11485_v32  ;;  %v22839_v46 = vpop.permute.xlu1 %12362  ;;  %v25452_v2 = vld [vmem:[#allocation88_spill] sm:$0xff] }
0x1c78   : > { %v11891_v22 = vpop.f32.mrf.mxu1  ;;  %v22831_v35 = vadd.f32 %v11820_v52, %v11492_v60 }
0x1c79   : > { %v12079_v40 = vpop.f32.mrf.mxu0  ;;  %v22833_v36 = vadd.f32 %v11891_v22, %v11486_v54 }
0x1c7a   : > { %v11895_v43 = vpop.f32.mrf.mxu1  ;;  %v12321_v0 = vadd.f32 %v12079_v40, %v11900_v14 }
0x1c7b   : > { %v12081_v16 = vpop.f32.mrf.mxu0  ;;  %v22835_v53 = vadd.f32 %v11895_v43, %v11493_v4 }
0x1c7c   : > { %v11897_v15 = vpop.f32.mrf.mxu1  ;;  %v12337_v17 = vadd.f32 %v12321_v0, %v25449_v37  ;;  %v12322_v3 = vadd.f32 %v12081_v16, %v11901_v11  ;;  %v25455_v0 = vld [vmem:[#allocation96_spill] sm:$0xff] }
0x1c7d   : > { %v12085_v59 = vpop.f32.mrf.mxu0  ;;  %v22841_v39 = vadd.f32 %v11897_v15, %v11494_v55  ;;  %v25456_v55 = vld [vmem:[#allocation90_spill] sm:$0xff] }
0x1c7e   : > { %v12365_v8 = vadd.f32 %v22823_v18, %v12337_v17  ;;  %v12338_v42 = vadd.f32 %v12322_v3, %v25450_v23  ;;  %v12329_v58 = vadd.f32 %v12085_v59, %v11908_v5  ;;  %v12156_v38 = vpop.f32.mrf.mxu1 }
0x1c7f   : > { %v12323_v30 = vadd.f32 %v12156_v38, %v11902_v20  ;;  %v12087_v50 = vpop.f32.mrf.mxu0 }
0x1c80   : > { %vm12381_vm2 = vcmp.gt.f32.partialorder %v12365_v8, 0.0  ;;  %v12397_v6 = vmul.f32 0.01, %v12365_v8  ;;  %v12366_v13 = vadd.f32 %v22823_v18, %v12338_v42  ;;  %v12345_v61 = vadd.f32 %v12329_v58, %v25451_v27  ;;  %v12158_v9 = vpop.f32.mrf.mxu1  ;;  %v25457_v27 = vld [vmem:[#allocation100_spill] sm:$0xff] }
0x1c81   : > { %v12339_v33 = vadd.f32 %v12323_v30, %v25452_v2  ;;  %v12330_v25 = vadd.f32 %v12087_v50, %v11909_v29  ;;  %v12324_v52 = vadd.f32 %v12158_v9, %v11903_v63  ;;  %v12233_v62 = vpop.f32.mrf.mxu0 }
0x1c82   : > { %v22844_v34 = vsel %vm12381_vm2, %v12365_v8, %v12397_v6  ;;  %vm12382_vm4 = vcmp.gt.f32.partialorder %v12366_v13, 0.0  ;;  %v12398_v48 = vmul.f32 0.01, %v12366_v13  ;;  %v12373_v14 = vadd.f32 %v22839_v46, %v12345_v61  ;;  %v12162_v22 = vpop.f32.mrf.mxu1 }
0x1c83   : > { %v12367_v19 = vadd.f32 %v22823_v18, %v12339_v33  ;;  %v12346_v26 = vadd.f32 %v12330_v25, %v25453_v41  ;;  %v12340_v1 = vadd.f32 %v12324_v52, %v25454_v47  ;;  %v12331_v32 = vadd.f32 %v12162_v22, %v11910_v21  ;;  %v12235_v45 = vpop.f32.mrf.mxu0  ;;  %v25459_v22 = vld [vmem:[#allocation97_spill] sm:$0xff]  ;;  %v25460_v41 = vld [vmem:[#allocation94_spill] sm:$0xff] }
0x1c84   : > { %v22850_v60 = vsel %vm12382_vm4, %v12366_v13, %v12398_v48  ;;  %vm12389_vm5 = vcmp.gt.f32.partialorder %v12373_v14, 0.0  ;;  %v12405_v40 = vmul.f32 0.01, %v12373_v14  ;;  %v12325_v51 = vadd.f32 %v12233_v62, %v11904_v24  ;;  %v12164_v54 = vpop.f32.mrf.mxu1  ;;  %v25461_v47 = vld [vmem:[#allocation101_spill] sm:$0xff] }
0x1c85   : > { %v12429_v31 = vadd.f32 %v22850_v60, %v22844_v34  ;;  %vm12383_vm6 = vcmp.gt.f32.partialorder %v12367_v19, 0.0  ;;  %v12399_v4 = vmul.f32 0.01, %v12367_v19  ;;  %v12374_v7 = vadd.f32 %v22839_v46, %v12346_v26  ;;  %v12239_v5 = vpop.f32.mrf.mxu0 }
0x1c86   : > { %v22855_v11 = vsel %vm12389_vm5, %v12373_v14, %v12405_v40  ;;  %v12368_v43 = vadd.f32 %v22823_v18, %v12340_v1  ;;  %v12347_v49 = vadd.f32 %v12331_v32, %v25455_v0  ;;  %v12341_v28 = vadd.f32 %v12325_v51, %v25456_v55  ;;  %v12310_v56 = vpop.f32.mrf.mxu1 }
0x1c87   : > { %v12438_v20 = vsel %vm804_vm0, %v22855_v11, 0.0  ;;  %v22862_v29 = vsel %vm12383_vm6, %v12367_v19, %v12399_v4  ;;  %vm12390_vm1 = vcmp.gt.f32.partialorder %v12374_v7, 0.0  ;;  %v12406_v16 = vmul.f32 0.01, %v12374_v7  ;;  %v12241_v58 = vpop.f32.mrf.mxu0 }
0x1c88   : > { %v12430_v63 = vadd.f32 %v12429_v31, %v22862_v29  ;;  %vm12384_vm2 = vcmp.gt.f32.partialorder %v12368_v43, 0.0  ;;  %v12400_v24 = vmul.f32 0.01, %v12368_v43  ;;  %v12375_v15 = vadd.f32 %v22839_v46, %v12347_v49  ;;  %v12312_v37 = vpop.f32.mrf.mxu1  ;;  %v25462_v31 = vld [vmem:[#allocation89_spill] sm:$0xff] }
0x1c89   : > { %v22866_v17 = vsel %vm12390_vm1, %v12374_v7, %v12406_v16  ;;  %v12369_v3 = vadd.f32 %v22823_v18, %v12341_v28  ;;  %v12332_v21 = vadd.f32 %v12164_v54, %v11911_v57  ;;  %v12326_v59 = vadd.f32 %v12235_v45, %v11905_v44  ;;  %v25458_v57 = vld [vmem:[#allocation91_spill] sm:$0xff] }
0x1c8a   : > { %v12439_v8 = vsel %vm804_vm0, %v22866_v17, 0.0  ;;  %v22871_v23 = vsel %vm12384_vm2, %v12368_v43, %v12400_v24  ;;  %vm12391_vm4 = vcmp.gt.f32.partialorder %v12375_v15, 0.0  ;;  %v12407_v42 = vmul.f32 0.01, %v12375_v15  ;;  %v12316_v6 = vpop.f32.mrf.mxu1  ;;  %v25463_v43 = vld [vmem:[#allocation98_spill] sm:$0xff]  ;;  %v25464_v24 = vld [vmem:[#allocation95_spill] sm:$0xff] }
0x1c8b   : > { %v12440_v38 = vadd.f32 %v12439_v8, %v12438_v20  ;;  %v12431_v30 = vadd.f32 %v12430_v63, %v22871_v23  ;;  %vm12385_vm5 = vcmp.gt.f32.partialorder %v12369_v3, 0.0  ;;  %v12401_v50 = vmul.f32 0.01, %v12369_v3 }
0x1c8c   : > { %v22874_v13 = vsel %vm12391_vm4, %v12375_v15, %v12407_v42  ;;  %v12348_v61 = vadd.f32 %v12332_v21, %v25457_v27  ;;  %v12342_v44 = vadd.f32 %v12326_v59, %v25458_v57  ;;  %v12333_v9 = vadd.f32 %v12239_v5, %v22825_v12  ;;  %v12318_v45 = vpop.f32.mrf.mxu1 }
0x1c8d   : > { %v12441_v2 = vsel %vm804_vm0, %v22874_v13, 0.0  ;;  %v22881_v33 = vsel %vm12385_vm5, %v12369_v3, %v12401_v50  ;;  %v12327_v25 = vadd.f32 %v12310_v56, %v22827_v10  ;;  %v12334_v52 = vadd.f32 %v12241_v58, %v22831_v35 }
0x1c8e   : > { %v12442_v62 = vadd.f32 %v12441_v2, %v12440_v38  ;;  %v12376_v48 = vadd.f32 %v22839_v46, %v12348_v61  ;;  %v12370_v14 = vadd.f32 %v22823_v18, %v12342_v44  ;;  %v12349_v19 = vadd.f32 %v12333_v9, %v25459_v22 }
0x1c8f   : > { %v12343_v26 = vadd.f32 %v12327_v25, %v25460_v41  ;;  %v12350_v12 = vadd.f32 %v12334_v52, %v25461_v47  ;;  %v12328_v1 = vadd.f32 %v12312_v37, %v22833_v36  ;;  %v12335_v32 = vadd.f32 %v12316_v6, %v22835_v53 }
0x1c90   : > { %vm12392_vm6 = vcmp.gt.f32.partialorder %v12376_v48, 0.0  ;;  %v12408_v10 = vmul.f32 0.01, %v12376_v48  ;;  %vm12386_vm1 = vcmp.gt.f32.partialorder %v12370_v14, 0.0  ;;  %v12402_v35 = vmul.f32 0.01, %v12370_v14 }
0x1c91   : > { %v12377_v40 = vadd.f32 %v22839_v46, %v12349_v19  ;;  %v12371_v51 = vadd.f32 %v22823_v18, %v12343_v26  ;;  %v12378_v54 = vadd.f32 %v22839_v46, %v12350_v12  ;;  %v12344_v4 = vadd.f32 %v12328_v1, %v25462_v31 }
0x1c92   : > { %v12424_v7 = vsel %vm12392_vm6, %v12376_v48, %v12408_v10  ;;  %v12351_v0 = vadd.f32 %v12335_v32, %v25463_v43  ;;  %v12336_v36 = vadd.f32 %v12318_v45, %v22841_v39  ;;  %v12418_v49 = vsel %vm12386_vm1, %v12370_v14, %v12402_v35 }
0x1c93   : > { %v12443_v53 = vsel %vm804_vm0, %v12424_v7, 0.0  ;;  %vm12393_vm2 = vcmp.gt.f32.partialorder %v12377_v40, 0.0  ;;  %v12409_v55 = vmul.f32 0.01, %v12377_v40  ;;  %vm12387_vm4 = vcmp.gt.f32.partialorder %v12371_v51, 0.0 }
0x1c94   : > { %v12444_v28 = vadd.f32 %v12443_v53, %v12442_v62  ;;  %v12403_v5 = vmul.f32 0.01, %v12371_v51  ;;  %vm12394_vm5 = vcmp.gt.f32.partialorder %v12378_v54, 0.0  ;;  %v12410_v56 = vmul.f32 0.01, %v12378_v54 }
0x1c95   : > { %v12425_v20 = vsel %vm12393_vm2, %v12377_v40, %v12409_v55  ;;  %v12372_v16 = vadd.f32 %v22823_v18, %v12344_v4  ;;  %v12379_v63 = vadd.f32 %v22839_v46, %v12351_v0  ;;  %v12352_v15 = vadd.f32 %v12336_v36, %v25464_v24 }
0x1c96   : > { %v12445_v37 = vsel %vm804_vm0, %v12425_v20, 0.0  ;;  %v12426_v39 = vsel %vm12394_vm5, %v12378_v54, %v12410_v56  ;;  %v12419_v3 = vsel %vm12387_vm4, %v12371_v51, %v12403_v5  ;;  %v12432_v21 = vadd.f32 %v12431_v30, %v22881_v33 }
0x1c97   : > { %v12404_v59 = vmul.f32 0.01, %v12372_v16  ;;  %vm12395_vm6 = vcmp.gt.f32.partialorder %v12379_v63, 0.0  ;;  %v12411_v8 = vmul.f32 0.01, %v12379_v63  ;;  %v12380_v42 = vadd.f32 %v22839_v46, %v12352_v15 }
0x1c98   : > { %vm12388_vm1 = vcmp.gt.f32.partialorder %v12372_v16, 0.0  ;;  %v12433_v58 = vadd.f32 %v12432_v21, %v12418_v49  ;;  %v12446_v38 = vadd.f32 %v12445_v37, %v12444_v28  ;;  %v12447_v18 = vsel %vm804_vm0, %v12426_v39, 0.0 }
0x1c99   : > { %v12412_v50 = vmul.f32 0.01, %v12380_v42  ;;  %v12420_v6 = vsel %vm12388_vm1, %v12372_v16, %v12404_v59  ;;  %vm12396_vm2 = vcmp.gt.f32.partialorder %v12380_v42, 0.0  ;;  %v12427_v27 = vsel %vm12395_vm6, %v12379_v63, %v12411_v8 }
0x1c9a   : > { %v12434_v61 = vadd.f32 %v12433_v58, %v12419_v3  ;;  %v12448_v57 = vadd.f32 %v12447_v18, %v12446_v38  ;;  %v12449_v44 = vsel %vm804_vm0, %v12427_v27, 0.0 }
0x1c9b   : > { %v12428_v9 = vsel %vm12396_vm2, %v12380_v42, %v12412_v50 }
0x1c9c   : > { %v12435_v30 = vadd.f32 %v12434_v61, %v12420_v6  ;;  %v12450_v2 = vadd.f32 %v12449_v44, %v12448_v57  ;;  %v12451_v25 = vsel %vm804_vm0, %v12428_v9, 0.0 }
0x1c9e   : > { %12436 = vadd.xlane.f32.xlu0 %v12435_v30  ;;  %v12452_v46 = vadd.f32 %v12451_v25, %v12450_v2 }
0x1ca0   : > { %12453 = vadd.xlane.f32.xlu1 %v12452_v46 }
0x1d27   : > { %v12437_v52 = vpop.xlane.xlu0 %12436 }
0x1d28   : > { %v12455_v62 = vmul.f32 0.0009765625, %v12437_v52 }
0x1d29   : > { %v12454_v48 = vpop.xlane.xlu1 %12453 }
0x1d2a   : > { %v12456_v14 = vmul.f32 0.0009765625, %v12454_v48  ;;  %v12457_v22 = vsub.f32 %v22844_v34, %v12455_v62  ;;  %v12458_v19 = vsub.f32 %v22850_v60, %v12455_v62  ;;  %v22911_v41 = vsub.f32 %v22862_v29, %v12455_v62 }
0x1d2b   : > { %v22914_v26 = vsub.f32 %v22871_v23, %v12455_v62  ;;  %v22917_v1 = vsub.f32 %v22881_v33, %v12455_v62  ;;  %v12462_v23 = vsub.f32 %v12418_v49, %v12455_v62  ;;  %v12464_v36 = vsub.f32 %v12420_v6, %v12455_v62 }
0x1d2c   : > { %v12473_v47 = vmul.f32 %v12457_v22, %v12457_v22  ;;  %v12474_v12 = vmul.f32 %v12458_v19, %v12458_v19  ;;  %v12475_v32 = vmul.f32 %v22911_v41, %v22911_v41  ;;  %v22922_v10 = vsub.f32 %v22855_v11, %v12456_v14 }
0x1d2d   : > { %v22925_v34 = vsub.f32 %v22866_v17, %v12456_v14  ;;  %v22928_v60 = vsub.f32 %v22874_v13, %v12456_v14  ;;  %v22930_v29 = vsub.f32 %v12424_v7, %v12456_v14  ;;  %v12476_v33 = vmul.f32 %v22914_v26, %v22914_v26 }
0x1d2e   : > { %v12489_v45 = vadd.f32 %v12474_v12, %v12473_v47  ;;  %v12481_v40 = vmul.f32 %v22922_v10, %v22922_v10  ;;  %v22936_v51 = vsub.f32 %v12425_v20, %v12456_v14  ;;  %v12463_v13 = vsub.f32 %v12419_v3, %v12455_v62 }
0x1d2f   : > { %v12482_v11 = vmul.f32 %v22925_v34, %v22925_v34  ;;  %v12483_v17 = vmul.f32 %v22928_v60, %v22928_v60  ;;  %v12477_v54 = vmul.f32 %v22917_v1, %v22917_v1  ;;  %v22944_v4 = vsub.f32 %v12426_v39, %v12456_v14 }
0x1d30   : > { %v12490_v35 = vadd.f32 %v12489_v45, %v12475_v32  ;;  %v12484_v7 = vmul.f32 %v22930_v29, %v22930_v29  ;;  %v12498_v43 = vsel %vm804_vm0, %v12481_v40, 0.0  ;;  %v12478_v49 = vmul.f32 %v12462_v23, %v12462_v23 }
0x1d31   : > { %v12499_v0 = vsel %vm804_vm0, %v12482_v11, 0.0  ;;  %v22950_v28 = vsub.f32 %v12427_v27, %v12456_v14  ;;  %v12485_v5 = vmul.f32 %v22936_v51, %v22936_v51  ;;  %v12501_v56 = vsel %vm804_vm0, %v12483_v17, 0.0 }
0x1d32   : > { %v12491_v31 = vadd.f32 %v12490_v35, %v12476_v33  ;;  %v12500_v55 = vadd.f32 %v12499_v0, %v12498_v43  ;;  %v12479_v20 = vmul.f32 %v12463_v13, %v12463_v13  ;;  %v22955_v24 = vsub.f32 %v12428_v9, %v12456_v14 }
0x1d33   : > { %v12486_v15 = vmul.f32 %v22944_v4, %v22944_v4  ;;  %v12503_v37 = vsel %vm804_vm0, %v12484_v7, 0.0  ;;  %v12480_v39 = vmul.f32 %v12464_v36, %v12464_v36  ;;  %v12487_v59 = vmul.f32 %v22950_v28, %v22950_v28 }
0x1d34   : > { %v12492_v53 = vadd.f32 %v12491_v31, %v12477_v54  ;;  %v12502_v63 = vadd.f32 %v12501_v56, %v12500_v55  ;;  %v12505_v8 = vsel %vm804_vm0, %v12485_v5, 0.0  ;;  %v12488_v38 = vmul.f32 %v22955_v24, %v22955_v24 }
0x1d35   : > { %v12507_v18 = vsel %vm804_vm0, %v12486_v15, 0.0  ;;  %v12509_v6 = vsel %vm804_vm0, %v12487_v59, 0.0 }
0x1d36   : > { %v12493_v16 = vadd.f32 %v12492_v53, %v12478_v49  ;;  %v12504_v21 = vadd.f32 %v12503_v37, %v12502_v63  ;;  %v12511_v61 = vsel %vm804_vm0, %v12488_v38, 0.0 }
0x1d38   : > { %v12494_v3 = vadd.f32 %v12493_v16, %v12479_v20  ;;  %v12506_v58 = vadd.f32 %v12505_v8, %v12504_v21 }
0x1d3a   : > { %v12495_v42 = vadd.f32 %v12494_v3, %v12480_v39  ;;  %v12508_v50 = vadd.f32 %v12507_v18, %v12506_v58 }
0x1d3c   : > { %12496 = vadd.xlane.f32.xlu1 %v12495_v42  ;;  %v12510_v27 = vadd.f32 %v12509_v6, %v12508_v50 }
0x1d3e   : > { %v12512_v57 = vadd.f32 %v12511_v61, %v12510_v27 }
0x1d40   : > { %12513 = vadd.xlane.f32.xlu0 %v12512_v57 }
0x1dc5   : > { %v12497_v44 = vpop.xlane.xlu1 %12496 }
0x1dc6   : > { %v12515_v9 = vmul.f32 0.0009765625, %v12497_v44 }
0x1dc8   : > { %v12517_v30 = vadd.f32 1e-05, %v12515_v9 }
0x1dca   : > { %17741 = vrsqrt.f32 %v12517_v30 }
0x1dd7   : > { %v17742_v2 = vpop.eup %17741 }
0x1dd8   : > { %v22968_v25 = vmul.f32 %v17742_v2, %v12458_v19  ;;  %v22970_v46 = vmul.f32 %v17742_v2, %v12457_v22  ;;  %v22977_v52 = vmul.f32 %v17742_v2, %v22911_v41  ;;  %v22979_v62 = vmul.f32 %v17742_v2, %v12464_v36  ;;  %v12514_v41 = vpop.xlane.xlu0 %12513 }
0x1dd9   : > { %v22986_v48 = vmul.f32 %v17742_v2, %v22917_v1  ;;  %v22989_v14 = vmul.f32 %v17742_v2, %v22914_v26  ;;  %v22995_v22 = vmul.f32 %v17742_v2, %v12462_v23  ;;  %v23001_v19 = vmul.f32 %v17742_v2, %v12463_v13 }
0x1dda   : > { %12606 = vrot.lane.b32.xlu1 %v22968_v25, %s25465_s4  ;;  %12602 = vrot.lane.b32.xlu0 %v22970_v46, %s25465_s4  ;;  %v12516_v26 = vmul.f32 0.0009765625, %v12514_v41 }
0x1ddb   : > { %25466 = vst [vmem:[#allocation110_spill] sm:$0xff] %v22986_v48  ;;  %25467 = vst [vmem:[#allocation104_spill] sm:$0xff] %v22995_v22 }
0x1ddc   : > { %25469 = vst [vmem:[#allocation111_spill] sm:$0xff] %v23001_v19  ;;  %v12518_v47 = vadd.f32 1e-05, %v12516_v26 }
0x1dde   : > { %12610 = vrot.lane.b32.xlu1 %v22977_v52, %s25465_s4  ;;  %12630 = vrot.lane.b32.xlu0 %v22979_v62, %s25465_s4  ;;  %17743 = vrsqrt.f32 %v12518_v47 }
0x1de2   : > { %12618 = vrot.lane.b32.xlu1 %v22986_v48, %s25465_s4  ;;  %12614 = vrot.lane.b32.xlu0 %v22989_v14, %s25465_s4 }
0x1de6   : > { %12537 = vrot.lane.b32.xlu1 %v22970_v46, %s25468_s0  ;;  %12622 = vrot.lane.b32.xlu0 %v22995_v22, %s25465_s4 }
0x1dea   : > { %12626 = vrot.lane.b32.xlu1 %v23001_v19, %s25465_s4  ;;  %12541 = vrot.lane.b32.xlu0 %v22968_v25, %s25468_s0 }
0x1deb   : > { %v17744_v32 = vpop.eup %17743 }
0x1dec   : > { %v23116_v33 = vmul.f32 %v17744_v32, %v22925_v34  ;;  %v23127_v11 = vmul.f32 %v17744_v32, %v22955_v24  ;;  %v23138_v13 = vmul.f32 %v17744_v32, %v22928_v60  ;;  %v23141_v54 = vmul.f32 %v17744_v32, %v22922_v10 }
0x1ded   : > { %v23152_v43 = vmul.f32 %v17744_v32, %v22936_v51  ;;  %v23155_v0 = vmul.f32 %v17744_v32, %v22930_v29  ;;  %v23166_v36 = vmul.f32 %v17744_v32, %v22944_v4  ;;  %v23177_v49 = vmul.f32 %v17744_v32, %v22950_v28 }
0x1dee   : > { %12545 = vrot.lane.b32.xlu1 %v22977_v52, %s25468_s0  ;;  %12565 = vrot.lane.b32.xlu0 %v22979_v62, %s25468_s0 }
0x1df2   : > { %12553 = vrot.lane.b32.xlu1 %v22986_v48, %s25468_s0  ;;  %12549 = vrot.lane.b32.xlu0 %v22989_v14, %s25468_s0 }
0x1df6   : > { %12561 = vrot.lane.b32.xlu1 %v23001_v19, %s25468_s0  ;;  %12557 = vrot.lane.b32.xlu0 %v22995_v22, %s25468_s0 }
0x1dfa   : > { %13294 = vrot.lane.b32.xlu1 %v22968_v25, %s25300_s6  ;;  %13290 = vrot.lane.b32.xlu0 %v22970_v46, %s25300_s6 }
0x1dfe   : > { %13298 = vrot.lane.b32.xlu1 %v22977_v52, %s25300_s6  ;;  %13318 = vrot.lane.b32.xlu0 %v22979_v62, %s25300_s6 }
0x1e02   : > { %13306 = vrot.lane.b32.xlu1 %v22986_v48, %s25300_s6  ;;  %13302 = vrot.lane.b32.xlu0 %v22989_v14, %s25300_s6 }
0x1e06   : > { %13314 = vrot.lane.b32.xlu1 %v23001_v19, %s25300_s6  ;;  %13310 = vrot.lane.b32.xlu0 %v22995_v22, %s25300_s6 }
0x1e0a   : > { %13679 = vrot.lane.b32.xlu1 %v22968_v25, %s25301_s5  ;;  %13675 = vrot.lane.b32.xlu0 %v22970_v46, %s25301_s5 }
0x1e0e   : > { %13683 = vrot.lane.b32.xlu1 %v22977_v52, %s25301_s5  ;;  %13703 = vrot.lane.b32.xlu0 %v22979_v62, %s25301_s5 }
0x1e12   : > { %13691 = vrot.lane.b32.xlu1 %v22986_v48, %s25301_s5  ;;  %13687 = vrot.lane.b32.xlu0 %v22989_v14, %s25301_s5 }
0x1e16   : > { %14389 = vrot.lane.b32.xlu1 %v22977_v52, %s25302_s2  ;;  %13695 = vrot.lane.b32.xlu0 %v22995_v22, %s25301_s5 }
0x1e1a   : > { %14393 = vrot.lane.b32.xlu1 %v22989_v14, %s25302_s2  ;;  %13699 = vrot.lane.b32.xlu0 %v23001_v19, %s25301_s5 }
0x1e1e   : > { %14401 = vrot.lane.b32.xlu1 %v22995_v22, %s25302_s2  ;;  %14385 = vrot.lane.b32.xlu0 %v22968_v25, %s25302_s2 }
0x1e22   : > { %14409 = vrot.lane.b32.xlu1 %v22979_v62, %s25302_s2  ;;  %14381 = vrot.lane.b32.xlu0 %v22970_v46, %s25302_s2 }
0x1e26   : > { %14774 = vrot.lane.b32.xlu1 %v22977_v52, %s25303_s30  ;;  %14397 = vrot.lane.b32.xlu0 %v22986_v48, %s25302_s2 }
0x1e2a   : > { %14778 = vrot.lane.b32.xlu1 %v22989_v14, %s25303_s30  ;;  %14405 = vrot.lane.b32.xlu0 %v23001_v19, %s25302_s2 }
0x1e2e   : > { %14786 = vrot.lane.b32.xlu1 %v22995_v22, %s25303_s30  ;;  %14770 = vrot.lane.b32.xlu0 %v22968_v25, %s25303_s30 }
0x1e32   : > { %14794 = vrot.lane.b32.xlu1 %v22979_v62, %s25303_s30  ;;  %14766 = vrot.lane.b32.xlu0 %v22970_v46, %s25303_s30 }
0x1e36   : > { %15159 = vrot.lane.b32.xlu1 %v22977_v52, %s25312_s19  ;;  %14782 = vrot.lane.b32.xlu0 %v22986_v48, %s25303_s30 }
0x1e3a   : > { %15163 = vrot.lane.b32.xlu1 %v22989_v14, %s25312_s19  ;;  %14790 = vrot.lane.b32.xlu0 %v23001_v19, %s25303_s30 }
0x1e3e   : > { %15171 = vrot.lane.b32.xlu1 %v22995_v22, %s25312_s19  ;;  %15155 = vrot.lane.b32.xlu0 %v22968_v25, %s25312_s19 }
0x1e42   : > { %15179 = vrot.lane.b32.xlu1 %v22979_v62, %s25312_s19  ;;  %15151 = vrot.lane.b32.xlu0 %v22970_v46, %s25312_s19 }
0x1e46   : > { %15544 = vrot.lane.b32.xlu1 %v22977_v52, %s25320_s26  ;;  %15167 = vrot.lane.b32.xlu0 %v22986_v48, %s25312_s19 }
0x1e4a   : > { %15548 = vrot.lane.b32.xlu1 %v22989_v14, %s25320_s26  ;;  %15175 = vrot.lane.b32.xlu0 %v23001_v19, %s25312_s19 }
0x1e4c   : > { %v23103_v12 = vpop.permute.xlu1 %12606  ;;  %v23105_v1 = vpop.permute.xlu0 %12602 }
0x1e4e   : > { %15556 = vrot.lane.b32.xlu1 %v22995_v22, %s25320_s26  ;;  %15540 = vrot.lane.b32.xlu0 %v22968_v25, %s25320_s26 }
0x1e50   : > { %v23111_v45 = vpop.permute.xlu1 %12610  ;;  %v23113_v23 = vpop.permute.xlu0 %12630 }
0x1e52   : > { %15536 = vrot.lane.b32.xlu0 %v22970_v46, %s25320_s26  ;;  %12608 = vrot.lane.b32.xlu1 %v23116_v33, %s25465_s4 }
0x1e54   : > { %v23122_v35 = vpop.permute.xlu1 %12618  ;;  %v23124_v40 = vpop.permute.xlu0 %12614 }
0x1e56   : > { %15552 = vrot.lane.b32.xlu0 %v22986_v48, %s25320_s26  ;;  %12632 = vrot.lane.b32.xlu1 %v23127_v11, %s25465_s4 }
0x1e58   : > { %v23133_v34 = vpop.permute.xlu1 %12537  ;;  %v23135_v17 = vpop.permute.xlu0 %12622 }
0x1e5a   : > { %12612 = vrot.lane.b32.xlu1 %v23138_v13, %s25465_s4  ;;  %12604 = vrot.lane.b32.xlu0 %v23141_v54, %s25465_s4 }
0x1e5c   : > { %v23147_v31 = vpop.permute.xlu1 %12626  ;;  %v23149_v7 = vpop.permute.xlu0 %12541 }
0x1e5e   : > { %12620 = vrot.lane.b32.xlu1 %v23152_v43, %s25465_s4  ;;  %12616 = vrot.lane.b32.xlu0 %v23155_v0, %s25465_s4 }
0x1e60   : > { %v23161_v10 = vpop.permute.xlu1 %12545  ;;  %v23163_v60 = vpop.permute.xlu0 %12565 }
0x1e62   : > { %12539 = vrot.lane.b32.xlu1 %v23141_v54, %s25468_s0  ;;  %12624 = vrot.lane.b32.xlu0 %v23166_v36, %s25465_s4 }
0x1e64   : > { %v23172_v29 = vpop.permute.xlu1 %12553  ;;  %v23174_v51 = vpop.permute.xlu0 %12549 }
0x1e66   : > { %12628 = vrot.lane.b32.xlu1 %v23177_v49, %s25465_s4  ;;  %12543 = vrot.lane.b32.xlu0 %v23116_v33, %s25468_s0 }
0x1e68   : > { %v23183_v4 = vpop.permute.xlu1 %12561  ;;  %v23185_v53 = vpop.permute.xlu0 %12557 }
0x1e6a   : > { %12547 = vrot.lane.b32.xlu1 %v23138_v13, %s25468_s0  ;;  %12567 = vrot.lane.b32.xlu0 %v23127_v11, %s25468_s0 }
0x1e6c   : > { %v23191_v55 = vpop.permute.xlu1 %13294  ;;  %v23193_v28 = vpop.permute.xlu0 %13290 }
0x1e6e   : > { %12555 = vrot.lane.b32.xlu1 %v23152_v43, %s25468_s0  ;;  %12551 = vrot.lane.b32.xlu0 %v23155_v0, %s25468_s0 }
0x1e70   : > { %v23199_v5 = vpop.permute.xlu1 %13298  ;;  %v23201_v56 = vpop.permute.xlu0 %13318 }
0x1e72   : > { %12563 = vrot.lane.b32.xlu1 %v23177_v49, %s25468_s0  ;;  %12559 = vrot.lane.b32.xlu0 %v23166_v36, %s25468_s0 }
0x1e74   : > { %v23207_v20 = vpop.permute.xlu1 %13306  ;;  %v23209_v16 = vpop.permute.xlu0 %13302 }
0x1e76   : > { %13296 = vrot.lane.b32.xlu1 %v23116_v33, %s25300_s6  ;;  %13292 = vrot.lane.b32.xlu0 %v23141_v54, %s25300_s6 }
0x1e78   : > { %v23215_v63 = vpop.permute.xlu1 %13314  ;;  %v23217_v24 = vpop.permute.xlu0 %13310 }
0x1e7a   : > { %13300 = vrot.lane.b32.xlu1 %v23138_v13, %s25300_s6  ;;  %13320 = vrot.lane.b32.xlu0 %v23127_v11, %s25300_s6 }
0x1e7c   : > { %v23223_v15 = vpop.permute.xlu1 %13679  ;;  %v23225_v37 = vpop.permute.xlu0 %13675 }
0x1e7e   : > { %13308 = vrot.lane.b32.xlu1 %v23152_v43, %s25300_s6  ;;  %13304 = vrot.lane.b32.xlu0 %v23155_v0, %s25300_s6 }
0x1e80   : > { %v23231_v39 = vpop.permute.xlu1 %13683  ;;  %v23233_v3 = vpop.permute.xlu0 %13703 }
0x1e82   : > { %13316 = vrot.lane.b32.xlu1 %v23177_v49, %s25300_s6  ;;  %13312 = vrot.lane.b32.xlu0 %v23166_v36, %s25300_s6 }
0x1e84   : > { %v23239_v21 = vpop.permute.xlu1 %13691  ;;  %v23241_v59 = vpop.permute.xlu0 %13687 }
0x1e86   : > { %13681 = vrot.lane.b32.xlu1 %v23116_v33, %s25301_s5  ;;  %13677 = vrot.lane.b32.xlu0 %v23141_v54, %s25301_s5 }
0x1e88   : > { %v23247_v8 = vpop.permute.xlu1 %14389  ;;  %v23249_v42 = vpop.permute.xlu0 %13695 }
0x1e8a   : > { %13685 = vrot.lane.b32.xlu1 %v23138_v13, %s25301_s5  ;;  %13705 = vrot.lane.b32.xlu0 %v23127_v11, %s25301_s5 }
0x1e8c   : > { %v23255_v58 = vpop.permute.xlu1 %14393  ;;  %v23257_v38 = vpop.permute.xlu0 %13699 }
0x1e8d   : > { %25470 = vst [vmem:[#allocation113_spill] sm:$0xff] %v23255_v58 }
0x1e8e   : > { %13693 = vrot.lane.b32.xlu1 %v23152_v43, %s25301_s5  ;;  %13689 = vrot.lane.b32.xlu0 %v23155_v0, %s25301_s5 }
0x1e90   : > { %v14402_v18 = vpop.permute.xlu1 %14401  ;;  %v23263_v50 = vpop.permute.xlu0 %14385 }
0x1e91   : > { %25471 = vst [vmem:[#allocation114_spill] sm:$0xff] %v23263_v50  ;;  %v25504_v50 = vld [vmem:[#allocation51_spill] sm:$0xff] }
0x1e92   : > { %13701 = vrot.lane.b32.xlu1 %v23177_v49, %s25301_s5  ;;  %13697 = vrot.lane.b32.xlu0 %v23166_v36, %s25301_s5 }
0x1e94   : > { %v14410_v6 = vpop.permute.xlu1 %14409  ;;  %v23269_v27 = vpop.permute.xlu0 %14381 }
0x1e95   : > { %25472 = vst [vmem:[#allocation105_spill] sm:$0xff] %v23269_v27  ;;  %v23274_v57 = vsel %vm6609_vm12, %v14410_v6, %v23269_v27 }
0x1e96   : > { %25474 = vst [vmem:[#allocation9_spill] sm:$0xff] %v23274_v57  ;;  %14387 = vrot.lane.b32.xlu1 %v23116_v33, %s25302_s2  ;;  %14391 = vrot.lane.b32.xlu0 %v23138_v13, %s25302_s2 }
0x1e98   : > { %v14775_v44 = vpop.permute.xlu1 %14774  ;;  %v23280_v9 = vpop.permute.xlu0 %14397 }
0x1e99   : > { %25475 = vst [vmem:[#allocation106_spill] sm:$0xff] %v23280_v9  ;;  %v23285_v30 = vsel %vm6609_vm12, %v23280_v9, %v14402_v18 }
0x1e9a   : > { %25476 = vst [vmem:[#allocation8_spill] sm:$0xff] %v23285_v30  ;;  %14383 = vrot.lane.b32.xlu1 %v23141_v54, %s25302_s2  ;;  %14399 = vrot.lane.b32.xlu0 %v23152_v43, %s25302_s2 }
0x1e9c   : > { %v14779_v2 = vpop.permute.xlu1 %14778  ;;  %v14406_v41 = vpop.permute.xlu0 %14405 }
0x1e9d   : > { %v23293_v26 = vsel %vm7076_vm13, %v14775_v44, %v14779_v2  ;;  %v23297_v47 = vsel %vm6609_vm12, %v14406_v41, %v14410_v6  ;;  %v23301_v32 = vsel %vm6609_vm12, %v14402_v18, %v14406_v41 }
0x1e9e   : > { %25477 = vst [vmem:[#allocation107_spill] sm:$0xff] %v23293_v26  ;;  %25478 = vst [vmem:[#allocation17_spill] sm:$0xff] %v23297_v47  ;;  %14395 = vrot.lane.b32.xlu1 %v23155_v0, %s25302_s2  ;;  %14407 = vrot.lane.b32.xlu0 %v23177_v49, %s25302_s2 }
0x1e9f   : > { %25479 = vst [vmem:[#allocation10_spill] sm:$0xff] %v23301_v32 }
0x1ea0   : > { %v14787_v30 = vpop.permute.xlu1 %14786  ;;  %v14771_v57 = vpop.permute.xlu0 %14770 }
0x1ea1   : > { %v23309_v27 = vsel %vm7076_vm13, %v14771_v57, %v14775_v44 }
0x1ea2   : > { %25480 = vst [vmem:[#allocation108_spill] sm:$0xff] %v23309_v27  ;;  %14403 = vrot.lane.b32.xlu1 %v23166_v36, %s25302_s2  ;;  %14772 = vrot.lane.b32.xlu0 %v23116_v33, %s25303_s30 }
0x1ea4   : > { %v14795_v18 = vpop.permute.xlu1 %14794  ;;  %v14767_v6 = vpop.permute.xlu0 %14766 }
0x1ea5   : > { %v23317_v41 = vsel %vm7076_vm13, %v14767_v6, %v14771_v57  ;;  %v23321_v26 = vsel %vm7076_vm13, %v14795_v18, %v14767_v6 }
0x1ea6   : > { %25481 = vst [vmem:[#allocation112_spill] sm:$0xff] %v23317_v41  ;;  %25482 = vst [vmem:[#allocation12_spill] sm:$0xff] %v23321_v26  ;;  %14411 = vrot.lane.b32.xlu1 %v23127_v11, %s25302_s2  ;;  %14768 = vrot.lane.b32.xlu0 %v23141_v54, %s25303_s30  ;;  %s784_s2 = scalar_lea.vmem %s24708_s25, %s25616_s3 }
0x1ea8   : > { %v15160_v44 = vpop.permute.xlu1 %15159  ;;  %v14783_v27 = vpop.permute.xlu0 %14782 }
0x1ea9   : > { %v23329_v47 = vsel %vm7076_vm13, %v14783_v27, %v14787_v30  ;;  %v23333_v57 = vsel %vm7076_vm13, %v14779_v2, %v14783_v27 }
0x1eaa   : > { %25483 = vst [vmem:[#allocation5_spill] sm:$0xff] %v23329_v47  ;;  %25484 = vst [vmem:[#allocation14_spill] sm:$0xff] %v23333_v57  ;;  %14776 = vrot.lane.b32.xlu1 %v23138_v13, %s25303_s30  ;;  %14784 = vrot.lane.b32.xlu0 %v23152_v43, %s25303_s30 }
0x1eac   : > { %v15164_v6 = vpop.permute.xlu1 %15163  ;;  %v14791_v26 = vpop.permute.xlu0 %14790 }
0x1ead   : > { %v23341_v41 = vsel %vm7543_vm14, %v15160_v44, %v15164_v6  ;;  %v23345_v32 = vsel %vm7076_vm13, %v14791_v26, %v14795_v18  ;;  %v23349_v27 = vsel %vm7076_vm13, %v14787_v30, %v14791_v26 }
0x1eae   : > { %25485 = vst [vmem:[#allocation6_spill] sm:$0xff] %v23341_v41  ;;  %25486 = vst [vmem:[#allocation18_spill] sm:$0xff] %v23345_v32  ;;  %14780 = vrot.lane.b32.xlu1 %v23155_v0, %s25303_s30  ;;  %14792 = vrot.lane.b32.xlu0 %v23177_v49, %s25303_s30 }
0x1eaf   : > { %25487 = vst [vmem:[#allocation4_spill] sm:$0xff] %v23349_v27 }
0x1eb0   : > { %v15172_v2 = vpop.permute.xlu1 %15171  ;;  %v15156_v47 = vpop.permute.xlu0 %15155 }
0x1eb1   : > { %v23357_v57 = vsel %vm7543_vm14, %v15156_v47, %v15160_v44 }
0x1eb2   : > { %25488 = vst [vmem:[#allocation15_spill] sm:$0xff] %v23357_v57  ;;  %14788 = vrot.lane.b32.xlu1 %v23166_v36, %s25303_s30  ;;  %15157 = vrot.lane.b32.xlu0 %v23116_v33, %s25312_s19 }
0x1eb4   : > { %v15180_v30 = vpop.permute.xlu1 %15179  ;;  %v15152_v26 = vpop.permute.xlu0 %15151 }
0x1eb5   : > { %v23365_v18 = vsel %vm7543_vm14, %v15152_v26, %v15156_v47  ;;  %v23369_v41 = vsel %vm7543_vm14, %v15180_v30, %v15152_v26 }
0x1eb6   : > { %25489 = vst [vmem:[#allocation11_spill] sm:$0xff] %v23365_v18  ;;  %25490 = vst [vmem:[#allocation19_spill] sm:$0xff] %v23369_v41  ;;  %14796 = vrot.lane.b32.xlu1 %v23127_v11, %s25303_s30  ;;  %15153 = vrot.lane.b32.xlu0 %v23141_v54, %s25312_s19 }
0x1eb8   : > { %v15545_v44 = vpop.permute.xlu1 %15544  ;;  %v15168_v57 = vpop.permute.xlu0 %15167 }
0x1eb9   : > { %v23377_v32 = vsel %vm7543_vm14, %v15168_v57, %v15172_v2  ;;  %v23381_v47 = vsel %vm7543_vm14, %v15164_v6, %v15168_v57 }
0x1eba   : > { %25491 = vst [vmem:[#allocation7_spill] sm:$0xff] %v23377_v32  ;;  %25492 = vst [vmem:[#allocation16_spill] sm:$0xff] %v23381_v47  ;;  %15161 = vrot.lane.b32.xlu1 %v23138_v13, %s25312_s19  ;;  %15169 = vrot.lane.b32.xlu0 %v23152_v43, %s25312_s19 }
0x1ebc   : > { %v15549_v26 = vpop.permute.xlu1 %15548  ;;  %v15176_v41 = vpop.permute.xlu0 %15175 }
0x1ebd   : > { %v23389_v18 = vsel %vm8010_vm15, %v15545_v44, %v15549_v26  ;;  %v23393_v27 = vsel %vm7543_vm14, %v15176_v41, %v15180_v30  ;;  %v23397_v57 = vsel %vm7543_vm14, %v15172_v2, %v15176_v41 }
0x1ebe   : > { %25493 = vst [vmem:[#allocation13_spill] sm:$0xff] %v23389_v18  ;;  %25494 = vst [vmem:[#allocation102_spill] sm:$0xff] %v23393_v27  ;;  %15165 = vrot.lane.b32.xlu1 %v23155_v0, %s25312_s19  ;;  %15177 = vrot.lane.b32.xlu0 %v23177_v49, %s25312_s19 }
0x1ebf   : > { %25495 = vst [vmem:[#allocation109_spill] sm:$0xff] %v23397_v57  ;;  %v25503_v57 = vld [vmem:[#allocation50_spill] sm:$0xff] }
0x1ec0   : > { %v23403_v6 = vpop.permute.xlu1 %15556  ;;  %v23405_v32 = vpop.permute.xlu0 %15540 }
0x1ec1   : > { %25496 = vst [vmem:[#allocation103_spill] sm:$0xff] %v23403_v6  ;;  %25497 = vst [vmem:[#allocation87_spill] sm:$0xff] %v23405_v32  ;;  %v23410_v18 = vsel %vm8010_vm15, %v23405_v32, %v15545_v44 }
0x1ec2   : > { %25498 = vst [vmem:[#allocation86_spill] sm:$0xff] %v23410_v18  ;;  %15173 = vrot.lane.b32.xlu1 %v23166_v36, %s25312_s19  ;;  %15542 = vrot.lane.b32.xlu0 %v23116_v33, %s25320_s26 }
0x1ec4   : > { %v12609_v41 = vpop.permute.xlu1 %12608  ;;  %v23416_v2 = vpop.permute.xlu0 %15536 }
0x1ec5   : > { %25499 = vst [vmem:[#allocation99_spill] sm:$0xff] %v23416_v2 }
0x1ec6   : > { %15181 = vrot.lane.b32.xlu1 %v23127_v11, %s25312_s19  ;;  %15538 = vrot.lane.b32.xlu0 %v23141_v54, %s25320_s26 }
0x1ec8   : > { %v12633_v30 = vpop.permute.xlu1 %12632  ;;  %v23422_v6 = vpop.permute.xlu0 %15552 }
0x1ec9   : > { %25500 = vst [vmem:[#allocation88_spill] sm:$0xff] %v23422_v6  ;;  %v23427_v44 = vsel %vm8010_vm15, %v15549_v26, %v23422_v6  ;;  %v12646_v26 = vsel %vm4528_vm7, %v23105_v1, %v23103_v12  ;;  %v25502_v6 = vld [vmem:[#allocation49_spill] sm:$0xff] }
0x1eca   : > { %25501 = vst [vmem:[#allocation93_spill] sm:$0xff] %v23427_v44  ;;  %15546 = vrot.lane.b32.xlu1 %v23138_v13, %s25320_s26  ;;  %15554 = vrot.lane.b32.xlu0 %v23152_v43, %s25320_s26  ;;  %v12651_v58 = vmul.f32 %v12646_v26, %v25503_v57 }
0x1ecc   : > { %v12613_v18 = vpop.permute.xlu1 %12612  ;;  %v12605_v2 = vpop.permute.xlu0 %12604 }
0x1ecd   : > { %v12647_v32 = vsel %vm4528_vm7, %v12605_v2, %v12609_v41  ;;  %v12649_v27 = vsel %vm4528_vm7, %v12633_v30, %v12605_v2  ;;  %v12648_v2 = vsel %vm4528_vm7, %v23113_v23, %v23105_v1  ;;  %v12642_v1 = vsel %vm4528_vm7, %v23111_v45, %v23124_v40 }
0x1ece   : > { %v12658_v44 = vmul.f32 %v12649_v27, %v25502_v6  ;;  %v12659_v47 = vmul.f32 %v12647_v32, %v25503_v57  ;;  %15550 = vrot.lane.b32.xlu1 %v23155_v0, %s25320_s26  ;;  %15562 = vrot.lane.b32.xlu0 %v23177_v49, %s25320_s26  ;;  %v12645_v27 = vsel %vm4528_vm7, %v12609_v41, %v12613_v18  ;;  %v25505_v41 = vld [vmem:[#allocation52_spill] sm:$0xff] }
0x1ecf   : > { %v12650_v9 = vmul.f32 %v12648_v2, %v25502_v6  ;;  %v12644_v57 = vsel %vm4528_vm7, %v23103_v12, %v23111_v45  ;;  %v12640_v6 = vsel %vm4528_vm7, %v23124_v40, %v23122_v35  ;;  %v12653_v45 = vmul.f32 %v12642_v1, %v25504_v50  ;;  %v25506_v40 = vld [vmem:[#allocation55_spill] sm:$0xff] }
0x1ed0   : > { %v12621_v48 = vpop.permute.xlu1 %12620  ;;  %17062 = vmatprep.subr.msk.mxu0 %vm804_vm0, %v12659_v47  ;;  %v12617_v22 = vpop.permute.xlu0 %12616  ;;  %v12636_v1 = vsel %vm4528_vm7, %v23135_v17, %v23147_v31 }
0x1ed1   : > { %v12643_v32 = vsel %vm4528_vm7, %v12613_v18, %v12617_v22  ;;  %17063 = vmatpush1.msk.msra.mxu0 %vm804_vm0, %v12658_v44  ;;  %v23471_v18 = vld [vmem:[%s24702_s18 + $0x1] sm:$0x1]  ;;  %v12660_v44 = vmul.f32 %v12645_v27, %v25505_v41  ;;  %v12641_v26 = vsel %vm4528_vm7, %v12617_v22, %v12621_v48  ;;  %v12652_v22 = vmul.f32 %v12644_v57, %v25505_v41 }
0x1ed2   : > { %v12661_v47 = vmul.f32 %v12643_v32, %v25504_v50  ;;  %15558 = vrot.lane.b32.xlu1 %v23166_v36, %s25320_s26  ;;  %15560 = vrot.lane.b32.xlu0 %v23001_v19, %s25320_s26  ;;  %v12638_v19 = vsel %vm4528_vm7, %v23122_v35, %v23135_v17  ;;  %v25507_v35 = vld [vmem:[#allocation53_spill] sm:$0xff]  ;;  %v12634_v50 = vsel %vm4528_vm7, %v23147_v31, %v23113_v23  ;;  %v25509_v17 = vld [vmem:[#allocation54_spill] sm:$0xff] }
0x1ed3   : > { %12725 = vmatprep.subr.mxu0 %v12651_v58  ;;  %v12662_v27 = vmul.f32 %v12641_v26, %v25507_v35  ;;  %v25508_v26 = vmov 0.0  }
0x1ed4   : > { %12726 = vmatpush1.msra.mxu0 %v12650_v9  ;;  %v12540_v2 = vpop.permute.xlu1 %12539  ;;  %v12625_v32 = vpop.permute.xlu0 %12624  ;;  %v12654_v9 = vmul.f32 %v12640_v6, %v25507_v35  ;;  %v12655_v6 = vmul.f32 %v12638_v19, %v25506_v40  ;;  %v12581_v19 = vsel %vm4417_vm9, %v23133_v34, %v23149_v7  ;;  %v12656_v35 = vmul.f32 %v12636_v1, %v25509_v17 }
0x1ed5   : > { %17065 = vmatprep.subr.msk.mxu0 %vm804_vm0, %v12661_v47  ;;  %v12639_v12 = vsel %vm4528_vm7, %v12621_v48, %v12625_v32  ;;  %17064 = vmatmul.mubr.msk.f32.vlgmr.msra.gmra.mxu0 %vm4609_vm8, %v23471_v18  ;;  %v15921_v48 = vld [vmem:[#allocation2] sm:$0x1] }
0x1ed6   : > { %v12663_v58 = vmul.f32 %v12639_v12, %v25506_v40  ;;  %17066 = vmatpush1.msk.msra.mxu0 %vm804_vm0, %v12660_v44  ;;  %15566 = vrot.lane.b32.xlu1 %v23127_v11, %s25320_s26  ;;  %v25510_v12 = vld [vmem:[#allocation56_spill] sm:$0xff] }
0x1ed7   : > { %15564 = vrot.lane.b32.xlu0 %v22979_v62, %s25320_s26  ;;  %12796 = vmatprep.subr.mxu0 %v12653_v45  ;;  %v12657_v40 = vmul.f32 %v12634_v50, %v25510_v12 }
0x1ed8   : > { %12797 = vmatpush1.msra.mxu0 %v12652_v22  ;;  %v12629_v47 = vpop.permute.xlu1 %12628  ;;  %17068 = vmatprep.subr.msk.mxu1 %vm804_vm0, %v12663_v58  ;;  %v12544_v57 = vpop.permute.xlu0 %12543  ;;  %v25511_v22 = vld [vmem:[#allocation57_spill] sm:$0xff] }
0x1ed9   : > { %v12635_v41 = vsel %vm4528_vm7, %v12629_v47, %v12633_v30  ;;  %v12637_v44 = vsel %vm4528_vm7, %v12625_v32, %v12629_v47  ;;  %v12582_v23 = vsel %vm4417_vm9, %v12540_v2, %v12544_v57  ;;  %17069 = vmatpush1.msk.msra.mxu1 %vm804_vm0, %v12662_v27  ;;  %12830 = vmatprep.mubr.f32.mxu0 %v25508_v26  ;;  %vm16419_vm7 = vcmask 122880  }
0x1eda   : > { %v12664_v31 = vmul.f32 %v12637_v44, %v25509_v17  ;;  %v12665_v45 = vmul.f32 %v12635_v41, %v25510_v12  ;;  %v12594_v58 = vmul.f32 %v12582_v23, %v25511_v22  ;;  %15924 = vperm.xlu1 %17683, %v15921_v48   ;;  %12867 = vmatprep.subr.mxu1 %v12655_v6  ;;  %v25512_v48 = vld [vmem:[#allocation58_spill] sm:$0xff]  ;;  %v12601_v44 = vld [vmem:[%s24702_s18] sm:$0x1] }
0x1edb   : > { %12868 = vmatpush1.msra.mxu1 %v12654_v9  ;;  %17067 = vmatmul.mubr.msk.f32.vlgmr.msra.gmra.mxu0 %vm4609_vm8, %v23471_v18  ;;  %v12583_v9 = vsel %vm4417_vm9, %v23163_v60, %v23133_v34  ;;  %v12586_v50 = vmul.f32 %v12581_v19, %v25511_v22  ;;  %v12579_v34 = vsel %vm4417_vm9, %v23149_v7, %v23161_v10 }
0x1edc   : > { %v12548_v30 = vpop.permute.xlu1 %12547  ;;  %17071 = vmatprep.subr.msk.mxu0 %vm804_vm0, %v12665_v45  ;;  %17074 = vmatprep.subr.msk.mxu1 %vm804_vm0, %v12594_v58  ;;  %v12568_v32 = vpop.permute.xlu0 %12567  ;;  %v12577_v7 = vsel %vm4417_vm9, %v23161_v10, %v23174_v51  ;;  %v12575_v10 = vsel %vm4417_vm9, %v23174_v51, %v23172_v29 }
0x1edd   : > { %v12584_v27 = vsel %vm4417_vm9, %v12568_v32, %v12540_v2  ;;  %17072 = vmatpush1.msk.msra.mxu0 %vm804_vm0, %v12664_v31  ;;  %17070 = vmatmul.mubr.msk.f32.vlgmr.msra.gmra.mxu1 %vm4609_vm8, %v23471_v18  ;;  %v12585_v2 = vmul.f32 %v12583_v9, %v25512_v48  ;;  %v12580_v1 = vsel %vm4417_vm9, %v12544_v57, %v12548_v30  ;;  %v25513_v57 = vld [vmem:[#allocation59_spill] sm:$0xff]  ;;  %v25514_v31 = vld [vmem:[#allocation60_spill] sm:$0xff] }
0x1ede   : > { %v12593_v47 = vmul.f32 %v12584_v27, %v25512_v48  ;;  %12938 = vmatprep.subr.mxu0 %v12657_v40  ;;  %12972 = vmatprep.mubr.f32.mxu0 %v25508_v26  ;;  %v12595_v12 = vmul.f32 %v12580_v1, %v25514_v31  ;;  %v12588_v19 = vmul.f32 %v12577_v7, %v25513_v57  ;;  %v25515_v27 = vld [vmem:[#allocation63_spill] sm:$0xff] }
0x1edf   : > { %12939 = vmatpush1.msra.mxu0 %v12656_v35  ;;  %13070 = vmatprep.mubr.f32.mxu1 %v25508_v26  ;;  %v12569_v9 = vsel %vm4417_vm9, %v23183_v4, %v23163_v60 }
0x1ee0   : > { %v12556_v6 = vpop.permute.xlu1 %12555  ;;  %17075 = vmatpush1.msk.msra.mxu1 %vm804_vm0, %v12593_v47  ;;  %v12552_v41 = vpop.permute.xlu0 %12551  ;;  %17073 = vmatmul.mubr.msk.f32.vlgmr.msra.gmra.mxu0 %vm4609_vm8, %v23471_v18  ;;  %v12587_v18 = vmul.f32 %v12579_v34, %v25514_v31  ;;  %v25516_v47 = vld [vmem:[#allocation62_spill] sm:$0xff]  ;;  %v13334_v31 = vsel %vm5318_vm10, %v23193_v28, %v23191_v55 }
0x1ee1   : > { %v12578_v23 = vsel %vm4417_vm9, %v12548_v30, %v12552_v41  ;;  %13036 = vmatprep.subr.mxu1 %v12586_v50  ;;  %13141 = vmatprep.mubr.f32.mxu0 %v25508_v26  ;;  %v12576_v45 = vsel %vm4417_vm9, %v12552_v41, %v12556_v6  ;;  %v12573_v30 = vsel %vm4417_vm9, %v23172_v29, %v23185_v53  ;;  %v25517_v50 = vld [vmem:[#allocation61_spill] sm:$0xff] }
0x1ee2   : > { %v12596_v17 = vmul.f32 %v12578_v23, %v25513_v57  ;;  %13037 = vmatpush1.msra.mxu1 %v12585_v2  ;;  %v25518_v2 = vld [vmem:[#allocation64_spill] sm:$0xff]  ;;  %v12590_v41 = vmul.f32 %v12573_v30, %v25516_v47  ;;  %v25519_v57 = vld [vmem:[#allocation65_spill] sm:$0xff] }
0x1ee3   : > { %17076 = vmatmul.mubr.msk.f32.vlgmr.msra.gmra.mxu1 %vm4609_vm8, %v12601_v44  ;;  %v12597_v1 = vmul.f32 %v12576_v45, %v25518_v2  ;;  %v12589_v7 = vmul.f32 %v12575_v10, %v25518_v2  ;;  %v13336_v10 = vsel %vm5318_vm10, %v23201_v56, %v23193_v28  ;;  %v13332_v28 = vsel %vm5318_vm10, %v23191_v55, %v23199_v5 }
0x1ee4   : > { %v12564_v22 = vpop.permute.xlu1 %12563  ;;  %17077 = vmatprep.subr.msk.mxu0 %vm804_vm0, %v12596_v17  ;;  %v12560_v58 = vpop.permute.xlu0 %12559  ;;  %13212 = vmatprep.mubr.f32.mxu1 %v25508_v26 }
0x1ee5   : > { %v12570_v40 = vsel %vm4417_vm9, %v12564_v22, %v12568_v32  ;;  %v12572_v51 = vsel %vm4417_vm9, %v12560_v58, %v12564_v22  ;;  %v12574_v35 = vsel %vm4417_vm9, %v12556_v6, %v12560_v58  ;;  %17078 = vmatpush1.msk.msra.mxu0 %vm804_vm0, %v12595_v12  ;;  %v12571_v32 = vsel %vm4417_vm9, %v23185_v53, %v23183_v4  ;;  %v25520_v22 = vld [vmem:[#allocation68_spill] sm:$0xff] }
0x1ee6   : > { %v12600_v48 = vmul.f32 %v12570_v40, %v25515_v27  ;;  %v12598_v29 = vmul.f32 %v12574_v35, %v25516_v47  ;;  %v12599_v34 = vmul.f32 %v12572_v51, %v25517_v50  ;;  %13107 = vmatprep.subr.mxu0 %v12588_v19  ;;  %v12592_v4 = vmul.f32 %v12569_v9, %v25515_v27  ;;  %v17086_v35 = vld [vmem:[%s24702_s18 + $0x2] sm:$0x1]  ;;  %v25521_v27 = vld [vmem:[#allocation66_spill] sm:$0xff]  ;;  %v25522_v47 = vld [vmem:[#allocation67_spill] sm:$0xff] }
0x1ee7   : > { %13108 = vmatpush1.msra.mxu0 %v12587_v18  ;;  %v12591_v53 = vmul.f32 %v12571_v32, %v25517_v50  ;;  %v13339_v19 = vmul.f32 %v13334_v31, %v25519_v57  ;;  %v13338_v30 = vmul.f32 %v13336_v10, %v25520_v22  ;;  %v13330_v9 = vsel %vm5318_vm10, %v23199_v5, %v23209_v16 }
0x1ee8   : > { %v13297_v6 = vpop.permute.xlu1 %13296  ;;  %17080 = vmatprep.subr.msk.mxu1 %vm804_vm0, %v12598_v29  ;;  %17083 = vmatprep.subr.msk.mxu0 %vm804_vm0, %v12600_v48  ;;  %v13293_v60 = vpop.permute.xlu0 %13292  ;;  %v13340_v29 = vmul.f32 %v13332_v28, %v25522_v47  ;;  %v13324_v31 = vsel %vm5318_vm10, %v23217_v24, %v23215_v63  ;;  %vm16511_vm9 = vcmask 0  }
0x1ee9   : > { %v13335_v23 = vsel %vm5318_vm10, %v13293_v60, %v13297_v6  ;;  %17079 = vmatmul.mubr.msk.f32.vlgmr.msra.gmra.mxu0 %vm4609_vm8, %v12601_v44  ;;  %17081 = vmatpush1.msk.msra.mxu1 %vm804_vm0, %v12597_v1  ;;  %v13341_v1 = vmul.f32 %v13330_v9, %v25521_v27 }
0x1eea   : > { %v13347_v17 = vmul.f32 %v13335_v23, %v25519_v57  ;;  %17084 = vmatpush1.msk.msra.mxu0 %vm804_vm0, %v12599_v34  ;;  %13178 = vmatprep.subr.mxu1 %v12590_v41  ;;  %v13328_v34 = vsel %vm5318_vm10, %v23209_v16, %v23207_v20  ;;  %v25523_v23 = vld [vmem:[#allocation20_spill] sm:$0xff]  ;;  %v25525_v57 = vld [vmem:[#allocation27_spill] sm:$0xff] }
0x1eeb   : > { %13249 = vmatprep.subr.mxu0 %v12592_v4  ;;  %13179 = vmatpush1.msra.mxu1 %v12589_v7  ;;  %v13322_v7 = vsel %vm5318_vm10, %v23215_v63, %v23201_v56 }
0x1eec   : > { %13250 = vmatpush1.msra.mxu0 %v12591_v53  ;;  %v13301_v18 = vpop.permute.xlu1 %13300  ;;  %17087 = vmatprep.subr.msk.mxu1 %vm804_vm0, %v13347_v17  ;;  %v13321_v12 = vpop.permute.xlu0 %13320  ;;  %v25524_v53 = vld [vmem:[#allocation69_spill] sm:$0xff]  ;;  %v13345_v63 = vmul.f32 %v13322_v7, %v25523_v23 }
0x1eed   : > { %v13337_v45 = vsel %vm5318_vm10, %v13321_v12, %v13293_v60  ;;  %17082 = vmatmul.mubr.msk.f32.vlgmr.msra.gmra.mxu1 %vm4609_vm8, %v12601_v44  ;;  %13283 = vmatprep.mubr.f32.mxu0 %v25508_v26  ;;  %v13333_v40 = vsel %vm5318_vm10, %v13297_v6, %v13301_v18  ;;  %v13326_v6 = vsel %vm5318_vm10, %v23207_v20, %v23217_v24 }
0x1eee   : > { %v13346_v58 = vmul.f32 %v13337_v45, %v25520_v22  ;;  %17085 = vmatmul.mubr.msk.f32.vlgmr.msra.gmra.mxu0 %vm4609_vm8, %v12601_v44  ;;  %13447 = vmatprep.mubr.f32.mxu1 %v25508_v26  ;;  %v13348_v50 = vmul.f32 %v13333_v40, %v25522_v47  ;;  %v13343_v45 = vmul.f32 %v13326_v6, %v25524_v53 }
0x1eef   : > { %13518 = vmatprep.mubr.f32.mxu0 %v25508_v26  ;;  %v13344_v24 = vmul.f32 %v13324_v31, %v25525_v57 }
0x1ef0   : > { %v13309_v51 = vpop.permute.xlu1 %13308  ;;  %17088 = vmatpush1.msk.msra.mxu1 %vm804_vm0, %v13346_v58  ;;  %v13305_v44 = vpop.permute.xlu0 %13304 }
0x1ef1   : > { %v13331_v55 = vsel %vm5318_vm10, %v13301_v18, %v13305_v44  ;;  %13413 = vmatprep.subr.mxu1 %v13339_v19  ;;  %v13329_v5 = vsel %vm5318_vm10, %v13305_v44, %v13309_v51  ;;  %v25526_v18 = vld [vmem:[#allocation25_spill] sm:$0xff]  ;;  %v13721_v44 = vsel %vm5785_vm11, %v23233_v3, %v23225_v37 }
0x1ef2   : > { %v13349_v48 = vmul.f32 %v13331_v55, %v25521_v27  ;;  %13414 = vmatpush1.msra.mxu1 %v13338_v30  ;;  %v13342_v22 = vmul.f32 %v13328_v34, %v25526_v18  ;;  %v25527_v19 = vld [vmem:[#allocation29_spill] sm:$0xff]  ;;  %v13719_v30 = vsel %vm5785_vm11, %v23225_v37, %v23223_v15  ;;  %v25528_v55 = vld [vmem:[#allocation31_spill] sm:$0xff]  ;;  %v13717_v37 = vsel %vm5785_vm11, %v23223_v15, %v23231_v39  ;;  %v17099_v34 = vld [vmem:[%s24702_s18 + $0x3] sm:$0x1] }
0x1ef3   : > { %17089 = vmatmul.mubr.msk.f32.vlgmr.msra.gmra.mxu1 %vm4609_vm8, %v17086_v35  ;;  %v13723_v47 = vmul.f32 %v13721_v44, %v25528_v55  ;;  %v25538_v44 = vld [vmem:[#allocation113_spill] sm:$0xff] }
0x1ef4   : > { %v13317_v32 = vpop.permute.xlu1 %13316  ;;  %17090 = vmatprep.subr.msk.mxu0 %vm804_vm0, %v13349_v48  ;;  %v13313_v2 = vpop.permute.xlu0 %13312  ;;  %13589 = vmatprep.mubr.f32.mxu1 %v25508_v26  ;;  %v13724_v48 = vmul.f32 %v13719_v30, %v25527_v19 }
0x1ef5   : > { %v13323_v60 = vsel %vm5318_vm10, %v13317_v32, %v13321_v12  ;;  %v13325_v16 = vsel %vm5318_vm10, %v13313_v2, %v13317_v32  ;;  %v13327_v41 = vsel %vm5318_vm10, %v13309_v51, %v13313_v2  ;;  %17091 = vmatpush1.msk.msra.mxu0 %vm804_vm0, %v13348_v50  ;;  %v13350_v12 = vmul.f32 %v13329_v5, %v25526_v18  ;;  %v25529_v32 = vld [vmem:[#allocation21_spill] sm:$0xff]  ;;  %v25532_v18 = vld [vmem:[#allocation22_spill] sm:$0xff] }
0x1ef6   : > { %v13353_v4 = vmul.f32 %v13323_v60, %v25523_v23  ;;  %v13351_v20 = vmul.f32 %v13327_v41, %v25524_v53  ;;  %v13352_v17 = vmul.f32 %v13325_v16, %v25525_v57  ;;  %13484 = vmatprep.subr.mxu0 %v13341_v1  ;;  %v13715_v5 = vsel %vm5785_vm11, %v23231_v39, %v23241_v59  ;;  %v25530_v1 = vld [vmem:[#allocation33_spill] sm:$0xff] }
0x1ef7   : > { %13485 = vmatpush1.msra.mxu0 %v13340_v29  ;;  %v13725_v6 = vmul.f32 %v13717_v37, %v25530_v1  ;;  %v13713_v16 = vsel %vm5785_vm11, %v23241_v59, %v23239_v21  ;;  %v13726_v23 = vmul.f32 %v13715_v5, %v25529_v32  ;;  %v13707_v57 = vsel %vm5785_vm11, %v23257_v38, %v23233_v3 }
0x1ef8   : > { %v13682_v10 = vpop.permute.xlu1 %13681  ;;  %17093 = vmatprep.subr.msk.mxu1 %vm804_vm0, %v13351_v20  ;;  %17096 = vmatprep.subr.msk.mxu0 %vm804_vm0, %v13353_v4  ;;  %v13678_v56 = vpop.permute.xlu0 %13677  ;;  %v13711_v4 = vsel %vm5785_vm11, %v23239_v21, %v23249_v42 }
0x1ef9   : > { %v13720_v58 = vsel %vm5785_vm11, %v13678_v56, %v13682_v10  ;;  %17092 = vmatmul.mubr.msk.f32.vlgmr.msra.gmra.mxu0 %vm4609_vm8, %v17086_v35  ;;  %17094 = vmatpush1.msk.msra.mxu1 %vm804_vm0, %v13350_v12  ;;  %v25533_v12 = vld [vmem:[#allocation36_spill] sm:$0xff] }
0x1efa   : > { %v13732_v28 = vmul.f32 %v13720_v58, %v25527_v19  ;;  %17097 = vmatpush1.msk.msra.mxu0 %vm804_vm0, %v13352_v17  ;;  %13555 = vmatprep.subr.mxu1 %v13343_v45  ;;  %v25531_v17 = vld [vmem:[#allocation23_spill] sm:$0xff] }
0x1efb   : > { %13626 = vmatprep.subr.mxu0 %v13345_v63  ;;  %13556 = vmatpush1.msra.mxu1 %v13342_v22  ;;  %v25534_v45 = vld [vmem:[#allocation35_spill] sm:$0xff]  ;;  %v13728_v63 = vmul.f32 %v13711_v4, %v25532_v18  ;;  %v13730_v19 = vmul.f32 %v13707_v57, %v25531_v17  ;;  %v25547_v4 = vld [vmem:[#allocation41_spill] sm:$0xff]  ;;  %v17125_v57 = vld [vmem:[%s24702_s18 + $0x5] sm:$0x1] }
0x1efc   : > { %13627 = vmatpush1.msra.mxu0 %v13344_v24  ;;  %v13686_v40 = vpop.permute.xlu1 %13685  ;;  %17100 = vmatprep.subr.msk.mxu1 %vm804_vm0, %v13732_v28  ;;  %v13706_v51 = vpop.permute.xlu0 %13705  ;;  %v13727_v24 = vmul.f32 %v13713_v16, %v25534_v45 }
0x1efd   : > { %v13722_v9 = vsel %vm5785_vm11, %v13706_v51, %v13678_v56  ;;  %17095 = vmatmul.mubr.msk.f32.vlgmr.msra.gmra.mxu1 %vm4609_vm8, %v17086_v35  ;;  %13660 = vmatprep.mubr.f32.mxu0 %v25508_v26  ;;  %v13718_v29 = vsel %vm5785_vm11, %v13682_v10, %v13686_v40  ;;  %v13709_v56 = vsel %vm5785_vm11, %v23249_v42, %v23257_v38 }
0x1efe   : > { %v13731_v27 = vmul.f32 %v13722_v9, %v25528_v55  ;;  %17098 = vmatmul.mubr.msk.f32.vlgmr.msra.gmra.mxu0 %vm4609_vm8, %v17086_v35  ;;  %13832 = vmatprep.mubr.f32.mxu1 %v25508_v26  ;;  %v13733_v60 = vmul.f32 %v13718_v29, %v25530_v1  ;;  %v13729_v42 = vmul.f32 %v13709_v56, %v25533_v12  ;;  %v25543_v29 = vld [vmem:[#allocation111_spill] sm:$0xff] }
0x1eff   : > { %13903 = vmatprep.mubr.f32.mxu0 %v25508_v26 }
0x1f00   : > { %v13694_v50 = vpop.permute.xlu1 %13693  ;;  %17101 = vmatpush1.msk.msra.mxu1 %vm804_vm0, %v13731_v27  ;;  %v13690_v35 = vpop.permute.xlu0 %13689  ;;  %v25539_v27 = vld [vmem:[#allocation104_spill] sm:$0xff] }
0x1f01   : > { %v13716_v15 = vsel %vm5785_vm11, %v13686_v40, %v13690_v35  ;;  %13798 = vmatprep.subr.mxu1 %v13724_v48  ;;  %v13714_v39 = vsel %vm5785_vm11, %v13690_v35, %v13694_v50  ;;  %v14421_v35 = vsel %vm6609_vm12, %v23247_v8, %v25538_v44 }
0x1f02   : > { %v13734_v2 = vmul.f32 %v13716_v15, %v25529_v32  ;;  %13799 = vmatpush1.msra.mxu1 %v13723_v47  ;;  %v13735_v22 = vmul.f32 %v13714_v39, %v25534_v45  ;;  %v25542_v47 = vld [vmem:[#allocation110_spill] sm:$0xff]  ;;  %v25551_v45 = vld [vmem:[#allocation9_spill] sm:$0xff] }
0x1f03   : > { %17102 = vmatmul.mubr.msk.f32.vlgmr.msra.gmra.mxu1 %vm4609_vm8, %v17099_v34  ;;  %v25545_v32 = vld [vmem:[#allocation38_spill] sm:$0xff] }
0x1f04   : > { %v13702_v41 = vpop.permute.xlu1 %13701  ;;  %17103 = vmatprep.subr.msk.mxu0 %vm804_vm0, %v13734_v2  ;;  %v13698_v7 = vpop.permute.xlu0 %13697  ;;  %13974 = vmatprep.mubr.f32.mxu1 %v25508_v26 }
0x1f05   : > { %v13708_v53 = vsel %vm5785_vm11, %v13702_v41, %v13706_v51  ;;  %v13710_v59 = vsel %vm5785_vm11, %v13698_v7, %v13702_v41  ;;  %v13712_v20 = vsel %vm5785_vm11, %v13694_v50, %v13698_v7  ;;  %17104 = vmatpush1.msk.msra.mxu0 %vm804_vm0, %v13733_v60  ;;  %v25537_v51 = vld [vmem:[#allocation106_spill] sm:$0xff] }
0x1f06   : > { %v13738_v31 = vmul.f32 %v13708_v53, %v25531_v17  ;;  %v13736_v21 = vmul.f32 %v13712_v20, %v25532_v18  ;;  %v13737_v10 = vmul.f32 %v13710_v59, %v25533_v12  ;;  %13869 = vmatprep.subr.mxu0 %v13726_v23  ;;  %v14419_v9 = vsel %vm6609_vm12, %v25538_v44, %v25537_v51  ;;  %v25546_v60 = vld [vmem:[#allocation26_spill] sm:$0xff] }
0x1f07   : > { %13870 = vmatpush1.msra.mxu0 %v13725_v6  ;;  %v25548_v59 = vld [vmem:[#allocation42_spill] sm:$0xff] }
0x1f08   : > { %v14388_v58 = vpop.permute.xlu1 %14387  ;;  %17106 = vmatprep.subr.msk.mxu1 %vm804_vm0, %v13736_v21  ;;  %17109 = vmatprep.subr.msk.mxu0 %vm804_vm0, %v13738_v31  ;;  %v14392_v3 = vpop.permute.xlu0 %14391  ;;  %v25549_v21 = vld [vmem:[#allocation28_spill] sm:$0xff] }
0x1f09   : > { %17105 = vmatmul.mubr.msk.f32.vlgmr.msra.gmra.mxu0 %vm4609_vm8, %v17099_v34  ;;  %17107 = vmatpush1.msk.msra.mxu1 %vm804_vm0, %v13735_v22  ;;  %v14436_v22 = vmul.f32 %v25551_v45, %v25548_v59  ;;  %v25572_v45 = vld [vmem:[#allocation15_spill] sm:$0xff] }
0x1f0a   : > { %17110 = vmatpush1.msk.msra.mxu0 %vm804_vm0, %v13737_v10  ;;  %13940 = vmatprep.subr.mxu1 %v13728_v63  ;;  %v25550_v10 = vld [vmem:[#allocation10_spill] sm:$0xff]  ;;  %v25553_v63 = vld [vmem:[#allocation43_spill] sm:$0xff] }
0x1f0b   : > { %14011 = vmatprep.subr.mxu0 %v13730_v19  ;;  %13941 = vmatpush1.msra.mxu1 %v13727_v24  ;;  %v14434_v56 = vmul.f32 %v25550_v10, %v25546_v60 }
0x1f0c   : > { %14012 = vmatpush1.msra.mxu0 %v13729_v42  ;;  %v14384_v38 = vpop.permute.xlu1 %14383  ;;  %14045 = vmatprep.mubr.f32.mxu0 %v25508_v26  ;;  %v14400_v28 = vpop.permute.xlu0 %14399 }
0x1f0d   : > { %17113 = vmatprep.subr.msk.mxu1 %vm804_vm0, %v23116_v33  ;;  %17116 = vmatprep.subr.msk.mxu0 %vm804_vm0, %v23155_v0  ;;  %v17112_v33 = vld [vmem:[%s24702_s18 + $0x4] sm:$0x1]  ;;  %v14426_v55 = vsel %vm6609_vm12, %v14384_v38, %v14388_v58 }
0x1f0e   : > { %17108 = vmatmul.mubr.msk.f32.vlgmr.msra.gmra.mxu1 %vm4609_vm8, %v17099_v34  ;;  %17111 = vmatmul.mubr.msk.f32.vlgmr.msra.gmra.mxu0 %vm4609_vm8, %v17099_v34  ;;  %v25544_v34 = vld [vmem:[#allocation105_spill] sm:$0xff]  ;;  %v14437_v2 = vmul.f32 %v14426_v55, %v25545_v32  ;;  %v25559_v55 = vld [vmem:[#allocation112_spill] sm:$0xff] }
0x1f0f   : > { %17114 = vmatpush1.msk.msra.mxu1 %vm804_vm0, %v23141_v54  ;;  %17117 = vmatpush1.msk.msra.mxu0 %vm804_vm0, %v23138_v13  ;;  %v25535_v13 = vld [vmem:[#allocation24_spill] sm:$0xff] }
0x1f10   : > { %14119 = vmatprep.subr.mxu1 %v22968_v25  ;;  %14190 = vmatprep.subr.mxu0 %v22989_v14  ;;  %v14396_v30 = vpop.permute.xlu1 %14395  ;;  %v14408_v40 = vpop.permute.xlu0 %14407  ;;  %v14424_v25 = vsel %vm6609_vm12, %v14388_v58, %v14392_v3  ;;  %v14432_v6 = vmul.f32 %v14419_v9, %v25535_v13  ;;  %v25552_v58 = vld [vmem:[#allocation8_spill] sm:$0xff] }
0x1f11   : > { %14120 = vmatpush1.msra.mxu1 %v22970_v46  ;;  %14191 = vmatpush1.msra.mxu0 %v22977_v52  ;;  %v14420_v54 = vsel %vm6609_vm12, %v14396_v30, %v14400_v28  ;;  %v14422_v46 = vsel %vm6609_vm12, %v14392_v3, %v14396_v30  ;;  %v14433_v3 = vmul.f32 %v25552_v58, %v25547_v4 }
0x1f12   : > { %14153 = vmatprep.mubr.f32.mxu1 %v25508_v26  ;;  %14224 = vmatprep.mubr.f32.mxu0 %v25508_v26  ;;  %v14440_v0 = vmul.f32 %v14420_v54, %v25535_v13  ;;  %v25555_v54 = vld [vmem:[#allocation30_spill] sm:$0xff] }
0x1f13   : > { %17119 = vmatprep.subr.msk.mxu1 %vm804_vm0, %v23166_v36  ;;  %17122 = vmatprep.subr.msk.mxu0 %vm804_vm0, %v23127_v11  ;;  %v25536_v11 = vld [vmem:[#allocation114_spill] sm:$0xff] }
0x1f14   : > { %17115 = vmatmul.mubr.msk.f32.vlgmr.msra.gmra.mxu1 %vm4609_vm8, %v17112_v33  ;;  %17118 = vmatmul.mubr.msk.f32.vlgmr.msra.gmra.mxu0 %vm4609_vm8, %v17112_v33  ;;  %v14404_v52 = vpop.permute.xlu1 %14403  ;;  %v14773_v14 = vpop.permute.xlu0 %14772  ;;  %v14423_v36 = vsel %vm6609_vm12, %v25536_v11, %v23247_v8 }
0x1f15   : > { %17120 = vmatpush1.msk.msra.mxu1 %vm804_vm0, %v23152_v43  ;;  %17123 = vmatpush1.msk.msra.mxu0 %vm804_vm0, %v23177_v49  ;;  %v25540_v43 = vld [vmem:[#allocation37_spill] sm:$0xff]  ;;  %v25541_v49 = vld [vmem:[#allocation39_spill] sm:$0xff]  ;;  %v14416_v50 = vsel %vm6609_vm12, %v14404_v52, %v14408_v40  ;;  %v14418_v1 = vsel %vm6609_vm12, %v14400_v28, %v14404_v52 }
0x1f16   : > { %14261 = vmatprep.subr.mxu1 %v25539_v27  ;;  %14332 = vmatprep.subr.mxu0 %v22979_v62  ;;  %v14438_v48 = vmul.f32 %v14424_v25, %v25540_v43  ;;  %v14439_v37 = vmul.f32 %v14422_v46, %v25541_v49  ;;  %v14425_v62 = vsel %vm6609_vm12, %v25544_v34, %v25536_v11  ;;  %v25556_v46 = vld [vmem:[#allocation44_spill] sm:$0xff] }
0x1f17   : > { %14262 = vmatpush1.msra.mxu1 %v25542_v47  ;;  %14333 = vmatpush1.msra.mxu0 %v25543_v29  ;;  %v14442_v16 = vmul.f32 %v14416_v50, %v25546_v60  ;;  %v14430_v39 = vmul.f32 %v14423_v36, %v25540_v43  ;;  %v14431_v41 = vmul.f32 %v14421_v35, %v25541_v49  ;;  %v25558_v36 = vld [vmem:[#allocation108_spill] sm:$0xff]  ;;  %v25561_v49 = vld [vmem:[#allocation14_spill] sm:$0xff]  ;;  %v25562_v47 = vld [vmem:[#allocation107_spill] sm:$0xff] }
0x1f18   : > { %14295 = vmatprep.mubr.f32.mxu1 %v25508_v26  ;;  %14366 = vmatprep.mubr.f32.mxu0 %v25508_v26  ;;  %v14412_v5 = vpop.permute.xlu1 %14411  ;;  %v23843_v15 = vpop.permute.xlu0 %14768  ;;  %v14429_v7 = vmul.f32 %v14425_v62, %v25545_v32  ;;  %v14441_v53 = vmul.f32 %v14418_v1, %v25547_v4  ;;  %v14815_v51 = vmul.f32 %v25558_v36, %v25553_v63  ;;  %v25560_v43 = vld [vmem:[#allocation32_spill] sm:$0xff]  ;;  %v25563_v50 = vld [vmem:[#allocation34_spill] sm:$0xff]  ;;  %v25579_v36 = vld [vmem:[#allocation73_spill] sm:$0xff] }
0x1f19   : > { %17126 = vmatprep.subr.msk.mxu1 %vm804_vm0, %v14438_v48  ;;  %17129 = vmatprep.subr.msk.mxu0 %vm804_vm0, %v14440_v0  ;;  %v14428_v8 = vsel %vm6609_vm12, %v14412_v5, %v14384_v38  ;;  %v14414_v23 = vsel %vm6609_vm12, %v14408_v40, %v14412_v5  ;;  %v14811_v38 = vsel %vm7076_vm13, %v23843_v15, %v14773_v14  ;;  %v25554_v40 = vld [vmem:[#allocation17_spill] sm:$0xff]  ;;  %v17138_v5 = vld [vmem:[%s24702_s18 + $0x6] sm:$0x1]  ;;  %v25564_v1 = vld [vmem:[#allocation70_spill] sm:$0xff] }
0x1f1a   : > { %17121 = vmatmul.mubr.msk.f32.vlgmr.msra.gmra.mxu1 %vm4609_vm8, %v17112_v33  ;;  %17124 = vmatmul.mubr.msk.f32.vlgmr.msra.gmra.mxu0 %vm4609_vm8, %v17112_v33  ;;  %v14444_v20 = vmul.f32 %v14428_v8, %v25548_v59  ;;  %v14443_v12 = vmul.f32 %v14414_v23, %v25549_v21  ;;  %v14435_v33 = vmul.f32 %v25554_v40, %v25549_v21  ;;  %v25568_v4 = vld [vmem:[#allocation12_spill] sm:$0xff] }
0x1f1b   : > { %17127 = vmatpush1.msk.msra.mxu1 %vm804_vm0, %v14437_v2  ;;  %17130 = vmatpush1.msk.msra.mxu0 %vm804_vm0, %v14439_v37  ;;  %v14822_v52 = vmul.f32 %v14811_v38, %v25556_v46  ;;  %v14814_v27 = vmul.f32 %v25559_v55, %v25556_v46  ;;  %v14817_v37 = vmul.f32 %v25561_v49, %v25555_v54  ;;  %v25571_v21 = vld [vmem:[#allocation72_spill] sm:$0xff]  ;;  %v25575_v38 = vld [vmem:[#allocation71_spill] sm:$0xff]  ;;  %v25577_v46 = vld [vmem:[#allocation6_spill] sm:$0xff] }
0x1f1c   : > { %14504 = vmatprep.subr.mxu1 %v14430_v39  ;;  %14575 = vmatprep.subr.mxu0 %v14432_v6  ;;  %v14777_v17 = vpop.permute.xlu1 %14776  ;;  %v14785_v31 = vpop.permute.xlu0 %14784  ;;  %v25565_v6 = vld [vmem:[#allocation48_spill] sm:$0xff] }
0x1f1d   : > { %14505 = vmatpush1.msra.mxu1 %v14429_v7  ;;  %14576 = vmatpush1.msra.mxu0 %v14431_v41  ;;  %v14809_v18 = vsel %vm7076_vm13, %v14773_v14, %v14777_v17  ;;  %v25557_v14 = vld [vmem:[#allocation45_spill] sm:$0xff]  ;;  %v25576_v40 = vld [vmem:[#allocation16_spill] sm:$0xff] }
0x1f1e   : > { %14538 = vmatprep.mubr.f32.mxu1 %v25508_v26  ;;  %17132 = vmatprep.subr.msk.mxu1 %vm804_vm0, %v14442_v16  ;;  %v14823_v24 = vmul.f32 %v14809_v18, %v25553_v63  ;;  %v14816_v29 = vmul.f32 %v25562_v47, %v25557_v14  ;;  %v25566_v16 = vld [vmem:[#allocation4_spill] sm:$0xff]  ;;  %v25567_v41 = vld [vmem:[#allocation5_spill] sm:$0xff]  ;;  %v25573_v63 = vld [vmem:[#allocation11_spill] sm:$0xff] }
0x1f1f   : > { %17128 = vmatmul.mubr.msk.f32.vlgmr.msra.gmra.mxu1 %vm4609_vm8, %v17125_v57  ;;  %14609 = vmatprep.mubr.f32.mxu0 %v25508_v26  ;;  %v14819_v39 = vmul.f32 %v25566_v16, %v25560_v43  ;;  %v14818_v7 = vmul.f32 %v25567_v41, %v25563_v50  ;;  %v25582_v47 = vld [vmem:[#allocation77_spill] sm:$0xff]  ;;  %v25587_v16 = vld [vmem:[#allocation99_spill] sm:$0xff]  ;;  %v25588_v41 = vld [vmem:[#allocation78_spill] sm:$0xff] }
0x1f20   : > { %17133 = vmatpush1.msk.msra.mxu1 %vm804_vm0, %v14441_v53  ;;  %17135 = vmatprep.subr.msk.mxu0 %vm804_vm0, %v14444_v20  ;;  %v14781_v19 = vpop.permute.xlu1 %14780  ;;  %v14793_v42 = vpop.permute.xlu0 %14792  ;;  %v14821_v53 = vmul.f32 %v25568_v4, %v25565_v6  ;;  %v25590_v4 = vld [vmem:[#allocation86_spill] sm:$0xff] }
0x1f21   : > { %14646 = vmatprep.subr.mxu1 %v14434_v56  ;;  %17131 = vmatmul.mubr.msk.f32.vlgmr.msra.gmra.mxu0 %vm4609_vm8, %v17125_v57  ;;  %v14805_v28 = vsel %vm7076_vm13, %v14781_v19, %v14785_v31  ;;  %v14807_v30 = vsel %vm7076_vm13, %v14777_v17, %v14781_v19  ;;  %v25574_v19 = vld [vmem:[#allocation74_spill] sm:$0xff] }
0x1f22   : > { %14647 = vmatpush1.msra.mxu1 %v14433_v3  ;;  %17136 = vmatpush1.msk.msra.mxu0 %vm804_vm0, %v14443_v12  ;;  %v14825_v25 = vmul.f32 %v14805_v28, %v25555_v54  ;;  %v14824_v13 = vmul.f32 %v14807_v30, %v25557_v14  ;;  %v17151_v30 = vld [vmem:[%s24702_s18 + $0x7] sm:$0x1] }
0x1f23   : > { %14717 = vmatprep.subr.mxu0 %v14436_v22  ;;  %14680 = vmatprep.mubr.f32.mxu1 %v25508_v26 }
0x1f24   : > { %14718 = vmatpush1.msra.mxu0 %v14435_v33  ;;  %17139 = vmatprep.subr.msk.mxu1 %vm804_vm0, %v14823_v24  ;;  %v14789_v0 = vpop.permute.xlu1 %14788  ;;  %v15158_v11 = vpop.permute.xlu0 %15157  ;;  %v15199_v24 = vmul.f32 %v25573_v63, %v25571_v21  ;;  %v15202_v33 = vmul.f32 %v25576_v40, %v25575_v38 }
0x1f25   : > { %17134 = vmatmul.mubr.msk.f32.vlgmr.msra.gmra.mxu1 %vm4609_vm8, %v17125_v57  ;;  %v14801_v44 = vsel %vm7076_vm13, %v14789_v0, %v14793_v42  ;;  %v14803_v9 = vsel %vm7076_vm13, %v14785_v31, %v14789_v0  ;;  %14751 = vmatprep.mubr.f32.mxu0 %v25508_v26  ;;  %v25570_v31 = vld [vmem:[#allocation40_spill] sm:$0xff] }
0x1f26   : > { %17140 = vmatpush1.msk.msra.mxu1 %vm804_vm0, %v14822_v52  ;;  %v14827_v48 = vmul.f32 %v14801_v44, %v25560_v43  ;;  %17142 = vmatprep.subr.msk.mxu0 %vm804_vm0, %v14825_v25  ;;  %v14826_v35 = vmul.f32 %v14803_v9, %v25563_v50  ;;  %v15200_v22 = vmul.f32 %v25572_v45, %v25570_v31  ;;  %v25578_v0 = vld [vmem:[#allocation76_spill] sm:$0xff]  ;;  %v25580_v44 = vld [vmem:[#allocation109_spill] sm:$0xff]  ;;  %v25581_v43 = vld [vmem:[#allocation7_spill] sm:$0xff] }
0x1f27   : > { %14889 = vmatprep.subr.mxu1 %v14815_v51  ;;  %17137 = vmatmul.mubr.msk.f32.vlgmr.msra.gmra.mxu0 %vm4609_vm8, %v17125_v57  ;;  %v25569_v57 = vld [vmem:[#allocation18_spill] sm:$0xff]  ;;  %v15201_v52 = vmul.f32 %v25577_v46, %v25574_v19  ;;  %v15204_v9 = vmul.f32 %v25580_v44, %v25579_v36  ;;  %v25583_v50 = vld [vmem:[#allocation75_spill] sm:$0xff]  ;;  %v25593_v45 = vld [vmem:[#allocation13_spill] sm:$0xff] }
0x1f28   : > { %14890 = vmatpush1.msra.mxu1 %v14814_v27  ;;  %17143 = vmatpush1.msk.msra.mxu0 %vm804_vm0, %v14824_v13  ;;  %v14797_v34 = vpop.permute.xlu1 %14796  ;;  %v23920_v62 = vpop.permute.xlu0 %15153  ;;  %v14820_v17 = vmul.f32 %v25569_v57, %v25564_v1 }
0x1f29   : > { %14960 = vmatprep.subr.mxu0 %v14817_v37  ;;  %v14799_v32 = vsel %vm7076_vm13, %v14793_v42, %v14797_v34  ;;  %v14813_v2 = vsel %vm7076_vm13, %v14797_v34, %v23843_v15  ;;  %14923 = vmatprep.mubr.f32.mxu1 %v25508_v26  ;;  %v15196_v59 = vsel %vm7543_vm14, %v23920_v62, %v15158_v11  ;;  %v25584_v34 = vld [vmem:[#allocation19_spill] sm:$0xff] }
0x1f2a   : > { %14961 = vmatpush1.msra.mxu0 %v14816_v29  ;;  %v14828_v8 = vmul.f32 %v14799_v32, %v25564_v1  ;;  %v14829_v60 = vmul.f32 %v14813_v2, %v25565_v6  ;;  %17145 = vmatprep.subr.msk.mxu1 %vm804_vm0, %v14827_v48  ;;  %v15207_v12 = vmul.f32 %v15196_v59, %v25571_v21  ;;  %v25585_v1 = vld [vmem:[#allocation102_spill] sm:$0xff]  ;;  %v25591_v21 = vld [vmem:[#allocation81_spill] sm:$0xff] }
0x1f2b   : > { %17141 = vmatmul.mubr.msk.f32.vlgmr.msra.gmra.mxu1 %vm4609_vm8, %v17138_v5  ;;  %14994 = vmatprep.mubr.f32.mxu0 %v25508_v26  ;;  %v15203_v48 = vmul.f32 %v25581_v43, %v25578_v0 }
0x1f2c   : > { %17146 = vmatpush1.msk.msra.mxu1 %vm804_vm0, %v14826_v35  ;;  %v15162_v15 = vpop.permute.xlu1 %15161  ;;  %17148 = vmatprep.subr.msk.mxu0 %vm804_vm0, %v14829_v60  ;;  %v15170_v23 = vpop.permute.xlu0 %15169  ;;  %v25586_v60 = vld [vmem:[#allocation87_spill] sm:$0xff] }
0x1f2d   : > { %15031 = vmatprep.subr.mxu1 %v14819_v39  ;;  %v15194_v20 = vsel %vm7543_vm14, %v15158_v11, %v15162_v15  ;;  %17144 = vmatmul.mubr.msk.f32.vlgmr.msra.gmra.mxu0 %vm4609_vm8, %v17138_v5  ;;  %v15580_v39 = vsel %vm8010_vm15, %v25587_v16, %v25586_v60 }
0x1f2e   : > { %15032 = vmatpush1.msra.mxu1 %v14818_v7  ;;  %v15208_v18 = vmul.f32 %v15194_v20, %v25570_v31  ;;  %17149 = vmatpush1.msk.msra.mxu0 %vm804_vm0, %v14828_v8  ;;  %v15205_v8 = vmul.f32 %v25585_v1, %v25582_v47 }
0x1f2f   : > { %15102 = vmatprep.subr.mxu0 %v14821_v53  ;;  %15065 = vmatprep.mubr.f32.mxu1 %v25508_v26  ;;  %v15585_v53 = vmul.f32 %v25590_v4, %v25588_v41 }
0x1f30   : > { %15103 = vmatpush1.msra.mxu0 %v14820_v17  ;;  %v15166_v10 = vpop.permute.xlu1 %15165  ;;  %17152 = vmatprep.subr.msk.mxu1 %vm804_vm0, %v15208_v18  ;;  %v15178_v56 = vpop.permute.xlu0 %15177  ;;  %v17164_v18 = vld [vmem:[%s24702_s18 + $0x8] sm:$0x1] }
0x1f31   : > { %v15190_v58 = vsel %vm7543_vm14, %v15166_v10, %v15170_v23  ;;  %v15192_v3 = vsel %vm7543_vm14, %v15162_v15, %v15166_v10  ;;  %17147 = vmatmul.mubr.msk.f32.vlgmr.msra.gmra.mxu1 %vm4609_vm8, %v17138_v5  ;;  %15136 = vmatprep.mubr.f32.mxu0 %v25508_v26  ;;  %v25589_v15 = vld [vmem:[#allocation79_spill] sm:$0xff]  ;;  %v25592_v10 = vld [vmem:[#allocation80_spill] sm:$0xff] }
0x1f32   : > { %v15209_v42 = vmul.f32 %v15192_v3, %v25574_v19  ;;  %v15210_v28 = vmul.f32 %v15190_v58, %v25575_v38  ;;  %17153 = vmatpush1.msk.msra.mxu1 %vm804_vm0, %v15207_v12  ;;  %17150 = vmatmul.mubr.msk.f32.vlgmr.msra.gmra.mxu0 %vm4609_vm8, %v17138_v5  ;;  %v15206_v5 = vmul.f32 %v25584_v34, %v25583_v50  ;;  %v25594_v58 = vld [vmem:[#allocation93_spill] sm:$0xff]  ;;  %v25595_v38 = vld [vmem:[#allocation103_spill] sm:$0xff] }
0x1f33   : > { %15274 = vmatprep.subr.mxu1 %v15200_v22  ;;  %15308 = vmatprep.mubr.f32.mxu1 %v25508_v26  ;;  %v15584_v57 = vmul.f32 %v15580_v39, %v25589_v15  ;;  %v15586_v22 = vmul.f32 %v25593_v45, %v25591_v21  ;;  %v15587_v3 = vmul.f32 %v25594_v58, %v25592_v10 }
0x1f34   : > { %15275 = vmatpush1.msra.mxu1 %v15199_v24  ;;  %v15174_v54 = vpop.permute.xlu1 %15173  ;;  %17155 = vmatprep.subr.msk.mxu0 %vm804_vm0, %v15210_v28  ;;  %v15543_v25 = vpop.permute.xlu0 %15542 }
0x1f35   : > { %v15186_v14 = vsel %vm7543_vm14, %v15174_v54, %v15178_v56  ;;  %v15188_v13 = vsel %vm7543_vm14, %v15170_v23, %v15174_v54  ;;  %17156 = vmatpush1.msk.msra.mxu0 %vm804_vm0, %v15209_v42  ;;  %17154 = vmatmul.mubr.msk.f32.vlgmr.msra.gmra.mxu1 %vm4609_vm8, %v17151_v30 }
0x1f36   : > { %v15211_v11 = vmul.f32 %v15188_v13, %v25578_v0  ;;  %v15212_v51 = vmul.f32 %v15186_v14, %v25579_v36  ;;  %15345 = vmatprep.subr.mxu0 %v15202_v33  ;;  %15379 = vmatprep.mubr.f32.mxu0 %v25508_v26  ;;  %v25597_v33 = vld [vmem:[#allocation83_spill] sm:$0xff] }
0x1f37   : > { %15346 = vmatpush1.msra.mxu0 %v15201_v52  ;;  %15450 = vmatprep.mubr.f32.mxu1 %v25508_v26 }
0x1f38   : > { %v15182_v55 = vpop.permute.xlu1 %15181  ;;  %17158 = vmatprep.subr.msk.mxu1 %vm804_vm0, %v15212_v51  ;;  %v23993_v27 = vpop.permute.xlu0 %15538  ;;  %17157 = vmatmul.mubr.msk.f32.vlgmr.msra.gmra.mxu0 %vm4609_vm8, %v17151_v30  ;;  %v25599_v51 = vld [vmem:[#allocation85_spill] sm:$0xff] }
0x1f39   : > { %v15184_v49 = vsel %vm7543_vm14, %v15178_v56, %v15182_v55  ;;  %v15198_v37 = vsel %vm7543_vm14, %v15182_v55, %v23920_v62  ;;  %17159 = vmatpush1.msk.msra.mxu1 %vm804_vm0, %v15211_v11  ;;  %15521 = vmatprep.mubr.f32.mxu0 %v25508_v26  ;;  %v15581_v32 = vsel %vm8010_vm15, %v23993_v27, %v15543_v25 }
0x1f3a   : > { %v15213_v29 = vmul.f32 %v15184_v49, %v25582_v47  ;;  %v15214_v35 = vmul.f32 %v15198_v37, %v25583_v50  ;;  %15416 = vmatprep.subr.mxu1 %v15204_v9  ;;  %v15592_v23 = vmul.f32 %v15581_v32, %v25589_v15  ;;  %v25600_v9 = vld [vmem:[#allocation84_spill] sm:$0xff] }
0x1f3b   : > { %15417 = vmatpush1.msra.mxu1 %v15203_v48 }
0x1f3c   : > { %v15547_v2 = vpop.permute.xlu1 %15546  ;;  %17160 = vmatmul.mubr.msk.f32.vlgmr.msra.gmra.mxu1 %vm4609_vm8, %v17151_v30  ;;  %17161 = vmatprep.subr.msk.mxu0 %vm804_vm0, %v15214_v35  ;;  %v15555_v62 = vpop.permute.xlu0 %15554 }
0x1f3d   : > { %v15579_v6 = vsel %vm8010_vm15, %v15543_v25, %v15547_v2  ;;  %17162 = vmatpush1.msk.msra.mxu0 %vm804_vm0, %v15213_v29  ;;  %15693 = vmatprep.mubr.f32.mxu1 %v25508_v26  ;;  %v25598_v25 = vld [vmem:[#allocation82_spill] sm:$0xff] }
0x1f3e   : > { %v15593_v7 = vmul.f32 %v15579_v6, %v25588_v41  ;;  %15487 = vmatprep.subr.mxu0 %v15206_v5 }
0x1f3f   : > { %15488 = vmatpush1.msra.mxu0 %v15205_v8 }
0x1f40   : > { %v15551_v59 = vpop.permute.xlu1 %15550  ;;  %17163 = vmatmul.mubr.msk.f32.vlgmr.msra.gmra.mxu0 %vm4609_vm8, %v17151_v30  ;;  %17165 = vmatprep.subr.msk.mxu1 %vm804_vm0, %v15593_v7  ;;  %v15563_v20 = vpop.permute.xlu0 %15562  ;;  %v25596_v30 = vld [vmem:[#allocation88_spill] sm:$0xff] }
0x1f41   : > { %v15575_v17 = vsel %vm8010_vm15, %v15551_v59, %v15555_v62  ;;  %v15577_v31 = vsel %vm8010_vm15, %v15547_v2, %v15551_v59  ;;  %17166 = vmatpush1.msk.msra.mxu1 %vm804_vm0, %v15592_v23  ;;  %15764 = vmatprep.mubr.f32.mxu0 %v25508_v26  ;;  %v15572_v40 = vsel %vm8010_vm15, %v25596_v30, %v25595_v38 }
0x1f42   : > { %v15594_v12 = vmul.f32 %v15577_v31, %v25591_v21  ;;  %v15595_v56 = vmul.f32 %v15575_v17, %v25592_v10  ;;  %15659 = vmatprep.subr.mxu1 %v15585_v53  ;;  %v15588_v13 = vmul.f32 %v15572_v40, %v25597_v33 }
0x1f43   : > { %15660 = vmatpush1.msra.mxu1 %v15584_v57 }
0x1f44   : > { %v15559_v63 = vpop.permute.xlu1 %15558  ;;  %17167 = vmatmul.mubr.msk.f32.vlgmr.msra.gmra.mxu1 %vm4609_vm8, %v17164_v18  ;;  %17168 = vmatprep.subr.msk.mxu0 %vm804_vm0, %v15595_v56  ;;  %v15561_v24 = vpop.permute.xlu0 %15560 }
0x1f45   : > { %v15571_v19 = vsel %vm8010_vm15, %v15559_v63, %v15563_v20  ;;  %v15573_v42 = vsel %vm8010_vm15, %v15555_v62, %v15559_v63  ;;  %v15570_v28 = vsel %vm8010_vm15, %v25595_v38, %v15561_v24  ;;  %17169 = vmatpush1.msk.msra.mxu0 %vm804_vm0, %v15594_v12  ;;  %15835 = vmatprep.mubr.f32.mxu1 %v25508_v26 }
0x1f46   : > { %v15596_v54 = vmul.f32 %v15573_v42, %v25597_v33  ;;  %v15597_v46 = vmul.f32 %v15571_v19, %v25598_v25  ;;  %15730 = vmatprep.subr.mxu0 %v15587_v3  ;;  %v15589_v52 = vmul.f32 %v15570_v28, %v25598_v25 }
0x1f47   : > { %15731 = vmatpush1.msra.mxu0 %v15586_v22 }
0x1f48   : > { %v15567_v14 = vpop.permute.xlu1 %15566  ;;  %17170 = vmatmul.mubr.msk.f32.vlgmr.msra.gmra.mxu0 %vm4609_vm8, %v17164_v18  ;;  %17171 = vmatprep.subr.msk.mxu1 %vm804_vm0, %v15597_v46 }
0x1f49   : > { %v15569_v0 = vsel %vm8010_vm15, %v15563_v20, %v15567_v14  ;;  %v15583_v11 = vsel %vm8010_vm15, %v15567_v14, %v23993_v27  ;;  %v15565_v36 = vpop.permute.xlu0 %15564  ;;  %17172 = vmatpush1.msk.msra.mxu1 %vm804_vm0, %v15596_v54  ;;  %15906 = vmatprep.mubr.f32.mxu0 %v25508_v26 }
0x1f4a   : > { %v15598_v44 = vmul.f32 %v15569_v0, %v25599_v51  ;;  %v15599_v55 = vmul.f32 %v15583_v11, %v25600_v9  ;;  %v15568_v43 = vsel %vm8010_vm15, %v15561_v24, %v15565_v36  ;;  %v15582_v48 = vsel %vm8010_vm15, %v15565_v36, %v25587_v16  ;;  %15801 = vmatprep.subr.mxu1 %v15589_v52 }
0x1f4b   : > { %15802 = vmatpush1.msra.mxu1 %v15588_v13  ;;  %v15591_v27 = vmul.f32 %v15582_v48, %v25600_v9  ;;  %v15590_v49 = vmul.f32 %v15568_v43, %v25599_v51 }
0x1f4c   : > { %17173 = vmatmul.mubr.msk.f32.vlgmr.msra.gmra.mxu1 %vm4609_vm8, %v17164_v18  ;;  %17174 = vmatprep.subr.msk.mxu0 %vm804_vm0, %v15599_v55 }
0x1f4d   : > { %17175 = vmatpush1.msk.msra.mxu0 %vm804_vm0, %v15598_v44  ;;  %vm15947_vm0 = vcmask 1040384  }
0x1f4e   : > { %15872 = vmatprep.subr.mxu0 %v15591_v27 }
0x1f4f   : > { %15873 = vmatpush1.msra.mxu0 %v15590_v49 }
0x1f50   : > { %17176 = vmatmul.mubr.msk.f32.vlgmr.msra.gmra.mxu0 %vm4609_vm8, %v17164_v18  ;;  %vm17767_vm8 = vmmov 0  }
0x1f95   : > { %v12761_v37 = vpop.f32.mrf.mxu0 }
0x1f97   : > { %v12763_v47 = vpop.f32.mrf.mxu0 }
0x1f9b   : > { %v12832_v61 = vpop.f32.mrf.mxu0 }
0x1f9d   : > { %v12834_v29 = vpop.f32.mrf.mxu0  ;;  %v12903_v50 = vpop.f32.mrf.mxu1 }
0x1f9f   : > { %v24089_v34 = vpop.f32.mrf.mxu1 }
0x1fa0   : > { %v24087_v35 = vpop.f32.mrf.mxu0 }
0x1fa2   : > { %v24091_v5 = vpop.f32.mrf.mxu0 }
0x1fa3   : > { %v13072_v32 = vpop.f32.mrf.mxu1 }
0x1fa4   : > { %v13073_v0 = vadd.f32 %v13072_v32, %v12761_v37 }
0x1fa5   : > { %v13074_v62 = vpop.f32.mrf.mxu1 }
0x1fa6   : > { %v13075_v36 = vadd.f32 %v13074_v62, %v12763_v47 }
0x1fa9   : > { %v13143_v2 = vpop.f32.mrf.mxu0 }
0x1faa   : > { %v13144_v9 = vadd.f32 %v13143_v2, %v12832_v61 }
0x1fab   : > { %v13145_v1 = vpop.f32.mrf.mxu0 }
0x1fac   : > { %v13146_v48 = vadd.f32 %v13145_v1, %v12834_v29 }
0x1fad   : > { %v13214_v8 = vpop.f32.mrf.mxu1 }
0x1fae   : > { %v13285_v6 = vpop.f32.mrf.mxu0  ;;  %v13215_v49 = vadd.f32 %v13214_v8, %v12903_v50  ;;  %v15925_v8 = vpop.permute.xlu1 %15924 }
0x1faf   : > { %v13216_v60 = vpop.f32.mrf.mxu1  ;;  %v13286_v62 = vadd.f32 %v13285_v6, %v24087_v35 }
0x1fb0   : > { %v24093_v16 = vpop.f32.mrf.mxu0  ;;  %v13217_v47 = vadd.f32 %v13216_v60, %v24089_v34 }
0x1fb1   : > { %v13288_v50 = vadd.f32 %v24093_v16, %v24091_v5 }
0x1fb3   : > { %v13449_v39 = vpop.f32.mrf.mxu1 }
0x1fb4   : > { %v13667_v55 = vadd.f32 %v13449_v39, %v13073_v0 }
0x1fb5   : > { %v13451_v7 = vpop.f32.mrf.mxu1 }
0x1fb6   : > { %v13668_v27 = vadd.f32 %v13451_v7, %v13075_v36 }
0x1fb9   : > { %v13520_v41 = vpop.f32.mrf.mxu0 }
0x1fbb   : > { %v13522_v15 = vpop.f32.mrf.mxu0 }
0x1fbd   : > { %v13591_v23 = vpop.f32.mrf.mxu1 }
0x1fbe   : > { %v24095_v4 = vpop.f32.mrf.mxu0 }
0x1fbf   : > { %v24097_v53 = vpop.f32.mrf.mxu1  ;;  %v13673_v34 = vadd.f32 %v24095_v4, %v13286_v62 }
0x1fc0   : > { %v24099_v59 = vpop.f32.mrf.mxu0 }
0x1fc1   : > { %v13674_v5 = vadd.f32 %v24099_v59, %v13288_v50 }
0x1fc3   : > { %v13834_v20 = vpop.f32.mrf.mxu1 }
0x1fc5   : > { %v13836_v31 = vpop.f32.mrf.mxu1 }
0x1fc6   : > { %v14053_v37 = vadd.f32 %v13836_v31, %v13668_v27  ;;  %v13672_v31 = vadd.f32 %v24097_v53, %v13217_v47 }
0x1fc9   : > { %v13905_v57 = vpop.f32.mrf.mxu0 }
0x1fcb   : > { %v13907_v17 = vpop.f32.mrf.mxu0 }
0x1fce   : > { %v13976_v18 = vpop.f32.mrf.mxu1  ;;  %v24101_v21 = vpop.f32.mrf.mxu0 }
0x1fd0   : > { %v24103_v12 = vpop.f32.mrf.mxu1  ;;  %v24105_v10 = vpop.f32.mrf.mxu0 }
0x1fd1   : > { %v14057_v16 = vadd.f32 %v24103_v12, %v13672_v31 }
0x1fd4   : > { %v14155_v56 = vpop.f32.mrf.mxu1  ;;  %v14226_v45 = vpop.f32.mrf.mxu0 }
0x1fd6   : > { %v14157_v22 = vpop.f32.mrf.mxu1  ;;  %v14228_v58 = vpop.f32.mrf.mxu0 }
0x1fd7   : > { %v14374_v39 = vadd.f32 %v14157_v22, %v14053_v37 }
0x1fda   : > { %v14297_v3 = vpop.f32.mrf.mxu1  ;;  %v24109_v24 = vpop.f32.mrf.mxu0 }
0x1fdc   : > { %v24107_v63 = vpop.f32.mrf.mxu1  ;;  %v24111_v42 = vpop.f32.mrf.mxu0 }
0x1fdd   : > { %25601 = vst [vmem:[#allocation92_spill] sm:$0xff] %v24111_v42 }
0x1fdf   : > { %v14540_v19 = vpop.f32.mrf.mxu1 }
0x1fe1   : > { %v14542_v38 = vpop.f32.mrf.mxu1  ;;  %v14611_v28 = vpop.f32.mrf.mxu0 }
0x1fe3   : > { %v14613_v40 = vpop.f32.mrf.mxu0 }
0x1fe5   : > { %v14682_v30 = vpop.f32.mrf.mxu1 }
0x1fe7   : > { %v24113_v33 = vpop.f32.mrf.mxu1  ;;  %v24115_v54 = vpop.f32.mrf.mxu0 }
0x1fe8   : > { %25602 = vst [vmem:[#allocation96_spill] sm:$0xff] %v24113_v33  ;;  %25603 = vst [vmem:[#allocation90_spill] sm:$0xff] %v24115_v54  ;;  %v14052_v54 = vadd.f32 %v13834_v20, %v13667_v55  ;;  %v14759_v20 = vadd.f32 %v14542_v38, %v14374_v39 }
0x1fe9   : > { %v24117_v46 = vpop.f32.mrf.mxu0 }
0x1fea   : > { %25604 = vst [vmem:[#allocation100_spill] sm:$0xff] %v24117_v46  ;;  %v13669_v46 = vadd.f32 %v13520_v41, %v13144_v9  ;;  %v14373_v32 = vadd.f32 %v14155_v56, %v14052_v54 }
0x1feb   : > { %v14925_v25 = vpop.f32.mrf.mxu1 }
0x1fec   : > { %v14054_v2 = vadd.f32 %v13905_v57, %v13669_v46  ;;  %v14758_v29 = vadd.f32 %v14540_v19, %v14373_v32  ;;  %v25607_v19 = vld [vmem:[#allocation47_spill] sm:$0xff] }
0x1fed   : > { %v14927_v52 = vpop.f32.mrf.mxu1  ;;  %v14996_v14 = vpop.f32.mrf.mxu0  ;;  %v24134_v54 = vrot.slane %v15925_v8, %v25607_v19 }
0x1fee   : > { %v14375_v7 = vadd.f32 %v14226_v45, %v14054_v2  ;;  %v15144_v56 = vadd.f32 %v14927_v52, %v14759_v20 }
0x1fef   : > { %v14998_v11 = vpop.f32.mrf.mxu0 }
0x1ff0   : > { %v14760_v57 = vadd.f32 %v14611_v28, %v14375_v7 }
0x1ff1   : > { %v24119_v13 = vpop.f32.mrf.mxu1  ;;  %v25612_v47 = vld [vmem:[#allocation100_spill] sm:$0xff] }
0x1ff2   : > { %25605 = vst [vmem:[#allocation91_spill] sm:$0xff] %v24119_v13  ;;  %v24123_v44 = vpop.f32.mrf.mxu0  ;;  %v13670_v13 = vadd.f32 %v13522_v15, %v13146_v48  ;;  %v15143_v15 = vadd.f32 %v14925_v25, %v14758_v29  ;;  %v15145_v53 = vadd.f32 %v14996_v14, %v14760_v57 }
0x1ff3   : > { %v24121_v51 = vpop.f32.mrf.mxu1  ;;  %25606 = vst [vmem:[#allocation97_spill] sm:$0xff] %v24123_v44  ;;  %v13671_v44 = vadd.f32 %v13591_v23, %v13215_v49 }
0x1ff4   : > { %v24125_v26 = vpop.f32.mrf.mxu0  ;;  %v14055_v41 = vadd.f32 %v13907_v17, %v13670_v13 }
0x1ff5   : > { %v15310_v43 = vpop.f32.mrf.mxu1  ;;  %v14056_v60 = vadd.f32 %v13976_v18, %v13671_v44  ;;  %v14058_v18 = vadd.f32 %v24101_v21, %v13673_v34 }
0x1ff6   : > { %v14376_v23 = vadd.f32 %v14228_v58, %v14055_v41  ;;  %v15528_v22 = vadd.f32 %v15310_v43, %v15143_v15  ;;  %v14378_v58 = vadd.f32 %v24107_v63, %v14057_v16  ;;  %v25611_v43 = vld [vmem:[#allocation90_spill] sm:$0xff] }
0x1ff7   : > { %v15312_v42 = vpop.f32.mrf.mxu1  ;;  %v14377_v17 = vadd.f32 %v14297_v3, %v14056_v60  ;;  %v14059_v3 = vadd.f32 %v24105_v10, %v13674_v5 }
0x1ff8   : > { %v15381_v33 = vpop.f32.mrf.mxu0  ;;  %v14761_v38 = vadd.f32 %v14613_v40, %v14376_v23  ;;  %v15529_v25 = vadd.f32 %v15312_v42, %v15144_v56  ;;  %v14379_v40 = vadd.f32 %v24109_v24, %v14058_v18  ;;  %v25608_v42 = vld [vmem:[#allocation96_spill] sm:$0xff] }
0x1ff9   : > { %v14762_v28 = vadd.f32 %v14682_v30, %v14377_v17  ;;  %v15530_v0 = vadd.f32 %v15381_v33, %v15145_v53  ;;  %v14763_v14 = vadd.f32 %v25608_v42, %v14378_v58  ;;  %v25609_v36 = vld [vmem:[#allocation91_spill] sm:$0xff] }
0x1ffa   : > { %v15383_v1 = vpop.f32.mrf.mxu0  ;;  %v15146_v13 = vadd.f32 %v14998_v11, %v14761_v38  ;;  %v25610_v11 = vld [vmem:[#allocation92_spill] sm:$0xff]  ;;  %v14764_v48 = vadd.f32 %v25611_v43, %v14379_v40  ;;  %v25613_v2 = vld [vmem:[#allocation97_spill] sm:$0xff]  ;;  %v16041_v40 = vld [vmem:[%s24705_s21 + $0xf8] sm:$0xff] }
0x1ffb   : > { %v15147_v21 = vadd.f32 %v25609_v36, %v14762_v28  ;;  %v14380_v55 = vadd.f32 %v25610_v11, %v14059_v3  ;;  %v15148_v10 = vadd.f32 %v24121_v51, %v14763_v14  ;;  %v16025_v42 = vld [vmem:[%s24705_s21 + $0x78] sm:$0xff]  ;;  %17287 = vmatprep.subr.mxu1 %v16041_v40  ;;  %v16040_v36 = vld [vmem:[%s24705_s21 + $0xf0] sm:$0xff]  ;;  %v16071_v11 = vld [vmem:[%s24705_s21 + $0x1e8] sm:$0xff] }
0x1ffc   : > { %v15452_v61 = vpop.f32.mrf.mxu1  ;;  %v15531_v63 = vadd.f32 %v15383_v1, %v15146_v13  ;;  %v15149_v39 = vadd.f32 %v25613_v2, %v14764_v48  ;;  %v16057_v14 = vld [vmem:[%s24705_s21 + $0x178] sm:$0xff]  ;;  %17288 = vmatpush3.msra.mxu1 %v16025_v42  ;;  %v16055_v43 = vld [vmem:[%s24705_s21 + $0x168] sm:$0xff]  ;;  %v16038_v48 = vld [vmem:[%s24705_s21 + $0xe0] sm:$0xff] }
0x1ffd   : > { %v15532_v24 = vadd.f32 %v15452_v61, %v15147_v21  ;;  %v14765_v62 = vadd.f32 %v25612_v47, %v14380_v55  ;;  %v16072_v21 = vld [vmem:[%s24705_s21 + $0x1f0] sm:$0xff]  ;;  %17289 = vmatprep.subr.mxu1 %v16040_v36  ;;  %v16023_v55 = vld [vmem:[%s24705_s21 + $0x68] sm:$0xff]  ;;  %v16069_v47 = vld [vmem:[%s24705_s21 + $0x1d8] sm:$0xff] }
0x1ffe   : > { %v15454_v35 = vpop.f32.mrf.mxu1  ;;  %v16053_v2 = vld [vmem:[%s24705_s21 + $0x158] sm:$0xff]  ;;  %v16050_v40 = vld [vmem:[%s24705_s21 + $0x140] sm:$0xff] }
0x1fff   : > { %v15533_v29 = vadd.f32 %v15454_v35, %v15148_v10  ;;  %v15150_v7 = vadd.f32 %v24125_v26, %v14765_v62  ;;  %v16070_v10 = vld [vmem:[%s24705_s21 + $0x1e0] sm:$0xff]  ;;  %v16021_v62 = vld [vmem:[%s24705_s21 + $0x58] sm:$0xff] }
0x2000   : > { %v15523_v6 = vpop.f32.mrf.mxu0  ;;  %v16065_v42 = vld [vmem:[%s24705_s21 + $0x1b8] sm:$0xff] }
0x2001   : > { %v15534_v20 = vadd.f32 %v15523_v6, %v15149_v39  ;;  %v16036_v39 = vld [vmem:[%s24705_s21 + $0xd0] sm:$0xff]  ;;  %v16049_v36 = vld [vmem:[%s24705_s21 + $0x138] sm:$0xff] }
0x2002   : > { %v15525_v46 = vpop.f32.mrf.mxu0 }
0x2003   : > { %v15535_v57 = vadd.f32 %v15525_v46, %v15150_v7 }
0x2004   : > { %v15695_v45 = vpop.f32.mrf.mxu1 }
0x2005   : > { %v15913_v4 = vadd.f32 %v15695_v45, %v15528_v22 }
0x2006   : > { %v15697_v52 = vpop.f32.mrf.mxu1 }
0x2007   : > { %v24141_v59 = vadd.f32 %v24134_v54, %v15913_v4  ;;  %v15914_v12 = vadd.f32 %v15697_v52, %v15529_v25 }
0x2008   : > { %v15766_v44 = vpop.f32.mrf.mxu0 }
0x2009   : > { %v15939_v30 = vmax.f32 %v24141_v59, 0.0  ;;  %v24149_v9 = vadd.f32 %v24134_v54, %v15914_v12  ;;  %v15915_v33 = vadd.f32 %v15766_v44, %v15530_v0  ;;  %v16024_v44 = vld [vmem:[%s24705_s21 + $0x70] sm:$0xff] }
0x200a   : > { %v15768_v27 = vpop.f32.mrf.mxu0  ;;  %17290 = vmatpush3.msra.mxu1 %v16024_v44  ;;  %v16064_v44 = vld [vmem:[%s24705_s21 + $0x1b0] sm:$0xff] }
0x200b   : > { %v15940_v49 = vmax.f32 %v24149_v9, 0.0  ;;  %v24156_v37 = vadd.f32 %v24134_v54, %v15915_v33  ;;  %v15916_v32 = vadd.f32 %v15768_v27, %v15531_v63  ;;  %v15948_v50 = vsel %vm15947_vm0, %v15939_v30, 0.0  ;;  %v16056_v63 = vld [vmem:[%s24705_s21 + $0x170] sm:$0xff]  ;;  %v16039_v33 = vld [vmem:[%s24705_s21 + $0xe8] sm:$0xff]  ;;  %v16022_v27 = vld [vmem:[%s24705_s21 + $0x60] sm:$0xff] }
0x200c   : > { %v15837_v1 = vpop.f32.mrf.mxu1  ;;  %17291 = vmatprep.subr.mxu1 %v16039_v33  ;;  %v16048_v33 = vld [vmem:[%s24705_s21 + $0x130] sm:$0xff] }
0x200d   : > { %v15949_v51 = vsel %vm15947_vm0, %v15940_v49, 0.0  ;;  %v15941_v61 = vmax.f32 %v24156_v37, 0.0  ;;  %v24168_v8 = vadd.f32 %v24134_v54, %v15916_v32  ;;  %v15917_v41 = vadd.f32 %v15837_v1, %v15532_v24  ;;  %v16054_v24 = vld [vmem:[%s24705_s21 + $0x160] sm:$0xff]  ;;  %17292 = vmatpush3.msra.mxu1 %v16023_v55  ;;  %v16037_v32 = vld [vmem:[%s24705_s21 + $0xd8] sm:$0xff]  ;;  %v16052_v1 = vld [vmem:[%s24705_s21 + $0x150] sm:$0xff] }
0x200e   : > { %v15950_v15 = vadd.f32 %v15949_v51, %v15948_v50  ;;  %v15839_v31 = vpop.f32.mrf.mxu1  ;;  %17293 = vmatprep.subr.mxu1 %v16038_v48  ;;  %v16020_v50 = vld [vmem:[%s24705_s21 + $0x50] sm:$0xff]  ;;  %v16063_v55 = vld [vmem:[%s24705_s21 + $0x1a8] sm:$0xff] }
0x200f   : > { %v15951_v34 = vsel %vm15947_vm0, %v15941_v61, 0.0  ;;  %v15942_v60 = vmax.f32 %v24168_v8, 0.0  ;;  %v24176_v35 = vadd.f32 %v24134_v54, %v15917_v41  ;;  %v15918_v23 = vadd.f32 %v15839_v31, %v15533_v29  ;;  %17294 = vmatpush3.msra.mxu1 %v16022_v27  ;;  %v16068_v29 = vld [vmem:[%s24705_s21 + $0x1d0] sm:$0xff]  ;;  %v16047_v48 = vld [vmem:[%s24705_s21 + $0x128] sm:$0xff]  ;;  %v16062_v27 = vld [vmem:[%s24705_s21 + $0x1a0] sm:$0xff] }
0x2010   : > { %v15952_v56 = vadd.f32 %v15951_v34, %v15950_v15  ;;  %v15908_v22 = vpop.f32.mrf.mxu0  ;;  %17295 = vmatprep.subr.mxu1 %v16037_v32  ;;  %v16046_v32 = vld [vmem:[%s24705_s21 + $0x120] sm:$0xff] }
0x2011   : > { %v15953_v26 = vsel %vm15947_vm0, %v15942_v60, 0.0  ;;  %v15943_v6 = vmax.f32 %v24176_v35, 0.0  ;;  %v24183_v19 = vadd.f32 %v24134_v54, %v15918_v23  ;;  %v15919_v5 = vadd.f32 %v15908_v22, %v15534_v20  ;;  %17296 = vmatpush3.msra.mxu1 %v16021_v62  ;;  %v16061_v62 = vld [vmem:[%s24705_s21 + $0x198] sm:$0xff] }
0x2012   : > { %v15954_v16 = vadd.f32 %v15953_v26, %v15952_v56  ;;  %v15910_v17 = vpop.f32.mrf.mxu0  ;;  %17297 = vmatprep.subr.mxu1 %v16036_v39  ;;  %v16045_v39 = vld [vmem:[%s24705_s21 + $0x118] sm:$0xff] }
0x2013   : > { %v15955_v45 = vsel %vm15947_vm0, %v15943_v6, 0.0  ;;  %v15944_v38 = vmax.f32 %v24183_v19, 0.0  ;;  %v24190_v53 = vadd.f32 %v24134_v54, %v15919_v5  ;;  %v15920_v25 = vadd.f32 %v15910_v17, %v15535_v57  ;;  %17298 = vmatpush3.msra.mxu1 %v16020_v50  ;;  %v16060_v50 = vld [vmem:[%s24705_s21 + $0x190] sm:$0xff] }
0x2014   : > { %v15956_v4 = vadd.f32 %v15955_v45, %v15954_v16 }
0x2015   : > { %v15957_v18 = vsel %vm15947_vm0, %v15944_v38, 0.0  ;;  %v15945_v58 = vmax.f32 %v24190_v53, 0.0  ;;  %v24197_v28 = vadd.f32 %v24134_v54, %v15920_v25  ;;  %v16073_v54 = vld [vmem:[%s24705_s21 + $0x1f8] sm:$0xff] }
0x2016   : > { %v15958_v46 = vadd.f32 %v15957_v18, %v15956_v4  ;;  %17322 = vmatprep.subr.mxu0 %v16073_v54  ;;  %v16033_v54 = vld [vmem:[%s24705_s21 + $0xb8] sm:$0xff] }
0x2017   : > { %v15959_v52 = vsel %vm15947_vm0, %v15945_v58, 0.0  ;;  %v15946_v13 = vmax.f32 %v24197_v28, 0.0  ;;  %17323 = vmatpush3.msra.mxu0 %v16057_v14  ;;  %v16035_v28 = vld [vmem:[%s24705_s21 + $0xc8] sm:$0xff]  ;;  %v16017_v14 = vld [vmem:[%s24705_s21 + $0x38] sm:$0xff] }
0x2018   : > { %v15960_v0 = vadd.f32 %v15959_v52, %v15958_v46  ;;  %17324 = vmatprep.subr.mxu0 %v16072_v21  ;;  %v16067_v46 = vld [vmem:[%s24705_s21 + $0x1c8] sm:$0xff]  ;;  %17299 = vmatprep.subr.mxu1 %v16035_v28  ;;  %v16032_v21 = vld [vmem:[%s24705_s21 + $0xb0] sm:$0xff]  ;;  %v16102_v28 = vld [vmem:[%s24705_s21 + $0x2e0] sm:$0xff] }
0x2019   : > { %v15961_v12 = vsel %vm15947_vm0, %v15946_v13, 0.0  ;;  %17325 = vmatpush3.msra.mxu0 %v16056_v63  ;;  %v16019_v52 = vld [vmem:[%s24705_s21 + $0x48] sm:$0xff]  ;;  %v16016_v63 = vld [vmem:[%s24705_s21 + $0x30] sm:$0xff] }
0x201a   : > { %v15962_v3 = vadd.f32 %v15961_v12, %v15960_v0  ;;  %17326 = vmatprep.subr.mxu0 %v16071_v11  ;;  %v16034_v0 = vld [vmem:[%s24705_s21 + $0xc0] sm:$0xff]  ;;  %17300 = vmatpush3.msra.mxu1 %v16019_v52  ;;  %v16031_v11 = vld [vmem:[%s24705_s21 + $0xa8] sm:$0xff] }
0x201b   : > { %17327 = vmatpush3.msra.mxu0 %v16055_v43  ;;  %v16066_v12 = vld [vmem:[%s24705_s21 + $0x1c0] sm:$0xff]  ;;  %17301 = vmatprep.subr.mxu1 %v16034_v0  ;;  %v16015_v43 = vld [vmem:[%s24705_s21 + $0x28] sm:$0xff]  ;;  %v16101_v0 = vld [vmem:[%s24705_s21 + $0x2d8] sm:$0xff] }
0x201c   : > { %15963 = vadd.xlane.f32.xlu0 %v15962_v3  ;;  %17328 = vmatprep.subr.mxu0 %v16070_v10  ;;  %v16018_v3 = vld [vmem:[%s24705_s21 + $0x40] sm:$0xff] }
0x201d   : > { %17329 = vmatpush3.msra.mxu0 %v16054_v24  ;;  %17302 = vmatpush3.msra.mxu1 %v16018_v3  ;;  %v16030_v10 = vld [vmem:[%s24705_s21 + $0xa0] sm:$0xff]  ;;  %v16085_v3 = vld [vmem:[%s24705_s21 + $0x258] sm:$0xff] }
0x201e   : > { %17330 = vmatprep.subr.mxu0 %v16069_v47  ;;  %17303 = vmatprep.subr.mxu1 %v16033_v54  ;;  %v16014_v24 = vld [vmem:[%s24705_s21 + $0x20] sm:$0xff]  ;;  %v16029_v47 = vld [vmem:[%s24705_s21 + $0x98] sm:$0xff]  ;;  %v16100_v54 = vld [vmem:[%s24705_s21 + $0x2d0] sm:$0xff] }
0x201f   : > { %17331 = vmatpush3.msra.mxu0 %v16053_v2  ;;  %17304 = vmatpush3.msra.mxu1 %v16017_v14  ;;  %v16013_v2 = vld [vmem:[%s24705_s21 + $0x18] sm:$0xff]  ;;  %v16086_v52 = vld [vmem:[%s24705_s21 + $0x260] sm:$0xff]  ;;  %v16084_v14 = vld [vmem:[%s24705_s21 + $0x250] sm:$0xff] }
0x2020   : > { %17332 = vmatprep.subr.mxu0 %v16068_v29  ;;  %17305 = vmatprep.subr.mxu1 %v16032_v21  ;;  %v16028_v29 = vld [vmem:[%s24705_s21 + $0x90] sm:$0xff]  ;;  %v16099_v21 = vld [vmem:[%s24705_s21 + $0x2c8] sm:$0xff] }
0x2021   : > { %17333 = vmatpush3.msra.mxu0 %v16052_v1  ;;  %17306 = vmatpush3.msra.mxu1 %v16016_v63  ;;  %v16012_v1 = vld [vmem:[%s24705_s21 + $0x10] sm:$0xff]  ;;  %v16083_v63 = vld [vmem:[%s24705_s21 + $0x248] sm:$0xff] }
0x2022   : > { %17334 = vmatprep.subr.mxu0 %v16067_v46  ;;  %17307 = vmatprep.subr.mxu1 %v16031_v11  ;;  %v16134_v46 = vld [vmem:[%s24705_s21 + $0x3e0] sm:$0xff] }
0x2023   : > { %17308 = vmatpush3.msra.mxu1 %v16015_v43  ;;  %v16098_v11 = vld [vmem:[%s24705_s21 + $0x2c0] sm:$0xff] }
0x2024   : > { %17309 = vmatprep.subr.mxu1 %v16030_v10  ;;  %v16082_v43 = vld [vmem:[%s24705_s21 + $0x240] sm:$0xff]  ;;  %v16097_v10 = vld [vmem:[%s24705_s21 + $0x2b8] sm:$0xff] }
0x2025   : > { %17310 = vmatpush3.msra.mxu1 %v16014_v24  ;;  %v16081_v24 = vld [vmem:[%s24705_s21 + $0x238] sm:$0xff] }
0x2026   : > { %17311 = vmatprep.subr.mxu1 %v16029_v47  ;;  %v16096_v47 = vld [vmem:[%s24705_s21 + $0x2b0] sm:$0xff] }
0x2027   : > { %17312 = vmatpush3.msra.mxu1 %v16013_v2  ;;  %v16080_v2 = vld [vmem:[%s24705_s21 + $0x230] sm:$0xff] }
0x2028   : > { %17313 = vmatprep.subr.mxu1 %v16028_v29  ;;  %v16095_v29 = vld [vmem:[%s24705_s21 + $0x2a8] sm:$0xff] }
0x2029   : > { %17314 = vmatpush3.msra.mxu1 %v16012_v1  ;;  %v16079_v1 = vld [vmem:[%s24705_s21 + $0x228] sm:$0xff] }
0x20a5   : > { %v15964_v51 = vpop.xlane.xlu0 %15963 }
0x20a6   : > { %v15965_v41 = vmul.f32 0.0009765625, %v15964_v51  ;;  %v16044_v51 = vld [vmem:[%s24705_s21 + $0x110] sm:$0xff] }
0x20a8   : > { %v24280_v7 = vsub.f32 %v15939_v30, %v15965_v41  ;;  %v24284_v20 = vsub.f32 %v15940_v49, %v15965_v41  ;;  %v24288_v15 = vsub.f32 %v15941_v61, %v15965_v41  ;;  %v24292_v31 = vsub.f32 %v15942_v60, %v15965_v41 }
0x20a9   : > { %v24296_v34 = vsub.f32 %v15943_v6, %v15965_v41  ;;  %v24306_v49 = vsub.f32 %v15944_v38, %v15965_v41  ;;  %v24314_v35 = vsub.f32 %v15945_v58, %v15965_v41  ;;  %v24321_v22 = vsub.f32 %v15946_v13, %v15965_v41  ;;  %v16051_v13 = vld [vmem:[%s24705_s21 + $0x148] sm:$0xff] }
0x20aa   : > { %v15974_v59 = vmul.f32 %v24280_v7, %v24280_v7  ;;  %v15975_v30 = vmul.f32 %v24284_v20, %v24284_v20  ;;  %v15976_v9 = vmul.f32 %v24288_v15, %v24288_v15  ;;  %v15977_v37 = vmul.f32 %v24292_v31, %v24292_v31  ;;  %17335 = vmatpush3.msra.mxu0 %v16051_v13  ;;  %v16027_v41 = vld [vmem:[%s24705_s21 + $0x88] sm:$0xff]  ;;  %v16118_v13 = vld [vmem:[%s24705_s21 + $0x360] sm:$0xff] }
0x20ab   : > { %v15978_v23 = vmul.f32 %v24296_v34, %v24296_v34  ;;  %v15979_v26 = vmul.f32 %v24306_v49, %v24306_v49  ;;  %v15980_v5 = vmul.f32 %v24314_v35, %v24314_v35  ;;  %v15981_v45 = vmul.f32 %v24321_v22, %v24321_v22  ;;  %17336 = vmatprep.subr.mxu0 %v16066_v12  ;;  %v16133_v12 = vld [vmem:[%s24705_s21 + $0x3d8] sm:$0xff] }
0x20ac   : > { %v15982_v61 = vsel %vm15947_vm0, %v15974_v59, 0.0  ;;  %v15983_v8 = vsel %vm15947_vm0, %v15975_v30, 0.0  ;;  %v15985_v57 = vsel %vm15947_vm0, %v15976_v9, 0.0  ;;  %v15987_v6 = vsel %vm15947_vm0, %v15977_v37, 0.0  ;;  %17337 = vmatpush3.msra.mxu0 %v16050_v40  ;;  %v16059_v59 = vld [vmem:[%s24705_s21 + $0x188] sm:$0xff]  ;;  %v16026_v37 = vld [vmem:[%s24705_s21 + $0x80] sm:$0xff]  ;;  %17315 = vmatprep.subr.mxu1 %v16027_v41 }
0x20ad   : > { %v15984_v60 = vadd.f32 %v15983_v8, %v15982_v61  ;;  %v15989_v16 = vsel %vm15947_vm0, %v15978_v23, 0.0  ;;  %v15991_v38 = vsel %vm15947_vm0, %v15979_v26, 0.0  ;;  %v15993_v25 = vsel %vm15947_vm0, %v15980_v5, 0.0  ;;  %17338 = vmatprep.subr.mxu0 %v16065_v42  ;;  %v16011_v30 = vld [vmem:[%s24705_s21 + $0x8] sm:$0xff]  ;;  %v16058_v61 = vld [vmem:[%s24705_s21 + $0x180] sm:$0xff]  ;;  %v16105_v23 = vld [vmem:[%s24705_s21 + $0x2f8] sm:$0xff] }
0x20ae   : > { %v15995_v18 = vsel %vm15947_vm0, %v15981_v45, 0.0  ;;  %17339 = vmatpush3.msra.mxu0 %v16049_v36  ;;  %v16043_v9 = vld [vmem:[%s24705_s21 + $0x108] sm:$0xff]  ;;  %v16010_v8 = vld [vmem:[%s24705_s21] sm:$0xff]  ;;  %17316 = vmatpush3.msra.mxu1 %v16011_v30  ;;  %v16117_v40 = vld [vmem:[%s24705_s21 + $0x358] sm:$0xff] }
0x20af   : > { %v15986_v56 = vadd.f32 %v15985_v57, %v15984_v60  ;;  %17340 = vmatprep.subr.mxu0 %v16064_v44  ;;  %v16042_v60 = vld [vmem:[%s24705_s21 + $0x100] sm:$0xff]  ;;  %v16137_v57 = vld [vmem:[%s24705_s21 + $0x3f8] sm:$0xff]  ;;  %17317 = vmatprep.subr.mxu1 %v16026_v37  ;;  %v16132_v42 = vld [vmem:[%s24705_s21 + $0x3d0] sm:$0xff] }
0x20b0   : > { %17341 = vmatpush3.msra.mxu0 %v16048_v33  ;;  %17318 = vmatpush3.msra.mxu1 %v16010_v8  ;;  %v16116_v36 = vld [vmem:[%s24705_s21 + $0x350] sm:$0xff]  ;;  %v16131_v44 = vld [vmem:[%s24705_s21 + $0x3c8] sm:$0xff]  ;;  %v16094_v41 = vld [vmem:[%s24705_s21 + $0x2a0] sm:$0xff] }
0x20b1   : > { %v15988_v19 = vadd.f32 %v15987_v6, %v15986_v56  ;;  %17342 = vmatprep.subr.mxu0 %v16063_v55  ;;  %17357 = vmatprep.subr.mxu1 %v16105_v23  ;;  %v16115_v33 = vld [vmem:[%s24705_s21 + $0x348] sm:$0xff]  ;;  %v16130_v55 = vld [vmem:[%s24705_s21 + $0x3c0] sm:$0xff]  ;;  %v16093_v37 = vld [vmem:[%s24705_s21 + $0x298] sm:$0xff] }
0x20b2   : > { %17343 = vmatpush3.msra.mxu0 %v16047_v48  ;;  %v16114_v48 = vld [vmem:[%s24705_s21 + $0x340] sm:$0xff]  ;;  %v16077_v8 = vld [vmem:[%s24705_s21 + $0x218] sm:$0xff]  ;;  %v16092_v23 = vld [vmem:[%s24705_s21 + $0x290] sm:$0xff] }
0x20b3   : > { %v15990_v17 = vadd.f32 %v15989_v16, %v15988_v19  ;;  %17344 = vmatprep.subr.mxu0 %v16062_v27  ;;  %v16129_v27 = vld [vmem:[%s24705_s21 + $0x3b8] sm:$0xff]  ;;  %v16078_v30 = vld [vmem:[%s24705_s21 + $0x220] sm:$0xff] }
0x20b4   : > { %17345 = vmatpush3.msra.mxu0 %v16046_v32  ;;  %v16113_v32 = vld [vmem:[%s24705_s21 + $0x338] sm:$0xff] }
0x20b5   : > { %v15992_v53 = vadd.f32 %v15991_v38, %v15990_v17  ;;  %17346 = vmatprep.subr.mxu0 %v16061_v62  ;;  %v16089_v38 = vld [vmem:[%s24705_s21 + $0x278] sm:$0xff]  ;;  %v16128_v62 = vld [vmem:[%s24705_s21 + $0x3b0] sm:$0xff] }
0x20b6   : > { %17347 = vmatpush3.msra.mxu0 %v16045_v39  ;;  %v16112_v39 = vld [vmem:[%s24705_s21 + $0x330] sm:$0xff] }
0x20b7   : > { %v15994_v4 = vadd.f32 %v15993_v25, %v15992_v53  ;;  %17348 = vmatprep.subr.mxu0 %v16060_v50  ;;  %v16121_v53 = vld [vmem:[%s24705_s21 + $0x378] sm:$0xff]  ;;  %v16088_v25 = vld [vmem:[%s24705_s21 + $0x270] sm:$0xff]  ;;  %v16127_v50 = vld [vmem:[%s24705_s21 + $0x3a8] sm:$0xff] }
0x20b8   : > { %17349 = vmatpush3.msra.mxu0 %v16044_v51  ;;  %v16111_v51 = vld [vmem:[%s24705_s21 + $0x328] sm:$0xff] }
0x20b9   : > { %v15996_v58 = vadd.f32 %v15995_v18, %v15994_v4  ;;  %17350 = vmatprep.subr.mxu0 %v16059_v59  ;;  %v16120_v4 = vld [vmem:[%s24705_s21 + $0x370] sm:$0xff]  ;;  %v16135_v18 = vld [vmem:[%s24705_s21 + $0x3e8] sm:$0xff]  ;;  %v16126_v59 = vld [vmem:[%s24705_s21 + $0x3a0] sm:$0xff] }
0x20ba   : > { %17351 = vmatpush3.msra.mxu0 %v16043_v9  ;;  %v16110_v9 = vld [vmem:[%s24705_s21 + $0x320] sm:$0xff] }
0x20bb   : > { %15997 = vadd.xlane.f32.xlu1 %v15996_v58  ;;  %17352 = vmatprep.subr.mxu0 %v16058_v61  ;;  %v16119_v58 = vld [vmem:[%s24705_s21 + $0x368] sm:$0xff]  ;;  %v16125_v61 = vld [vmem:[%s24705_s21 + $0x398] sm:$0xff] }
0x20bc   : > { %17353 = vmatpush3.msra.mxu0 %v16042_v60  ;;  %v16109_v60 = vld [vmem:[%s24705_s21 + $0x318] sm:$0xff] }
0x20bd   : > { %17392 = vmatprep.subr.mxu0 %v16137_v57  ;;  %v16124_v57 = vld [vmem:[%s24705_s21 + $0x390] sm:$0xff] }
0x2144   : > { %v15998_v56 = vpop.xlane.xlu1 %15997 }
0x2145   : > { %v15999_v26 = vmul.f32 0.0009765625, %v15998_v56  ;;  %v16076_v56 = vld [vmem:[%s24705_s21 + $0x210] sm:$0xff] }
0x2147   : > { %v16000_v6 = vadd.f32 1e-05, %v15999_v26  ;;  %v16108_v26 = vld [vmem:[%s24705_s21 + $0x310] sm:$0xff] }
0x2149   : > { %17745 = vrsqrt.f32 %v16000_v6  ;;  %v16091_v6 = vld [vmem:[%s24705_s21 + $0x288] sm:$0xff] }
0x2156   : > { %v24460_v19 = vpop.eup %17745 }
0x2157   : > { %v16003_v5 = vmul.f32 %v24460_v19, %v24284_v20  ;;  %v16005_v16 = vmul.f32 %v24460_v19, %v24292_v31  ;;  %v16002_v17 = vmul.f32 %v24460_v19, %v24280_v7  ;;  %v16004_v45 = vmul.f32 %v24460_v19, %v24288_v15  ;;  %v16104_v20 = vld [vmem:[%s24705_s21 + $0x2f0] sm:$0xff] }
0x2158   : > { %v16007_v7 = vmul.f32 %v24460_v19, %v24306_v49  ;;  %v16136_v15 = vld [vmem:[%s24705_s21 + $0x3f0] sm:$0xff]  ;;  %v16009_v31 = vmul.f32 %v24460_v19, %v24321_v22  ;;  %v16103_v49 = vld [vmem:[%s24705_s21 + $0x2e8] sm:$0xff] }
0x2159   : > { %16203 = vmatprep.mubr.f32.mxu1 %v16003_v5  ;;  %16273 = vmatprep.mubr.f32.mxu0 %v16005_v16  ;;  %v16087_v22 = vld [vmem:[%s24705_s21 + $0x268] sm:$0xff] }
0x215a   : > { %16204 = vmatmul.mubr.f32.vlgmr.msra.gmra.mxu1 %v16002_v17  ;;  %16274 = vmatmul.mubr.f32.vlgmr.msra.gmra.mxu0 %v16004_v45  ;;  %v16123_v5 = vld [vmem:[%s24705_s21 + $0x388] sm:$0xff]  ;;  %v16090_v45 = vld [vmem:[%s24705_s21 + $0x280] sm:$0xff] }
0x215b   : > { %17358 = vmatpush3.msra.mxu1 %v16089_v38  ;;  %17393 = vmatpush3.msra.mxu0 %v16121_v53  ;;  %v16075_v16 = vld [vmem:[%s24705_s21 + $0x208] sm:$0xff]  ;;  %v16122_v38 = vld [vmem:[%s24705_s21 + $0x380] sm:$0xff] }
0x215c   : > { %17359 = vmatprep.subr.mxu1 %v16104_v20  ;;  %16343 = vmatprep.mubr.f32.mxu1 %v16007_v7  ;;  %v16107_v17 = vld [vmem:[%s24705_s21 + $0x308] sm:$0xff]  ;;  %v16074_v53 = vld [vmem:[%s24705_s21 + $0x200] sm:$0xff]  ;;  %v16006_v7 = vmul.f32 %v24460_v19, %v24296_v34 }
0x215d   : > { %17394 = vmatprep.subr.mxu0 %v16136_v15  ;;  %16413 = vmatprep.mubr.f32.mxu0 %v16009_v31  ;;  %v16106_v20 = vld [vmem:[%s24705_s21 + $0x300] sm:$0xff]  ;;  %v16008_v15 = vmul.f32 %v24460_v19, %v24314_v35  ;;  %v25614_v31 = vmov 0.0  }
0x215e   : > { %17360 = vmatpush3.msra.mxu1 %v16088_v25  ;;  %17395 = vmatpush3.msra.mxu0 %v16120_v4 }
0x215f   : > { %17361 = vmatprep.subr.mxu1 %v16103_v49  ;;  %17396 = vmatprep.subr.mxu0 %v16135_v18 }
0x2160   : > { %17362 = vmatpush3.msra.mxu1 %v16087_v22  ;;  %17397 = vmatpush3.msra.mxu0 %v16119_v58  ;;  %v16138_v22 = vld [vmem:[%s24706_s22] sm:$0x1] }
0x2161   : > { %17363 = vmatprep.subr.mxu1 %v16102_v28  ;;  %17398 = vmatprep.subr.mxu0 %v16134_v46 }
0x2162   : > { %17364 = vmatpush3.msra.mxu1 %v16086_v52  ;;  %17399 = vmatpush3.msra.mxu0 %v16118_v13 }
0x2163   : > { %17365 = vmatprep.subr.mxu1 %v16101_v0  ;;  %17400 = vmatprep.subr.mxu0 %v16133_v12 }
0x2164   : > { %17366 = vmatpush3.msra.mxu1 %v16085_v3  ;;  %17401 = vmatpush3.msra.mxu0 %v16117_v40 }
0x2165   : > { %17367 = vmatprep.subr.mxu1 %v16100_v54  ;;  %17402 = vmatprep.subr.mxu0 %v16132_v42 }
0x2166   : > { %17368 = vmatpush3.msra.mxu1 %v16084_v14  ;;  %17403 = vmatpush3.msra.mxu0 %v16116_v36 }
0x2167   : > { %17369 = vmatprep.subr.mxu1 %v16099_v21  ;;  %17404 = vmatprep.subr.mxu0 %v16131_v44 }
0x2168   : > { %17370 = vmatpush3.msra.mxu1 %v16083_v63  ;;  %17405 = vmatpush3.msra.mxu0 %v16115_v33  ;;  %v16436_v63 = vld [vmem:[%s24707_s23 + $0x8] sm:$0xff]  ;;  %v16435_v33 = vld [vmem:[%s24707_s23] sm:$0xff] }
0x2169   : > { %17371 = vmatprep.subr.mxu1 %v16098_v11  ;;  %17406 = vmatprep.subr.mxu0 %v16130_v55 }
0x216a   : > { %17372 = vmatpush3.msra.mxu1 %v16082_v43  ;;  %17407 = vmatpush3.msra.mxu0 %v16114_v48 }
0x216b   : > { %17373 = vmatprep.subr.mxu1 %v16097_v10  ;;  %17408 = vmatprep.subr.mxu0 %v16129_v27 }
0x216c   : > { %17374 = vmatpush3.msra.mxu1 %v16081_v24  ;;  %17409 = vmatpush3.msra.mxu0 %v16113_v32  ;;  %v16437_v24 = vld [vmem:[#allocation3] sm:$0x1] }
0x216d   : > { %17375 = vmatprep.subr.mxu1 %v16096_v47  ;;  %17410 = vmatprep.subr.mxu0 %v16128_v62 }
0x216e   : > { %17376 = vmatpush3.msra.mxu1 %v16080_v2  ;;  %17411 = vmatpush3.msra.mxu0 %v16112_v39 }
0x216f   : > { %17377 = vmatprep.subr.mxu1 %v16095_v29  ;;  %17412 = vmatprep.subr.mxu0 %v16127_v50 }
0x2170   : > { %17378 = vmatpush3.msra.mxu1 %v16079_v1  ;;  %17413 = vmatpush3.msra.mxu0 %v16111_v51 }
0x2171   : > { %17379 = vmatprep.subr.mxu1 %v16094_v41  ;;  %17414 = vmatprep.subr.mxu0 %v16126_v59 }
0x2172   : > { %17380 = vmatpush3.msra.mxu1 %v16078_v30  ;;  %17415 = vmatpush3.msra.mxu0 %v16110_v9 }
0x2173   : > { %17381 = vmatprep.subr.mxu1 %v16093_v37  ;;  %17416 = vmatprep.subr.mxu0 %v16125_v61 }
0x2174   : > { %17382 = vmatpush3.msra.mxu1 %v16077_v8  ;;  %17417 = vmatpush3.msra.mxu0 %v16109_v60 }
0x2175   : > { %17383 = vmatprep.subr.mxu1 %v16092_v23  ;;  %17418 = vmatprep.subr.mxu0 %v16124_v57 }
0x2176   : > { %17384 = vmatpush3.msra.mxu1 %v16076_v56  ;;  %17419 = vmatpush3.msra.mxu0 %v16108_v26 }
0x2177   : > { %17385 = vmatprep.subr.mxu1 %v16091_v6  ;;  %17420 = vmatprep.subr.mxu0 %v16123_v5 }
0x2178   : > { %17386 = vmatpush3.msra.mxu1 %v16075_v16  ;;  %17421 = vmatpush3.msra.mxu0 %v16107_v17 }
0x2179   : > { %17387 = vmatprep.subr.mxu1 %v16090_v45  ;;  %17422 = vmatprep.subr.mxu0 %v16122_v38 }
0x217a   : > { %17388 = vmatpush3.msra.mxu1 %v16074_v53  ;;  %17423 = vmatpush3.msra.mxu0 %v16106_v20 }
0x217b   : > { %16344 = vmatmul.mubr.f32.vlgmr.msra.gmra.mxu1 %v16006_v7  ;;  %16414 = vmatmul.mubr.f32.vlgmr.msra.gmra.mxu0 %v16008_v15 }
0x217c   : > { %17609 = vmatprep.subr.mxu1 %v25614_v31  ;;  %17613 = vmatprep.mubr.msk.f32.mxu1 %vm17767_vm8, %v25614_v31 }
0x217d   : > { %17610 = vmatpush3.msra.mxu1 %v16436_v63 }
0x217e   : > { %17611 = vmatprep.subr.mxu1 %v25614_v31 }
0x217f   : > { %17612 = vmatpush3.msra.mxu1 %v16435_v33 }
0x221a   : > { %v17319_v25 = vpop.f32.mrf.mxu1  ;;  %v17354_v49 = vpop.f32.mrf.mxu0 }
0x221c   : > { %v17320_v4 = vpop.f32.mrf.mxu1  ;;  %v17355_v58 = vpop.f32.mrf.mxu0 }
0x221d   : > { %v17321_v18 = vadd.f32 %v17320_v4, %v17319_v25  ;;  %v17356_v52 = vadd.f32 %v17355_v58, %v17354_v49 }
0x221f   : > { %v16206_v28 = vadd.f32 %v17321_v18, %v16138_v22 }
0x2221   : > { %v16276_v13 = vadd.f32 %v17356_v52, %v16206_v28 }
0x223b   : > { %v17389_v34 = vpop.f32.mrf.mxu1  ;;  %v17424_v46 = vpop.f32.mrf.mxu0 }
0x223d   : > { %v17390_v35 = vpop.f32.mrf.mxu1  ;;  %v17425_v19 = vpop.f32.mrf.mxu0 }
0x223e   : > { %v17391_v0 = vadd.f32 %v17390_v35, %v17389_v34  ;;  %v17426_v3 = vadd.f32 %v17425_v19, %v17424_v46 }
0x2240   : > { %v16346_v12 = vadd.f32 %v17391_v0, %v16276_v13 }
0x2242   : > { %v16416_v40 = vadd.f32 %v17426_v3, %v16346_v12 }
0x2244   : > { %v16420_v54 = vsel %vm16419_vm7, %v16416_v40, 0.0 }
0x2245   : > { %16421 = vadd.xlane.f32.xlu0 %v16420_v54 }
0x22ce   : > { %v16422_v42 = vpop.xlane.xlu0 %16421 }
0x22cf   : > { %v16424_v14 = vmul.f32 0.0625, %v16422_v42 }
0x22d1   : > { %v16425_v36 = vsub.f32 %v16416_v40, %v16424_v14 }
0x22d3   : > { %v16426_v21 = vmul.f32 %v16425_v36, %v16425_v36 }
0x22d5   : > { %v16427_v44 = vsel %vm16419_vm7, %v16426_v21, 0.0 }
0x22d6   : > { %16428 = vadd.xlane.f32.xlu0 %v16427_v44 }
0x235f   : > { %v16429_v11 = vpop.xlane.xlu0 %16428 }
0x2360   : > { %v16430_v55 = vmul.f32 0.0625, %v16429_v11 }
0x2362   : > { %v16431_v43 = vadd.f32 1e-05, %v16430_v55 }
0x2364   : > { %17747 = vrsqrt.f32 %v16431_v43 }
0x2371   : > { %v17748_v48 = vpop.eup %17747 }
0x2372   : > { %v16433_v10 = vmul.f32 %v17748_v48, %v16425_v36 }
0x2374   : > { %v16434_v27 = vmax.f32 %v16433_v10, 0.0 }
0x2376   : > { %17614 = vmatmul.mubr.msk.f32.vlgmr.msra.gmra.mxu1 %vm1142_vm3, %v16434_v27 }
0x2436   : > { %v16507_v32 = vpop.f32.mrf.mxu1 }
0x2437   : > { %v16508_v47 = vadd.f32 %v16507_v32, %v16437_v24 }
0x2438   : > { %v17615_v62 = vpop.f32.mrf.mxu1 }
0x2439   : > { %16512 = vst.msk [vmem:[%s784_s2] sm:$0x1] %vm16511_vm9, %v16508_v47 }
0x243a PF: > { %s39_s7 = sadd.s32 1, %s17755_s7  }
0x243b   : > { %p36_p4 = scmp.ge.s32.totalorder %s39_s7, 4  }
0x243d   :  { %38 = sbr.rel (!%p36_p4) target bundleno = 11 (0xb), region = 190 }

</bundles_post_ra>
